<compile_context>
chip_gen: v7x
topology: tpu7x:2x2x1
jax: 0.10.0
libtpu: 0.0.40
codegen_flags: <defaults>
</compile_context>

<pallas_src>
import functools

import jax
import jax.numpy as jnp
from jax.experimental import pallas as pl
from jax.experimental.pallas import tpu as pltpu


def _round_up(n, m):
    return ((n + m - 1) // m) * m


def ffn_kernel(x_ref, w1_ref, b1_ref, w2_ref, b2_ref, o_ref):
    """One (TM, C) row tile x one TH-wide hidden slab.

    x_ref : (TM, C)  f32   (cast to bf16 in-kernel)
    w1_ref: (C, TH)  bf16
    b1_ref: (1, TH)  bf16 (v6e/v7x bf16 epilogue) or f32 (v5e f32 epilogue)
    w2_ref: (TH, C)  bf16
    b2_ref: (1, C)   f32
    o_ref : (TM, C)  f32   resident across the hidden axis; partial results of
                           the second matmul accumulate directly into it.
    """
    j = pl.program_id(1)

    @pl.when(j == 0)
    def _init():
        # Seed the resident f32 output block with the final bias; avoids a
        # separate accumulator scratch and a finalize pass.
        o_ref[...] = jnp.broadcast_to(b2_ref[...], o_ref.shape).astype(o_ref.dtype)

    x_bf = x_ref[...].astype(jnp.bfloat16)
    h = jnp.dot(x_bf, w1_ref[...], preferred_element_type=jnp.float32)

    if b1_ref.dtype == jnp.bfloat16:
        # v6e/v7x: bf16 VALU available -> bias + ReLU on the bf16 copy, which
        # halves the elementwise/vreg traffic of the h intermediate.
        hb = jnp.maximum(h.astype(jnp.bfloat16) + b1_ref[...], 0.0)
    else:
        # v5e: no bf16 VALU -> keep the epilogue in f32 (hidden under the MXU),
        # cast only for the second MXU pass.
        hb = jnp.maximum(h + b1_ref[...], 0.0).astype(jnp.bfloat16)

    o_ref[...] += jnp.dot(hb, w2_ref[...], preferred_element_type=jnp.float32)
    # Dropout(p=0.1) == identity in eval mode.


def _has_bf16_valu():
    """bf16 epilogue only where the VPU supports bf16 (v6e / v7x)."""
    try:
        kind = jax.devices()[0].device_kind.lower()
    except Exception:  # pragma: no cover - conservative fallback
        return True
    return not any(v in kind for v in ("v2", "v3", "v4", "v5"))


def prepare_params(w1, b1, w2, b2, *, bf16_epilogue=None):
    """Cast parameters to their kernel dtypes ONCE, outside the hot path."""
    if bf16_epilogue is None:
        bf16_epilogue = _has_bf16_valu()
    b1_dtype = jnp.bfloat16 if bf16_epilogue else jnp.float32
    return (w1.astype(jnp.bfloat16),
            b1.astype(b1_dtype),
            w2.astype(jnp.bfloat16),
            b2.astype(jnp.float32))


def _pick_hidden_tile(C, H, budget_bytes):
    """Largest hidden tile (multiple of 128, divides H) whose double-buffered
    bf16 W1/W2 slabs fit `budget_bytes`; H itself if everything fits."""
    per_col = 2 * (2 * C * 2)          # W1 col + W2 row, bf16, x2 pipeline bufs
    if H * per_col <= budget_bytes or H % 128 != 0:
        return H
    best = None
    th = 128
    while th <= H:
        if H % th == 0 and th * per_col <= budget_bytes:
            best = th
        th += 128
    return best if best is not None else H


@functools.partial(jax.jit, static_argnames=("tm_cap", "hidden_tile"))
def feed_forward(x, params, *, tm_cap=512, hidden_tile=None):
    """x: (B, T, C) f32; params from prepare_params().  Returns (B, T, C) f32
    = Dropout(Linear(ReLU(Linear(x)))) in eval mode."""
    w1, b1, w2, b2 = params
    B, T, C = x.shape
    H = w1.shape[1]
    M = B * T

    x2d = x.reshape(M, C)              # contiguous -> free

    # Row tile: >=2 balanced tiles (v7x megacore), multiple of 16 (bf16
    # sublane packing), capped so v5e/v6e get few large grid steps.
    TM = min(tm_cap, _round_up(max(pl.cdiv(M, 2), 8), 16))

    # Hidden tile: resident weights when they fit; otherwise reduce over H.
    if hidden_tile is None:
        TH = _pick_hidden_tile(C, H, budget_bytes=12 * 1024 * 1024)
    else:
        assert H % hidden_tile == 0 and hidden_tile % 128 == 0
        TH = hidden_tile

    grid = (pl.cdiv(M, TM), pl.cdiv(H, TH))

    flops = 4 * M * C * H              # two matmuls
    bytes_accessed = (x2d.size * 4 + w1.size * 2 + w2.size * 2
                      + b1.size * b1.dtype.itemsize + b2.size * 4 + M * C * 4)

    out = pl.pallas_call(
        ffn_kernel,
        out_shape=jax.ShapeDtypeStruct((M, C), jnp.float32),
        grid=grid,
        in_specs=[
            pl.BlockSpec((TM, C), lambda i, j: (i, 0)),   # x row tile
            pl.BlockSpec((C, TH), lambda i, j: (0, j)),   # W1 hidden slab
            pl.BlockSpec((1, TH), lambda i, j: (0, j)),   # b1 hidden slab
            pl.BlockSpec((TH, C), lambda i, j: (j, 0)),   # W2 hidden slab
            pl.BlockSpec((1, C), lambda i, j: (0, 0)),    # b2 (resident)
        ],
        out_specs=pl.BlockSpec((TM, C), lambda i, j: (i, 0)),
        compiler_params=pltpu.CompilerParams(
            # Row tiles independent -> megacore-shardable; hidden axis is a
            # reduction into the resident output block.
            dimension_semantics=("parallel", "arbitrary"),
            vmem_limit_bytes=48 * 1024 * 1024,
        ),
        cost_estimate=pl.CostEstimate(
            flops=flops, transcendentals=0, bytes_accessed=bytes_accessed),
    )(x2d, w1, b1, w2, b2)

    return out.reshape(B, T, C)


def init_params(key, n_embd):
    """Deterministic init matching PyTorch nn.Linear shapes (weights stored
    transposed, (in, out), so the kernel does x @ W directly)."""
    k1, k2, k3, k4 = jax.random.split(key, 4)
    hidden = 4 * n_embd
    bound1 = 1.0 / (n_embd ** 0.5)
    bound2 = 1.0 / (hidden ** 0.5)
    w1 = jax.random.uniform(k1, (n_embd, hidden), jnp.float32, -bound1, bound1)
    b1 = jax.random.uniform(k2, (1, hidden), jnp.float32, -bound1, bound1)
    w2 = jax.random.uniform(k3, (hidden, n_embd), jnp.float32, -bound2, bound2)
    b2 = jax.random.uniform(k4, (1, n_embd), jnp.float32, -bound2, bound2)
    return w1, b1, w2, b2


def _reference(x, w1, b1, w2, b2):
    B, T, C = x.shape
    h = jnp.maximum(x.reshape(-1, C) @ w1 + b1, 0.0)
    return (h @ w2 + b2).reshape(B, T, C)


if __name__ == "__main__":
    n_embd = 384
    key = jax.random.PRNGKey(0)
    kx1, kx2, kp = jax.random.split(key, 3)

    w1, b1, w2, b2 = init_params(kp, n_embd)
    params = prepare_params(w1, b1, w2, b2)   # cast once, outside the hot path

    # --- Test 1: fast path (M=512 -> 2 row tiles, weights fully resident) ---
    B, T = 4, 128
    x = jax.random.normal(kx1, (B, T, n_embd), dtype=jnp.float32)
    y = jax.block_until_ready(feed_forward(x, params))
    ref = _reference(x, w1, b1, w2, b2)
    assert y.shape == (B, T, n_embd)
    assert jnp.allclose(y, ref, atol=3e-2, rtol=3e-2)

    # --- Test 2: ragged M tile + hidden-dim reduction axis (large-C path) ---
    B2, T2 = 3, 100                            # M=300 -> TM=160, ragged edge
    x2 = jax.random.normal(kx2, (B2, T2, n_embd), dtype=jnp.float32)
    y2 = jax.block_until_ready(feed_forward(x2, params, hidden_tile=512))
    ref2 = _reference(x2, w1, b1, w2, b2)
    assert y2.shape == (B2, T2, n_embd)
    assert jnp.allclose(y2, ref2, atol=3e-2, rtol=3e-2)

    print("KERNEL_OK")
</pallas_src>

<mosaic_0001>
module attributes {stable_mosaic.version = 11 : i64} {
  func.func @ffn_kernel(%arg0: i32, %arg1: i32, %arg2: memref<256x384xf32, #tpu.memory_space<vmem>>, %arg3: memref<384x1536xbf16, #tpu.memory_space<vmem>>, %arg4: memref<1x1536xbf16, #tpu.memory_space<vmem>>, %arg5: memref<1536x384xbf16, #tpu.memory_space<vmem>>, %arg6: memref<1x384xf32, #tpu.memory_space<vmem>>, %arg7: memref<256x384xf32, #tpu.memory_space<vmem>>) attributes {dimension_semantics = [#tpu.dimension_semantics<parallel>, #tpu.dimension_semantics<arbitrary>], iteration_bounds = array<i64: 2, 1>, scalar_prefetch = 0 : i64, scratch_operands = 0 : i64, tpu.core_type = #tpu.core_type<tc>, window_params = [{transform_indices = @transform_0, window_bounds = array<i64: 256, 384>}, {transform_indices = @transform_1, window_bounds = array<i64: 384, 1536>}, {transform_indices = @transform_2, window_bounds = array<i64: 1, 1536>}, {transform_indices = @transform_3, window_bounds = array<i64: 1536, 384>}, {pipeline_mode = #tpu.pipeline_mode<synchronous>, transform_indices = @transform_4, window_bounds = array<i64: 1, 384>}, {transform_indices = @transform_5, window_bounds = array<i64: 256, 384>}]} {
    %c0_i32 = arith.constant 0 : i32
    %0 = arith.cmpi eq, %arg1, %c0_i32 : i32
    %1 = arith.extui %0 : i1 to i32
    %c0_i32_0 = arith.constant 0 : i32
    %2 = arith.cmpi ne, %1, %c0_i32_0 : i32
    scf.if %2 {
      %c0_14 = arith.constant 0 : index
      %c0_15 = arith.constant 0 : index
      %18 = vector.load %arg6[%c0_14, %c0_15] : memref<1x384xf32, #tpu.memory_space<vmem>>, vector<1x384xf32>
      %19 = vector.shape_cast %18 : vector<1x384xf32> to vector<1x384xf32>
      %20 = vector.broadcast %19 : vector<1x384xf32> to vector<256x384xf32>
      %c0_16 = arith.constant 0 : index
      %c0_17 = arith.constant 0 : index
      %21 = vector.load %arg7[%c0_16, %c0_17] : memref<256x384xf32, #tpu.memory_space<vmem>>, vector<256x384xf32>
      tpu.vector_store %arg7[%c0_16, %c0_17], %20 {strides = array<i32>} : memref<256x384xf32, #tpu.memory_space<vmem>>, vector<256x384xf32>,
    } else {
    }
    %c0 = arith.constant 0 : index
    %c0_1 = arith.constant 0 : index
    %3 = vector.load %arg2[%c0, %c0_1] : memref<256x384xf32, #tpu.memory_space<vmem>>, vector<256x384xf32>
    %4 = arith.truncf %3 : vector<256x384xf32> to vector<256x384xbf16>
    %c0_2 = arith.constant 0 : index
    %c0_3 = arith.constant 0 : index
    %5 = vector.load %arg3[%c0_2, %c0_3] : memref<384x1536xbf16, #tpu.memory_space<vmem>>, vector<384x1536xbf16>
    %cst = arith.constant dense<0.000000e+00> : vector<256x1536xf32>
    %6 = tpu.matmul %4, %5, %cst {dimension_numbers = #tpu.dot_dimension_numbers<[1], [0], [0], [1], [0, 0, 1, 1], [], []>} : vector<256x384xbf16>, vector<384x1536xbf16>, vector<256x1536xf32> -> vector<256x1536xf32>
    %7 = arith.truncf %6 : vector<256x1536xf32> to vector<256x1536xbf16>
    %c0_4 = arith.constant 0 : index
    %c0_5 = arith.constant 0 : index
    %8 = vector.load %arg4[%c0_4, %c0_5] : memref<1x1536xbf16, #tpu.memory_space<vmem>>, vector<1x1536xbf16>
    %9 = vector.broadcast %8 : vector<1x1536xbf16> to vector<256x1536xbf16>
    %10 = arith.addf %7, %9 : vector<256x1536xbf16>
    %cst_6 = arith.constant 0.000000e+00 : bf16
    %11 = vector.broadcast %cst_6 : bf16 to vector<256x1536xbf16>
    %12 = arith.maximumf %10, %11 : vector<256x1536xbf16>
    %c0_7 = arith.constant 0 : index
    %c0_8 = arith.constant 0 : index
    %13 = vector.load %arg7[%c0_7, %c0_8] : memref<256x384xf32, #tpu.memory_space<vmem>>, vector<256x384xf32>
    %c0_9 = arith.constant 0 : index
    %c0_10 = arith.constant 0 : index
    %14 = vector.load %arg5[%c0_9, %c0_10] : memref<1536x384xbf16, #tpu.memory_space<vmem>>, vector<1536x384xbf16>
    %cst_11 = arith.constant dense<0.000000e+00> : vector<256x384xf32>
    %15 = tpu.matmul %12, %14, %cst_11 {dimension_numbers = #tpu.dot_dimension_numbers<[1], [0], [0], [1], [0, 0, 1, 1], [], []>} : vector<256x1536xbf16>, vector<1536x384xbf16>, vector<256x384xf32> -> vector<256x384xf32>
    %16 = arith.addf %13, %15 : vector<256x384xf32>
    %c0_12 = arith.constant 0 : index
    %c0_13 = arith.constant 0 : index
    %17 = vector.load %arg7[%c0_12, %c0_13] : memref<256x384xf32, #tpu.memory_space<vmem>>, vector<256x384xf32>
    tpu.vector_store %arg7[%c0_12, %c0_13], %16 {strides = array<i32>} : memref<256x384xf32, #tpu.memory_space<vmem>>, vector<256x384xf32>,
    return
  }
  func.func @transform_0(%arg0: i32, %arg1: i32) -> (i32, i32) {
    %c0_i32 = arith.constant 0 : i32
    %c0_i32_0 = arith.constant 0 : i32
    return %arg0, %c0_i32 : i32, i32
  }
  func.func @transform_1(%arg0: i32, %arg1: i32) -> (i32, i32) {
    %c0_i32 = arith.constant 0 : i32
    %c0_i32_0 = arith.constant 0 : i32
    return %c0_i32, %arg1 : i32, i32
  }
  func.func @transform_2(%arg0: i32, %arg1: i32) -> (i32, i32) {
    %c0_i32 = arith.constant 0 : i32
    %c0_i32_0 = arith.constant 0 : i32
    return %c0_i32, %arg1 : i32, i32
  }
  func.func @transform_3(%arg0: i32, %arg1: i32) -> (i32, i32) {
    %c0_i32 = arith.constant 0 : i32
    %c0_i32_0 = arith.constant 0 : i32
    return %arg1, %c0_i32 : i32, i32
  }
  func.func @transform_4(%arg0: i32, %arg1: i32) -> (i32, i32) {
    %c0_i32 = arith.constant 0 : i32
    %c0_i32_0 = arith.constant 0 : i32
    %c0_i32_1 = arith.constant 0 : i32
    return %c0_i32, %c0_i32_0 : i32, i32
  }
  func.func @transform_5(%arg0: i32, %arg1: i32) -> (i32, i32) {
    %c0_i32 = arith.constant 0 : i32
    %c0_i32_0 = arith.constant 0 : i32
    return %arg0, %c0_i32 : i32, i32
  }
}

</mosaic_0001>

<bundles_post_ra>
// kernel: feed_forward.1
= control target key start
LH: loop header
LB: loop body
LE: loop exit
PB: predicated region body
PF: predicated region fallthrough
CT: control target
= control target key end

     0   :  { %s16811_s0 = inlined_call_operand.hbm [shape: f32[512,384], index: 0, kind: input, shape index: {}]   ;;  %s16812_s1 = inlined_call_operand.hbm [shape: bf16[384,1536], index: 1, kind: input, shape index: {}]   ;;  %s16813_s2 = inlined_call_operand.hbm [shape: bf16[1,1536], index: 2, kind: input, shape index: {}]   ;;  %s16814_s3 = inlined_call_operand.hbm [shape: bf16[1536,384], index: 3, kind: input, shape index: {}]   ;;  %s16815_s4 = inlined_call_operand.hbm [shape: f32[1,384], index: 4, kind: input, shape index: {}]   ;;  %s16816_s5 = inlined_call_operand.hbm [shape: f32[512,384], index: 5, kind: output, shape index: {}]  }
   0x1   :  { %17173 = sst [smem:[#allocation257_spill]] %s16812_s1 }
   0x2   :  { %10 = vsyncpa [#allocation3], 0 }
   0x3   :  { %12 = vsyncpa [#allocation3 + $0x1], 0 }
   0x4   :  { %13 = vsyncpa [#allocation6], 0 }
   0x5   :  { %14 = vsyncpa [#allocation9], 0 }
   0x6   :  { %15 = vsyncpa [#allocation4], 0 }
   0x7   :  { %17 = vsyncpa [#allocation4 + $0x1], 0  ;;  %s13045_s18 = smov 0   ;;  %s13047_s19 = smov 0  }
   0x8   :  { %s13049_s20 = smov 0   ;;  %s13051_s21 = smov 0  }
   0x9   :  { %s13053_s22 = smov 0   ;;  %s13055_s23 = smov 0  }
   0xa LB: > { %s9855_s24 = sadd.s32 4294967295, %s12997_s23   ;;  %s9856_s25 = sadd.s32 4294967294, %s12997_s23   ;;  %s12997_s23 = sphi %s13055_s23, %s23_s23   ;;  %s12993_s22 = sphi %s13053_s22, %s18079_s22   ;;  %s12989_s21 = sphi %s13051_s21, %s18078_s21   ;;  %s12985_s20 = sphi %s13049_s20, %s18077_s20   ;;  %s12981_s19 = sphi %s13047_s19, %s18076_s19   ;;  %s12977_s18 = sphi %s13045_s18, %s18075_s18  }
   0xb   : > { %p55_p0 = scmp.ne.s32.totalorder %s12981_s19, %s12977_s18  ;;  %p13079_p1 = scmp.eq.s32.totalorder %s9855_s24, 0 }
   0xc   : > { %p13083_p2 = scmp.eq.s32.totalorder %s9855_s24, 1  ;;  %p184_p3 = scmp.eq.s32.totalorder %s9856_s25, 1 }
   0xd   : > { %s17174_s26 = scalar_select %p13079_p1, 1, 0 }
   0xe   : > { %s17175_s27 = scalar_select %p13083_p2, 1, 0 }
   0xf   : > { %p13089_p4 = por %p13079_p1, %p55_p0  ;;  %p9857_p5 = scmp.ge.s32.totalorder %s12997_s23, 1 }
  0x10   : > { %p13094_p6 = por %p184_p3, %p55_p0  ;;  %p191_p7 = scmp.lt.s32.totalorder %s12997_s23, 3 }
  0x11   : > { %s17176_s28 = scalar_select %p13089_p4, 1, 0 }
  0x12   : > { %s17177_s29 = scalar_select %p13094_p6, 1, 0 }
  0x13   : > { %p13099_p8 = pnand %p9857_p5, %p191_p7  ;;  %s12999_s6 = smov [#allocation5]  }
  0x14   : > { %17178 = sst [smem:[#allocation16_spill]] %s17177_s29  ;;  %s206_s7 = sshll.u32 %s12999_s6, 4  ;;  %s13103_s7 = int_to_ptr.vmem [resolvable:$true] %s206_s7 }
  0x15   : > { %s17179_s30 = scalar_select %p13099_p8, 1, 0 }
  0x16   : > { %p11853_p9 = pneg %p13099_p8  ;;  %s13000_s9 = smov [#allocation8]  }
  0x17   : > { %s237_s10 = sshll.u32 %s13000_s9, 4  ;;  %s17181_s1 = sld [smem:[#allocation257_spill]]  ;;  %s13114_s10 = int_to_ptr.vmem [resolvable:$true] %s237_s10 }
  0x18   : > { %p13110_p11 = pnand %p11853_p9, %p13079_p1 }
  0x1a   : > { %p13124_p13 = pneg %p13110_p11 }
  0x1d   : > { %s12765_s13 = scalar_lea.hbm %s17181_s1, 36864 }
  0x1e   : > { %p12766_p12 = scmp.ne.s32.totalorder %s17181_s1, %s12765_s13  ;;  %p12772_p5 = scmp.lt.u32.totalorder %s12765_s13, %s17181_s1 }
  0x20   : > { %p12768_p0 = pnand %p13124_p13, %p12766_p12 }
  0x22   : > { %p12769_p3 = pneg %p12768_p0 }
  0x24   : > { %p12774_p7 = pnand %p12772_p5, %p12769_p3 }
  0x26   : > { %12777 = shalt.err (!%p12774_p7)
}
  0x27   : > { %s12778_s25 = scalar_lea.vmem %s13103_s7, 36864  ;;  %p12786_p1 = scmp.lt.s32.totalorder %s13103_s7, %s13103_s7 }
  0x28   : > { %p12779_p9 = scmp.ne.s32.totalorder %s13103_s7, %s12778_s25  ;;  %p12787_p4 = scmp.lt.s32.totalorder %s12778_s25, %s12778_s25 }
  0x2a   : > { %p12781_p10 = pnand %p12779_p9, %p13124_p13  ;;  %p12788_p12 = por %p12787_p4, %p12786_p1 }
  0x2c   : > { %p12782_p6 = pneg %p12781_p10 }
  0x2e   : > { %p12789_p0 = pnand %p12788_p12, %p12782_p6 }
  0x30   : > { %12792 = shalt.err (!%p12789_p0)
}
  0x31   : > { %s13001_s6 = smov 768   ;;  %s13002_s9 = smov 48  }
  0x32   : > { %11856 = dma.hbm_to_vmem [thread:$0]  (!%p13110_p11), %s17181_s1, 36864, %s13103_s7, [#allocation6], %s13001_s6, %s13001_s6, %s13002_s9  }
  0x33   : > { %s12793_s15 = scalar_lea.hbm %s16814_s3, 36864 }
  0x34   : > { %p12794_p1 = scmp.ne.s32.totalorder %s16814_s3, %s12793_s15  ;;  %p12800_p10 = scmp.lt.u32.totalorder %s12793_s15, %s16814_s3 }
  0x36   : > { %p12796_p4 = pnand %p12794_p1, %p13124_p13 }
  0x38   : > { %p12797_p6 = pneg %p12796_p4 }
  0x3a   : > { %p12802_p3 = pnand %p12800_p10, %p12797_p6 }
  0x3c   : > { %12805 = shalt.err (!%p12802_p3)
}
  0x3d   : > { %s12806_s7 = scalar_lea.vmem %s13114_s10, 36864  ;;  %p12814_p12 = scmp.lt.s32.totalorder %s13114_s10, %s13114_s10 }
  0x3e   : > { %p12807_p5 = scmp.ne.s32.totalorder %s13114_s10, %s12806_s7  ;;  %p12815_p0 = scmp.lt.s32.totalorder %s12806_s7, %s12806_s7 }
  0x40   : > { %p12809_p7 = pnand %p12807_p5, %p13124_p13  ;;  %p12816_p1 = por %p12815_p0, %p12814_p12 }
  0x42   : > { %p12810_p9 = pneg %p12809_p7 }
  0x44   : > { %p12817_p4 = pnand %p12816_p1, %p12810_p9 }
  0x46   : > { %12820 = shalt.err (!%p12817_p4)
}
  0x47   : > { %s13003_s6 = smov 192   ;;  %s13004_s29 = smov 12  }
  0x48   : > { %11862 = dma.hbm_to_vmem [thread:$0]  (!%p13110_p11), %s16814_s3, 36864, %s13114_s10, [#allocation9], %s13003_s6, %s13003_s6, %s13004_s29  }
  0x49   : > { %s13005_s12 = smov [#allocation7]   ;;  %s13006_s14 = smov [#allocation10]  }
  0x4a   : > { %s223_s13 = sshll.u32 %s13005_s12, 4  ;;  %s251_s15 = sshll.u32 %s13006_s14, 4  ;;  %s224_s13 = int_to_ptr.vmem [resolvable:$true] %s223_s13  ;;  %s13168_s15 = int_to_ptr.vmem [resolvable:$true] %s251_s15 }
  0x4b   : > { %s12821_s25 = scalar_lea.hbm %s16813_s2, 192 }
  0x4c   : > { %p12822_p6 = scmp.ne.s32.totalorder %s16813_s2, %s12821_s25  ;;  %p12828_p5 = scmp.lt.u32.totalorder %s12821_s25, %s16813_s2 }
  0x4e   : > { %p12824_p10 = pnand %p12822_p6, %p13124_p13 }
  0x50   : > { %p12825_p3 = pneg %p12824_p10 }
  0x52   : > { %p12830_p7 = pnand %p12828_p5, %p12825_p3 }
  0x54   : > { %12833 = shalt.err (!%p12830_p7)
}
  0x55   : > { %s12834_s6 = scalar_lea.vmem %s224_s13, 192  ;;  %p12842_p1 = scmp.lt.s32.totalorder %s224_s13, %s224_s13 }
  0x56   : > { %p12835_p9 = scmp.ne.s32.totalorder %s224_s13, %s12834_s6  ;;  %p12843_p4 = scmp.lt.s32.totalorder %s12834_s6, %s12834_s6 }
  0x58   : > { %p12837_p12 = pnand %p12835_p9, %p13124_p13  ;;  %p12844_p8 = por %p12843_p4, %p12842_p1 }
  0x5a   : > { %p12838_p0 = pneg %p12837_p12 }
  0x5c   : > { %p12845_p2 = pnand %p12844_p8, %p12838_p0 }
  0x5e   : > { %12848 = shalt.err (!%p12845_p2)
}
  0x5f   : > { %11859 = dma.hbm_to_vmem [thread:$0]  (!%p13110_p11), %s16813_s2, 192, %s224_s13, [#allocation6]  }
  0x60   : > { %s12849_s14 = scalar_lea.hbm %s16815_s4, 48 }
  0x61   : > { %p12850_p6 = scmp.ne.s32.totalorder %s16815_s4, %s12849_s14  ;;  %p12856_p2 = scmp.lt.u32.totalorder %s12849_s14, %s16815_s4 }
  0x63   : > { %p12852_p10 = pnand %p12850_p6, %p13124_p13 }
  0x65   : > { %p12853_p3 = pneg %p12852_p10 }
  0x67   : > { %p12858_p8 = pnand %p12856_p2, %p12853_p3 }
  0x69   : > { %12861 = shalt.err (!%p12858_p8)
}
  0x6a   : > { %s12862_s13 = scalar_lea.vmem %s13168_s15, 48  ;;  %s12869_s9 = scalar_lea.vmem %s13168_s15, 64 }
  0x6b   : > { %p12863_p5 = scmp.ne.s32.totalorder %s13168_s15, %s12862_s13  ;;  %p12870_p12 = scmp.lt.s32.totalorder %s13168_s15, %s13168_s15 }
  0x6c   : > { %p12871_p0 = scmp.lt.s32.totalorder %s12869_s9, %s12862_s13 }
  0x6d   : > { %p12865_p7 = pnand %p12863_p5, %p13124_p13 }
  0x6e   : > { %p12872_p1 = por %p12871_p0, %p12870_p12 }
  0x6f   : > { %p12866_p9 = pneg %p12865_p7 }
  0x71   : > { %p12873_p4 = pnand %p12872_p1, %p12866_p9 }
  0x73   : > { %12876 = shalt.err (!%p12873_p4)
}
  0x74   : > { %11865 = dma.hbm_to_vmem [thread:$0]  (!%p13110_p11), %s16815_s4, 48, %s13168_s15, [#allocation9]  }
  0x75   : > { %s35_s16 = sadd.s32 1, %s12993_s22  ;;  %s42_s1 = sadd.s32 1, %s12985_s20 }
  0x76   : > { %p37_p13 = scmp.ge.s32.totalorder %s35_s16, 2  ;;  %p49_p6 = scmp.ne.s32.totalorder %s12985_s20, %s12981_s19 }
  0x77   : > { %p50_p10 = scmp.eq.s32.totalorder %s12997_s23, 0  ;;  %p11878_p3 = scmp.lt.s32.totalorder %s12997_s23, 2 }
  0x78   : > { %s18081_s16 = smov (%p37_p13, %s35_s16), 0  ;;  %p17183_p8 = scmp.ne.s32.totalorder %s17175_s27, 0 }
  0x79   : > { %p51_p2 = por %p50_p10, %p49_p6  ;;  %s39_s29 = ssub.s32 %s12993_s22, %s18081_s16 }
  0x7a   : > { %p13222_p5 = por %p17183_p8, %p49_p6  ;;  %s262_s11 = sand.u32 1, %s12985_s20  }
  0x7b   : > { %p40_p7 = scmp.eq.s32.totalorder %s39_s29, 0  ;;  %s11829_s15 = smul.u32 768, %s262_s11 }
  0x7c   : > { %p13229_p11 = pnand %p11878_p3, %p51_p2  ;;  %s11830_s17 = smul.u32 12288, %s12993_s22 }
  0x7d   : > { %s13234_s14 = scalar_select %p40_p7, %s12985_s20, %s42_s1  }
  0x7e   : > { %s266_s24 = scalar_lea.vmem [#allocation2], %s11829_s15  ;;  %s13240_s13 = scalar_lea.hbm %s16811_s0, %s11830_s17 }
  0x7f   : > { %s274_s25 = sshll.u32 %s266_s24, 4  ;;  %s13244_s9 = scalar_lea.sflag [#allocation3], %s262_s11  ;;  %s13242_s25 = int_to_ptr.vmem [resolvable:$true] %s274_s25 }
  0x80   : > { %s12877_s10 = scalar_lea.hbm %s13240_s13, 12288  ;;  %p12879_p12 = pneg %p13229_p11 }
  0x81   : > { %p12878_p9 = scmp.ne.s32.totalorder %s13240_s13, %s12877_s10  ;;  %s12882_s29 = scalar_lea.hbm %s16811_s0, 24576 }
  0x82   : > { %p12883_p4 = scmp.lt.u32.totalorder %s13240_s13, %s16811_s0  ;;  %p12884_p13 = scmp.lt.u32.totalorder %s12882_s29, %s12877_s10 }
  0x83   : > { %p12880_p0 = pnand %p12879_p12, %p12878_p9  ;;  %p12886_p10 = scmp.lt.u32.totalorder %s12877_s10, %s13240_s13 }
  0x84   : > { %p12885_p6 = por %p12884_p13, %p12883_p4 }
  0x85   : > { %p12881_p1 = pneg %p12880_p0 }
  0x86   : > { %p12887_p3 = por %p12886_p10, %p12885_p6 }
  0x88   : > { %p12888_p2 = pnand %p12887_p3, %p12881_p1 }
  0x8a   : > { %12891 = shalt.err (!%p12888_p2)
}
  0x8b   : > { %s12892_s11 = scalar_lea.vmem %s13242_s25, 12288  ;;  %s13007_s24 = smov [#allocation2]  }
  0x8c   : > { %p12893_p8 = scmp.ne.s32.totalorder %s13242_s25, %s12892_s11  ;;  %s12897_s27 = sshll.u32 %s13007_s24, 4  ;;  %s12898_s27 = int_to_ptr.vmem [resolvable:$false] %s12897_s27 }
  0x8d   : > { %s12899_s7 = scalar_lea.vmem %s12898_s27, 24576  ;;  %p12900_p0 = scmp.lt.s32.totalorder %s13242_s25, %s12898_s27 }
  0x8e   : > { %p12895_p7 = pnand %p12893_p8, %p12879_p12  ;;  %p12901_p4 = scmp.lt.s32.totalorder %s12899_s7, %s12892_s11 }
  0x90   : > { %p12896_p9 = pneg %p12895_p7  ;;  %p12902_p13 = por %p12901_p4, %p12900_p0 }
  0x92   : > { %p12903_p6 = pnand %p12902_p13, %p12896_p9 }
  0x94   : > { %12906 = shalt.err (!%p12903_p6)
}
  0x95   : > { %s13008_s10 = smov 384   ;;  %s13009_s6 = smov 24  }
  0x96   : > { %11869 = dma.hbm_to_vmem [thread:$0]  (!%p13229_p11), %s13240_s13, 12288, %s13242_s25, %s13244_s9, %s13008_s10, %s13008_s10, %s13009_s6  }
  0x97   : > { %p17186_p12 = scmp.ne.s32.totalorder %s17179_s30, 0 }
  0x99   : > { %286 = sbr.rel (%p17186_p12) target bundleno = 1999 (0x7cf), region = 40 }
  0xa0   : > { %s13275_s1 = sand.u32 1, %s12981_s19   ;;  %p17187_p1 = scmp.ne.s32.totalorder %s17176_s28, 0 }
  0xa1   : > { %s11831_s29 = smul.u32 768, %s13275_s1  ;;  %s289_s15 = scalar_lea.sflag [#allocation3], %s13275_s1 }
  0xa3   : > { %s13281_s17 = scalar_lea.vmem [#allocation2], %s11831_s29 }
  0xa4   : > { %12960 = dma.done.wait (%p17187_p1), %s289_s15, 12288  }
  0xa5   : > { %12962 = vsyncadd (%p17187_p1), %s289_s15, 4294955008  ;;  %p17188_p11 = scmp.ne.s32.totalorder %s17174_s26, 0 }
  0xa7   : > { %12964 = dma.done.wait (%p17188_p11), [#allocation6], 37056  }
  0xa8   : > { %12966 = vsyncadd (%p17188_p11), [#allocation6], 4294930240 }
  0xa9   : > { %12968 = dma.done.wait (%p17188_p11), [#allocation9], 36912  }
  0xaa   : > { %12970 = vsyncadd (%p17188_p11), [#allocation9], 4294930384  ;;  %v11946_v0 = vld [vmem:[#allocation5 + $0x4] ss:$48 sps:$4 sm:$0xff]   ;;  %v11948_v1 = vld [vmem:[#allocation5 + $0xc] ss:$48 sps:$4 sm:$0xff]  }
  0xab   : > { %2330 = vmatprep.subr.bf16.mxu0 %v11946_v0  ;;  %v11950_v2 = vld [vmem:[#allocation5] ss:$48 sps:$4 sm:$0xff]   ;;  %v11951_v3 = vld [vmem:[#allocation5 + $0x8] ss:$48 sps:$4 sm:$0xff]   ;;  %2716 = vmatprep.subr.bf16.mxu1 %v11948_v1  ;;  %v11952_v4 = vld [vmem:[#allocation5 + $0x64] ss:$48 sps:$4 sm:$0xff]  }
  0xac   : > { %2331 = vmatpush1.bf16.msra.mxu0 %v11950_v2  ;;  %2717 = vmatpush1.bf16.msra.mxu1 %v11951_v3  ;;  %v11954_v5 = vld [vmem:[#allocation5 + $0x6c] ss:$48 sps:$4 sm:$0xff]   ;;  %v11956_v6 = vld [vmem:[#allocation5 + $0x60] ss:$48 sps:$4 sm:$0xff]   ;;  %v11957_v7 = vld [vmem:[#allocation5 + $0x68] ss:$48 sps:$4 sm:$0xff]  }
  0xad   : > { %2332 = vmatprep.subr.bf16.mxu0 %v11952_v4  ;;  %2718 = vmatprep.subr.bf16.mxu1 %v11954_v5  ;;  %v11958_v8 = vld [vmem:[#allocation5 + $0xc4] ss:$48 sps:$4 sm:$0xff]   ;;  %v11960_v9 = vld [vmem:[#allocation5 + $0xcc] ss:$48 sps:$4 sm:$0xff]   ;;  %v11962_v10 = vld [vmem:[#allocation5 + $0xc0] ss:$48 sps:$4 sm:$0xff]  }
  0xae   : > { %v11963_v11 = vld [vmem:[#allocation5 + $0xc8] ss:$48 sps:$4 sm:$0xff]   ;;  %v11964_v12 = vld [vmem:[#allocation5 + $0x124] ss:$48 sps:$4 sm:$0xff]   ;;  %v11966_v13 = vld [vmem:[#allocation5 + $0x12c] ss:$48 sps:$4 sm:$0xff]  }
  0xaf   : > { %v11968_v14 = vld [vmem:[#allocation5 + $0x120] ss:$48 sps:$4 sm:$0xff]   ;;  %v11969_v15 = vld [vmem:[#allocation5 + $0x128] ss:$48 sps:$4 sm:$0xff]   ;;  %v11970_v16 = vld [vmem:[#allocation5 + $0x184] ss:$48 sps:$4 sm:$0xff]  }
  0xb0   : > { %2333 = vmatpush1.bf16.msra.mxu0 %v11956_v6  ;;  %2719 = vmatpush1.bf16.msra.mxu1 %v11957_v7  ;;  %v11972_v17 = vld [vmem:[#allocation5 + $0x18c] ss:$48 sps:$4 sm:$0xff]   ;;  %v11974_v18 = vld [vmem:[#allocation5 + $0x180] ss:$48 sps:$4 sm:$0xff]   ;;  %v11975_v19 = vld [vmem:[#allocation5 + $0x188] ss:$48 sps:$4 sm:$0xff]  }
  0xb1   : > { %2334 = vmatprep.subr.bf16.mxu0 %v11958_v8  ;;  %2720 = vmatprep.subr.bf16.mxu1 %v11960_v9  ;;  %v11976_v20 = vld [vmem:[#allocation5 + $0x1e4] ss:$48 sps:$4 sm:$0xff]   ;;  %v11978_v21 = vld [vmem:[#allocation5 + $0x1ec] ss:$48 sps:$4 sm:$0xff]   ;;  %v11980_v22 = vld [vmem:[#allocation5 + $0x1e0] ss:$48 sps:$4 sm:$0xff]  }
  0xb2   : > { %v11981_v23 = vld [vmem:[#allocation5 + $0x1e8] ss:$48 sps:$4 sm:$0xff]   ;;  %v11982_v24 = vld [vmem:[#allocation5 + $0x244] ss:$48 sps:$4 sm:$0xff]   ;;  %v11984_v25 = vld [vmem:[#allocation5 + $0x24c] ss:$48 sps:$4 sm:$0xff]  }
  0xb3   : > { %v11986_v26 = vld [vmem:[#allocation5 + $0x240] ss:$48 sps:$4 sm:$0xff]   ;;  %v11987_v27 = vld [vmem:[#allocation5 + $0x248] ss:$48 sps:$4 sm:$0xff]   ;;  %v11988_v28 = vld [vmem:[#allocation5 + $0x2a4] ss:$48 sps:$4 sm:$0xff]  }
  0xb4   : > { %2335 = vmatpush1.bf16.msra.mxu0 %v11962_v10  ;;  %2721 = vmatpush1.bf16.msra.mxu1 %v11963_v11  ;;  %v11990_v29 = vld [vmem:[#allocation5 + $0x2ac] ss:$48 sps:$4 sm:$0xff]   ;;  %v11992_v30 = vld [vmem:[#allocation5 + $0x2a0] ss:$48 sps:$4 sm:$0xff]   ;;  %v11993_v31 = vld [vmem:[#allocation5 + $0x2a8] ss:$48 sps:$4 sm:$0xff]  }
  0xb5   : > { %2336 = vmatprep.subr.bf16.mxu0 %v11964_v12  ;;  %2722 = vmatprep.subr.bf16.mxu1 %v11966_v13  ;;  %v11994_v32 = vld [vmem:[#allocation5 + $0x304] ss:$48 sps:$4 sm:$0xff]   ;;  %v11996_v33 = vld [vmem:[#allocation5 + $0x30c] ss:$48 sps:$4 sm:$0xff]   ;;  %v11998_v34 = vld [vmem:[#allocation5 + $0x300] ss:$48 sps:$4 sm:$0xff]  }
  0xb6   : > { %v11999_v35 = vld [vmem:[#allocation5 + $0x308] ss:$48 sps:$4 sm:$0xff]   ;;  %v12000_v36 = vld [vmem:[#allocation5 + $0x364] ss:$48 sps:$4 sm:$0xff]   ;;  %v12002_v37 = vld [vmem:[#allocation5 + $0x36c] ss:$48 sps:$4 sm:$0xff]  }
  0xb7   : > { %v12004_v38 = vld [vmem:[#allocation5 + $0x360] ss:$48 sps:$4 sm:$0xff]   ;;  %v12005_v39 = vld [vmem:[#allocation5 + $0x368] ss:$48 sps:$4 sm:$0xff]   ;;  %v12006_v40 = vld [vmem:[#allocation5 + $0x3c4] ss:$48 sps:$4 sm:$0xff]  }
  0xb8   : > { %2337 = vmatpush1.bf16.msra.mxu0 %v11968_v14  ;;  %2723 = vmatpush1.bf16.msra.mxu1 %v11969_v15  ;;  %v12008_v41 = vld [vmem:[#allocation5 + $0x3cc] ss:$48 sps:$4 sm:$0xff]   ;;  %v12010_v42 = vld [vmem:[#allocation5 + $0x3c0] ss:$48 sps:$4 sm:$0xff]   ;;  %v12011_v43 = vld [vmem:[#allocation5 + $0x3c8] ss:$48 sps:$4 sm:$0xff]  }
  0xb9   : > { %2338 = vmatprep.subr.bf16.mxu0 %v11970_v16  ;;  %2724 = vmatprep.subr.bf16.mxu1 %v11972_v17  ;;  %v12012_v44 = vld [vmem:[#allocation5 + $0x424] ss:$48 sps:$4 sm:$0xff]   ;;  %v12014_v45 = vld [vmem:[#allocation5 + $0x42c] ss:$48 sps:$4 sm:$0xff]   ;;  %v12016_v47 = vld [vmem:[#allocation5 + $0x420] ss:$48 sps:$4 sm:$0xff]  }
  0xba   : > { %v459_v46 = vld [vmem:[%s13281_s17 + $0x8] sm:$0xff]  ;;  %v462_v49 = vld [vmem:[%s13281_s17 + $0x20] sm:$0xff]  ;;  %v461_v4 = vld [vmem:[%s13281_s17 + $0x18] sm:$0xff]  ;;  %s16531_s26 = scalar_lea.vmem [#allocation11], %s11831_s29  ;;  %s11832_s28 = smul.u32 12288, %s12989_s21 }
  0xbb   : > { %v12017_v48 = vld [vmem:[#allocation5 + $0x428] ss:$48 sps:$4 sm:$0xff]   ;;  %v12018_v50 = vld [vmem:[#allocation5 + $0x484] ss:$48 sps:$4 sm:$0xff]   ;;  %v13297_v51 = vpack.c.bf16 %v462_v49, %v459_v46  ;;  %v12020_v52 = vld [vmem:[#allocation5 + $0x48c] ss:$48 sps:$4 sm:$0xff]  }
  0xbc   : > { %2339 = vmatpush1.bf16.msra.mxu0 %v11974_v18  ;;  %2725 = vmatpush1.bf16.msra.mxu1 %v11975_v19  ;;  %v12022_v53 = vld [vmem:[#allocation5 + $0x480] ss:$48 sps:$4 sm:$0xff]   ;;  %v12023_v54 = vld [vmem:[#allocation5 + $0x488] ss:$48 sps:$4 sm:$0xff]   ;;  %v12024_v55 = vld [vmem:[#allocation5 + $0x4e4] ss:$48 sps:$4 sm:$0xff]   ;;  %s16757_s13 = scalar_lea.hbm %s16816_s5, %s11832_s28 }
  0xbd   : > { %2340 = vmatprep.subr.bf16.mxu0 %v11976_v20  ;;  %2726 = vmatprep.subr.bf16.mxu1 %v11978_v21  ;;  %v12026_v56 = vld [vmem:[#allocation5 + $0x4ec] ss:$48 sps:$4 sm:$0xff]   ;;  %v12028_v57 = vld [vmem:[#allocation5 + $0x4e0] ss:$48 sps:$4 sm:$0xff]   ;;  %v12029_v58 = vld [vmem:[#allocation5 + $0x4e8] ss:$48 sps:$4 sm:$0xff]  }
  0xbe   : > { %2362 = vmatprep.mubr.bf16.mxu0 %v13297_v51  ;;  %2748 = vmatprep.mubr.bf16.mxu1 %v13297_v51  ;;  %v12030_v59 = vld [vmem:[#allocation5 + $0x544] ss:$48 sps:$4 sm:$0xff]   ;;  %v12032_v60 = vld [vmem:[#allocation5 + $0x54c] ss:$48 sps:$4 sm:$0xff]   ;;  %v12034_v61 = vld [vmem:[#allocation5 + $0x540] ss:$48 sps:$4 sm:$0xff]  }
  0xbf   : > { %v12035_v62 = vld [vmem:[#allocation5 + $0x548] ss:$48 sps:$4 sm:$0xff]   ;;  %v12036_v63 = vld [vmem:[#allocation5 + $0x5a4] ss:$48 sps:$4 sm:$0xff]   ;;  %v12038_v0 = vld [vmem:[#allocation5 + $0x5ac] ss:$48 sps:$4 sm:$0xff]  }
  0xc0   : > { %2341 = vmatpush1.bf16.msra.mxu0 %v11980_v22  ;;  %2727 = vmatpush1.bf16.msra.mxu1 %v11981_v23  ;;  %v12040_v1 = vld [vmem:[#allocation5 + $0x5a0] ss:$48 sps:$4 sm:$0xff]   ;;  %v12041_v2 = vld [vmem:[#allocation5 + $0x5a8] ss:$48 sps:$4 sm:$0xff]   ;;  %v12044_v5 = vld [vmem:[#allocation5 + $0x60c] ss:$48 sps:$4 sm:$0xff]  }
  0xc1   : > { %2342 = vmatprep.subr.bf16.mxu0 %v11982_v24  ;;  %2728 = vmatprep.subr.bf16.mxu1 %v11984_v25  ;;  %v458_v3 = vld [vmem:[%s13281_s17] sm:$0xff]  ;;  %v465_v7 = vld [vmem:[%s13281_s17 + $0x38] sm:$0xff]  ;;  %v468_v8 = vld [vmem:[%s13281_s17 + $0x50] sm:$0xff]  ;;  %s9730_s30 = sshll.u32 %s16531_s26, 4  ;;  %s9716_s21 = scalar_lea.sflag [#allocation4], %s13275_s1  ;;  %s16759_s30 = int_to_ptr.vmem [resolvable:$true] %s9730_s30 }
  0xc2   : > { %v12047_v6 = vld [vmem:[#allocation5 + $0x604] ss:$48 sps:$4 sm:$0xff]   ;;  %v13305_v9 = vpack.c.bf16 %v461_v4, %v458_v3  ;;  %v12042_v10 = vld [vmem:[#allocation5 + $0x608] ss:$48 sps:$4 sm:$0xff]   ;;  %v12045_v11 = vld [vmem:[#allocation5 + $0x600] ss:$48 sps:$4 sm:$0xff]   ;;  %v13307_v12 = vpack.c.bf16 %v468_v8, %v465_v7 }
  0xc3   : > { %v12050_v13 = vld [vmem:[#allocation5 + $0x66c] ss:$48 sps:$4 sm:$0xff]   ;;  %v12053_v14 = vld [vmem:[#allocation5 + $0x664] ss:$48 sps:$4 sm:$0xff]   ;;  %v12048_v18 = vld [vmem:[#allocation5 + $0x668] ss:$48 sps:$4 sm:$0xff]  }
  0xc4   : > { %2343 = vmatpush1.bf16.msra.mxu0 %v11986_v26  ;;  %2729 = vmatpush1.bf16.msra.mxu1 %v11987_v27  ;;  %v464_v15 = vld [vmem:[%s13281_s17 + $0x30] sm:$0xff]  ;;  %v467_v16 = vld [vmem:[%s13281_s17 + $0x48] sm:$0xff]  ;;  %v474_v20 = vld [vmem:[%s13281_s17 + $0x80] sm:$0xff]  ;;  %s12907_s9 = scalar_lea.vmem %s16759_s30, 12288  ;;  %s13012_s11 = smov [#allocation11]  }
  0xc5   : > { %2344 = vmatprep.subr.bf16.mxu0 %v11988_v28  ;;  %2730 = vmatprep.subr.bf16.mxu1 %v11990_v29  ;;  %v471_v17 = vld [vmem:[%s13281_s17 + $0x68] sm:$0xff]  ;;  %v12051_v19 = vld [vmem:[#allocation5 + $0x660] ss:$48 sps:$4 sm:$0xff]   ;;  %v12059_v22 = vld [vmem:[#allocation5 + $0x6c4] ss:$48 sps:$4 sm:$0xff]   ;;  %v13317_v23 = vpack.c.bf16 %v467_v16, %v464_v15  ;;  %p12908_p10 = scmp.ne.s32.totalorder %s16759_s30, %s12907_s9  ;;  %s12911_s24 = sshll.u32 %s13012_s11, 4  ;;  %s12912_s24 = int_to_ptr.vmem [resolvable:$false] %s12911_s24 }
  0xc6   : > { %v12056_v21 = vld [vmem:[#allocation5 + $0x6cc] ss:$48 sps:$4 sm:$0xff]   ;;  %v13319_v24 = vpack.c.bf16 %v474_v20, %v471_v17  ;;  %v12054_v25 = vld [vmem:[#allocation5 + $0x6c8] ss:$48 sps:$4 sm:$0xff]   ;;  %v12057_v26 = vld [vmem:[#allocation5 + $0x6c0] ss:$48 sps:$4 sm:$0xff]   ;;  %p12914_p8 = scmp.lt.s32.totalorder %s16759_s30, %s12912_s24 }
  0xc7   : > { %v470_v27 = vld [vmem:[%s13281_s17 + $0x60] sm:$0xff]  ;;  %v12062_v28 = vld [vmem:[#allocation5 + $0x72c] ss:$48 sps:$4 sm:$0xff]   ;;  %v488_v4 = vld [vmem:[%s13281_s17 + $0xf0] sm:$0xff]  ;;  %p12909_p3 = pnand %p12908_p10, %p13222_p5  ;;  %s12913_s27 = scalar_lea.vmem %s12912_s24, 24576 }
  0xc8   : > { %2345 = vmatpush1.bf16.msra.mxu0 %v11992_v30  ;;  %2731 = vmatpush1.bf16.msra.mxu1 %v11993_v31  ;;  %v12065_v29 = vld [vmem:[#allocation5 + $0x724] ss:$48 sps:$4 sm:$0xff]   ;;  %v473_v30 = vld [vmem:[%s13281_s17 + $0x78] sm:$0xff]  ;;  %v507_v20 = vld [vmem:[%s13281_s17 + $0x188] sm:$0xff]  ;;  %p12915_p7 = scmp.lt.s32.totalorder %s12913_s27, %s12907_s9 }
  0xc9   : > { %2346 = vmatprep.subr.bf16.mxu0 %v11994_v32  ;;  %2732 = vmatprep.subr.bf16.mxu1 %v11996_v33  ;;  %v477_v31 = vld [vmem:[%s13281_s17 + $0x98] sm:$0xff]  ;;  %v480_v32 = vld [vmem:[%s13281_s17 + $0xb0] sm:$0xff]  ;;  %v486_v46 = vld [vmem:[%s13281_s17 + $0xe0] sm:$0xff]  ;;  %p12910_p2 = pneg %p12909_p3 }
  0xca   : > { %v12060_v33 = vld [vmem:[#allocation5 + $0x728] ss:$48 sps:$4 sm:$0xff]   ;;  %v12080_v49 = vld [vmem:[#allocation5 + $0x84c] ss:$48 sps:$4 sm:$0xff]   ;;  %v498_v7 = vld [vmem:[%s13281_s17 + $0x140] sm:$0xff]  ;;  %p12916_p9 = por %p12915_p7, %p12914_p8 }
  0xcb   : > { %v504_v15 = vld [vmem:[%s13281_s17 + $0x170] sm:$0xff] }
  0xcc   : > { %2347 = vmatpush1.bf16.msra.mxu0 %v11998_v34  ;;  %2733 = vmatpush1.bf16.msra.mxu1 %v11999_v35  ;;  %v12063_v34 = vld [vmem:[#allocation5 + $0x720] ss:$48 sps:$4 sm:$0xff]   ;;  %v12068_v35 = vld [vmem:[#allocation5 + $0x78c] ss:$48 sps:$4 sm:$0xff]   ;;  %p12917_p0 = pnand %p12916_p9, %p12910_p2 }
  0xcd   : > { %2348 = vmatprep.subr.bf16.mxu0 %v12000_v36  ;;  %2734 = vmatprep.subr.bf16.mxu1 %v12002_v37  ;;  %v12071_v36 = vld [vmem:[#allocation5 + $0x784] ss:$48 sps:$4 sm:$0xff]   ;;  %v13329_v37 = vpack.c.bf16 %v473_v30, %v470_v27  ;;  %v509_v27 = vld [vmem:[%s13281_s17 + $0x198] sm:$0xff] }
  0xd0   : > { %2349 = vmatpush1.bf16.msra.mxu0 %v12004_v38  ;;  %2735 = vmatpush1.bf16.msra.mxu1 %v12005_v39  ;;  %v13331_v38 = vpack.c.bf16 %v480_v32, %v477_v31  ;;  %v12066_v39 = vld [vmem:[#allocation5 + $0x788] ss:$48 sps:$4 sm:$0xff]   ;;  %v512_v32 = vld [vmem:[%s13281_s17 + $0x1b0] sm:$0xff] }
  0xd1   : > { %2350 = vmatprep.subr.bf16.mxu0 %v12006_v40  ;;  %2736 = vmatprep.subr.bf16.mxu1 %v12008_v41  ;;  %v12069_v40 = vld [vmem:[#allocation5 + $0x780] ss:$48 sps:$4 sm:$0xff]   ;;  %v12074_v41 = vld [vmem:[#allocation5 + $0x7ec] ss:$48 sps:$4 sm:$0xff]  }
  0xd4   : > { %2351 = vmatpush1.bf16.msra.mxu0 %v12010_v42  ;;  %2737 = vmatpush1.bf16.msra.mxu1 %v12011_v43  ;;  %v12077_v42 = vld [vmem:[#allocation5 + $0x7e4] ss:$48 sps:$4 sm:$0xff]  }
  0xd5   : > { %2352 = vmatprep.subr.bf16.mxu0 %v12012_v44  ;;  %2738 = vmatprep.subr.bf16.mxu1 %v12014_v45  ;;  %v476_v43 = vld [vmem:[%s13281_s17 + $0x90] sm:$0xff]  ;;  %v479_v44 = vld [vmem:[%s13281_s17 + $0xa8] sm:$0xff] }
  0xd6   : > { %v483_v45 = vld [vmem:[%s13281_s17 + $0xc8] sm:$0xff] }
  0xd8   : > { %2353 = vmatpush1.bf16.msra.mxu0 %v12016_v47  ;;  %2739 = vmatpush1.bf16.msra.mxu1 %v12017_v48  ;;  %v12072_v47 = vld [vmem:[#allocation5 + $0x7e8] ss:$48 sps:$4 sm:$0xff]   ;;  %v12075_v48 = vld [vmem:[#allocation5 + $0x7e0] ss:$48 sps:$4 sm:$0xff]  }
  0xd9   : > { %2354 = vmatprep.subr.bf16.mxu0 %v12018_v50  ;;  %2740 = vmatprep.subr.bf16.mxu1 %v12020_v52  ;;  %v12083_v50 = vld [vmem:[#allocation5 + $0x844] ss:$48 sps:$4 sm:$0xff]   ;;  %v13341_v52 = vpack.c.bf16 %v479_v44, %v476_v43 }
  0xda   : > { %v528_v43 = vld [vmem:[%s13281_s17 + $0x230] sm:$0xff] }
  0xdc   : > { %2355 = vmatpush1.bf16.msra.mxu0 %v12022_v53  ;;  %2741 = vmatpush1.bf16.msra.mxu1 %v12023_v54  ;;  %v13343_v53 = vpack.c.bf16 %v486_v46, %v483_v45  ;;  %v12078_v54 = vld [vmem:[#allocation5 + $0x848] ss:$48 sps:$4 sm:$0xff]   ;;  %v524_v46 = vld [vmem:[%s13281_s17 + $0x210] sm:$0xff] }
  0xdd   : > { %2356 = vmatprep.subr.bf16.mxu0 %v12024_v55  ;;  %2742 = vmatprep.subr.bf16.mxu1 %v12026_v56  ;;  %v12081_v55 = vld [vmem:[#allocation5 + $0x840] ss:$48 sps:$4 sm:$0xff]  }
  0xde   : > { %v482_v56 = vld [vmem:[%s13281_s17 + $0xc0] sm:$0xff] }
  0xe0   : > { %2357 = vmatpush1.bf16.msra.mxu0 %v12028_v57  ;;  %2743 = vmatpush1.bf16.msra.mxu1 %v12029_v58  ;;  %v12086_v57 = vld [vmem:[#allocation5 + $0x8ac] ss:$48 sps:$4 sm:$0xff]   ;;  %v12089_v58 = vld [vmem:[#allocation5 + $0x8a4] ss:$48 sps:$4 sm:$0xff]  }
  0xe1   : > { %2358 = vmatprep.subr.bf16.mxu0 %v12030_v59  ;;  %2744 = vmatprep.subr.bf16.mxu1 %v12032_v60  ;;  %v485_v59 = vld [vmem:[%s13281_s17 + $0xd8] sm:$0xff] }
  0xe2   : > { %v489_v60 = vld [vmem:[%s13281_s17 + $0xf8] sm:$0xff] }
  0xe4   : > { %2359 = vmatpush1.bf16.msra.mxu0 %v12034_v61  ;;  %2745 = vmatpush1.bf16.msra.mxu1 %v12035_v62  ;;  %v492_v61 = vld [vmem:[%s13281_s17 + $0x110] sm:$0xff]  ;;  %v12084_v62 = vld [vmem:[#allocation5 + $0x8a8] ss:$48 sps:$4 sm:$0xff]  }
  0xe5   : > { %2360 = vmatprep.subr.bf16.mxu0 %v12036_v63  ;;  %2746 = vmatprep.subr.bf16.mxu1 %v12038_v0  ;;  %v12087_v63 = vld [vmem:[#allocation5 + $0x8a0] ss:$48 sps:$4 sm:$0xff]   ;;  %v12092_v0 = vld [vmem:[#allocation5 + $0x1c] ss:$48 sps:$4 sm:$0xff]   ;;  %v13355_v3 = vpack.c.bf16 %v492_v61, %v489_v60 }
  0xe6   : > { %v536_v61 = vld [vmem:[%s13281_s17 + $0x270] sm:$0xff] }
  0xe8   : > { %2361 = vmatpush1.bf16.msra.mxu0 %v12040_v1  ;;  %2747 = vmatpush1.bf16.msra.mxu1 %v12041_v2  ;;  %v12095_v1 = vld [vmem:[#allocation5 + $0x14] ss:$48 sps:$4 sm:$0xff]   ;;  %v13353_v2 = vpack.c.bf16 %v485_v59, %v482_v56  ;;  %v533_v56 = vld [vmem:[%s13281_s17 + $0x258] sm:$0xff] }
  0xe9   : > { %2909 = vmatprep.subr.bf16.mxu1 %v12044_v5  ;;  %2523 = vmatprep.subr.bf16.mxu0 %v12047_v6  ;;  %v491_v5 = vld [vmem:[%s13281_s17 + $0x108] sm:$0xff] }
  0xea   : > { %v495_v6 = vld [vmem:[%s13281_s17 + $0x128] sm:$0xff]  ;;  %v13365_v8 = vpack.c.bf16 %v491_v5, %v488_v4  ;;  %v542_v5 = vld [vmem:[%s13281_s17 + $0x2a0] sm:$0xff] }
  0xeb   : > { %2363 = vmatmul.mubr.bf16.vlgmr.msra.gmra.mrb[0].mxu0 %v13305_v9  ;;  %2749 = vmatmul.mubr.bf16.vlgmr.msra.gmra.mrb[0].mxu1 %v13305_v9 }
  0xec   : > { %2910 = vmatpush1.bf16.msra.mxu1 %v12042_v10  ;;  %2524 = vmatpush1.bf16.msra.mxu0 %v12045_v11  ;;  %v13367_v10 = vpack.c.bf16 %v498_v7, %v495_v6  ;;  %v494_v11 = vld [vmem:[%s13281_s17 + $0x120] sm:$0xff]  ;;  %v545_v6 = vld [vmem:[%s13281_s17 + $0x2b8] sm:$0xff] }
  0xed   : > { %2372 = vmatprep.mubr.bf16.mxu0 %v13307_v12  ;;  %2758 = vmatprep.mubr.bf16.mxu1 %v13307_v12  ;;  %v549_v7 = vld [vmem:[%s13281_s17 + $0x2d8] sm:$0xff] }
  0xee   : > { %2911 = vmatprep.subr.bf16.mxu1 %v12050_v13  ;;  %2525 = vmatprep.subr.bf16.mxu0 %v12053_v14  ;;  %v497_v13 = vld [vmem:[%s13281_s17 + $0x138] sm:$0xff] }
  0xef   : > { %v501_v14 = vld [vmem:[%s13281_s17 + $0x158] sm:$0xff]  ;;  %v13377_v16 = vpack.c.bf16 %v497_v13, %v494_v11  ;;  %v552_v11 = vld [vmem:[%s13281_s17 + $0x2f0] sm:$0xff]  ;;  %v13473_v13 = vpack.c.bf16 %v545_v6, %v542_v5 }
  0xf0   : > { %2912 = vmatpush1.bf16.msra.mxu1 %v12048_v18  ;;  %2526 = vmatpush1.bf16.msra.mxu0 %v12051_v19  ;;  %v13379_v17 = vpack.c.bf16 %v504_v15, %v501_v14  ;;  %v500_v18 = vld [vmem:[%s13281_s17 + $0x150] sm:$0xff]  ;;  %v503_v19 = vld [vmem:[%s13281_s17 + $0x168] sm:$0xff]  ;;  %v13475_v14 = vpack.c.bf16 %v552_v11, %v549_v7 }
  0xf1   : > { %2913 = vmatprep.subr.bf16.mxu1 %v12056_v21  ;;  %2527 = vmatprep.subr.bf16.mxu0 %v12059_v22  ;;  %v510_v21 = vld [vmem:[%s13281_s17 + $0x1a0] sm:$0xff]  ;;  %v13389_v22 = vpack.c.bf16 %v503_v19, %v500_v18  ;;  %v548_v15 = vld [vmem:[%s13281_s17 + $0x2d0] sm:$0xff]  ;;  %v551_v18 = vld [vmem:[%s13281_s17 + $0x2e8] sm:$0xff] }
  0xf2   : > { %17189 = vst [vmem:[#allocation17_spill] sm:$0xff] %v13475_v14  ;;  %v13483_v19 = vpack.c.bf16 %v551_v18, %v548_v15  ;;  %v12114_v5 = vld [vmem:[#allocation5 + $0x198] ss:$48 sps:$4 sm:$0xff]   ;;  %v12117_v6 = vld [vmem:[#allocation5 + $0x190] ss:$48 sps:$4 sm:$0xff]  }
  0xf3   : > { %2373 = vmatmul.mubr.bf16.gmra.mrb[4].mxu0 %v13317_v23  ;;  %2759 = vmatmul.mubr.bf16.gmra.mrb[4].mxu1 %v13317_v23  ;;  %v12122_v7 = vld [vmem:[#allocation5 + $0x1fc] ss:$48 sps:$4 sm:$0xff]   ;;  %v12125_v11 = vld [vmem:[#allocation5 + $0x1f4] ss:$48 sps:$4 sm:$0xff]  }
  0xf4   : > { %2382 = vmatprep.mubr.bf16.mxu0 %v13319_v24  ;;  %2768 = vmatprep.mubr.bf16.mxu1 %v13319_v24  ;;  %17190 = vst [vmem:[#allocation18_spill] sm:$0xff] %v13483_v19  ;;  %v478_v15 = vld [vmem:[%s13281_s17 + $0xa0] sm:$0xff]  ;;  %v481_v18 = vld [vmem:[%s13281_s17 + $0xb8] sm:$0xff] }
  0xf5   : > { %2914 = vmatpush1.bf16.msra.mxu1 %v12054_v25  ;;  %2528 = vmatpush1.bf16.msra.mxu0 %v12057_v26  ;;  %v13391_v25 = vpack.c.bf16 %v510_v21, %v507_v20  ;;  %v506_v26 = vld [vmem:[%s13281_s17 + $0x180] sm:$0xff]  ;;  %v460_v20 = vld [vmem:[%s13281_s17 + $0x10] sm:$0xff]  ;;  %v16822_v21 = vmov 0  }
  0xf6   : > { %2915 = vmatprep.subr.bf16.mxu1 %v12062_v28  ;;  %2529 = vmatprep.subr.bf16.mxu0 %v12065_v29  ;;  %v513_v28 = vld [vmem:[%s13281_s17 + $0x1b8] sm:$0xff]  ;;  %v516_v29 = vld [vmem:[%s13281_s17 + $0x1d0] sm:$0xff]  ;;  %v13401_v30 = vpack.c.bf16 %v509_v27, %v506_v26  ;;  %v463_v26 = vld [vmem:[%s13281_s17 + $0x28] sm:$0xff] }
  0xf7   : > { %v13403_v31 = vpack.c.bf16 %v516_v29, %v513_v28  ;;  %v12090_v27 = vld [vmem:[#allocation5 + $0x18] ss:$48 sps:$4 sm:$0xff]   ;;  %v12093_v28 = vld [vmem:[#allocation5 + $0x10] ss:$48 sps:$4 sm:$0xff]   ;;  %v13491_v29 = vpack.c.bf16 %v463_v26, %v460_v20 }
  0xf8   : > { %v12120_v20 = vld [vmem:[#allocation5 + $0x1f8] ss:$48 sps:$4 sm:$0xff]   ;;  %v12123_v26 = vld [vmem:[#allocation5 + $0x1f0] ss:$48 sps:$4 sm:$0xff]  }
  0xf9   : > { %2916 = vmatpush1.bf16.msra.mxu1 %v12060_v33  ;;  %2530 = vmatpush1.bf16.msra.mxu0 %v12063_v34  ;;  %v515_v33 = vld [vmem:[%s13281_s17 + $0x1c8] sm:$0xff]  ;;  %17191 = vst [vmem:[#allocation19_spill] sm:$0xff] %v13491_v29 }
  0xfa   : > { %2917 = vmatprep.subr.bf16.mxu1 %v12068_v35  ;;  %2531 = vmatprep.subr.bf16.mxu0 %v12071_v36  ;;  %v519_v34 = vld [vmem:[%s13281_s17 + $0x1e8] sm:$0xff]  ;;  %v522_v35 = vld [vmem:[%s13281_s17 + $0x200] sm:$0xff]  ;;  %v13413_v36 = vpack.c.bf16 %v515_v33, %v512_v32 }
  0xfb   : > { %2383 = vmatmul.mubr.bf16.gmra.mrb[8].mxu0 %v13329_v37  ;;  %2769 = vmatmul.mubr.bf16.gmra.mrb[8].mxu1 %v13329_v37  ;;  %v12098_v32 = vld [vmem:[#allocation5 + $0x7c] ss:$48 sps:$4 sm:$0xff]   ;;  %v12101_v33 = vld [vmem:[#allocation5 + $0x74] ss:$48 sps:$4 sm:$0xff]  }
  0xfc   : > { %2392 = vmatprep.mubr.bf16.mxu0 %v13331_v38  ;;  %2778 = vmatprep.mubr.bf16.mxu1 %v13331_v38 }
  0xfd   : > { %2918 = vmatpush1.bf16.msra.mxu1 %v12066_v39  ;;  %2532 = vmatpush1.bf16.msra.mxu0 %v12069_v40  ;;  %v13415_v39 = vpack.c.bf16 %v522_v35, %v519_v34  ;;  %v518_v40 = vld [vmem:[%s13281_s17 + $0x1e0] sm:$0xff]  ;;  %v469_v35 = vld [vmem:[%s13281_s17 + $0x58] sm:$0xff] }
  0xfe   : > { %2919 = vmatprep.subr.bf16.mxu1 %v12074_v41  ;;  %2533 = vmatprep.subr.bf16.mxu0 %v12077_v42  ;;  %v521_v41 = vld [vmem:[%s13281_s17 + $0x1f8] sm:$0xff]  ;;  %v466_v34 = vld [vmem:[%s13281_s17 + $0x40] sm:$0xff] }
  0xff   : > { %v525_v42 = vld [vmem:[%s13281_s17 + $0x218] sm:$0xff]  ;;  %v13425_v44 = vpack.c.bf16 %v521_v41, %v518_v40  ;;  %v12099_v41 = vld [vmem:[#allocation5 + $0x70] ss:$48 sps:$4 sm:$0xff]  }
 0x100   : > { %v13427_v45 = vpack.c.bf16 %v528_v43, %v525_v42  ;;  %v12096_v40 = vld [vmem:[#allocation5 + $0x78] ss:$48 sps:$4 sm:$0xff]   ;;  %v12104_v42 = vld [vmem:[#allocation5 + $0xdc] ss:$48 sps:$4 sm:$0xff]   ;;  %v12107_v43 = vld [vmem:[#allocation5 + $0xd4] ss:$48 sps:$4 sm:$0xff]  }
 0x101   : > { %2920 = vmatpush1.bf16.msra.mxu1 %v12072_v47  ;;  %2534 = vmatpush1.bf16.msra.mxu0 %v12075_v48  ;;  %v527_v47 = vld [vmem:[%s13281_s17 + $0x228] sm:$0xff] }
 0x102   : > { %2921 = vmatprep.subr.bf16.mxu1 %v12080_v49  ;;  %2535 = vmatprep.subr.bf16.mxu0 %v12083_v50  ;;  %v531_v48 = vld [vmem:[%s13281_s17 + $0x248] sm:$0xff]  ;;  %v534_v49 = vld [vmem:[%s13281_s17 + $0x260] sm:$0xff]  ;;  %v13437_v50 = vpack.c.bf16 %v527_v47, %v524_v46  ;;  %v13499_v46 = vpack.c.bf16 %v469_v35, %v466_v34 }
 0x103   : > { %2393 = vmatmul.mubr.bf16.gmra.mrb[12].mxu0 %v13341_v52  ;;  %2779 = vmatmul.mubr.bf16.gmra.mrb[12].mxu1 %v13341_v52  ;;  %v12102_v47 = vld [vmem:[#allocation5 + $0xd8] ss:$48 sps:$4 sm:$0xff]   ;;  %v12129_v34 = vld [vmem:[#allocation5 + $0x250] ss:$48 sps:$4 sm:$0xff]   ;;  %v12134_v35 = vld [vmem:[#allocation5 + $0x2bc] ss:$48 sps:$4 sm:$0xff]  }
 0x104   : > { %2402 = vmatprep.mubr.bf16.mxu0 %v13343_v53  ;;  %2788 = vmatprep.mubr.bf16.mxu1 %v13343_v53 }
 0x105   : > { %2922 = vmatpush1.bf16.msra.mxu1 %v12078_v54  ;;  %2536 = vmatpush1.bf16.msra.mxu0 %v12081_v55  ;;  %v13439_v54 = vpack.c.bf16 %v534_v49, %v531_v48  ;;  %v530_v55 = vld [vmem:[%s13281_s17 + $0x240] sm:$0xff]  ;;  %v12110_v49 = vld [vmem:[#allocation5 + $0x13c] ss:$48 sps:$4 sm:$0xff]  }
 0x106   : > { %2923 = vmatprep.subr.bf16.mxu1 %v12086_v57  ;;  %2537 = vmatprep.subr.bf16.mxu0 %v12089_v58  ;;  %v537_v57 = vld [vmem:[%s13281_s17 + $0x278] sm:$0xff]  ;;  %v540_v58 = vld [vmem:[%s13281_s17 + $0x290] sm:$0xff]  ;;  %v13449_v59 = vpack.c.bf16 %v533_v56, %v530_v55 }
 0x107   : > { %v13451_v60 = vpack.c.bf16 %v540_v58, %v537_v57  ;;  %v12105_v48 = vld [vmem:[#allocation5 + $0xd0] ss:$48 sps:$4 sm:$0xff]   ;;  %v12113_v55 = vld [vmem:[#allocation5 + $0x134] ss:$48 sps:$4 sm:$0xff]   ;;  %v475_v57 = vld [vmem:[%s13281_s17 + $0x88] sm:$0xff] }
 0x108   : > { %v472_v56 = vld [vmem:[%s13281_s17 + $0x70] sm:$0xff]  ;;  %v12108_v58 = vld [vmem:[#allocation5 + $0x138] ss:$48 sps:$4 sm:$0xff]  }
 0x109   : > { %2924 = vmatpush1.bf16.msra.mxu1 %v12084_v62  ;;  %2538 = vmatpush1.bf16.msra.mxu0 %v12087_v63  ;;  %v539_v62 = vld [vmem:[%s13281_s17 + $0x288] sm:$0xff] }
 0x10a   : > { %3488 = vmatprep.subr.bf16.mxu1 %v12092_v0  ;;  %3102 = vmatprep.subr.bf16.mxu0 %v12095_v1  ;;  %v543_v63 = vld [vmem:[%s13281_s17 + $0x2a8] sm:$0xff]  ;;  %v546_v0 = vld [vmem:[%s13281_s17 + $0x2c0] sm:$0xff]  ;;  %v13461_v1 = vpack.c.bf16 %v539_v62, %v536_v61 }
 0x10b   : > { %2403 = vmatmul.mubr.bf16.gmra.mrb[16].mxu0 %v13353_v2  ;;  %2789 = vmatmul.mubr.bf16.gmra.mrb[16].mxu1 %v13353_v2  ;;  %v13463_v4 = vpack.c.bf16 %v546_v0, %v543_v63  ;;  %v12111_v61 = vld [vmem:[#allocation5 + $0x130] ss:$48 sps:$4 sm:$0xff]   ;;  %v12116_v62 = vld [vmem:[#allocation5 + $0x19c] ss:$48 sps:$4 sm:$0xff]   ;;  %v12119_v63 = vld [vmem:[#allocation5 + $0x194] ss:$48 sps:$4 sm:$0xff]   ;;  %v13507_v0 = vpack.c.bf16 %v475_v57, %v472_v56 }
 0x10c   : > { %2412 = vmatprep.mubr.bf16.mxu0 %v13355_v3  ;;  %2798 = vmatprep.mubr.bf16.mxu1 %v13355_v3  ;;  %v12138_v56 = vld [vmem:[#allocation5 + $0x318] ss:$48 sps:$4 sm:$0xff]   ;;  %v12141_v57 = vld [vmem:[#allocation5 + $0x310] ss:$48 sps:$4 sm:$0xff]  }
 0x113   : > { %2413 = vmatmul.mubr.bf16.gmra.mrb[20].mxu0 %v13365_v8  ;;  %2799 = vmatmul.mubr.bf16.gmra.mrb[20].mxu1 %v13365_v8 }
 0x114   : > { %2422 = vmatprep.mubr.bf16.mxu0 %v13367_v10  ;;  %2808 = vmatprep.mubr.bf16.mxu1 %v13367_v10 }
 0x11b   : > { %2423 = vmatmul.mubr.bf16.gmra.mrb[24].mxu0 %v13377_v16  ;;  %2809 = vmatmul.mubr.bf16.gmra.mrb[24].mxu1 %v13377_v16 }
 0x11c   : > { %2432 = vmatprep.mubr.bf16.mxu0 %v13379_v17  ;;  %2818 = vmatprep.mubr.bf16.mxu1 %v13379_v17 }
 0x123   : > { %2433 = vmatmul.mubr.bf16.gmra.mrb[28].mxu0 %v13389_v22  ;;  %2819 = vmatmul.mubr.bf16.gmra.mrb[28].mxu1 %v13389_v22 }
 0x124   : > { %2442 = vmatprep.mubr.bf16.mxu0 %v13391_v25  ;;  %2828 = vmatprep.mubr.bf16.mxu1 %v13391_v25 }
 0x12b   : > { %2443 = vmatmul.mubr.bf16.gmra.mrb[32].mxu0 %v13401_v30  ;;  %2829 = vmatmul.mubr.bf16.gmra.mrb[32].mxu1 %v13401_v30 }
 0x12c   : > { %2452 = vmatprep.mubr.bf16.mxu0 %v13403_v31  ;;  %2838 = vmatprep.mubr.bf16.mxu1 %v13403_v31 }
 0x133   : > { %2453 = vmatmul.mubr.bf16.gmra.mrb[36].mxu0 %v13413_v36  ;;  %2839 = vmatmul.mubr.bf16.gmra.mrb[36].mxu1 %v13413_v36 }
 0x134   : > { %2462 = vmatprep.mubr.bf16.mxu0 %v13415_v39  ;;  %2848 = vmatprep.mubr.bf16.mxu1 %v13415_v39 }
 0x13b   : > { %2463 = vmatmul.mubr.bf16.gmra.mrb[40].mxu0 %v13425_v44  ;;  %2849 = vmatmul.mubr.bf16.gmra.mrb[40].mxu1 %v13425_v44 }
 0x13c   : > { %2472 = vmatprep.mubr.bf16.mxu0 %v13427_v45  ;;  %2858 = vmatprep.mubr.bf16.mxu1 %v13427_v45 }
 0x143   : > { %2473 = vmatmul.mubr.bf16.gmra.mrb[44].mxu0 %v13437_v50  ;;  %2859 = vmatmul.mubr.bf16.gmra.mrb[44].mxu1 %v13437_v50 }
 0x144   : > { %2482 = vmatprep.mubr.bf16.mxu0 %v13439_v54  ;;  %2868 = vmatprep.mubr.bf16.mxu1 %v13439_v54 }
 0x14b   : > { %2483 = vmatmul.mubr.bf16.gmra.mrb[48].mxu0 %v13449_v59  ;;  %2869 = vmatmul.mubr.bf16.gmra.mrb[48].mxu1 %v13449_v59 }
 0x14c   : > { %2492 = vmatprep.mubr.bf16.mxu0 %v13451_v60  ;;  %2878 = vmatprep.mubr.bf16.mxu1 %v13451_v60 }
 0x153   : > { %2493 = vmatmul.mubr.bf16.gmra.mrb[52].mxu0 %v13461_v1  ;;  %2879 = vmatmul.mubr.bf16.gmra.mrb[52].mxu1 %v13461_v1 }
 0x154   : > { %2502 = vmatprep.mubr.bf16.mxu0 %v13463_v4  ;;  %2888 = vmatprep.mubr.bf16.mxu1 %v13463_v4 }
 0x15b   : > { %2503 = vmatmul.mubr.bf16.gmra.mrb[56].mxu0 %v13473_v13  ;;  %2889 = vmatmul.mubr.bf16.gmra.mrb[56].mxu1 %v13473_v13 }
 0x15c   : > { %2512 = vmatprep.mubr.bf16.mxu0 %v13475_v14  ;;  %2898 = vmatprep.mubr.bf16.mxu1 %v13475_v14 }
 0x163   : > { %2513 = vmatmul.mubr.bf16.gmra.mrb[60].mxu0 %v13483_v19  ;;  %2899 = vmatmul.mubr.bf16.gmra.mrb[60].mxu1 %v13483_v19 }
 0x164   : > { %2555 = vmatprep.mubr.bf16.mxu0 %v16822_v21  ;;  %2941 = vmatprep.mubr.bf16.mxu1 %v16822_v21 }
 0x16b   : > { %2556 = vmatmul.mubr.bf16.vlgmr.msra.gmra.mrb[0].mxu0 %v13491_v29  ;;  %2942 = vmatmul.mubr.bf16.vlgmr.msra.gmra.mrb[0].mxu1 %v13491_v29 }
 0x16c   : > { %3489 = vmatpush1.bf16.msra.mxu1 %v12090_v27  ;;  %3103 = vmatpush1.bf16.msra.mxu0 %v12093_v28  ;;  %v12128_v27 = vld [vmem:[#allocation5 + $0x25c] ss:$48 sps:$4 sm:$0xff]   ;;  %v12131_v28 = vld [vmem:[#allocation5 + $0x254] ss:$48 sps:$4 sm:$0xff]  }
 0x16d   : > { %2565 = vmatprep.mubr.bf16.mxu0 %v16822_v21  ;;  %2951 = vmatprep.mubr.bf16.mxu1 %v16822_v21 }
 0x16e   : > { %3490 = vmatprep.subr.bf16.mxu1 %v12098_v32  ;;  %3104 = vmatprep.subr.bf16.mxu0 %v12101_v33  ;;  %v13515_v32 = vpack.c.bf16 %v481_v18, %v478_v15  ;;  %v12126_v33 = vld [vmem:[#allocation5 + $0x258] ss:$48 sps:$4 sm:$0xff]  }
 0x16f   : > { %v12150_v18 = vld [vmem:[#allocation5 + $0x3d8] ss:$48 sps:$4 sm:$0xff]  }
 0x170   : > { %3491 = vmatpush1.bf16.msra.mxu1 %v12096_v40  ;;  %3105 = vmatpush1.bf16.msra.mxu0 %v12099_v41  ;;  %v12137_v40 = vld [vmem:[#allocation5 + $0x2b4] ss:$48 sps:$4 sm:$0xff]  }
 0x171   : > { %3492 = vmatprep.subr.bf16.mxu1 %v12104_v42  ;;  %3106 = vmatprep.subr.bf16.mxu0 %v12107_v43  ;;  %v484_v41 = vld [vmem:[%s13281_s17 + $0xd0] sm:$0xff]  ;;  %v487_v42 = vld [vmem:[%s13281_s17 + $0xe8] sm:$0xff] }
 0x172   : > { %v12132_v43 = vld [vmem:[#allocation5 + $0x2b8] ss:$48 sps:$4 sm:$0xff]  }
 0x173   : > { %2566 = vmatmul.mubr.bf16.gmra.mrb[4].mxu0 %v13499_v46  ;;  %2952 = vmatmul.mubr.bf16.gmra.mrb[4].mxu1 %v13499_v46 }
 0x174   : > { %2575 = vmatprep.mubr.bf16.mxu0 %v16822_v21  ;;  %2961 = vmatprep.mubr.bf16.mxu1 %v16822_v21 }
 0x175   : > { %3493 = vmatpush1.bf16.msra.mxu1 %v12102_v47  ;;  %3107 = vmatpush1.bf16.msra.mxu0 %v12105_v48  ;;  %v12135_v47 = vld [vmem:[#allocation5 + $0x2b0] ss:$48 sps:$4 sm:$0xff]   ;;  %v12140_v48 = vld [vmem:[#allocation5 + $0x31c] ss:$48 sps:$4 sm:$0xff]  }
 0x176   : > { %3494 = vmatprep.subr.bf16.mxu1 %v12110_v49  ;;  %3108 = vmatprep.subr.bf16.mxu0 %v12113_v55  ;;  %v12143_v49 = vld [vmem:[#allocation5 + $0x314] ss:$48 sps:$4 sm:$0xff]   ;;  %v13523_v55 = vpack.c.bf16 %v487_v42, %v484_v41 }
 0x177   : > { %v12167_v41 = vld [vmem:[#allocation5 + $0x494] ss:$48 sps:$4 sm:$0xff]  }
 0x179   : > { %3495 = vmatpush1.bf16.msra.mxu1 %v12108_v58  ;;  %3109 = vmatpush1.bf16.msra.mxu0 %v12111_v61  ;;  %v12146_v58 = vld [vmem:[#allocation5 + $0x37c] ss:$48 sps:$4 sm:$0xff]   ;;  %v12149_v61 = vld [vmem:[#allocation5 + $0x374] ss:$48 sps:$4 sm:$0xff]  }
 0x17a   : > { %3496 = vmatprep.subr.bf16.mxu1 %v12116_v62  ;;  %3110 = vmatprep.subr.bf16.mxu0 %v12119_v63  ;;  %v490_v62 = vld [vmem:[%s13281_s17 + $0x100] sm:$0xff]  ;;  %v493_v63 = vld [vmem:[%s13281_s17 + $0x118] sm:$0xff] }
 0x17b   : > { %2576 = vmatmul.mubr.bf16.gmra.mrb[8].mxu0 %v13507_v0  ;;  %2962 = vmatmul.mubr.bf16.gmra.mrb[8].mxu1 %v13507_v0  ;;  %v13531_v15 = vpack.c.bf16 %v493_v63, %v490_v62  ;;  %v12176_v62 = vld [vmem:[#allocation5 + $0x55c] ss:$48 sps:$4 sm:$0xff]   ;;  %v12179_v63 = vld [vmem:[#allocation5 + $0x554] ss:$48 sps:$4 sm:$0xff]  }
 0x17c   : > { %2585 = vmatprep.mubr.bf16.mxu0 %v16822_v21  ;;  %2971 = vmatprep.mubr.bf16.mxu1 %v16822_v21 }
 0x17d   : > { %3497 = vmatpush1.bf16.msra.mxu1 %v12114_v5  ;;  %3111 = vmatpush1.bf16.msra.mxu0 %v12117_v6  ;;  %v12144_v5 = vld [vmem:[#allocation5 + $0x378] ss:$48 sps:$4 sm:$0xff]   ;;  %v12147_v6 = vld [vmem:[#allocation5 + $0x370] ss:$48 sps:$4 sm:$0xff]  }
 0x17e   : > { %3498 = vmatprep.subr.bf16.mxu1 %v12122_v7  ;;  %3112 = vmatprep.subr.bf16.mxu0 %v12125_v11  ;;  %v12152_v7 = vld [vmem:[#allocation5 + $0x3dc] ss:$48 sps:$4 sm:$0xff]   ;;  %v12155_v11 = vld [vmem:[#allocation5 + $0x3d4] ss:$48 sps:$4 sm:$0xff]  }
 0x181   : > { %3499 = vmatpush1.bf16.msra.mxu1 %v12120_v20  ;;  %3113 = vmatpush1.bf16.msra.mxu0 %v12123_v26  ;;  %v12153_v20 = vld [vmem:[#allocation5 + $0x3d0] ss:$48 sps:$4 sm:$0xff]   ;;  %v12158_v26 = vld [vmem:[#allocation5 + $0x43c] ss:$48 sps:$4 sm:$0xff]  }
 0x182   : > { %3500 = vmatprep.subr.bf16.mxu1 %v12128_v27  ;;  %3114 = vmatprep.subr.bf16.mxu0 %v12131_v28  ;;  %v12161_v27 = vld [vmem:[#allocation5 + $0x434] ss:$48 sps:$4 sm:$0xff]  }
 0x183   : > { %2586 = vmatmul.mubr.bf16.gmra.mrb[12].mxu0 %v13515_v32  ;;  %2972 = vmatmul.mubr.bf16.gmra.mrb[12].mxu1 %v13515_v32  ;;  %v496_v28 = vld [vmem:[%s13281_s17 + $0x130] sm:$0xff] }
 0x184   : > { %2595 = vmatprep.mubr.bf16.mxu0 %v16822_v21  ;;  %2981 = vmatprep.mubr.bf16.mxu1 %v16822_v21 }
 0x185   : > { %3501 = vmatpush1.bf16.msra.mxu1 %v12126_v33  ;;  %3115 = vmatpush1.bf16.msra.mxu0 %v12129_v34  ;;  %v499_v33 = vld [vmem:[%s13281_s17 + $0x148] sm:$0xff] }
 0x186   : > { %3502 = vmatprep.subr.bf16.mxu1 %v12134_v35  ;;  %3116 = vmatprep.subr.bf16.mxu0 %v12137_v40  ;;  %v12156_v34 = vld [vmem:[#allocation5 + $0x438] ss:$48 sps:$4 sm:$0xff]   ;;  %v12159_v35 = vld [vmem:[#allocation5 + $0x430] ss:$48 sps:$4 sm:$0xff]   ;;  %v12164_v40 = vld [vmem:[#allocation5 + $0x49c] ss:$48 sps:$4 sm:$0xff]   ;;  %v13539_v42 = vpack.c.bf16 %v499_v33, %v496_v28 }
 0x187   : > { %v12183_v28 = vld [vmem:[#allocation5 + $0x5b0] ss:$48 sps:$4 sm:$0xff]   ;;  %v12188_v33 = vld [vmem:[#allocation5 + $0x61c] ss:$48 sps:$4 sm:$0xff]  }
 0x189   : > { %3503 = vmatpush1.bf16.msra.mxu1 %v12132_v43  ;;  %3117 = vmatpush1.bf16.msra.mxu0 %v12135_v47  ;;  %v12162_v43 = vld [vmem:[#allocation5 + $0x498] ss:$48 sps:$4 sm:$0xff]   ;;  %v12165_v47 = vld [vmem:[#allocation5 + $0x490] ss:$48 sps:$4 sm:$0xff]  }
 0x18a   : > { %3504 = vmatprep.subr.bf16.mxu1 %v12140_v48  ;;  %3118 = vmatprep.subr.bf16.mxu0 %v12143_v49  ;;  %v12170_v48 = vld [vmem:[#allocation5 + $0x4fc] ss:$48 sps:$4 sm:$0xff]   ;;  %v12173_v49 = vld [vmem:[#allocation5 + $0x4f4] ss:$48 sps:$4 sm:$0xff]  }
 0x18b   : > { %2596 = vmatmul.mubr.bf16.gmra.mrb[16].mxu0 %v13523_v55  ;;  %2982 = vmatmul.mubr.bf16.gmra.mrb[16].mxu1 %v13523_v55 }
 0x18c   : > { %2605 = vmatprep.mubr.bf16.mxu0 %v16822_v21  ;;  %2991 = vmatprep.mubr.bf16.mxu1 %v16822_v21 }
 0x18d   : > { %3505 = vmatpush1.bf16.msra.mxu1 %v12138_v56  ;;  %3119 = vmatpush1.bf16.msra.mxu0 %v12141_v57  ;;  %v502_v56 = vld [vmem:[%s13281_s17 + $0x160] sm:$0xff]  ;;  %v505_v57 = vld [vmem:[%s13281_s17 + $0x178] sm:$0xff] }
 0x18e   : > { %3506 = vmatprep.subr.bf16.mxu1 %v12146_v58  ;;  %3120 = vmatprep.subr.bf16.mxu0 %v12149_v61  ;;  %v12168_v58 = vld [vmem:[#allocation5 + $0x4f8] ss:$48 sps:$4 sm:$0xff]   ;;  %v12171_v61 = vld [vmem:[#allocation5 + $0x4f0] ss:$48 sps:$4 sm:$0xff]  }
 0x191   : > { %3507 = vmatpush1.bf16.msra.mxu1 %v12144_v5  ;;  %3121 = vmatpush1.bf16.msra.mxu0 %v12147_v6  ;;  %v13547_v5 = vpack.c.bf16 %v505_v57, %v502_v56  ;;  %v12174_v6 = vld [vmem:[#allocation5 + $0x558] ss:$48 sps:$4 sm:$0xff]   ;;  %v526_v56 = vld [vmem:[%s13281_s17 + $0x220] sm:$0xff] }
 0x192   : > { %3508 = vmatprep.subr.bf16.mxu1 %v12152_v7  ;;  %3122 = vmatprep.subr.bf16.mxu0 %v12155_v11  ;;  %v12177_v7 = vld [vmem:[#allocation5 + $0x550] ss:$48 sps:$4 sm:$0xff]   ;;  %v12182_v11 = vld [vmem:[#allocation5 + $0x5bc] ss:$48 sps:$4 sm:$0xff]  }
 0x193   : > { %2606 = vmatmul.mubr.bf16.gmra.mrb[20].mxu0 %v13531_v15  ;;  %2992 = vmatmul.mubr.bf16.gmra.mrb[20].mxu1 %v13531_v15  ;;  %v529_v57 = vld [vmem:[%s13281_s17 + $0x238] sm:$0xff] }
 0x194   : > { %2615 = vmatprep.mubr.bf16.mxu0 %v16822_v21  ;;  %3001 = vmatprep.mubr.bf16.mxu1 %v16822_v21 }
 0x195   : > { %3509 = vmatpush1.bf16.msra.mxu1 %v12150_v18  ;;  %3123 = vmatpush1.bf16.msra.mxu0 %v12153_v20  ;;  %v12185_v18 = vld [vmem:[#allocation5 + $0x5b4] ss:$48 sps:$4 sm:$0xff]  }
 0x196   : > { %3510 = vmatprep.subr.bf16.mxu1 %v12158_v26  ;;  %3124 = vmatprep.subr.bf16.mxu0 %v12161_v27  ;;  %v508_v20 = vld [vmem:[%s13281_s17 + $0x190] sm:$0xff]  ;;  %v511_v26 = vld [vmem:[%s13281_s17 + $0x1a8] sm:$0xff] }
 0x197   : > { %v12180_v27 = vld [vmem:[#allocation5 + $0x5b8] ss:$48 sps:$4 sm:$0xff]  }
 0x199   : > { %3511 = vmatpush1.bf16.msra.mxu1 %v12156_v34  ;;  %3125 = vmatpush1.bf16.msra.mxu0 %v12159_v35  ;;  %v12191_v34 = vld [vmem:[#allocation5 + $0x614] ss:$48 sps:$4 sm:$0xff]   ;;  %v13555_v35 = vpack.c.bf16 %v511_v26, %v508_v20  ;;  %v547_v20 = vld [vmem:[%s13281_s17 + $0x2c8] sm:$0xff] }
 0x19a   : > { %3512 = vmatprep.subr.bf16.mxu1 %v12164_v40  ;;  %3126 = vmatprep.subr.bf16.mxu0 %v12167_v41  ;;  %v514_v40 = vld [vmem:[%s13281_s17 + $0x1c0] sm:$0xff]  ;;  %v517_v41 = vld [vmem:[%s13281_s17 + $0x1d8] sm:$0xff] }
 0x19b   : > { %2616 = vmatmul.mubr.bf16.gmra.mrb[24].mxu0 %v13539_v42  ;;  %3002 = vmatmul.mubr.bf16.gmra.mrb[24].mxu1 %v13539_v42 }
 0x19c   : > { %2625 = vmatprep.mubr.bf16.mxu0 %v16822_v21  ;;  %3011 = vmatprep.mubr.bf16.mxu1 %v16822_v21 }
 0x19d   : > { %3513 = vmatpush1.bf16.msra.mxu1 %v12162_v43  ;;  %3127 = vmatpush1.bf16.msra.mxu0 %v12165_v47  ;;  %v13563_v43 = vpack.c.bf16 %v517_v41, %v514_v40  ;;  %v520_v47 = vld [vmem:[%s13281_s17 + $0x1f0] sm:$0xff]  ;;  %v12194_v41 = vld [vmem:[#allocation5 + $0x67c] ss:$48 sps:$4 sm:$0xff]  }
 0x19e   : > { %3514 = vmatprep.subr.bf16.mxu1 %v12170_v48  ;;  %3128 = vmatprep.subr.bf16.mxu0 %v12173_v49  ;;  %v523_v48 = vld [vmem:[%s13281_s17 + $0x208] sm:$0xff]  ;;  %v12189_v40 = vld [vmem:[#allocation5 + $0x610] ss:$48 sps:$4 sm:$0xff]  }
 0x19f   : > { %v13571_v49 = vpack.c.bf16 %v523_v48, %v520_v47  ;;  %v12197_v47 = vld [vmem:[#allocation5 + $0x674] ss:$48 sps:$4 sm:$0xff]   ;;  %v12192_v48 = vld [vmem:[#allocation5 + $0x678] ss:$48 sps:$4 sm:$0xff]  }
 0x1a1   : > { %3515 = vmatpush1.bf16.msra.mxu1 %v12168_v58  ;;  %3129 = vmatpush1.bf16.msra.mxu0 %v12171_v61  ;;  %v13579_v58 = vpack.c.bf16 %v529_v57, %v526_v56  ;;  %v532_v61 = vld [vmem:[%s13281_s17 + $0x250] sm:$0xff]  ;;  %v12200_v57 = vld [vmem:[#allocation5 + $0x6dc] ss:$48 sps:$4 sm:$0xff]  }
 0x1a2   : > { %3516 = vmatprep.subr.bf16.mxu1 %v12176_v62  ;;  %3130 = vmatprep.subr.bf16.mxu0 %v12179_v63  ;;  %v535_v62 = vld [vmem:[%s13281_s17 + $0x268] sm:$0xff]  ;;  %v12195_v56 = vld [vmem:[#allocation5 + $0x670] ss:$48 sps:$4 sm:$0xff]  }
 0x1a3   : > { %2626 = vmatmul.mubr.bf16.gmra.mrb[28].mxu0 %v13547_v5  ;;  %3012 = vmatmul.mubr.bf16.gmra.mrb[28].mxu1 %v13547_v5  ;;  %v13587_v63 = vpack.c.bf16 %v535_v62, %v532_v61  ;;  %v12203_v61 = vld [vmem:[#allocation5 + $0x6d4] ss:$48 sps:$4 sm:$0xff]   ;;  %v12198_v62 = vld [vmem:[#allocation5 + $0x6d8] ss:$48 sps:$4 sm:$0xff]  }
 0x1a4   : > { %2635 = vmatprep.mubr.bf16.mxu0 %v16822_v21  ;;  %3021 = vmatprep.mubr.bf16.mxu1 %v16822_v21 }
 0x1a5   : > { %3517 = vmatpush1.bf16.msra.mxu1 %v12174_v6  ;;  %3131 = vmatpush1.bf16.msra.mxu0 %v12177_v7  ;;  %v538_v6 = vld [vmem:[%s13281_s17 + $0x280] sm:$0xff]  ;;  %v541_v7 = vld [vmem:[%s13281_s17 + $0x298] sm:$0xff] }
 0x1a6   : > { %3518 = vmatprep.subr.bf16.mxu1 %v12182_v11  ;;  %3132 = vmatprep.subr.bf16.mxu0 %v12185_v18  ;;  %v13595_v11 = vpack.c.bf16 %v541_v7, %v538_v6  ;;  %v544_v18 = vld [vmem:[%s13281_s17 + $0x2b0] sm:$0xff]  ;;  %v12206_v7 = vld [vmem:[#allocation5 + $0x73c] ss:$48 sps:$4 sm:$0xff]  }
 0x1a7   : > { %v13603_v26 = vpack.c.bf16 %v547_v20, %v544_v18  ;;  %v12201_v6 = vld [vmem:[#allocation5 + $0x6d0] ss:$48 sps:$4 sm:$0xff]   ;;  %v12209_v18 = vld [vmem:[#allocation5 + $0x734] ss:$48 sps:$4 sm:$0xff]   ;;  %v12204_v20 = vld [vmem:[#allocation5 + $0x738] ss:$48 sps:$4 sm:$0xff]  }
 0x1a9   : > { %3519 = vmatpush1.bf16.msra.mxu1 %v12180_v27  ;;  %3133 = vmatpush1.bf16.msra.mxu0 %v12183_v28  ;;  %v550_v27 = vld [vmem:[%s13281_s17 + $0x2e0] sm:$0xff]  ;;  %v553_v28 = vld [vmem:[%s13281_s17 + $0x2f8] sm:$0xff] }
 0x1aa   : > { %3681 = vmatprep.subr.bf16.mxu1 %v12188_v33  ;;  %3295 = vmatprep.subr.bf16.mxu0 %v12191_v34  ;;  %v13611_v33 = vpack.c.bf16 %v553_v28, %v550_v27  ;;  %v12186_v34 = vld [vmem:[#allocation5 + $0x618] ss:$48 sps:$4 sm:$0xff]   ;;  %v12207_v27 = vld [vmem:[#allocation5 + $0x730] ss:$48 sps:$4 sm:$0xff]   ;;  %v12212_v28 = vld [vmem:[#allocation5 + $0x79c] ss:$48 sps:$4 sm:$0xff]  }
 0x1ab   : > { %2636 = vmatmul.mubr.bf16.gmra.mrb[32].mxu0 %v13555_v35  ;;  %3022 = vmatmul.mubr.bf16.gmra.mrb[32].mxu1 %v13555_v35 }
 0x1ac   : > { %2645 = vmatprep.mubr.bf16.mxu0 %v16822_v21  ;;  %3031 = vmatprep.mubr.bf16.mxu1 %v16822_v21 }
 0x1b3   : > { %2646 = vmatmul.mubr.bf16.gmra.mrb[36].mxu0 %v13563_v43  ;;  %3032 = vmatmul.mubr.bf16.gmra.mrb[36].mxu1 %v13563_v43 }
 0x1b4   : > { %2655 = vmatprep.mubr.bf16.mxu0 %v16822_v21  ;;  %3041 = vmatprep.mubr.bf16.mxu1 %v16822_v21 }
 0x1bb   : > { %2656 = vmatmul.mubr.bf16.gmra.mrb[40].mxu0 %v13571_v49  ;;  %3042 = vmatmul.mubr.bf16.gmra.mrb[40].mxu1 %v13571_v49 }
 0x1bc   : > { %2665 = vmatprep.mubr.bf16.mxu0 %v16822_v21  ;;  %3051 = vmatprep.mubr.bf16.mxu1 %v16822_v21 }
 0x1c3   : > { %2666 = vmatmul.mubr.bf16.gmra.mrb[44].mxu0 %v13579_v58  ;;  %3052 = vmatmul.mubr.bf16.gmra.mrb[44].mxu1 %v13579_v58 }
 0x1c4   : > { %2675 = vmatprep.mubr.bf16.mxu0 %v16822_v21  ;;  %3061 = vmatprep.mubr.bf16.mxu1 %v16822_v21 }
 0x1cb   : > { %2676 = vmatmul.mubr.bf16.gmra.mrb[48].mxu0 %v13587_v63  ;;  %3062 = vmatmul.mubr.bf16.gmra.mrb[48].mxu1 %v13587_v63 }
 0x1cc   : > { %2685 = vmatprep.mubr.bf16.mxu0 %v16822_v21  ;;  %3071 = vmatprep.mubr.bf16.mxu1 %v16822_v21 }
 0x1d3   : > { %2686 = vmatmul.mubr.bf16.gmra.mrb[52].mxu0 %v13595_v11  ;;  %3072 = vmatmul.mubr.bf16.gmra.mrb[52].mxu1 %v13595_v11 }
 0x1d4   : > { %2695 = vmatprep.mubr.bf16.mxu0 %v16822_v21  ;;  %3081 = vmatprep.mubr.bf16.mxu1 %v16822_v21 }
 0x1db   : > { %2696 = vmatmul.mubr.bf16.gmra.mrb[56].mxu0 %v13603_v26  ;;  %3082 = vmatmul.mubr.bf16.gmra.mrb[56].mxu1 %v13603_v26 }
 0x1dc   : > { %2705 = vmatprep.mubr.bf16.mxu0 %v16822_v21  ;;  %3091 = vmatprep.mubr.bf16.mxu1 %v16822_v21 }
 0x1e3   : > { %2706 = vmatmul.mubr.bf16.gmra.mrb[60].mxu0 %v13611_v33  ;;  %3092 = vmatmul.mubr.bf16.gmra.mrb[60].mxu1 %v13611_v33 }
 0x1e4   : > { %3134 = vmatprep.mubr.bf16.mxu0 %v13297_v51  ;;  %3520 = vmatprep.mubr.bf16.mxu1 %v13297_v51 }
 0x1eb   : > { %3135 = vmatmul.mubr.bf16.vlgmr.msra.gmra.mrb[64].mxu0 %v13305_v9  ;;  %3521 = vmatmul.mubr.bf16.vlgmr.msra.gmra.mrb[64].mxu1 %v13305_v9 }
 0x1ec   : > { %3682 = vmatpush1.bf16.msra.mxu1 %v12186_v34  ;;  %3296 = vmatpush1.bf16.msra.mxu0 %v12189_v40  ;;  %v12215_v34 = vld [vmem:[#allocation5 + $0x794] ss:$48 sps:$4 sm:$0xff]   ;;  %v12210_v40 = vld [vmem:[#allocation5 + $0x798] ss:$48 sps:$4 sm:$0xff]  }
 0x1ed   : > { %3144 = vmatprep.mubr.bf16.mxu0 %v13307_v12  ;;  %3530 = vmatprep.mubr.bf16.mxu1 %v13307_v12 }
 0x1ee   : > { %3683 = vmatprep.subr.bf16.mxu1 %v12194_v41  ;;  %3297 = vmatprep.subr.bf16.mxu0 %v12197_v47  ;;  %v12213_v41 = vld [vmem:[#allocation5 + $0x790] ss:$48 sps:$4 sm:$0xff]   ;;  %v12218_v47 = vld [vmem:[#allocation5 + $0x7fc] ss:$48 sps:$4 sm:$0xff]  }
 0x1f0   : > { %3684 = vmatpush1.bf16.msra.mxu1 %v12192_v48  ;;  %3298 = vmatpush1.bf16.msra.mxu0 %v12195_v56  ;;  %v12221_v48 = vld [vmem:[#allocation5 + $0x7f4] ss:$48 sps:$4 sm:$0xff]   ;;  %v12216_v56 = vld [vmem:[#allocation5 + $0x7f8] ss:$48 sps:$4 sm:$0xff]  }
 0x1f1   : > { %3685 = vmatprep.subr.bf16.mxu1 %v12200_v57  ;;  %3299 = vmatprep.subr.bf16.mxu0 %v12203_v61  ;;  %v12219_v57 = vld [vmem:[#allocation5 + $0x7f0] ss:$48 sps:$4 sm:$0xff]   ;;  %v12224_v61 = vld [vmem:[#allocation5 + $0x85c] ss:$48 sps:$4 sm:$0xff]  }
 0x1f3   : > { %3145 = vmatmul.mubr.bf16.gmra.mrb[68].mxu0 %v13317_v23  ;;  %3531 = vmatmul.mubr.bf16.gmra.mrb[68].mxu1 %v13317_v23 }
 0x1f4   : > { %3154 = vmatprep.mubr.bf16.mxu0 %v13319_v24  ;;  %3540 = vmatprep.mubr.bf16.mxu1 %v13319_v24 }
 0x1f5   : > { %3686 = vmatpush1.bf16.msra.mxu1 %v12198_v62  ;;  %3300 = vmatpush1.bf16.msra.mxu0 %v12201_v6  ;;  %v12227_v62 = vld [vmem:[#allocation5 + $0x854] ss:$48 sps:$4 sm:$0xff]   ;;  %v12222_v6 = vld [vmem:[#allocation5 + $0x858] ss:$48 sps:$4 sm:$0xff]  }
 0x1f6   : > { %3687 = vmatprep.subr.bf16.mxu1 %v12206_v7  ;;  %3301 = vmatprep.subr.bf16.mxu0 %v12209_v18  ;;  %v12225_v7 = vld [vmem:[#allocation5 + $0x850] ss:$48 sps:$4 sm:$0xff]   ;;  %v12230_v18 = vld [vmem:[#allocation5 + $0x8bc] ss:$48 sps:$4 sm:$0xff]  }
 0x1f9   : > { %3688 = vmatpush1.bf16.msra.mxu1 %v12204_v20  ;;  %3302 = vmatpush1.bf16.msra.mxu0 %v12207_v27  ;;  %v12233_v20 = vld [vmem:[#allocation5 + $0x8b4] ss:$48 sps:$4 sm:$0xff]   ;;  %v12228_v27 = vld [vmem:[#allocation5 + $0x8b8] ss:$48 sps:$4 sm:$0xff]  }
 0x1fa   : > { %3689 = vmatprep.subr.bf16.mxu1 %v12212_v28  ;;  %3303 = vmatprep.subr.bf16.mxu0 %v12215_v34  ;;  %v12231_v28 = vld [vmem:[#allocation5 + $0x8b0] ss:$48 sps:$4 sm:$0xff]   ;;  %v12236_v34 = vld [vmem:[#allocation5 + $0x2c] ss:$48 sps:$4 sm:$0xff]  }
 0x1fb   : > { %3155 = vmatmul.mubr.bf16.gmra.mrb[72].mxu0 %v13329_v37  ;;  %3541 = vmatmul.mubr.bf16.gmra.mrb[72].mxu1 %v13329_v37 }
 0x1fc   : > { %3164 = vmatprep.mubr.bf16.mxu0 %v13331_v38  ;;  %3550 = vmatprep.mubr.bf16.mxu1 %v13331_v38 }
 0x1fd   : > { %3690 = vmatpush1.bf16.msra.mxu1 %v12210_v40  ;;  %3304 = vmatpush1.bf16.msra.mxu0 %v12213_v41  ;;  %v12239_v40 = vld [vmem:[#allocation5 + $0x24] ss:$48 sps:$4 sm:$0xff]  }
 0x1fe   : > { %3691 = vmatprep.subr.bf16.mxu1 %v12218_v47  ;;  %3305 = vmatprep.subr.bf16.mxu0 %v12221_v48 }
 0x201   : > { %3692 = vmatpush1.bf16.msra.mxu1 %v12216_v56  ;;  %3306 = vmatpush1.bf16.msra.mxu0 %v12219_v57 }
 0x202   : > { %3693 = vmatprep.subr.bf16.mxu1 %v12224_v61  ;;  %3307 = vmatprep.subr.bf16.mxu0 %v12227_v62 }
 0x203   : > { %3165 = vmatmul.mubr.bf16.gmra.mrb[76].mxu0 %v13341_v52  ;;  %3551 = vmatmul.mubr.bf16.gmra.mrb[76].mxu1 %v13341_v52 }
 0x204   : > { %3174 = vmatprep.mubr.bf16.mxu0 %v13343_v53  ;;  %3560 = vmatprep.mubr.bf16.mxu1 %v13343_v53 }
 0x205   : > { %3694 = vmatpush1.bf16.msra.mxu1 %v12222_v6  ;;  %3308 = vmatpush1.bf16.msra.mxu0 %v12225_v7 }
 0x206   : > { %3695 = vmatprep.subr.bf16.mxu1 %v12230_v18  ;;  %3309 = vmatprep.subr.bf16.mxu0 %v12233_v20 }
 0x209   : > { %3696 = vmatpush1.bf16.msra.mxu1 %v12228_v27  ;;  %3310 = vmatpush1.bf16.msra.mxu0 %v12231_v28 }
 0x20a   : > { %4260 = vmatprep.subr.bf16.mxu1 %v12236_v34  ;;  %3874 = vmatprep.subr.bf16.mxu0 %v12239_v40 }
 0x20b   : > { %3175 = vmatmul.mubr.bf16.gmra.mrb[80].mxu0 %v13353_v2  ;;  %3561 = vmatmul.mubr.bf16.gmra.mrb[80].mxu1 %v13353_v2 }
 0x20c   : > { %3184 = vmatprep.mubr.bf16.mxu0 %v13355_v3  ;;  %3570 = vmatprep.mubr.bf16.mxu1 %v13355_v3 }
 0x213   : > { %3185 = vmatmul.mubr.bf16.gmra.mrb[84].mxu0 %v13365_v8  ;;  %3571 = vmatmul.mubr.bf16.gmra.mrb[84].mxu1 %v13365_v8 }
 0x214   : > { %3194 = vmatprep.mubr.bf16.mxu0 %v13367_v10  ;;  %3580 = vmatprep.mubr.bf16.mxu1 %v13367_v10 }
 0x21b   : > { %3195 = vmatmul.mubr.bf16.gmra.mrb[88].mxu0 %v13377_v16  ;;  %3581 = vmatmul.mubr.bf16.gmra.mrb[88].mxu1 %v13377_v16 }
 0x21c   : > { %3204 = vmatprep.mubr.bf16.mxu0 %v13379_v17  ;;  %3590 = vmatprep.mubr.bf16.mxu1 %v13379_v17 }
 0x223   : > { %3205 = vmatmul.mubr.bf16.gmra.mrb[92].mxu0 %v13389_v22  ;;  %3591 = vmatmul.mubr.bf16.gmra.mrb[92].mxu1 %v13389_v22 }
 0x224   : > { %3214 = vmatprep.mubr.bf16.mxu0 %v13391_v25  ;;  %3600 = vmatprep.mubr.bf16.mxu1 %v13391_v25 }
 0x22b   : > { %3215 = vmatmul.mubr.bf16.gmra.mrb[96].mxu0 %v13401_v30  ;;  %3601 = vmatmul.mubr.bf16.gmra.mrb[96].mxu1 %v13401_v30 }
 0x22c   : > { %3224 = vmatprep.mubr.bf16.mxu0 %v13403_v31  ;;  %3610 = vmatprep.mubr.bf16.mxu1 %v13403_v31 }
 0x233   : > { %3225 = vmatmul.mubr.bf16.gmra.mrb[100].mxu0 %v13413_v36  ;;  %3611 = vmatmul.mubr.bf16.gmra.mrb[100].mxu1 %v13413_v36 }
 0x234   : > { %3234 = vmatprep.mubr.bf16.mxu0 %v13415_v39  ;;  %3620 = vmatprep.mubr.bf16.mxu1 %v13415_v39 }
 0x23b   : > { %3235 = vmatmul.mubr.bf16.gmra.mrb[104].mxu0 %v13425_v44  ;;  %3621 = vmatmul.mubr.bf16.gmra.mrb[104].mxu1 %v13425_v44 }
 0x23c   : > { %3244 = vmatprep.mubr.bf16.mxu0 %v13427_v45  ;;  %3630 = vmatprep.mubr.bf16.mxu1 %v13427_v45 }
 0x23e   : > { %v13661_v41 = vpop.f32.mrb[0].mxu0  ;;  %v13663_v47 = vpop.f32.mrb[0].mxu1 }
 0x23f   : > { %17192 = vst [vmem:[#allocation20_spill] sm:$0xff] %v13661_v41  ;;  %17193 = vst [vmem:[#allocation21_spill] sm:$0xff] %v13663_v47  ;;  %v13665_v48 = vpop.f32.mrb[1].mxu0  ;;  %v13667_v56 = vpop.f32.mrb[1].mxu1  ;;  %v17232_v41 = vmov 0  }
 0x240   : > { %17194 = vst [vmem:[#allocation22_spill] sm:$0xff] %v13665_v48  ;;  %17195 = vst [vmem:[#allocation23_spill] sm:$0xff] %v13667_v56  ;;  %v13669_v57 = vpop.f32.mrb[2].mxu0  ;;  %v13671_v61 = vpop.f32.mrb[2].mxu1 }
 0x241   : > { %17196 = vst [vmem:[#allocation24_spill] sm:$0xff] %v13669_v57  ;;  %17197 = vst [vmem:[#allocation25_spill] sm:$0xff] %v13671_v61  ;;  %v13677_v7 = vpop.f32.mrb[3].mxu0  ;;  %v13679_v18 = vpop.f32.mrb[3].mxu1 }
 0x242   : > { %17198 = vst [vmem:[#allocation26_spill] sm:$0xff] %v13677_v7  ;;  %17199 = vst [vmem:[#allocation27_spill] sm:$0xff] %v13679_v18  ;;  %v12242_v7 = vld [vmem:[#allocation5 + $0x8c] ss:$48 sps:$4 sm:$0xff]  }
 0x243   : > { %3245 = vmatmul.mubr.bf16.gmra.mrb[108].mxu0 %v13437_v50  ;;  %3631 = vmatmul.mubr.bf16.gmra.mrb[108].mxu1 %v13437_v50 }
 0x244   : > { %3254 = vmatprep.mubr.bf16.mxu0 %v13439_v54  ;;  %3640 = vmatprep.mubr.bf16.mxu1 %v13439_v54 }
 0x246   : > { %v13689_v28 = vpop.f32.mrb[4].mxu0  ;;  %v13691_v34 = vpop.f32.mrb[4].mxu1 }
 0x247   : > { %17200 = vst [vmem:[#allocation28_spill] sm:$0xff] %v13689_v28  ;;  %17201 = vst [vmem:[#allocation29_spill] sm:$0xff] %v13691_v34  ;;  %v13693_v40 = vpop.f32.mrb[5].mxu0  ;;  %v13695_v6 = vpop.f32.mrb[5].mxu1 }
 0x248   : > { %17202 = vst [vmem:[#allocation30_spill] sm:$0xff] %v13693_v40  ;;  %17203 = vst [vmem:[#allocation31_spill] sm:$0xff] %v13695_v6  ;;  %v13697_v62 = vpop.f32.mrb[6].mxu0  ;;  %v13699_v20 = vpop.f32.mrb[6].mxu1 }
 0x249   : > { %17204 = vst [vmem:[#allocation32_spill] sm:$0xff] %v13697_v62  ;;  %17205 = vst [vmem:[#allocation33_spill] sm:$0xff] %v13699_v20  ;;  %v13705_v47 = vpop.f32.mrb[7].mxu0  ;;  %v13707_v61 = vpop.f32.mrb[7].mxu1 }
 0x24a   : > { %17206 = vst [vmem:[#allocation34_spill] sm:$0xff] %v13705_v47  ;;  %17207 = vst [vmem:[#allocation35_spill] sm:$0xff] %v13707_v61 }
 0x24b   : > { %3255 = vmatmul.mubr.bf16.gmra.mrb[112].mxu0 %v13449_v59  ;;  %3641 = vmatmul.mubr.bf16.gmra.mrb[112].mxu1 %v13449_v59 }
 0x24c   : > { %3264 = vmatprep.mubr.bf16.mxu0 %v13451_v60  ;;  %3650 = vmatprep.mubr.bf16.mxu1 %v13451_v60 }
 0x24e   : > { %v13717_v27 = vpop.f32.mrb[8].mxu0  ;;  %v13719_v21 = vpop.f32.mrb[8].mxu1 }
 0x24f   : > { %17208 = vst [vmem:[#allocation36_spill] sm:$0xff] %v13717_v27  ;;  %17209 = vst [vmem:[#allocation37_spill] sm:$0xff] %v13719_v21  ;;  %v13721_v34 = vpop.f32.mrb[9].mxu0  ;;  %v13723_v20 = vpop.f32.mrb[9].mxu1 }
 0x250   : > { %17210 = vst [vmem:[#allocation38_spill] sm:$0xff] %v13721_v34  ;;  %17211 = vst [vmem:[#allocation39_spill] sm:$0xff] %v13723_v20  ;;  %v13725_v56 = vpop.f32.mrb[10].mxu0  ;;  %v13727_v28 = vpop.f32.mrb[10].mxu1 }
 0x251   : > { %17212 = vst [vmem:[#allocation40_spill] sm:$0xff] %v13725_v56  ;;  %17213 = vst [vmem:[#allocation41_spill] sm:$0xff] %v13727_v28  ;;  %v13733_v61 = vpop.f32.mrb[11].mxu0  ;;  %v13735_v62 = vpop.f32.mrb[11].mxu1 }
 0x252   : > { %17214 = vst [vmem:[#allocation42_spill] sm:$0xff] %v13733_v61  ;;  %17215 = vst [vmem:[#allocation43_spill] sm:$0xff] %v13735_v62 }
 0x253   : > { %3265 = vmatmul.mubr.bf16.gmra.mrb[116].mxu0 %v13461_v1  ;;  %3651 = vmatmul.mubr.bf16.gmra.mrb[116].mxu1 %v13461_v1 }
 0x254   : > { %3274 = vmatprep.mubr.bf16.mxu0 %v13463_v4  ;;  %3660 = vmatprep.mubr.bf16.mxu1 %v13463_v4 }
 0x256   : > { %v13745_v18 = vpop.f32.mrb[12].mxu0  ;;  %v13747_v6 = vpop.f32.mrb[12].mxu1 }
 0x257   : > { %17216 = vst [vmem:[#allocation44_spill] sm:$0xff] %v13745_v18  ;;  %17217 = vst [vmem:[#allocation45_spill] sm:$0xff] %v13747_v6  ;;  %v13749_v21 = vpop.f32.mrb[13].mxu0  ;;  %v13751_v28 = vpop.f32.mrb[13].mxu1 }
 0x258   : > { %17218 = vst [vmem:[#allocation46_spill] sm:$0xff] %v13749_v21  ;;  %17219 = vst [vmem:[#allocation47_spill] sm:$0xff] %v13751_v28  ;;  %v13753_v40 = vpop.f32.mrb[14].mxu0  ;;  %v13755_v27 = vpop.f32.mrb[14].mxu1 }
 0x259   : > { %17220 = vst [vmem:[#allocation48_spill] sm:$0xff] %v13753_v40  ;;  %17221 = vst [vmem:[#allocation49_spill] sm:$0xff] %v13755_v27  ;;  %v13761_v62 = vpop.f32.mrb[15].mxu0  ;;  %v13763_v56 = vpop.f32.mrb[15].mxu1 }
 0x25a   : > { %17222 = vst [vmem:[#allocation50_spill] sm:$0xff] %v13761_v62  ;;  %17223 = vst [vmem:[#allocation51_spill] sm:$0xff] %v13763_v56  ;;  %v12234_v62 = vld [vmem:[#allocation5 + $0x28] ss:$48 sps:$4 sm:$0xff]  }
 0x25b   : > { %3275 = vmatmul.mubr.bf16.gmra.mrb[120].mxu0 %v13473_v13  ;;  %3661 = vmatmul.mubr.bf16.gmra.mrb[120].mxu1 %v13473_v13 }
 0x25c   : > { %3284 = vmatprep.mubr.bf16.mxu0 %v13475_v14  ;;  %3670 = vmatprep.mubr.bf16.mxu1 %v13475_v14  ;;  %v12257_v14 = vld [vmem:[#allocation5 + $0x144] ss:$48 sps:$4 sm:$0xff]  }
 0x25e   : > { %v13773_v47 = vpop.f32.mrb[16].mxu0  ;;  %v13775_v20 = vpop.f32.mrb[16].mxu1 }
 0x25f   : > { %17224 = vst [vmem:[#allocation52_spill] sm:$0xff] %v13773_v47  ;;  %17225 = vst [vmem:[#allocation53_spill] sm:$0xff] %v13775_v20  ;;  %v13777_v6 = vpop.f32.mrb[17].mxu0  ;;  %v13779_v27 = vpop.f32.mrb[17].mxu1 }
 0x260   : > { %17226 = vst [vmem:[#allocation54_spill] sm:$0xff] %v13777_v6  ;;  %17227 = vst [vmem:[#allocation55_spill] sm:$0xff] %v13779_v27  ;;  %v13781_v34 = vpop.f32.mrb[18].mxu0  ;;  %v13783_v18 = vpop.f32.mrb[18].mxu1  ;;  %v12237_v27 = vld [vmem:[#allocation5 + $0x20] ss:$48 sps:$4 sm:$0xff]  }
 0x261   : > { %17228 = vst [vmem:[#allocation56_spill] sm:$0xff] %v13781_v34  ;;  %17229 = vst [vmem:[#allocation57_spill] sm:$0xff] %v13783_v18  ;;  %v13789_v56 = vpop.f32.mrb[19].mxu0  ;;  %v13791_v40 = vpop.f32.mrb[19].mxu1  ;;  %v12243_v34 = vld [vmem:[#allocation5 + $0x80] ss:$48 sps:$4 sm:$0xff]  }
 0x262   : > { %17230 = vst [vmem:[#allocation58_spill] sm:$0xff] %v13789_v56  ;;  %17231 = vst [vmem:[#allocation59_spill] sm:$0xff] %v13791_v40  ;;  %v12240_v40 = vld [vmem:[#allocation5 + $0x88] ss:$48 sps:$4 sm:$0xff]  }
 0x263   : > { %3285 = vmatmul.mubr.bf16.gmra.mrb[124].mxu0 %v13483_v19  ;;  %3671 = vmatmul.mubr.bf16.gmra.mrb[124].mxu1 %v13483_v19  ;;  %v12245_v19 = vld [vmem:[#allocation5 + $0x84] ss:$48 sps:$4 sm:$0xff]  }
 0x264   : > { %3327 = vmatprep.mubr.bf16.mxu0 %v17232_v41  ;;  %3713 = vmatprep.mubr.bf16.mxu1 %v17232_v41 }
 0x266   : > { %v13801_v61 = vpop.f32.mrb[20].mxu0  ;;  %v13803_v28 = vpop.f32.mrb[20].mxu1 }
 0x267   : > { %17233 = vst [vmem:[#allocation60_spill] sm:$0xff] %v13801_v61  ;;  %17234 = vst [vmem:[#allocation61_spill] sm:$0xff] %v13803_v28  ;;  %v13805_v20 = vpop.f32.mrb[21].mxu0  ;;  %v13807_v18 = vpop.f32.mrb[21].mxu1  ;;  %v12248_v28 = vld [vmem:[#allocation5 + $0xec] ss:$48 sps:$4 sm:$0xff]  }
 0x268   : > { %17235 = vst [vmem:[#allocation62_spill] sm:$0xff] %v13805_v20  ;;  %17236 = vst [vmem:[#allocation63_spill] sm:$0xff] %v13807_v18  ;;  %v13809_v21 = vpop.f32.mrb[22].mxu0  ;;  %v13811_v47 = vpop.f32.mrb[22].mxu1 }
 0x269   : > { %17237 = vst [vmem:[#allocation64_spill] sm:$0xff] %v13809_v21  ;;  %17238 = vst [vmem:[#allocation65_spill] sm:$0xff] %v13811_v47  ;;  %v13817_v6 = vpop.f32.mrb[23].mxu0  ;;  %v13819_v56 = vpop.f32.mrb[23].mxu1  ;;  %v12251_v47 = vld [vmem:[#allocation5 + $0xe4] ss:$48 sps:$4 sm:$0xff]  }
 0x26a   : > { %17239 = vst [vmem:[#allocation66_spill] sm:$0xff] %v13817_v6  ;;  %17240 = vst [vmem:[#allocation67_spill] sm:$0xff] %v13819_v56  ;;  %v12249_v6 = vld [vmem:[#allocation5 + $0xe0] ss:$48 sps:$4 sm:$0xff]  }
 0x26b   : > { %3328 = vmatmul.mubr.bf16.vlgmr.msra.gmra.mrb[64].mxu0 %v13491_v29  ;;  %3714 = vmatmul.mubr.bf16.vlgmr.msra.gmra.mrb[64].mxu1 %v13491_v29  ;;  %v12263_v29 = vld [vmem:[#allocation5 + $0x1a4] ss:$48 sps:$4 sm:$0xff]  }
 0x26c   : > { %4261 = vmatpush1.bf16.msra.mxu1 %v12234_v62  ;;  %3875 = vmatpush1.bf16.msra.mxu0 %v12237_v27 }
 0x26d   : > { %3337 = vmatprep.mubr.bf16.mxu0 %v17232_v41  ;;  %3723 = vmatprep.mubr.bf16.mxu1 %v17232_v41 }
 0x26e   : > { %v13829_v57 = vpop.f32.mrb[24].mxu0  ;;  %v13831_v61 = vpop.f32.mrb[24].mxu1  ;;  %4262 = vmatprep.subr.bf16.mxu1 %v12242_v7  ;;  %3876 = vmatprep.subr.bf16.mxu0 %v12245_v19  ;;  %v12246_v19 = vld [vmem:[#allocation5 + $0xe8] ss:$48 sps:$4 sm:$0xff]  }
 0x26f   : > { %17241 = vst [vmem:[#allocation68_spill] sm:$0xff] %v13829_v57  ;;  %17242 = vst [vmem:[#allocation69_spill] sm:$0xff] %v13831_v61  ;;  %v13833_v48 = vpop.f32.mrb[25].mxu0  ;;  %v13835_v18 = vpop.f32.mrb[25].mxu1 }
 0x270   : > { %17243 = vst [vmem:[#allocation70_spill] sm:$0xff] %v13833_v48  ;;  %17244 = vst [vmem:[#allocation71_spill] sm:$0xff] %v13835_v18  ;;  %v13837_v62 = vpop.f32.mrb[26].mxu0  ;;  %v13839_v27 = vpop.f32.mrb[26].mxu1  ;;  %4263 = vmatpush1.bf16.msra.mxu1 %v12240_v40  ;;  %3877 = vmatpush1.bf16.msra.mxu0 %v12243_v34  ;;  %v12254_v40 = vld [vmem:[#allocation5 + $0x14c] ss:$48 sps:$4 sm:$0xff]  }
 0x271   : > { %17245 = vst [vmem:[#allocation72_spill] sm:$0xff] %v13837_v62  ;;  %17246 = vst [vmem:[#allocation73_spill] sm:$0xff] %v13839_v27  ;;  %v13845_v20 = vpop.f32.mrb[27].mxu0  ;;  %v13847_v7 = vpop.f32.mrb[27].mxu1  ;;  %4264 = vmatprep.subr.bf16.mxu1 %v12248_v28  ;;  %3878 = vmatprep.subr.bf16.mxu0 %v12251_v47  ;;  %v12252_v28 = vld [vmem:[#allocation5 + $0x148] ss:$48 sps:$4 sm:$0xff]  }
 0x272   : > { %17247 = vst [vmem:[#allocation74_spill] sm:$0xff] %v13845_v20  ;;  %17248 = vst [vmem:[#allocation75_spill] sm:$0xff] %v13847_v7  ;;  %v12255_v47 = vld [vmem:[#allocation5 + $0x140] ss:$48 sps:$4 sm:$0xff]   ;;  %v12260_v34 = vld [vmem:[#allocation5 + $0x1ac] ss:$48 sps:$4 sm:$0xff]  }
 0x273   : > { %3338 = vmatmul.mubr.bf16.gmra.mrb[68].mxu0 %v13499_v46  ;;  %3724 = vmatmul.mubr.bf16.gmra.mrb[68].mxu1 %v13499_v46  ;;  %v12261_v62 = vld [vmem:[#allocation5 + $0x1a0] ss:$48 sps:$4 sm:$0xff]  }
 0x274   : > { %3347 = vmatprep.mubr.bf16.mxu0 %v17232_v41  ;;  %3733 = vmatprep.mubr.bf16.mxu1 %v17232_v41 }
 0x275   : > { %4265 = vmatpush1.bf16.msra.mxu1 %v12246_v19  ;;  %3879 = vmatpush1.bf16.msra.mxu0 %v12249_v6  ;;  %v12266_v6 = vld [vmem:[#allocation5 + $0x20c] ss:$48 sps:$4 sm:$0xff]  }
 0x276   : > { %v13857_v21 = vpop.f32.mrb[28].mxu0  ;;  %v13859_v56 = vpop.f32.mrb[28].mxu1  ;;  %4266 = vmatprep.subr.bf16.mxu1 %v12254_v40  ;;  %3880 = vmatprep.subr.bf16.mxu0 %v12257_v14  ;;  %v12258_v14 = vld [vmem:[#allocation5 + $0x1a8] ss:$48 sps:$4 sm:$0xff]  }
 0x277   : > { %17249 = vst [vmem:[#allocation76_spill] sm:$0xff] %v13857_v21  ;;  %17250 = vst [vmem:[#allocation77_spill] sm:$0xff] %v13859_v56  ;;  %v13861_v61 = vpop.f32.mrb[29].mxu0  ;;  %v13863_v27 = vpop.f32.mrb[29].mxu1  ;;  %v12269_v21 = vld [vmem:[#allocation5 + $0x204] ss:$48 sps:$4 sm:$0xff]  }
 0x278   : > { %17251 = vst [vmem:[#allocation78_spill] sm:$0xff] %v13861_v61  ;;  %17252 = vst [vmem:[#allocation79_spill] sm:$0xff] %v13863_v27  ;;  %v13865_v18 = vpop.f32.mrb[30].mxu0  ;;  %v13867_v7 = vpop.f32.mrb[30].mxu1 }
 0x279   : > { %17253 = vst [vmem:[#allocation80_spill] sm:$0xff] %v13865_v18  ;;  %17254 = vst [vmem:[#allocation81_spill] sm:$0xff] %v13867_v7  ;;  %v13873_v57 = vpop.f32.mrb[31].mxu0  ;;  %v13875_v40 = vpop.f32.mrb[31].mxu1  ;;  %4267 = vmatpush1.bf16.msra.mxu1 %v12252_v28  ;;  %3881 = vmatpush1.bf16.msra.mxu0 %v12255_v47  ;;  %v12264_v28 = vld [vmem:[#allocation5 + $0x208] ss:$48 sps:$4 sm:$0xff]  }
 0x27a   : > { %17255 = vst [vmem:[#allocation82_spill] sm:$0xff] %v13873_v57  ;;  %17256 = vst [vmem:[#allocation83_spill] sm:$0xff] %v13875_v40  ;;  %4268 = vmatprep.subr.bf16.mxu1 %v12260_v34  ;;  %3882 = vmatprep.subr.bf16.mxu0 %v12263_v29  ;;  %v12267_v47 = vld [vmem:[#allocation5 + $0x200] ss:$48 sps:$4 sm:$0xff]   ;;  %v12272_v29 = vld [vmem:[#allocation5 + $0x26c] ss:$48 sps:$4 sm:$0xff]  }
 0x27b   : > { %3348 = vmatmul.mubr.bf16.gmra.mrb[72].mxu0 %v13507_v0  ;;  %3734 = vmatmul.mubr.bf16.gmra.mrb[72].mxu1 %v13507_v0  ;;  %v12275_v34 = vld [vmem:[#allocation5 + $0x264] ss:$48 sps:$4 sm:$0xff]   ;;  %v12273_v18 = vld [vmem:[#allocation5 + $0x260] ss:$48 sps:$4 sm:$0xff]  }
 0x27c   : > { %3357 = vmatprep.mubr.bf16.mxu0 %v17232_v41  ;;  %3743 = vmatprep.mubr.bf16.mxu1 %v17232_v41 }
 0x27d   : > { %4269 = vmatpush1.bf16.msra.mxu1 %v12258_v14  ;;  %3883 = vmatpush1.bf16.msra.mxu0 %v12261_v62  ;;  %v12278_v62 = vld [vmem:[#allocation5 + $0x2cc] ss:$48 sps:$4 sm:$0xff]  }
 0x27e   : > { %v13885_v19 = vpop.f32.mrb[32].mxu0  ;;  %v13887_v48 = vpop.f32.mrb[32].mxu1  ;;  %4270 = vmatprep.subr.bf16.mxu1 %v12266_v6  ;;  %3884 = vmatprep.subr.bf16.mxu0 %v12269_v21  ;;  %v12270_v21 = vld [vmem:[#allocation5 + $0x268] ss:$48 sps:$4 sm:$0xff]  }
 0x27f   : > { %17257 = vst [vmem:[#allocation84_spill] sm:$0xff] %v13885_v19  ;;  %17258 = vst [vmem:[#allocation85_spill] sm:$0xff] %v13887_v48  ;;  %v13889_v20 = vpop.f32.mrb[33].mxu0  ;;  %v13891_v56 = vpop.f32.mrb[33].mxu1  ;;  %v12281_v19 = vld [vmem:[#allocation5 + $0x2c4] ss:$48 sps:$4 sm:$0xff]  }
 0x280   : > { %17259 = vst [vmem:[#allocation86_spill] sm:$0xff] %v13889_v20  ;;  %17260 = vst [vmem:[#allocation87_spill] sm:$0xff] %v13891_v56  ;;  %v13893_v7 = vpop.f32.mrb[34].mxu0  ;;  %v13895_v27 = vpop.f32.mrb[34].mxu1 }
 0x281   : > { %17261 = vst [vmem:[#allocation88_spill] sm:$0xff] %v13893_v7  ;;  %17262 = vst [vmem:[#allocation89_spill] sm:$0xff] %v13895_v27  ;;  %v13901_v40 = vpop.f32.mrb[35].mxu0  ;;  %v13903_v6 = vpop.f32.mrb[35].mxu1  ;;  %4271 = vmatpush1.bf16.msra.mxu1 %v12264_v28  ;;  %3885 = vmatpush1.bf16.msra.mxu0 %v12267_v47  ;;  %v12276_v28 = vld [vmem:[#allocation5 + $0x2c8] ss:$48 sps:$4 sm:$0xff]  }
 0x282   : > { %17263 = vst [vmem:[#allocation90_spill] sm:$0xff] %v13901_v40  ;;  %17264 = vst [vmem:[#allocation91_spill] sm:$0xff] %v13903_v6  ;;  %4272 = vmatprep.subr.bf16.mxu1 %v12272_v29  ;;  %3886 = vmatprep.subr.bf16.mxu0 %v12275_v34  ;;  %v12279_v47 = vld [vmem:[#allocation5 + $0x2c0] ss:$48 sps:$4 sm:$0xff]   ;;  %v12284_v29 = vld [vmem:[#allocation5 + $0x32c] ss:$48 sps:$4 sm:$0xff]  }
 0x283   : > { %3358 = vmatmul.mubr.bf16.gmra.mrb[76].mxu0 %v13515_v32  ;;  %3744 = vmatmul.mubr.bf16.gmra.mrb[76].mxu1 %v13515_v32  ;;  %v12287_v34 = vld [vmem:[#allocation5 + $0x324] ss:$48 sps:$4 sm:$0xff]   ;;  %v12285_v7 = vld [vmem:[#allocation5 + $0x320] ss:$48 sps:$4 sm:$0xff]  }
 0x284   : > { %3367 = vmatprep.mubr.bf16.mxu0 %v17232_v41  ;;  %3753 = vmatprep.mubr.bf16.mxu1 %v17232_v41 }
 0x285   : > { %4273 = vmatpush1.bf16.msra.mxu1 %v12270_v21  ;;  %3887 = vmatpush1.bf16.msra.mxu0 %v12273_v18  ;;  %v12290_v18 = vld [vmem:[#allocation5 + $0x38c] ss:$48 sps:$4 sm:$0xff]  }
 0x286   : > { %v13913_v14 = vpop.f32.mrb[36].mxu0  ;;  %v13915_v61 = vpop.f32.mrb[36].mxu1  ;;  %4274 = vmatprep.subr.bf16.mxu1 %v12278_v62  ;;  %3888 = vmatprep.subr.bf16.mxu0 %v12281_v19  ;;  %v12282_v19 = vld [vmem:[#allocation5 + $0x328] ss:$48 sps:$4 sm:$0xff]  }
 0x287   : > { %17265 = vst [vmem:[#allocation92_spill] sm:$0xff] %v13913_v14  ;;  %17266 = vst [vmem:[#allocation93_spill] sm:$0xff] %v13915_v61  ;;  %v13917_v57 = vpop.f32.mrb[37].mxu0  ;;  %v13919_v48 = vpop.f32.mrb[37].mxu1  ;;  %v12293_v14 = vld [vmem:[#allocation5 + $0x384] ss:$48 sps:$4 sm:$0xff]  }
 0x288   : > { %17267 = vst [vmem:[#allocation94_spill] sm:$0xff] %v13917_v57  ;;  %17268 = vst [vmem:[#allocation95_spill] sm:$0xff] %v13919_v48  ;;  %v13921_v27 = vpop.f32.mrb[38].mxu0  ;;  %v13923_v56 = vpop.f32.mrb[38].mxu1 }
 0x289   : > { %17269 = vst [vmem:[#allocation96_spill] sm:$0xff] %v13921_v27  ;;  %17270 = vst [vmem:[#allocation97_spill] sm:$0xff] %v13923_v56  ;;  %v13929_v6 = vpop.f32.mrb[39].mxu0  ;;  %v13931_v62 = vpop.f32.mrb[39].mxu1  ;;  %4275 = vmatpush1.bf16.msra.mxu1 %v12276_v28  ;;  %3889 = vmatpush1.bf16.msra.mxu0 %v12279_v47  ;;  %v12288_v28 = vld [vmem:[#allocation5 + $0x388] ss:$48 sps:$4 sm:$0xff]  }
 0x28a   : > { %17271 = vst [vmem:[#allocation98_spill] sm:$0xff] %v13929_v6  ;;  %17272 = vst [vmem:[#allocation99_spill] sm:$0xff] %v13931_v62  ;;  %4276 = vmatprep.subr.bf16.mxu1 %v12284_v29  ;;  %3890 = vmatprep.subr.bf16.mxu0 %v12287_v34  ;;  %v12291_v47 = vld [vmem:[#allocation5 + $0x380] ss:$48 sps:$4 sm:$0xff]   ;;  %v12296_v29 = vld [vmem:[#allocation5 + $0x3ec] ss:$48 sps:$4 sm:$0xff]  }
 0x28b   : > { %3368 = vmatmul.mubr.bf16.gmra.mrb[80].mxu0 %v13523_v55  ;;  %3754 = vmatmul.mubr.bf16.gmra.mrb[80].mxu1 %v13523_v55  ;;  %v12299_v34 = vld [vmem:[#allocation5 + $0x3e4] ss:$48 sps:$4 sm:$0xff]   ;;  %v12297_v27 = vld [vmem:[#allocation5 + $0x3e0] ss:$48 sps:$4 sm:$0xff]  }
 0x28c   : > { %3377 = vmatprep.mubr.bf16.mxu0 %v17232_v41  ;;  %3763 = vmatprep.mubr.bf16.mxu1 %v17232_v41 }
 0x28d   : > { %4277 = vmatpush1.bf16.msra.mxu1 %v12282_v19  ;;  %3891 = vmatpush1.bf16.msra.mxu0 %v12285_v7  ;;  %v12302_v7 = vld [vmem:[#allocation5 + $0x44c] ss:$48 sps:$4 sm:$0xff]  }
 0x28e   : > { %v13941_v21 = vpop.f32.mrb[40].mxu0  ;;  %v13943_v20 = vpop.f32.mrb[40].mxu1  ;;  %4278 = vmatprep.subr.bf16.mxu1 %v12290_v18  ;;  %3892 = vmatprep.subr.bf16.mxu0 %v12293_v14  ;;  %v12294_v14 = vld [vmem:[#allocation5 + $0x3e8] ss:$48 sps:$4 sm:$0xff]  }
 0x28f   : > { %17273 = vst [vmem:[#allocation100_spill] sm:$0xff] %v13941_v21  ;;  %17274 = vst [vmem:[#allocation101_spill] sm:$0xff] %v13943_v20  ;;  %v13945_v40 = vpop.f32.mrb[41].mxu0  ;;  %v13947_v61 = vpop.f32.mrb[41].mxu1  ;;  %v12305_v21 = vld [vmem:[#allocation5 + $0x444] ss:$48 sps:$4 sm:$0xff]  }
 0x290   : > { %17275 = vst [vmem:[#allocation102_spill] sm:$0xff] %v13945_v40  ;;  %17276 = vst [vmem:[#allocation103_spill] sm:$0xff] %v13947_v61  ;;  %v13949_v56 = vpop.f32.mrb[42].mxu0  ;;  %v13951_v48 = vpop.f32.mrb[42].mxu1 }
 0x291   : > { %17277 = vst [vmem:[#allocation104_spill] sm:$0xff] %v13949_v56  ;;  %17278 = vst [vmem:[#allocation105_spill] sm:$0xff] %v13951_v48  ;;  %v13957_v62 = vpop.f32.mrb[43].mxu0  ;;  %v13959_v18 = vpop.f32.mrb[43].mxu1  ;;  %4279 = vmatpush1.bf16.msra.mxu1 %v12288_v28  ;;  %3893 = vmatpush1.bf16.msra.mxu0 %v12291_v47  ;;  %v12300_v28 = vld [vmem:[#allocation5 + $0x448] ss:$48 sps:$4 sm:$0xff]  }
 0x292   : > { %17279 = vst [vmem:[#allocation106_spill] sm:$0xff] %v13957_v62  ;;  %17280 = vst [vmem:[#allocation107_spill] sm:$0xff] %v13959_v18  ;;  %4280 = vmatprep.subr.bf16.mxu1 %v12296_v29  ;;  %3894 = vmatprep.subr.bf16.mxu0 %v12299_v34  ;;  %v12303_v47 = vld [vmem:[#allocation5 + $0x440] ss:$48 sps:$4 sm:$0xff]   ;;  %v12308_v29 = vld [vmem:[#allocation5 + $0x4ac] ss:$48 sps:$4 sm:$0xff]  }
 0x293   : > { %3378 = vmatmul.mubr.bf16.gmra.mrb[84].mxu0 %v13531_v15  ;;  %3764 = vmatmul.mubr.bf16.gmra.mrb[84].mxu1 %v13531_v15  ;;  %v12311_v34 = vld [vmem:[#allocation5 + $0x4a4] ss:$48 sps:$4 sm:$0xff]   ;;  %v12309_v56 = vld [vmem:[#allocation5 + $0x4a0] ss:$48 sps:$4 sm:$0xff]  }
 0x294   : > { %3387 = vmatprep.mubr.bf16.mxu0 %v17232_v41  ;;  %3773 = vmatprep.mubr.bf16.mxu1 %v17232_v41 }
 0x295   : > { %4281 = vmatpush1.bf16.msra.mxu1 %v12294_v14  ;;  %3895 = vmatpush1.bf16.msra.mxu0 %v12297_v27  ;;  %v12314_v27 = vld [vmem:[#allocation5 + $0x50c] ss:$48 sps:$4 sm:$0xff]  }
 0x296   : > { %v13969_v19 = vpop.f32.mrb[44].mxu0  ;;  %v13971_v57 = vpop.f32.mrb[44].mxu1  ;;  %4282 = vmatprep.subr.bf16.mxu1 %v12302_v7  ;;  %3896 = vmatprep.subr.bf16.mxu0 %v12305_v21  ;;  %v12306_v21 = vld [vmem:[#allocation5 + $0x4a8] ss:$48 sps:$4 sm:$0xff]  }
 0x297   : > { %17281 = vst [vmem:[#allocation108_spill] sm:$0xff] %v13969_v19  ;;  %17282 = vst [vmem:[#allocation109_spill] sm:$0xff] %v13971_v57  ;;  %v13973_v6 = vpop.f32.mrb[45].mxu0  ;;  %v13975_v20 = vpop.f32.mrb[45].mxu1  ;;  %v12317_v19 = vld [vmem:[#allocation5 + $0x504] ss:$48 sps:$4 sm:$0xff]  }
 0x298   : > { %17283 = vst [vmem:[#allocation110_spill] sm:$0xff] %v13973_v6  ;;  %17284 = vst [vmem:[#allocation111_spill] sm:$0xff] %v13975_v20  ;;  %v13977_v48 = vpop.f32.mrb[46].mxu0  ;;  %v13979_v61 = vpop.f32.mrb[46].mxu1 }
 0x299   : > { %17285 = vst [vmem:[#allocation112_spill] sm:$0xff] %v13977_v48  ;;  %17286 = vst [vmem:[#allocation113_spill] sm:$0xff] %v13979_v61  ;;  %v13985_v18 = vpop.f32.mrb[47].mxu0  ;;  %v13987_v7 = vpop.f32.mrb[47].mxu1  ;;  %4283 = vmatpush1.bf16.msra.mxu1 %v12300_v28  ;;  %3897 = vmatpush1.bf16.msra.mxu0 %v12303_v47  ;;  %v12312_v28 = vld [vmem:[#allocation5 + $0x508] ss:$48 sps:$4 sm:$0xff]  }
 0x29a   : > { %17287 = vst [vmem:[#allocation114_spill] sm:$0xff] %v13985_v18  ;;  %17288 = vst [vmem:[#allocation115_spill] sm:$0xff] %v13987_v7  ;;  %4284 = vmatprep.subr.bf16.mxu1 %v12308_v29  ;;  %3898 = vmatprep.subr.bf16.mxu0 %v12311_v34  ;;  %v12315_v47 = vld [vmem:[#allocation5 + $0x500] ss:$48 sps:$4 sm:$0xff]   ;;  %v12320_v29 = vld [vmem:[#allocation5 + $0x56c] ss:$48 sps:$4 sm:$0xff]  }
 0x29b   : > { %3388 = vmatmul.mubr.bf16.gmra.mrb[88].mxu0 %v13539_v42  ;;  %3774 = vmatmul.mubr.bf16.gmra.mrb[88].mxu1 %v13539_v42  ;;  %v12323_v34 = vld [vmem:[#allocation5 + $0x564] ss:$48 sps:$4 sm:$0xff]   ;;  %v12321_v48 = vld [vmem:[#allocation5 + $0x560] ss:$48 sps:$4 sm:$0xff]  }
 0x29c   : > { %3397 = vmatprep.mubr.bf16.mxu0 %v17232_v41  ;;  %3783 = vmatprep.mubr.bf16.mxu1 %v17232_v41 }
 0x29d   : > { %4285 = vmatpush1.bf16.msra.mxu1 %v12306_v21  ;;  %3899 = vmatpush1.bf16.msra.mxu0 %v12309_v56  ;;  %v12326_v56 = vld [vmem:[#allocation5 + $0x5cc] ss:$48 sps:$4 sm:$0xff]  }
 0x29e   : > { %v13997_v14 = vpop.f32.mrb[48].mxu0  ;;  %v13999_v40 = vpop.f32.mrb[48].mxu1  ;;  %4286 = vmatprep.subr.bf16.mxu1 %v12314_v27  ;;  %3900 = vmatprep.subr.bf16.mxu0 %v12317_v19  ;;  %v12318_v19 = vld [vmem:[#allocation5 + $0x568] ss:$48 sps:$4 sm:$0xff]  }
 0x29f   : > { %17289 = vst [vmem:[#allocation116_spill] sm:$0xff] %v13997_v14  ;;  %17290 = vst [vmem:[#allocation117_spill] sm:$0xff] %v13999_v40  ;;  %v14001_v62 = vpop.f32.mrb[49].mxu0  ;;  %v14003_v57 = vpop.f32.mrb[49].mxu1  ;;  %v12329_v14 = vld [vmem:[#allocation5 + $0x5c4] ss:$48 sps:$4 sm:$0xff]  }
 0x2a0   : > { %17291 = vst [vmem:[#allocation118_spill] sm:$0xff] %v14003_v57  ;;  %v14005_v61 = vpop.f32.mrb[50].mxu0  ;;  %v14007_v20 = vpop.f32.mrb[50].mxu1 }
 0x2a1   : > { %17292 = vst [vmem:[#allocation119_spill] sm:$0xff] %v14005_v61  ;;  %17293 = vst [vmem:[#allocation120_spill] sm:$0xff] %v14007_v20  ;;  %v14013_v7 = vpop.f32.mrb[51].mxu0  ;;  %v14015_v27 = vpop.f32.mrb[51].mxu1  ;;  %4287 = vmatpush1.bf16.msra.mxu1 %v12312_v28  ;;  %3901 = vmatpush1.bf16.msra.mxu0 %v12315_v47  ;;  %v12324_v28 = vld [vmem:[#allocation5 + $0x5c8] ss:$48 sps:$4 sm:$0xff]  }
 0x2a2   : > { %17294 = vst [vmem:[#allocation121_spill] sm:$0xff] %v14015_v27  ;;  %4288 = vmatprep.subr.bf16.mxu1 %v12320_v29  ;;  %3902 = vmatprep.subr.bf16.mxu0 %v12323_v34  ;;  %v12327_v47 = vld [vmem:[#allocation5 + $0x5c0] ss:$48 sps:$4 sm:$0xff]   ;;  %v12332_v29 = vld [vmem:[#allocation5 + $0x62c] ss:$48 sps:$4 sm:$0xff]  }
 0x2a3   : > { %3398 = vmatmul.mubr.bf16.gmra.mrb[92].mxu0 %v13547_v5  ;;  %3784 = vmatmul.mubr.bf16.gmra.mrb[92].mxu1 %v13547_v5  ;;  %v12335_v34 = vld [vmem:[#allocation5 + $0x624] ss:$48 sps:$4 sm:$0xff]  }
 0x2a4   : > { %3407 = vmatprep.mubr.bf16.mxu0 %v17232_v41  ;;  %3793 = vmatprep.mubr.bf16.mxu1 %v17232_v41 }
 0x2a5   : > { %4289 = vmatpush1.bf16.msra.mxu1 %v12318_v19  ;;  %3903 = vmatpush1.bf16.msra.mxu0 %v12321_v48 }
 0x2a6   : > { %v14025_v21 = vpop.f32.mrb[52].mxu0  ;;  %v14027_v6 = vpop.f32.mrb[52].mxu1  ;;  %4290 = vmatprep.subr.bf16.mxu1 %v12326_v56  ;;  %3904 = vmatprep.subr.bf16.mxu0 %v12329_v14 }
 0x2a7   : > { %17295 = vst [vmem:[#allocation122_spill] sm:$0xff] %v14027_v6  ;;  %v14029_v18 = vpop.f32.mrb[53].mxu0  ;;  %v14031_v40 = vpop.f32.mrb[53].mxu1 }
 0x2a8   : > { %17296 = vst [vmem:[#allocation123_spill] sm:$0xff] %v14031_v40  ;;  %v14033_v20 = vpop.f32.mrb[54].mxu0  ;;  %v14035_v57 = vpop.f32.mrb[54].mxu1 }
 0x2a9   : > { %17297 = vst [vmem:[#allocation124_spill] sm:$0xff] %v14035_v57  ;;  %v14041_v27 = vpop.f32.mrb[55].mxu0  ;;  %v14043_v56 = vpop.f32.mrb[55].mxu1  ;;  %4291 = vmatpush1.bf16.msra.mxu1 %v12324_v28  ;;  %3905 = vmatpush1.bf16.msra.mxu0 %v12327_v47 }
 0x2aa   : > { %17298 = vst [vmem:[#allocation125_spill] sm:$0xff] %v14043_v56  ;;  %4453 = vmatprep.subr.bf16.mxu1 %v12332_v29  ;;  %4067 = vmatprep.subr.bf16.mxu0 %v12335_v34  ;;  %v12338_v56 = vld [vmem:[#allocation5 + $0x68c] ss:$48 sps:$4 sm:$0xff]  }
 0x2ab   : > { %3408 = vmatmul.mubr.bf16.gmra.mrb[96].mxu0 %v13555_v35  ;;  %3794 = vmatmul.mubr.bf16.gmra.mrb[96].mxu1 %v13555_v35 }
 0x2ac   : > { %3417 = vmatprep.mubr.bf16.mxu0 %v17232_v41  ;;  %3803 = vmatprep.mubr.bf16.mxu1 %v17232_v41 }
 0x2ae   : > { %v14053_v19 = vpop.f32.mrb[56].mxu0  ;;  %v14055_v28 = vpop.f32.mrb[56].mxu1 }
 0x2af   : > { %17299 = vst [vmem:[#allocation126_spill] sm:$0xff] %v14053_v19  ;;  %17300 = vst [vmem:[#allocation127_spill] sm:$0xff] %v14055_v28  ;;  %v14057_v47 = vpop.f32.mrb[57].mxu0  ;;  %v14059_v48 = vpop.f32.mrb[57].mxu1 }
 0x2b0   : > { %17301 = vst [vmem:[#allocation128_spill] sm:$0xff] %v14057_v47  ;;  %17302 = vst [vmem:[#allocation129_spill] sm:$0xff] %v14059_v48  ;;  %v14061_v14 = vpop.f32.mrb[58].mxu0  ;;  %v14063_v29 = vpop.f32.mrb[58].mxu1  ;;  %v12330_v48 = vld [vmem:[#allocation5 + $0x628] ss:$48 sps:$4 sm:$0xff]  }
 0x2b1   : > { %17303 = vst [vmem:[#allocation130_spill] sm:$0xff] %v14061_v14  ;;  %17304 = vst [vmem:[#allocation131_spill] sm:$0xff] %v14063_v29  ;;  %v14069_v6 = vpop.f32.mrb[59].mxu0  ;;  %v14071_v57 = vpop.f32.mrb[59].mxu1  ;;  %v12341_v47 = vld [vmem:[#allocation5 + $0x684] ss:$48 sps:$4 sm:$0xff]  }
 0x2b2   : > { %17305 = vst [vmem:[#allocation132_spill] sm:$0xff] %v14069_v6  ;;  %17306 = vst [vmem:[#allocation133_spill] sm:$0xff] %v14071_v57  ;;  %v12333_v6 = vld [vmem:[#allocation5 + $0x620] ss:$48 sps:$4 sm:$0xff]  }
 0x2b3   : > { %3418 = vmatmul.mubr.bf16.gmra.mrb[100].mxu0 %v13563_v43  ;;  %3804 = vmatmul.mubr.bf16.gmra.mrb[100].mxu1 %v13563_v43 }
 0x2b4   : > { %3427 = vmatprep.mubr.bf16.mxu0 %v17232_v41  ;;  %3813 = vmatprep.mubr.bf16.mxu1 %v17232_v41 }
 0x2b6   : > { %v14081_v34 = vpop.f32.mrb[60].mxu0  ;;  %v14083_v61 = vpop.f32.mrb[60].mxu1 }
 0x2b7   : > { %17307 = vst [vmem:[#allocation134_spill] sm:$0xff] %v14081_v34  ;;  %17308 = vst [vmem:[#allocation135_spill] sm:$0xff] %v14083_v61  ;;  %v14085_v28 = vpop.f32.mrb[61].mxu0  ;;  %v14087_v29 = vpop.f32.mrb[61].mxu1  ;;  %v12336_v61 = vld [vmem:[#allocation5 + $0x688] ss:$48 sps:$4 sm:$0xff]  }
 0x2b8   : > { %17309 = vst [vmem:[#allocation136_spill] sm:$0xff] %v14087_v29  ;;  %v14089_v40 = vpop.f32.mrb[62].mxu0  ;;  %v14091_v19 = vpop.f32.mrb[62].mxu1  ;;  %v12344_v29 = vld [vmem:[#allocation5 + $0x6ec] ss:$48 sps:$4 sm:$0xff]  }
 0x2b9   : > { %17310 = vst [vmem:[#allocation137_spill] sm:$0xff] %v14089_v40  ;;  %17311 = vst [vmem:[#allocation138_spill] sm:$0xff] %v14091_v19  ;;  %v14097_v57 = vpop.f32.mrb[63].mxu0  ;;  %v14099_v14 = vpop.f32.mrb[63].mxu1  ;;  %v12339_v19 = vld [vmem:[#allocation5 + $0x680] ss:$48 sps:$4 sm:$0xff]  }
 0x2ba   : > { %17312 = vst [vmem:[#allocation139_spill] sm:$0xff] %v14099_v14  ;;  %v12347_v14 = vld [vmem:[#allocation5 + $0x6e4] ss:$48 sps:$4 sm:$0xff]   ;;  %v12345_v34 = vld [vmem:[#allocation5 + $0x6e0] ss:$48 sps:$4 sm:$0xff]  }
 0x2bb   : > { %3428 = vmatmul.mubr.bf16.gmra.mrb[104].mxu0 %v13571_v49  ;;  %3814 = vmatmul.mubr.bf16.gmra.mrb[104].mxu1 %v13571_v49  ;;  %v12350_v40 = vld [vmem:[#allocation5 + $0x74c] ss:$48 sps:$4 sm:$0xff]  }
 0x2bc   : > { %3437 = vmatprep.mubr.bf16.mxu0 %v17232_v41  ;;  %3823 = vmatprep.mubr.bf16.mxu1 %v17232_v41 }
 0x2c3   : > { %3438 = vmatmul.mubr.bf16.gmra.mrb[108].mxu0 %v13579_v58  ;;  %3824 = vmatmul.mubr.bf16.gmra.mrb[108].mxu1 %v13579_v58 }
 0x2c4   : > { %3447 = vmatprep.mubr.bf16.mxu0 %v17232_v41  ;;  %3833 = vmatprep.mubr.bf16.mxu1 %v17232_v41 }
 0x2cb   : > { %3448 = vmatmul.mubr.bf16.gmra.mrb[112].mxu0 %v13587_v63  ;;  %3834 = vmatmul.mubr.bf16.gmra.mrb[112].mxu1 %v13587_v63 }
 0x2cc   : > { %3457 = vmatprep.mubr.bf16.mxu0 %v17232_v41  ;;  %3843 = vmatprep.mubr.bf16.mxu1 %v17232_v41 }
 0x2d3   : > { %3458 = vmatmul.mubr.bf16.gmra.mrb[116].mxu0 %v13595_v11  ;;  %3844 = vmatmul.mubr.bf16.gmra.mrb[116].mxu1 %v13595_v11 }
 0x2d4   : > { %3467 = vmatprep.mubr.bf16.mxu0 %v17232_v41  ;;  %3853 = vmatprep.mubr.bf16.mxu1 %v17232_v41 }
 0x2db   : > { %3468 = vmatmul.mubr.bf16.gmra.mrb[120].mxu0 %v13603_v26  ;;  %3854 = vmatmul.mubr.bf16.gmra.mrb[120].mxu1 %v13603_v26 }
 0x2dc   : > { %3477 = vmatprep.mubr.bf16.mxu0 %v17232_v41  ;;  %3863 = vmatprep.mubr.bf16.mxu1 %v17232_v41 }
 0x2e3   : > { %3478 = vmatmul.mubr.bf16.gmra.mrb[124].mxu0 %v13611_v33  ;;  %3864 = vmatmul.mubr.bf16.gmra.mrb[124].mxu1 %v13611_v33 }
 0x2e4   : > { %3906 = vmatprep.mubr.bf16.mxu0 %v13297_v51  ;;  %4292 = vmatprep.mubr.bf16.mxu1 %v13297_v51  ;;  %v12342_v51 = vld [vmem:[#allocation5 + $0x6e8] ss:$48 sps:$4 sm:$0xff]  }
 0x2eb   : > { %3907 = vmatmul.mubr.bf16.vlgmr.msra.gmra.mrb[128].mxu0 %v13305_v9  ;;  %4293 = vmatmul.mubr.bf16.vlgmr.msra.gmra.mrb[128].mxu1 %v13305_v9  ;;  %v12353_v9 = vld [vmem:[#allocation5 + $0x744] ss:$48 sps:$4 sm:$0xff]  }
 0x2ec   : > { %4454 = vmatpush1.bf16.msra.mxu1 %v12330_v48  ;;  %4068 = vmatpush1.bf16.msra.mxu0 %v12333_v6  ;;  %v12351_v6 = vld [vmem:[#allocation5 + $0x740] ss:$48 sps:$4 sm:$0xff]   ;;  %v12359_v48 = vld [vmem:[#allocation5 + $0x7a4] ss:$48 sps:$4 sm:$0xff]  }
 0x2ed   : > { %3916 = vmatprep.mubr.bf16.mxu0 %v13307_v12  ;;  %4302 = vmatprep.mubr.bf16.mxu1 %v13307_v12  ;;  %v12348_v12 = vld [vmem:[#allocation5 + $0x748] ss:$48 sps:$4 sm:$0xff]  }
 0x2ee   : > { %4455 = vmatprep.subr.bf16.mxu1 %v12338_v56  ;;  %4069 = vmatprep.subr.bf16.mxu0 %v12341_v47  ;;  %v12357_v56 = vld [vmem:[#allocation5 + $0x7a0] ss:$48 sps:$4 sm:$0xff]   ;;  %v12369_v47 = vld [vmem:[#allocation5 + $0x86c] ss:$48 sps:$4 sm:$0xff]  }
 0x2f0   : > { %4456 = vmatpush1.bf16.msra.mxu1 %v12336_v61  ;;  %4070 = vmatpush1.bf16.msra.mxu0 %v12339_v19  ;;  %v12356_v61 = vld [vmem:[#allocation5 + $0x7ac] ss:$48 sps:$4 sm:$0xff]   ;;  %v12354_v19 = vld [vmem:[#allocation5 + $0x7a8] ss:$48 sps:$4 sm:$0xff]  }
 0x2f1   : > { %4457 = vmatprep.subr.bf16.mxu1 %v12344_v29  ;;  %4071 = vmatprep.subr.bf16.mxu0 %v12347_v14  ;;  %v12362_v14 = vld [vmem:[#allocation5 + $0x80c] ss:$48 sps:$4 sm:$0xff]   ;;  %v12372_v29 = vld [vmem:[#allocation5 + $0x864] ss:$48 sps:$4 sm:$0xff]  }
 0x2f3   : > { %3917 = vmatmul.mubr.bf16.gmra.mrb[132].mxu0 %v13317_v23  ;;  %4303 = vmatmul.mubr.bf16.gmra.mrb[132].mxu1 %v13317_v23  ;;  %v12365_v23 = vld [vmem:[#allocation5 + $0x804] ss:$48 sps:$4 sm:$0xff]  }
 0x2f4   : > { %3926 = vmatprep.mubr.bf16.mxu0 %v13319_v24  ;;  %4312 = vmatprep.mubr.bf16.mxu1 %v13319_v24  ;;  %v12360_v24 = vld [vmem:[#allocation5 + $0x808] ss:$48 sps:$4 sm:$0xff]  }
 0x2f5   : > { %4458 = vmatpush1.bf16.msra.mxu1 %v12342_v51  ;;  %4072 = vmatpush1.bf16.msra.mxu0 %v12345_v34  ;;  %v12367_v34 = vld [vmem:[#allocation5 + $0x868] ss:$48 sps:$4 sm:$0xff]   ;;  %v12370_v51 = vld [vmem:[#allocation5 + $0x860] ss:$48 sps:$4 sm:$0xff]  }
 0x2f6   : > { %4459 = vmatprep.subr.bf16.mxu1 %v12350_v40  ;;  %4073 = vmatprep.subr.bf16.mxu0 %v12353_v9  ;;  %v12363_v40 = vld [vmem:[#allocation5 + $0x800] ss:$48 sps:$4 sm:$0xff]   ;;  %v12375_v9 = vld [vmem:[#allocation5 + $0x8cc] ss:$48 sps:$4 sm:$0xff]  }
 0x2f9   : > { %4460 = vmatpush1.bf16.msra.mxu1 %v12348_v12  ;;  %4074 = vmatpush1.bf16.msra.mxu0 %v12351_v6  ;;  %v12376_v12 = vld [vmem:[#allocation5 + $0x8c0] ss:$48 sps:$4 sm:$0xff]  }
 0x2fa   : > { %4461 = vmatprep.subr.bf16.mxu1 %v12356_v61  ;;  %4075 = vmatprep.subr.bf16.mxu0 %v12359_v48  ;;  %v12379_v6 = vld [vmem:[#allocation8 + $0xc8] ss:$12 sps:$4 sm:$0xff]   ;;  %v12383_v61 = vld [vmem:[#allocation8 + $0x4] ss:$12 sps:$4 sm:$0xff]  }
 0x2fb   : > { %3927 = vmatmul.mubr.bf16.gmra.mrb[136].mxu0 %v13329_v37  ;;  %4313 = vmatmul.mubr.bf16.gmra.mrb[136].mxu1 %v13329_v37  ;;  %v12378_v37 = vld [vmem:[#allocation5 + $0x8c4] ss:$48 sps:$4 sm:$0xff]  }
 0x2fc   : > { %3936 = vmatprep.mubr.bf16.mxu0 %v13331_v38  ;;  %4322 = vmatprep.mubr.bf16.mxu1 %v13331_v38  ;;  %v12373_v38 = vld [vmem:[#allocation5 + $0x8c8] ss:$48 sps:$4 sm:$0xff]  }
 0x2fd   : > { %4462 = vmatpush1.bf16.msra.mxu1 %v12354_v19  ;;  %4076 = vmatpush1.bf16.msra.mxu0 %v12357_v56 }
 0x2fe   : > { %4463 = vmatprep.subr.bf16.mxu1 %v12362_v14  ;;  %4077 = vmatprep.subr.bf16.mxu0 %v12365_v23  ;;  %v17329_v23 = vld [vmem:[#allocation17_spill] sm:$0xff] }
 0x301   : > { %4464 = vmatpush1.bf16.msra.mxu1 %v12360_v24  ;;  %4078 = vmatpush1.bf16.msra.mxu0 %v12363_v40 }
 0x302   : > { %4465 = vmatprep.subr.bf16.mxu1 %v12369_v47  ;;  %4079 = vmatprep.subr.bf16.mxu0 %v12372_v29 }
 0x303   : > { %3937 = vmatmul.mubr.bf16.gmra.mrb[140].mxu0 %v13341_v52  ;;  %4323 = vmatmul.mubr.bf16.gmra.mrb[140].mxu1 %v13341_v52 }
 0x304   : > { %3946 = vmatprep.mubr.bf16.mxu0 %v13343_v53  ;;  %4332 = vmatprep.mubr.bf16.mxu1 %v13343_v53 }
 0x305   : > { %4466 = vmatpush1.bf16.msra.mxu1 %v12367_v34  ;;  %4080 = vmatpush1.bf16.msra.mxu0 %v12370_v51 }
 0x306   : > { %4467 = vmatprep.subr.bf16.mxu1 %v12375_v9  ;;  %4081 = vmatprep.subr.bf16.mxu0 %v12378_v37 }
 0x309   : > { %4468 = vmatpush1.bf16.msra.mxu1 %v12373_v38  ;;  %4082 = vmatpush1.bf16.msra.mxu0 %v12376_v12 }
 0x30a   : > { %10453 = vmatprep.subr.bf16.mxu1 %v12379_v6  ;;  %7399 = vmatprep.subr.bf16.mxu0 %v12383_v61 }
 0x30b   : > { %3947 = vmatmul.mubr.bf16.gmra.mrb[144].mxu0 %v13353_v2  ;;  %4333 = vmatmul.mubr.bf16.gmra.mrb[144].mxu1 %v13353_v2 }
 0x30c   : > { %3956 = vmatprep.mubr.bf16.mxu0 %v13355_v3  ;;  %4342 = vmatprep.mubr.bf16.mxu1 %v13355_v3 }
 0x313   : > { %3957 = vmatmul.mubr.bf16.gmra.mrb[148].mxu0 %v13365_v8  ;;  %4343 = vmatmul.mubr.bf16.gmra.mrb[148].mxu1 %v13365_v8 }
 0x314   : > { %3966 = vmatprep.mubr.bf16.mxu0 %v13367_v10  ;;  %4352 = vmatprep.mubr.bf16.mxu1 %v13367_v10 }
 0x31b   : > { %3967 = vmatmul.mubr.bf16.gmra.mrb[152].mxu0 %v13377_v16  ;;  %4353 = vmatmul.mubr.bf16.gmra.mrb[152].mxu1 %v13377_v16 }
 0x31c   : > { %3976 = vmatprep.mubr.bf16.mxu0 %v13379_v17  ;;  %4362 = vmatprep.mubr.bf16.mxu1 %v13379_v17 }
 0x323   : > { %3977 = vmatmul.mubr.bf16.gmra.mrb[156].mxu0 %v13389_v22  ;;  %4363 = vmatmul.mubr.bf16.gmra.mrb[156].mxu1 %v13389_v22 }
 0x324   : > { %3986 = vmatprep.mubr.bf16.mxu0 %v13391_v25  ;;  %4372 = vmatprep.mubr.bf16.mxu1 %v13391_v25 }
 0x32b   : > { %3987 = vmatmul.mubr.bf16.gmra.mrb[160].mxu0 %v13401_v30  ;;  %4373 = vmatmul.mubr.bf16.gmra.mrb[160].mxu1 %v13401_v30 }
 0x32c   : > { %3996 = vmatprep.mubr.bf16.mxu0 %v13403_v31  ;;  %4382 = vmatprep.mubr.bf16.mxu1 %v13403_v31 }
 0x333   : > { %3997 = vmatmul.mubr.bf16.gmra.mrb[164].mxu0 %v13413_v36  ;;  %4383 = vmatmul.mubr.bf16.gmra.mrb[164].mxu1 %v13413_v36 }
 0x334   : > { %4006 = vmatprep.mubr.bf16.mxu0 %v13415_v39  ;;  %4392 = vmatprep.mubr.bf16.mxu1 %v13415_v39 }
 0x33b   : > { %4007 = vmatmul.mubr.bf16.gmra.mrb[168].mxu0 %v13425_v44  ;;  %4393 = vmatmul.mubr.bf16.gmra.mrb[168].mxu1 %v13425_v44 }
 0x33c   : > { %4016 = vmatprep.mubr.bf16.mxu0 %v13427_v45  ;;  %4402 = vmatprep.mubr.bf16.mxu1 %v13427_v45 }
 0x33e   : > { %v14173_v52 = vpop.f32.mrb[64].mxu0  ;;  %v14175_v53 = vpop.f32.mrb[64].mxu1 }
 0x33f   : > { %17313 = vst [vmem:[#allocation140_spill] sm:$0xff] %v14175_v53  ;;  %v14177_v2 = vpop.f32.mrb[65].mxu0  ;;  %v14179_v3 = vpop.f32.mrb[65].mxu1  ;;  %v17341_v53 = vld [vmem:[#allocation19_spill] sm:$0xff] }
 0x340   : > { %17314 = vst [vmem:[#allocation141_spill] sm:$0xff] %v14179_v3  ;;  %v14181_v8 = vpop.f32.mrb[66].mxu0  ;;  %v14183_v10 = vpop.f32.mrb[66].mxu1 }
 0x341   : > { %17315 = vst [vmem:[#allocation142_spill] sm:$0xff] %v14183_v10  ;;  %v14189_v22 = vpop.f32.mrb[67].mxu0  ;;  %v14191_v25 = vpop.f32.mrb[67].mxu1 }
 0x342   : > { %17316 = vst [vmem:[#allocation143_spill] sm:$0xff] %v14191_v25  ;;  %v12396_v25 = vld [vmem:[#allocation8 + $0x38] ss:$12 sps:$4 sm:$0xff]  }
 0x343   : > { %4017 = vmatmul.mubr.bf16.gmra.mrb[172].mxu0 %v13437_v50  ;;  %4403 = vmatmul.mubr.bf16.gmra.mrb[172].mxu1 %v13437_v50 }
 0x344   : > { %4026 = vmatprep.mubr.bf16.mxu0 %v13439_v54  ;;  %4412 = vmatprep.mubr.bf16.mxu1 %v13439_v54 }
 0x346   : > { %v14201_v36 = vpop.f32.mrb[68].mxu0  ;;  %v14203_v39 = vpop.f32.mrb[68].mxu1 }
 0x347   : > { %17317 = vst [vmem:[#allocation144_spill] sm:$0xff] %v14203_v39  ;;  %v14205_v44 = vpop.f32.mrb[69].mxu0  ;;  %v14207_v45 = vpop.f32.mrb[69].mxu1 }
 0x348   : > { %17318 = vst [vmem:[#allocation145_spill] sm:$0xff] %v14207_v45  ;;  %v14209_v48 = vpop.f32.mrb[70].mxu0  ;;  %v14211_v19 = vpop.f32.mrb[70].mxu1  ;;  %v12386_v45 = vld [vmem:[#allocation8 + $0x1c] ss:$12 sps:$4 sm:$0xff]  }
 0x349   : > { %17319 = vst [vmem:[#allocation146_spill] sm:$0xff] %v14211_v19  ;;  %v14217_v14 = vpop.f32.mrb[71].mxu0  ;;  %v14219_v54 = vpop.f32.mrb[71].mxu1 }
 0x34a   : > { %17320 = vst [vmem:[#allocation147_spill] sm:$0xff] %v14219_v54  ;;  %v12387_v54 = vld [vmem:[#allocation8 + $0xe0] ss:$12 sps:$4 sm:$0xff]  }
 0x34b   : > { %4027 = vmatmul.mubr.bf16.gmra.mrb[176].mxu0 %v13449_v59  ;;  %4413 = vmatmul.mubr.bf16.gmra.mrb[176].mxu1 %v13449_v59 }
 0x34c   : > { %4036 = vmatprep.mubr.bf16.mxu0 %v13451_v60  ;;  %4422 = vmatprep.mubr.bf16.mxu1 %v13451_v60 }
 0x34e   : > { %v14229_v40 = vpop.f32.mrb[72].mxu0  ;;  %v14231_v47 = vpop.f32.mrb[72].mxu1 }
 0x34f   : > { %17321 = vst [vmem:[#allocation148_spill] sm:$0xff] %v14231_v47  ;;  %v14233_v29 = vpop.f32.mrb[73].mxu0  ;;  %v14235_v34 = vpop.f32.mrb[73].mxu1  ;;  %v17334_v47 = vld [vmem:[#allocation18_spill] sm:$0xff] }
 0x350   : > { %17322 = vst [vmem:[#allocation149_spill] sm:$0xff] %v14235_v34  ;;  %v14237_v51 = vpop.f32.mrb[74].mxu0  ;;  %v14239_v9 = vpop.f32.mrb[74].mxu1 }
 0x351   : > { %17323 = vst [vmem:[#allocation150_spill] sm:$0xff] %v14239_v9  ;;  %v14245_v38 = vpop.f32.mrb[75].mxu0  ;;  %v14247_v60 = vpop.f32.mrb[75].mxu1 }
 0x352   : > { %17324 = vst [vmem:[#allocation151_spill] sm:$0xff] %v14247_v60 }
 0x353   : > { %4037 = vmatmul.mubr.bf16.gmra.mrb[180].mxu0 %v13461_v1  ;;  %4423 = vmatmul.mubr.bf16.gmra.mrb[180].mxu1 %v13461_v1 }
 0x354   : > { %4046 = vmatprep.mubr.bf16.mxu0 %v13463_v4  ;;  %4432 = vmatprep.mubr.bf16.mxu1 %v13463_v4 }
 0x356   : > { %v14257_v61 = vpop.f32.mrb[76].mxu0  ;;  %v14259_v59 = vpop.f32.mrb[76].mxu1 }
 0x357   : > { %17325 = vst [vmem:[#allocation152_spill] sm:$0xff] %v14259_v59  ;;  %v14261_v50 = vpop.f32.mrb[77].mxu0  ;;  %v14263_v24 = vpop.f32.mrb[77].mxu1 }
 0x358   : > { %17326 = vst [vmem:[#allocation153_spill] sm:$0xff] %v14263_v24  ;;  %v14265_v17 = vpop.f32.mrb[78].mxu0  ;;  %v14267_v31 = vpop.f32.mrb[78].mxu1 }
 0x359   : > { %17327 = vst [vmem:[#allocation154_spill] sm:$0xff] %v14267_v31  ;;  %v14273_v37 = vpop.f32.mrb[79].mxu0  ;;  %v14275_v4 = vpop.f32.mrb[79].mxu1 }
 0x35a   : > { %17328 = vst [vmem:[#allocation155_spill] sm:$0xff] %v14275_v4  ;;  %v12380_v4 = vld [vmem:[#allocation8 + $0x8] ss:$12 sps:$4 sm:$0xff]  }
 0x35b   : > { %4047 = vmatmul.mubr.bf16.gmra.mrb[184].mxu0 %v13473_v13  ;;  %4433 = vmatmul.mubr.bf16.gmra.mrb[184].mxu1 %v13473_v13 }
 0x35c   : > { %4056 = vmatprep.mubr.bf16.mxu0 %v17329_v23  ;;  %4442 = vmatprep.mubr.bf16.mxu1 %v17329_v23 }
 0x35e   : > { %v14285_v6 = vpop.f32.mrb[80].mxu0  ;;  %v14287_v1 = vpop.f32.mrb[80].mxu1 }
 0x35f   : > { %17330 = vst [vmem:[#allocation17_spill] sm:$0xff] %v14287_v1  ;;  %v14289_v16 = vpop.f32.mrb[81].mxu0  ;;  %v14291_v30 = vpop.f32.mrb[81].mxu1 }
 0x360   : > { %17331 = vst [vmem:[#allocation156_spill] sm:$0xff] %v14291_v30  ;;  %v14293_v12 = vpop.f32.mrb[82].mxu0  ;;  %v14295_v59 = vpop.f32.mrb[82].mxu1  ;;  %v12381_v30 = vld [vmem:[#allocation8] ss:$12 sps:$4 sm:$0xff]  }
 0x361   : > { %17332 = vst [vmem:[#allocation157_spill] sm:$0xff] %v14295_v59  ;;  %v14301_v31 = vpop.f32.mrb[83].mxu0  ;;  %v14303_v23 = vpop.f32.mrb[83].mxu1 }
 0x362   : > { %17333 = vst [vmem:[#allocation158_spill] sm:$0xff] %v14303_v23  ;;  %v12388_v23 = vld [vmem:[#allocation8 + $0x20] ss:$12 sps:$4 sm:$0xff]  }
 0x363   : > { %4057 = vmatmul.mubr.bf16.gmra.mrb[188].mxu0 %v17334_v47  ;;  %4443 = vmatmul.mubr.bf16.gmra.mrb[188].mxu1 %v17334_v47  ;;  %v12384_v47 = vld [vmem:[#allocation8 + $0x18] ss:$12 sps:$4 sm:$0xff]  }
 0x364   : > { %4099 = vmatprep.mubr.bf16.mxu0 %v17232_v41  ;;  %4485 = vmatprep.mubr.bf16.mxu1 %v17232_v41 }
 0x366   : > { %v14313_v56 = vpop.f32.mrb[84].mxu0  ;;  %v14315_v13 = vpop.f32.mrb[84].mxu1 }
 0x367   : > { %17335 = vst [vmem:[#allocation18_spill] sm:$0xff] %v14313_v56  ;;  %17336 = vst [vmem:[#allocation159_spill] sm:$0xff] %v14315_v13  ;;  %v14317_v1 = vpop.f32.mrb[85].mxu0  ;;  %v14319_v59 = vpop.f32.mrb[85].mxu1  ;;  %v12391_v13 = vld [vmem:[#allocation8 + $0x34] ss:$12 sps:$4 sm:$0xff]  }
 0x368   : > { %17337 = vst [vmem:[#allocation160_spill] sm:$0xff] %v14319_v59  ;;  %v14321_v24 = vpop.f32.mrb[86].mxu0  ;;  %v14323_v9 = vpop.f32.mrb[86].mxu1  ;;  %v12411_v56 = vld [vmem:[#allocation8 + $0x128] ss:$12 sps:$4 sm:$0xff]  }
 0x369   : > { %17338 = vst [vmem:[#allocation161_spill] sm:$0xff] %v14321_v24  ;;  %17339 = vst [vmem:[#allocation162_spill] sm:$0xff] %v14323_v9  ;;  %v14329_v34 = vpop.f32.mrb[87].mxu0  ;;  %v14331_v60 = vpop.f32.mrb[87].mxu1  ;;  %v12395_v9 = vld [vmem:[#allocation8 + $0xf8] ss:$12 sps:$4 sm:$0xff]  }
 0x36a   : > { %17340 = vst [vmem:[#allocation163_spill] sm:$0xff] %v14331_v60  ;;  %v12403_v24 = vld [vmem:[#allocation8 + $0x110] ss:$12 sps:$4 sm:$0xff]  }
 0x36b   : > { %4100 = vmatmul.mubr.bf16.vlgmr.msra.gmra.mrb[128].mxu0 %v17341_v53  ;;  %4486 = vmatmul.mubr.bf16.vlgmr.msra.gmra.mrb[128].mxu1 %v17341_v53 }
 0x36c   : > { %10454 = vmatpush3.bf16.msra.mxu1 %v12380_v4  ;;  %7400 = vmatpush1.bf16.msra.mxu0 %v12381_v30 }
 0x36d   : > { %4109 = vmatprep.mubr.bf16.mxu0 %v17232_v41  ;;  %4495 = vmatprep.mubr.bf16.mxu1 %v17232_v41 }
 0x36e   : > { %v14341_v39 = vpop.f32.mrb[88].mxu0  ;;  %v14343_v10 = vpop.f32.mrb[88].mxu1  ;;  %7401 = vmatprep.subr.bf16.mxu0 %v12386_v45  ;;  %10455 = vmatprep.subr.bf16.mxu1 %v12387_v54  ;;  %v12389_v54 = vld [vmem:[#allocation8 + $0x30] ss:$12 sps:$4 sm:$0xff]  }
 0x36f   : > { %17342 = vst [vmem:[#allocation19_spill] sm:$0xff] %v14341_v39  ;;  %17343 = vst [vmem:[#allocation164_spill] sm:$0xff] %v14343_v10  ;;  %v14345_v19 = vpop.f32.mrb[89].mxu0  ;;  %v14347_v59 = vpop.f32.mrb[89].mxu1  ;;  %v12412_v39 = vld [vmem:[#allocation8 + $0x68] ss:$12 sps:$4 sm:$0xff]  }
 0x370   : > { %17344 = vst [vmem:[#allocation165_spill] sm:$0xff] %v14345_v19  ;;  %17345 = vst [vmem:[#allocation166_spill] sm:$0xff] %v14347_v59  ;;  %v14349_v53 = vpop.f32.mrb[90].mxu0  ;;  %v14351_v30 = vpop.f32.mrb[90].mxu1  ;;  %7402 = vmatpush1.bf16.msra.mxu0 %v12384_v47  ;;  %10456 = vmatpush3.bf16.msra.mxu1 %v12388_v23  ;;  %v12394_v47 = vld [vmem:[#allocation8 + $0x4c] ss:$12 sps:$4 sm:$0xff]  }
 0x371   : > { %17346 = vst [vmem:[#allocation167_spill] sm:$0xff] %v14349_v53  ;;  %17347 = vst [vmem:[#allocation168_spill] sm:$0xff] %v14351_v30  ;;  %v14357_v3 = vpop.f32.mrb[91].mxu0  ;;  %v14359_v45 = vpop.f32.mrb[91].mxu1  ;;  %7403 = vmatprep.subr.bf16.mxu0 %v12391_v13  ;;  %10457 = vmatprep.subr.bf16.mxu1 %v12395_v9  ;;  %v12392_v13 = vld [vmem:[#allocation8 + $0x48] ss:$12 sps:$4 sm:$0xff]  }
 0x372   : > { %17348 = vst [vmem:[#allocation169_spill] sm:$0xff] %v14357_v3  ;;  %17349 = vst [vmem:[#allocation170_spill] sm:$0xff] %v14359_v45  ;;  %v12404_v9 = vld [vmem:[#allocation8 + $0x50] ss:$12 sps:$4 sm:$0xff]  }
 0x373   : > { %4110 = vmatmul.mubr.bf16.gmra.mrb[132].mxu0 %v13499_v46  ;;  %4496 = vmatmul.mubr.bf16.gmra.mrb[132].mxu1 %v13499_v46  ;;  %v12399_v23 = vld [vmem:[#allocation8 + $0x64] ss:$12 sps:$4 sm:$0xff]   ;;  %v12402_v3 = vld [vmem:[#allocation8 + $0x7c] ss:$12 sps:$4 sm:$0xff]  }
 0x374   : > { %4119 = vmatprep.mubr.bf16.mxu0 %v17232_v41  ;;  %4505 = vmatprep.mubr.bf16.mxu1 %v17232_v41 }
 0x375   : > { %7404 = vmatpush1.bf16.msra.mxu0 %v12389_v54  ;;  %10458 = vmatpush3.bf16.msra.mxu1 %v12396_v25  ;;  %v12419_v25 = vld [vmem:[#allocation8 + $0x140] ss:$12 sps:$4 sm:$0xff]  }
 0x376   : > { %v14369_v60 = vpop.f32.mrb[92].mxu0  ;;  %v14371_v4 = vpop.f32.mrb[92].mxu1  ;;  %7405 = vmatprep.subr.bf16.mxu0 %v12394_v47  ;;  %10459 = vmatprep.subr.bf16.mxu1 %v12403_v24  ;;  %v12397_v24 = vld [vmem:[#allocation8 + $0x60] ss:$12 sps:$4 sm:$0xff]  }
 0x377   : > { %17350 = vst [vmem:[#allocation171_spill] sm:$0xff] %v14369_v60  ;;  %17351 = vst [vmem:[#allocation172_spill] sm:$0xff] %v14371_v4  ;;  %v14373_v10 = vpop.f32.mrb[93].mxu0  ;;  %v14375_v30 = vpop.f32.mrb[93].mxu1 }
 0x378   : > { %17352 = vst [vmem:[#allocation173_spill] sm:$0xff] %v14373_v10  ;;  %17353 = vst [vmem:[#allocation174_spill] sm:$0xff] %v14375_v30  ;;  %v14377_v46 = vpop.f32.mrb[94].mxu0  ;;  %v14379_v59 = vpop.f32.mrb[94].mxu1  ;;  %v12410_v10 = vld [vmem:[#allocation8 + $0xac] ss:$12 sps:$4 sm:$0xff]  }
 0x379   : > { %17354 = vst [vmem:[#allocation175_spill] sm:$0xff] %v14377_v46  ;;  %17355 = vst [vmem:[#allocation176_spill] sm:$0xff] %v14379_v59  ;;  %v14385_v45 = vpop.f32.mrb[95].mxu0  ;;  %v14387_v47 = vpop.f32.mrb[95].mxu1  ;;  %7406 = vmatpush1.bf16.msra.mxu0 %v12392_v13  ;;  %10460 = vmatpush3.bf16.msra.mxu1 %v12404_v9  ;;  %v12400_v13 = vld [vmem:[#allocation8 + $0x78] ss:$12 sps:$4 sm:$0xff]  }
 0x37a   : > { %17356 = vst [vmem:[#allocation177_spill] sm:$0xff] %v14387_v47  ;;  %7407 = vmatprep.subr.bf16.mxu0 %v12399_v23  ;;  %10461 = vmatprep.subr.bf16.mxu1 %v12411_v56  ;;  %v12420_v9 = vld [vmem:[#allocation8 + $0x80] ss:$12 sps:$4 sm:$0xff]   ;;  %v12427_v56 = vld [vmem:[#allocation8 + $0x158] ss:$12 sps:$4 sm:$0xff]  }
 0x37b   : > { %4120 = vmatmul.mubr.bf16.gmra.mrb[136].mxu0 %v13507_v0  ;;  %4506 = vmatmul.mubr.bf16.gmra.mrb[136].mxu1 %v13507_v0  ;;  %v12407_v23 = vld [vmem:[#allocation8 + $0x94] ss:$12 sps:$4 sm:$0xff]   ;;  %v12428_v47 = vld [vmem:[#allocation8 + $0x98] ss:$12 sps:$4 sm:$0xff]  }
 0x37c   : > { %4129 = vmatprep.mubr.bf16.mxu0 %v17232_v41  ;;  %4515 = vmatprep.mubr.bf16.mxu1 %v17232_v41 }
 0x37d   : > { %7408 = vmatpush1.bf16.msra.mxu0 %v12397_v24  ;;  %10462 = vmatpush3.bf16.msra.mxu1 %v12412_v39  ;;  %v12435_v39 = vld [vmem:[#allocation8 + $0x170] ss:$12 sps:$4 sm:$0xff]  }
 0x37e   : > { %v14397_v54 = vpop.f32.mrb[96].mxu0  ;;  %v14399_v53 = vpop.f32.mrb[96].mxu1  ;;  %7409 = vmatprep.subr.bf16.mxu0 %v12402_v3  ;;  %10463 = vmatprep.subr.bf16.mxu1 %v12419_v25  ;;  %v12405_v25 = vld [vmem:[#allocation8 + $0x90] ss:$12 sps:$4 sm:$0xff]  }
 0x37f   : > { %17357 = vst [vmem:[#allocation178_spill] sm:$0xff] %v14397_v54  ;;  %17358 = vst [vmem:[#allocation179_spill] sm:$0xff] %v14399_v53  ;;  %v14401_v19 = vpop.f32.mrb[97].mxu0  ;;  %v14403_v4 = vpop.f32.mrb[97].mxu1 }
 0x380   : > { %17359 = vst [vmem:[#allocation180_spill] sm:$0xff] %v14403_v4  ;;  %v14405_v0 = vpop.f32.mrb[98].mxu0  ;;  %v14407_v59 = vpop.f32.mrb[98].mxu1 }
 0x381   : > { %17360 = vst [vmem:[#allocation181_spill] sm:$0xff] %v14405_v0  ;;  %17361 = vst [vmem:[#allocation182_spill] sm:$0xff] %v14407_v59  ;;  %v14413_v30 = vpop.f32.mrb[99].mxu0  ;;  %v14415_v3 = vpop.f32.mrb[99].mxu1  ;;  %7410 = vmatpush1.bf16.msra.mxu0 %v12400_v13  ;;  %10464 = vmatpush3.bf16.msra.mxu1 %v12420_v9  ;;  %v12408_v13 = vld [vmem:[#allocation8 + $0xa8] ss:$12 sps:$4 sm:$0xff]  }
 0x382   : > { %17362 = vst [vmem:[#allocation183_spill] sm:$0xff] %v14415_v3  ;;  %7411 = vmatprep.subr.bf16.mxu0 %v12407_v23  ;;  %10465 = vmatprep.subr.bf16.mxu1 %v12427_v56  ;;  %v12436_v9 = vld [vmem:[#allocation8 + $0xb0] ss:$12 sps:$4 sm:$0xff]   ;;  %v12443_v56 = vld [vmem:[#allocation8 + $0x248] ss:$12 sps:$4 sm:$0xff]  }
 0x383   : > { %4130 = vmatmul.mubr.bf16.gmra.mrb[140].mxu0 %v13515_v32  ;;  %4516 = vmatmul.mubr.bf16.gmra.mrb[140].mxu1 %v13515_v32  ;;  %v12415_v23 = vld [vmem:[#allocation8 + $0xc4] ss:$12 sps:$4 sm:$0xff]   ;;  %v12418_v0 = vld [vmem:[#allocation8 + $0xdc] ss:$12 sps:$4 sm:$0xff]  }
 0x384   : > { %4139 = vmatprep.mubr.bf16.mxu0 %v17232_v41  ;;  %4525 = vmatprep.mubr.bf16.mxu1 %v17232_v41 }
 0x385   : > { %7412 = vmatpush1.bf16.msra.mxu0 %v12405_v25  ;;  %10466 = vmatpush3.bf16.msra.mxu1 %v12428_v47  ;;  %v12423_v47 = vld [vmem:[#allocation8 + $0xf4] ss:$12 sps:$4 sm:$0xff]  }
 0x386   : > { %v14425_v24 = vpop.f32.mrb[100].mxu0  ;;  %v14427_v60 = vpop.f32.mrb[100].mxu1  ;;  %7413 = vmatprep.subr.bf16.mxu0 %v12410_v10  ;;  %10467 = vmatprep.subr.bf16.mxu1 %v12435_v39  ;;  %v12413_v39 = vld [vmem:[#allocation8 + $0xc0] ss:$12 sps:$4 sm:$0xff]  }
 0x387   : > { %17363 = vst [vmem:[#allocation184_spill] sm:$0xff] %v14425_v24  ;;  %17364 = vst [vmem:[#allocation185_spill] sm:$0xff] %v14427_v60  ;;  %v14429_v46 = vpop.f32.mrb[101].mxu0  ;;  %v14431_v53 = vpop.f32.mrb[101].mxu1  ;;  %v12426_v24 = vld [vmem:[#allocation8 + $0x10c] ss:$12 sps:$4 sm:$0xff]  }
 0x388   : > { %17365 = vst [vmem:[#allocation186_spill] sm:$0xff] %v14431_v53  ;;  %v14433_v32 = vpop.f32.mrb[102].mxu0  ;;  %v14435_v59 = vpop.f32.mrb[102].mxu1  ;;  %v12431_v53 = vld [vmem:[#allocation8 + $0x124] ss:$12 sps:$4 sm:$0xff]  }
 0x389   : > { %17366 = vst [vmem:[#allocation187_spill] sm:$0xff] %v14435_v59  ;;  %v14441_v4 = vpop.f32.mrb[103].mxu0  ;;  %v14443_v10 = vpop.f32.mrb[103].mxu1  ;;  %7414 = vmatpush1.bf16.msra.mxu0 %v12408_v13  ;;  %10468 = vmatpush3.bf16.msra.mxu1 %v12436_v9  ;;  %v12416_v13 = vld [vmem:[#allocation8 + $0xd8] ss:$12 sps:$4 sm:$0xff]  }
 0x38a   : > { %17367 = vst [vmem:[#allocation188_spill] sm:$0xff] %v14443_v10  ;;  %7415 = vmatprep.subr.bf16.mxu0 %v12415_v23  ;;  %10565 = vmatprep.subr.bf16.mxu1 %v12443_v56 }
 0x38b   : > { %4140 = vmatmul.mubr.bf16.gmra.mrb[144].mxu0 %v13523_v55  ;;  %4526 = vmatmul.mubr.bf16.gmra.mrb[144].mxu1 %v13523_v55 }
 0x38c   : > { %4149 = vmatprep.mubr.bf16.mxu0 %v17232_v41  ;;  %4535 = vmatprep.mubr.bf16.mxu1 %v17232_v41 }
 0x38d   : > { %7416 = vmatpush1.bf16.msra.mxu0 %v12413_v39  ;;  %v12424_v39 = vld [vmem:[#allocation8 + $0x108] ss:$12 sps:$4 sm:$0xff]  }
 0x38e   : > { %v14453_v9 = vpop.f32.mrb[104].mxu0  ;;  %v14455_v25 = vpop.f32.mrb[104].mxu1  ;;  %7417 = vmatprep.subr.bf16.mxu0 %v12418_v0  ;;  %v12421_v0 = vld [vmem:[#allocation8 + $0xf0] ss:$12 sps:$4 sm:$0xff]  }
 0x38f   : > { %17368 = vst [vmem:[#allocation189_spill] sm:$0xff] %v14453_v9  ;;  %17369 = vst [vmem:[#allocation190_spill] sm:$0xff] %v14455_v25  ;;  %v14457_v54 = vpop.f32.mrb[105].mxu0  ;;  %v14459_v23 = vpop.f32.mrb[105].mxu1  ;;  %v12439_v9 = vld [vmem:[#allocation8 + $0x154] ss:$12 sps:$4 sm:$0xff]  }
 0x390   : > { %17370 = vst [vmem:[#allocation191_spill] sm:$0xff] %v14457_v54  ;;  %17371 = vst [vmem:[#allocation192_spill] sm:$0xff] %v14459_v23  ;;  %v14461_v56 = vpop.f32.mrb[106].mxu0  ;;  %v14463_v3 = vpop.f32.mrb[106].mxu1  ;;  %v12434_v54 = vld [vmem:[#allocation8 + $0x13c] ss:$12 sps:$4 sm:$0xff]  }
 0x391   : > { %17372 = vst [vmem:[#allocation193_spill] sm:$0xff] %v14461_v56  ;;  %17373 = vst [vmem:[#allocation194_spill] sm:$0xff] %v14463_v3  ;;  %v14469_v60 = vpop.f32.mrb[107].mxu0  ;;  %v14471_v59 = vpop.f32.mrb[107].mxu1  ;;  %7418 = vmatpush1.bf16.msra.mxu0 %v12416_v13 }
 0x392   : > { %17374 = vst [vmem:[#allocation195_spill] sm:$0xff] %v14471_v59  ;;  %7419 = vmatprep.subr.bf16.mxu0 %v12423_v47 }
 0x393   : > { %4150 = vmatmul.mubr.bf16.gmra.mrb[148].mxu0 %v13531_v15  ;;  %4536 = vmatmul.mubr.bf16.gmra.mrb[148].mxu1 %v13531_v15 }
 0x394   : > { %4159 = vmatprep.mubr.bf16.mxu0 %v17232_v41  ;;  %4545 = vmatprep.mubr.bf16.mxu1 %v17232_v41 }
 0x395   : > { %7420 = vmatpush1.bf16.msra.mxu0 %v12421_v0  ;;  %v12432_v0 = vld [vmem:[#allocation8 + $0x138] ss:$12 sps:$4 sm:$0xff]  }
 0x396   : > { %v14481_v13 = vpop.f32.mrb[108].mxu0  ;;  %v14483_v55 = vpop.f32.mrb[108].mxu1  ;;  %7421 = vmatprep.subr.bf16.mxu0 %v12426_v24  ;;  %v12429_v24 = vld [vmem:[#allocation8 + $0x120] ss:$12 sps:$4 sm:$0xff]  }
 0x397   : > { %17375 = vst [vmem:[#allocation196_spill] sm:$0xff] %v14481_v13  ;;  %17376 = vst [vmem:[#allocation197_spill] sm:$0xff] %v14483_v55  ;;  %v14485_v25 = vpop.f32.mrb[109].mxu0  ;;  %v14487_v47 = vpop.f32.mrb[109].mxu1  ;;  %v12447_v13 = vld [vmem:[#allocation8 + $0x184] ss:$12 sps:$4 sm:$0xff]  }
 0x398   : > { %17377 = vst [vmem:[#allocation198_spill] sm:$0xff] %v14485_v25  ;;  %17378 = vst [vmem:[#allocation199_spill] sm:$0xff] %v14487_v47  ;;  %v14489_v10 = vpop.f32.mrb[110].mxu0  ;;  %v14491_v3 = vpop.f32.mrb[110].mxu1  ;;  %v12442_v25 = vld [vmem:[#allocation8 + $0x16c] ss:$12 sps:$4 sm:$0xff]  }
 0x399   : > { %17379 = vst [vmem:[#allocation200_spill] sm:$0xff] %v14489_v10  ;;  %17380 = vst [vmem:[#allocation201_spill] sm:$0xff] %v14491_v3  ;;  %v14497_v23 = vpop.f32.mrb[111].mxu0  ;;  %v14499_v59 = vpop.f32.mrb[111].mxu1  ;;  %7422 = vmatpush1.bf16.msra.mxu0 %v12424_v39 }
 0x39a   : > { %17381 = vst [vmem:[#allocation202_spill] sm:$0xff] %v14499_v59  ;;  %7423 = vmatprep.subr.bf16.mxu0 %v12431_v53 }
 0x39b   : > { %4160 = vmatmul.mubr.bf16.gmra.mrb[152].mxu0 %v13539_v42  ;;  %4546 = vmatmul.mubr.bf16.gmra.mrb[152].mxu1 %v13539_v42 }
 0x39c   : > { %4169 = vmatprep.mubr.bf16.mxu0 %v17232_v41  ;;  %4555 = vmatprep.mubr.bf16.mxu1 %v17232_v41 }
 0x39d   : > { %7424 = vmatpush1.bf16.msra.mxu0 %v12429_v24  ;;  %v12440_v24 = vld [vmem:[#allocation8 + $0x168] ss:$12 sps:$4 sm:$0xff]  }
 0x39e   : > { %v14509_v39 = vpop.f32.mrb[112].mxu0  ;;  %v14511_v15 = vpop.f32.mrb[112].mxu1  ;;  %7425 = vmatprep.subr.bf16.mxu0 %v12434_v54  ;;  %v12437_v54 = vld [vmem:[#allocation8 + $0x150] ss:$12 sps:$4 sm:$0xff]  }
 0x39f   : > { %17382 = vst [vmem:[#allocation203_spill] sm:$0xff] %v14509_v39  ;;  %17383 = vst [vmem:[#allocation204_spill] sm:$0xff] %v14511_v15  ;;  %v14513_v55 = vpop.f32.mrb[113].mxu0  ;;  %v14515_v53 = vpop.f32.mrb[113].mxu1 }
 0x3a0   : > { %17384 = vst [vmem:[#allocation205_spill] sm:$0xff] %v14513_v55  ;;  %17385 = vst [vmem:[#allocation206_spill] sm:$0xff] %v14515_v53  ;;  %v14517_v56 = vpop.f32.mrb[114].mxu0  ;;  %v14519_v3 = vpop.f32.mrb[114].mxu1  ;;  %v12461_v55 = vld [vmem:[#allocation8 + $0x1e0] ss:$12 sps:$4 sm:$0xff]  }
 0x3a1   : > { %17386 = vst [vmem:[#allocation207_spill] sm:$0xff] %v14517_v56  ;;  %17387 = vst [vmem:[#allocation208_spill] sm:$0xff] %v14519_v3  ;;  %v14525_v47 = vpop.f32.mrb[115].mxu0  ;;  %v14527_v59 = vpop.f32.mrb[115].mxu1  ;;  %7426 = vmatpush1.bf16.msra.mxu0 %v12432_v0  ;;  %v12455_v56 = vld [vmem:[#allocation8 + $0x1b4] ss:$12 sps:$4 sm:$0xff]  }
 0x3a2   : > { %17388 = vst [vmem:[#allocation209_spill] sm:$0xff] %v14527_v59  ;;  %7427 = vmatprep.subr.bf16.mxu0 %v12439_v9 }
 0x3a3   : > { %4170 = vmatmul.mubr.bf16.gmra.mrb[156].mxu0 %v13547_v5  ;;  %4556 = vmatmul.mubr.bf16.gmra.mrb[156].mxu1 %v13547_v5 }
 0x3a4   : > { %4179 = vmatprep.mubr.bf16.mxu0 %v17232_v41  ;;  %4565 = vmatprep.mubr.bf16.mxu1 %v17232_v41 }
 0x3a5   : > { %7428 = vmatpush1.bf16.msra.mxu0 %v12437_v54 }
 0x3a6   : > { %v14537_v0 = vpop.f32.mrb[116].mxu0  ;;  %v14539_v42 = vpop.f32.mrb[116].mxu1  ;;  %7429 = vmatprep.subr.bf16.mxu0 %v12442_v25 }
 0x3a7   : > { %17389 = vst [vmem:[#allocation210_spill] sm:$0xff] %v14537_v0  ;;  %17390 = vst [vmem:[#allocation211_spill] sm:$0xff] %v14539_v42  ;;  %v14541_v15 = vpop.f32.mrb[117].mxu0  ;;  %v14543_v9 = vpop.f32.mrb[117].mxu1  ;;  %v347_v0 = vlaneseq }
 0x3a8   : > { %17391 = vst [vmem:[#allocation212_spill] sm:$0xff] %v14541_v15  ;;  %17392 = vst [vmem:[#allocation213_spill] sm:$0xff] %v14543_v9  ;;  %v14545_v10 = vpop.f32.mrb[118].mxu0  ;;  %v14547_v3 = vpop.f32.mrb[118].mxu1  ;;  %v12450_v15 = vld [vmem:[#allocation8 + $0x19c] ss:$12 sps:$4 sm:$0xff]  }
 0x3a9   : > { %17393 = vst [vmem:[#allocation214_spill] sm:$0xff] %v14545_v10  ;;  %17394 = vst [vmem:[#allocation215_spill] sm:$0xff] %v14547_v3  ;;  %v14553_v53 = vpop.f32.mrb[119].mxu0  ;;  %v14555_v59 = vpop.f32.mrb[119].mxu1  ;;  %7430 = vmatpush1.bf16.msra.mxu0 %v12440_v24 }
 0x3aa   : > { %17395 = vst [vmem:[#allocation216_spill] sm:$0xff] %v14553_v53  ;;  %17396 = vst [vmem:[#allocation217_spill] sm:$0xff] %v14555_v59  ;;  %7592 = vmatprep.subr.bf16.mxu0 %v12447_v13 }
 0x3ab   : > { %4180 = vmatmul.mubr.bf16.gmra.mrb[160].mxu0 %v13555_v35  ;;  %4566 = vmatmul.mubr.bf16.gmra.mrb[160].mxu1 %v13555_v35 }
 0x3ac   : > { %4189 = vmatprep.mubr.bf16.mxu0 %v17232_v41  ;;  %4575 = vmatprep.mubr.bf16.mxu1 %v17232_v41 }
 0x3ae   : > { %v14565_v54 = vpop.f32.mrb[120].mxu0  ;;  %v14567_v5 = vpop.f32.mrb[120].mxu1 }
 0x3af   : > { %17397 = vst [vmem:[#allocation218_spill] sm:$0xff] %v14565_v54  ;;  %17398 = vst [vmem:[#allocation219_spill] sm:$0xff] %v14567_v5  ;;  %v14569_v24 = vpop.f32.mrb[121].mxu0  ;;  %v14571_v42 = vpop.f32.mrb[121].mxu1 }
 0x3b0   : > { %17399 = vst [vmem:[#allocation220_spill] sm:$0xff] %v14569_v24  ;;  %17400 = vst [vmem:[#allocation221_spill] sm:$0xff] %v14571_v42  ;;  %v14573_v25 = vpop.f32.mrb[122].mxu0  ;;  %v14575_v39 = vpop.f32.mrb[122].mxu1 }
 0x3b1   : > { %17401 = vst [vmem:[#allocation222_spill] sm:$0xff] %v14573_v25  ;;  %17402 = vst [vmem:[#allocation223_spill] sm:$0xff] %v14575_v39  ;;  %v14581_v3 = vpop.f32.mrb[123].mxu0  ;;  %v14583_v9 = vpop.f32.mrb[123].mxu1 }
 0x3b2   : > { %17403 = vst [vmem:[#allocation224_spill] sm:$0xff] %v14581_v3  ;;  %17404 = vst [vmem:[#allocation225_spill] sm:$0xff] %v14583_v9  ;;  %v12764_v24 = vld.sshfl [vmem:[#allocation7] sm:$0xff pattern:$0x75316420] }
 0x3b3   : > { %4190 = vmatmul.mubr.bf16.gmra.mrb[164].mxu0 %v13563_v43  ;;  %4576 = vmatmul.mubr.bf16.gmra.mrb[164].mxu1 %v13563_v43  ;;  %v13011_v43 = vmov 1966171168   ;;  %v12444_v3 = vld [vmem:[#allocation8 + $0x188] ss:$12 sps:$4 sm:$0xff]  }
 0x3b4   : > { %4199 = vmatprep.mubr.bf16.mxu0 %v17232_v41  ;;  %4585 = vmatprep.mubr.bf16.mxu1 %v17232_v41 }
 0x3b6   : > { %v14593_v13 = vpop.f32.mrb[124].mxu0  ;;  %v14595_v35 = vpop.f32.mrb[124].mxu1 }
 0x3b7   : > { %17405 = vst [vmem:[#allocation226_spill] sm:$0xff] %v14593_v13  ;;  %17406 = vst [vmem:[#allocation227_spill] sm:$0xff] %v14595_v35  ;;  %v14597_v5 = vpop.f32.mrb[125].mxu0  ;;  %v14599_v39 = vpop.f32.mrb[125].mxu1  ;;  %v4844_v35 = vunpack.c.l.s4 %v13011_v43  ;;  %v17418_v13 = vld [vmem:[#allocation20_spill] sm:$0xff] }
 0x3b8   : > { %17407 = vst [vmem:[#allocation228_spill] sm:$0xff] %v14597_v5  ;;  %17408 = vst [vmem:[#allocation229_spill] sm:$0xff] %v14599_v39  ;;  %v14601_v59 = vpop.f32.mrb[126].mxu0  ;;  %v14603_v54 = vpop.f32.mrb[126].mxu1 }
 0x3b9   : > { %17409 = vst [vmem:[#allocation230_spill] sm:$0xff] %v14601_v59  ;;  %17410 = vst [vmem:[#allocation231_spill] sm:$0xff] %v14603_v54  ;;  %v14609_v42 = vpop.f32.mrb[127].mxu0  ;;  %v14611_v9 = vpop.f32.mrb[127].mxu1  ;;  %v14623_v54 = vshrl.u32 %v347_v0, 7  ;;  %v4845_v25 = vunpack.c.0.s8 %v4844_v35 }
 0x3ba   : > { %17411 = vst [vmem:[#allocation232_spill] sm:$0xff] %v14609_v42  ;;  %17412 = vst [vmem:[#allocation233_spill] sm:$0xff] %v14611_v9  ;;  %v17420_v42 = vld [vmem:[#allocation34_spill] sm:$0xff] }
 0x3bb   : > { %4200 = vmatmul.mubr.bf16.gmra.mrb[168].mxu0 %v13571_v49  ;;  %4586 = vmatmul.mubr.bf16.gmra.mrb[168].mxu1 %v13571_v49  ;;  %17413 = vst [vmem:[#allocation234_spill] sm:$0xff] %v14623_v54  ;;  %v14628_v49 = vsub.s32 %v4845_v25, %v14623_v54  ;;  %v14642_v25 = vsub.s32 0, %v14623_v54  ;;  %v17415_v54 = vld [vmem:[#allocation22_spill] sm:$0xff] }
 0x3bc   : > { %4209 = vmatprep.mubr.bf16.mxu0 %v17232_v41  ;;  %4595 = vmatprep.mubr.bf16.mxu1 %v17232_v41 }
 0x3bd   : > { %v14650_v43 = vrot.slane %v12764_v24, %v14628_v49 }
 0x3c3   : > { %4210 = vmatmul.mubr.bf16.gmra.mrb[172].mxu0 %v13579_v58  ;;  %4596 = vmatmul.mubr.bf16.gmra.mrb[172].mxu1 %v13579_v58  ;;  %v4857_v58 = vcombine.high %v12764_v24, %v12764_v24 }
 0x3c4   : > { %4219 = vmatprep.mubr.bf16.mxu0 %v17232_v41  ;;  %4605 = vmatprep.mubr.bf16.mxu1 %v17232_v41 }
 0x3c5   : > { %v14637_v0 = vrot.slane %v4857_v58, %v14628_v49  ;;  %v17414_v58 = vld [vmem:[#allocation26_spill] sm:$0xff] }
 0x3c6   : > { %v17416_v39 = vpack.c.bf16 %v17414_v58, %v17415_v54  ;;  %v17421_v54 = vld [vmem:[#allocation30_spill] sm:$0xff] }
 0x3c7   : > { %v17422_v58 = vpack.c.bf16 %v17420_v42, %v17421_v54  ;;  %v12448_v42 = vld [vmem:[#allocation8 + $0x198] ss:$12 sps:$4 sm:$0xff]   ;;  %v12452_v54 = vld [vmem:[#allocation8 + $0x1a0] ss:$12 sps:$4 sm:$0xff]  }
 0x3cb   : > { %4220 = vmatmul.mubr.bf16.gmra.mrb[176].mxu0 %v13587_v63  ;;  %4606 = vmatmul.mubr.bf16.gmra.mrb[176].mxu1 %v13587_v63  ;;  %v4923_v63 = vpack.i.b16 %v14637_v0, %v14637_v0 }
 0x3cc   : > { %4229 = vmatprep.mubr.bf16.mxu0 %v17232_v41  ;;  %4615 = vmatprep.mubr.bf16.mxu1 %v17232_v41 }
 0x3cd   : > { %v14647_v35 = vrot.slane %v4923_v63, %v14642_v25 }
 0x3cf   : > { %v5000_v63 = vadd.bf16 %v14647_v35, %v17416_v39  ;;  %v5012_v39 = vadd.bf16 %v14647_v35, %v17422_v58  ;;  %v17427_v58 = vld [vmem:[#allocation38_spill] sm:$0xff] }
 0x3d1   : > { %v5192_v24 = vmax.bf16 %v17232_v41, %v5000_v63  ;;  %v12445_v63 = vld [vmem:[#allocation8 + $0x180] ss:$12 sps:$4 sm:$0xff]   ;;  %v5204_v10 = vmax.bf16 %v17232_v41, %v5012_v39 }
 0x3d3   : > { %4230 = vmatmul.mubr.bf16.gmra.mrb[180].mxu0 %v13595_v11  ;;  %4616 = vmatmul.mubr.bf16.gmra.mrb[180].mxu1 %v13595_v11  ;;  %v4916_v11 = vpack.i.b16 %v14650_v43, %v14650_v43 }
 0x3d4   : > { %4239 = vmatprep.mubr.bf16.mxu0 %v17232_v41  ;;  %4625 = vmatprep.mubr.bf16.mxu1 %v17232_v41 }
 0x3d5   : > { %v14663_v9 = vrot.slane %v4916_v11, %v14642_v25 }
 0x3db   : > { %4240 = vmatmul.mubr.bf16.gmra.mrb[184].mxu0 %v13603_v26  ;;  %4626 = vmatmul.mubr.bf16.gmra.mrb[184].mxu1 %v13603_v26  ;;  %v17417_v26 = vld [vmem:[#allocation24_spill] sm:$0xff] }
 0x3dc   : > { %4249 = vmatprep.mubr.bf16.mxu0 %v17232_v41  ;;  %4635 = vmatprep.mubr.bf16.mxu1 %v17232_v41  ;;  %v17419_v59 = vpack.c.bf16 %v17417_v26, %v17418_v13  ;;  %v17423_v13 = vld [vmem:[#allocation32_spill] sm:$0xff] }
 0x3de   : > { %v4999_v5 = vadd.bf16 %v14663_v9, %v17419_v59 }
 0x3e0   : > { %v5191_v11 = vmax.bf16 %v17232_v41, %v4999_v5  ;;  %v17426_v5 = vld [vmem:[#allocation42_spill] sm:$0xff] }
 0x3e1   : > { %v17428_v53 = vpack.c.bf16 %v17426_v5, %v17427_v58  ;;  %v17433_v58 = vld [vmem:[#allocation46_spill] sm:$0xff] }
 0x3e3   : > { %4250 = vmatmul.mubr.bf16.gmra.mrb[188].mxu0 %v13611_v33  ;;  %4636 = vmatmul.mubr.bf16.gmra.mrb[188].mxu1 %v13611_v33  ;;  %v12451_v33 = vld [vmem:[#allocation8 + $0x260] ss:$12 sps:$4 sm:$0xff]   ;;  %v5024_v39 = vadd.bf16 %v14647_v35, %v17428_v53 }
 0x3e4   : > { %7431 = vmatprep.mubr.bf16.mxu0 %v5192_v24  ;;  %8589 = vmatprep.mubr.bf16.mxu1 %v5192_v24  ;;  %v17424_v24 = vld [vmem:[#allocation28_spill] sm:$0xff] }
 0x3e5   : > { %v17425_v59 = vpack.c.bf16 %v17423_v13, %v17424_v24  ;;  %v12453_v13 = vld [vmem:[#allocation8 + $0x1b0] ss:$12 sps:$4 sm:$0xff]   ;;  %v12460_v24 = vld [vmem:[#allocation8 + $0x1b8] ss:$12 sps:$4 sm:$0xff]  }
 0x3e6   : > { %v17430_v53 = vld [vmem:[#allocation36_spill] sm:$0xff] }
 0x3e7   : > { %v5011_v26 = vadd.bf16 %v14663_v9, %v17425_v59  ;;  %v12467_v59 = vld [vmem:[#allocation8 + $0x290] ss:$12 sps:$4 sm:$0xff]  }
 0x3eb   : > { %7432 = vmatmul.mubr.bf16.vlgmr.msra.gmra.mrb[192].mxu0 %v5191_v11  ;;  %8590 = vmatmul.mubr.bf16.vlgmr.msra.gmra.mrb[192].mxu1 %v5191_v11  ;;  %v12459_v11 = vld [vmem:[#allocation8 + $0x278] ss:$12 sps:$4 sm:$0xff]  }
 0x3ec   : > { %7441 = vmatprep.mubr.bf16.mxu0 %v5204_v10  ;;  %8597 = vmatprep.mubr.bf16.mxu1 %v5204_v10  ;;  %v5203_v10 = vmax.bf16 %v17232_v41, %v5011_v26  ;;  %v12456_v26 = vld [vmem:[#allocation8 + $0x1c8] ss:$12 sps:$4 sm:$0xff]  }
 0x3ed   : > { %10566 = vmatpush3.bf16.msra.mxu1 %v12444_v3  ;;  %7593 = vmatpush1.bf16.msra.mxu0 %v12445_v63  ;;  %v5216_v3 = vmax.bf16 %v17232_v41, %v5024_v39  ;;  %v12458_v63 = vld [vmem:[#allocation8 + $0x1cc] ss:$12 sps:$4 sm:$0xff]  }
 0x3ee   : > { %7594 = vmatprep.subr.bf16.mxu0 %v12450_v15  ;;  %10567 = vmatprep.subr.bf16.mxu1 %v12451_v33  ;;  %v17429_v15 = vld [vmem:[#allocation40_spill] sm:$0xff] }
 0x3ef   : > { %v17431_v33 = vpack.c.bf16 %v17429_v15, %v17430_v53  ;;  %v12476_v15 = vld [vmem:[#allocation8 + $0x1e8] ss:$12 sps:$4 sm:$0xff]   ;;  %v12483_v53 = vld [vmem:[#allocation8 + $0x2c0] ss:$12 sps:$4 sm:$0xff]  }
 0x3f1   : > { %7595 = vmatpush1.bf16.msra.mxu0 %v12448_v42  ;;  %10568 = vmatpush3.bf16.msra.mxu1 %v12452_v54  ;;  %v5023_v5 = vadd.bf16 %v14663_v9, %v17431_v33  ;;  %v12468_v42 = vld [vmem:[#allocation8 + $0x1d0] ss:$12 sps:$4 sm:$0xff]  }
 0x3f2   : > { %7596 = vmatprep.subr.bf16.mxu0 %v12455_v56  ;;  %10569 = vmatprep.subr.bf16.mxu1 %v12459_v11  ;;  %v17432_v54 = vld [vmem:[#allocation50_spill] sm:$0xff]  ;;  %v17436_v33 = vld [vmem:[#allocation44_spill] sm:$0xff] }
 0x3f3   : > { %7442 = vmatmul.mubr.bf16.gmra.mrb[196].mxu0 %v5203_v10  ;;  %8598 = vmatmul.mubr.bf16.gmra.mrb[196].mxu1 %v5203_v10  ;;  %v17434_v39 = vpack.c.bf16 %v17432_v54, %v17433_v58  ;;  %v12463_v11 = vld [vmem:[#allocation8 + $0x1e4] ss:$12 sps:$4 sm:$0xff]   ;;  %v12475_v10 = vld [vmem:[#allocation8 + $0x2a8] ss:$12 sps:$4 sm:$0xff]  }
 0x3f4   : > { %7451 = vmatprep.mubr.bf16.mxu0 %v5216_v3  ;;  %8605 = vmatprep.mubr.bf16.mxu1 %v5216_v3  ;;  %v5215_v3 = vmax.bf16 %v17232_v41, %v5023_v5  ;;  %v12464_v5 = vld [vmem:[#allocation8 + $0x1f8] ss:$12 sps:$4 sm:$0xff]   ;;  %v17439_v58 = vld [vmem:[#allocation54_spill] sm:$0xff] }
 0x3f5   : > { %7597 = vmatpush1.bf16.msra.mxu0 %v12453_v13  ;;  %10570 = vmatpush3.bf16.msra.mxu1 %v12460_v24  ;;  %v5036_v56 = vadd.bf16 %v14647_v35, %v17434_v39  ;;  %v12466_v24 = vld [vmem:[#allocation8 + $0x1fc] ss:$12 sps:$4 sm:$0xff]  }
 0x3f6   : > { %7598 = vmatprep.subr.bf16.mxu0 %v12458_v63  ;;  %10571 = vmatprep.subr.bf16.mxu1 %v12467_v59  ;;  %v17435_v63 = vld [vmem:[#allocation48_spill] sm:$0xff] }
 0x3f7   : > { %v5228_v13 = vmax.bf16 %v17232_v41, %v5036_v56  ;;  %v17437_v59 = vpack.c.bf16 %v17435_v63, %v17436_v33  ;;  %v12492_v63 = vld [vmem:[#allocation8 + $0x218] ss:$12 sps:$4 sm:$0xff]   ;;  %v12499_v33 = vld [vmem:[#allocation8 + $0x2f0] ss:$12 sps:$4 sm:$0xff]  }
 0x3f9   : > { %7599 = vmatpush1.bf16.msra.mxu0 %v12456_v26  ;;  %10572 = vmatpush3.bf16.msra.mxu1 %v12468_v42  ;;  %v5035_v54 = vadd.bf16 %v14663_v9, %v17437_v59  ;;  %v12484_v26 = vld [vmem:[#allocation8 + $0x200] ss:$12 sps:$4 sm:$0xff]  }
 0x3fa   : > { %7600 = vmatprep.subr.bf16.mxu0 %v12463_v11  ;;  %10573 = vmatprep.subr.bf16.mxu1 %v12475_v10  ;;  %v17438_v42 = vld [vmem:[#allocation58_spill] sm:$0xff]  ;;  %v12471_v11 = vld [vmem:[#allocation8 + $0x214] ss:$12 sps:$4 sm:$0xff]   ;;  %v12491_v10 = vld [vmem:[#allocation8 + $0x2d8] ss:$12 sps:$4 sm:$0xff]  }
 0x3fb   : > { %7452 = vmatmul.mubr.bf16.gmra.mrb[200].mxu0 %v5215_v3  ;;  %8606 = vmatmul.mubr.bf16.gmra.mrb[200].mxu1 %v5215_v3  ;;  %v17440_v39 = vpack.c.bf16 %v17438_v42, %v17439_v58  ;;  %v5227_v3 = vmax.bf16 %v17232_v41, %v5035_v54  ;;  %v17442_v59 = vld [vmem:[#allocation52_spill] sm:$0xff]  ;;  %v12472_v54 = vld [vmem:[#allocation8 + $0x228] ss:$12 sps:$4 sm:$0xff]   ;;  %v17445_v58 = vld [vmem:[#allocation62_spill] sm:$0xff] }
 0x3fc   : > { %7461 = vmatprep.mubr.bf16.mxu0 %v5228_v13  ;;  %8613 = vmatprep.mubr.bf16.mxu1 %v5228_v13  ;;  %v12469_v13 = vld [vmem:[#allocation8 + $0x210] ss:$12 sps:$4 sm:$0xff]  }
 0x3fd   : > { %7601 = vmatpush1.bf16.msra.mxu0 %v12461_v55  ;;  %10574 = vmatpush3.bf16.msra.mxu1 %v12476_v15  ;;  %v5048_v56 = vadd.bf16 %v14647_v35, %v17440_v39  ;;  %v12474_v15 = vld [vmem:[#allocation8 + $0x22c] ss:$12 sps:$4 sm:$0xff]  }
 0x3fe   : > { %7602 = vmatprep.subr.bf16.mxu0 %v12466_v24  ;;  %10575 = vmatprep.subr.bf16.mxu1 %v12483_v53  ;;  %v17441_v24 = vld [vmem:[#allocation56_spill] sm:$0xff] }
 0x3ff   : > { %v5240_v55 = vmax.bf16 %v17232_v41, %v5048_v56  ;;  %v17443_v53 = vpack.c.bf16 %v17441_v24, %v17442_v59  ;;  %v17448_v59 = vld [vmem:[#allocation60_spill] sm:$0xff] }
 0x401   : > { %7603 = vmatpush1.bf16.msra.mxu0 %v12464_v5  ;;  %10576 = vmatpush3.bf16.msra.mxu1 %v12484_v26  ;;  %v5047_v42 = vadd.bf16 %v14663_v9, %v17443_v53  ;;  %v12500_v5 = vld [vmem:[#allocation8 + $0x230] ss:$12 sps:$4 sm:$0xff]   ;;  %v12480_v53 = vld [vmem:[#allocation8 + $0x258] ss:$12 sps:$4 sm:$0xff]  }
 0x402   : > { %7604 = vmatprep.subr.bf16.mxu0 %v12471_v11  ;;  %10577 = vmatprep.subr.bf16.mxu1 %v12491_v10  ;;  %v17444_v26 = vld [vmem:[#allocation66_spill] sm:$0xff]  ;;  %v12507_v10 = vld [vmem:[#allocation8 + $0x3c8] ss:$12 sps:$4 sm:$0xff]  }
 0x403   : > { %7462 = vmatmul.mubr.bf16.gmra.mrb[204].mxu0 %v5227_v3  ;;  %8614 = vmatmul.mubr.bf16.gmra.mrb[204].mxu1 %v5227_v3  ;;  %v17446_v39 = vpack.c.bf16 %v17444_v26, %v17445_v58  ;;  %v12479_v11 = vld [vmem:[#allocation8 + $0x244] ss:$12 sps:$4 sm:$0xff]   ;;  %v5239_v3 = vmax.bf16 %v17232_v41, %v5047_v42  ;;  %v12487_v58 = vld [vmem:[#allocation8 + $0x274] ss:$12 sps:$4 sm:$0xff]  }
 0x404   : > { %7471 = vmatprep.mubr.bf16.mxu0 %v5240_v55  ;;  %8621 = vmatprep.mubr.bf16.mxu1 %v5240_v55  ;;  %v12477_v55 = vld [vmem:[#allocation8 + $0x240] ss:$12 sps:$4 sm:$0xff]  }
 0x405   : > { %7605 = vmatpush1.bf16.msra.mxu0 %v12469_v13  ;;  %10578 = vmatpush3.bf16.msra.mxu1 %v12492_v63  ;;  %v5060_v56 = vadd.bf16 %v14647_v35, %v17446_v39  ;;  %v12482_v13 = vld [vmem:[#allocation8 + $0x25c] ss:$12 sps:$4 sm:$0xff]   ;;  %v17450_v42 = vld [vmem:[#allocation74_spill] sm:$0xff] }
 0x406   : > { %7606 = vmatprep.subr.bf16.mxu0 %v12474_v15  ;;  %10579 = vmatprep.subr.bf16.mxu1 %v12499_v33  ;;  %v17447_v63 = vld [vmem:[#allocation64_spill] sm:$0xff] }
 0x407   : > { %v5252_v24 = vmax.bf16 %v17232_v41, %v5060_v56  ;;  %v17449_v15 = vpack.c.bf16 %v17447_v63, %v17448_v59  ;;  %v12485_v56 = vld [vmem:[#allocation8 + $0x270] ss:$12 sps:$4 sm:$0xff]  }
 0x408   : > { %v17456_v59 = vld [vmem:[#allocation82_spill] sm:$0xff] }
 0x409   : > { %7607 = vmatpush1.bf16.msra.mxu0 %v12472_v54  ;;  %10580 = vmatpush3.bf16.msra.mxu1 %v12500_v5  ;;  %v5059_v33 = vadd.bf16 %v14663_v9, %v17449_v15  ;;  %v17451_v54 = vld [vmem:[#allocation70_spill] sm:$0xff] }
 0x40a   : > { %7608 = vmatprep.subr.bf16.mxu0 %v12479_v11  ;;  %10677 = vmatprep.subr.bf16.mxu1 %v12507_v10  ;;  %v17452_v26 = vpack.c.bf16 %v17450_v42, %v17451_v54  ;;  %v12490_v10 = vld [vmem:[#allocation8 + $0x28c] ss:$12 sps:$4 sm:$0xff]   ;;  %v12495_v42 = vld [vmem:[#allocation8 + $0x2a4] ss:$12 sps:$4 sm:$0xff]  }
 0x40b   : > { %7472 = vmatmul.mubr.bf16.gmra.mrb[208].mxu0 %v5239_v3  ;;  %8622 = vmatmul.mubr.bf16.gmra.mrb[208].mxu1 %v5239_v3  ;;  %v5251_v39 = vmax.bf16 %v17232_v41, %v5059_v33  ;;  %v17453_v3 = vld [vmem:[#allocation72_spill] sm:$0xff]  ;;  %v17457_v15 = vld [vmem:[#allocation78_spill] sm:$0xff] }
 0x40c   : > { %7481 = vmatprep.mubr.bf16.mxu0 %v5252_v24  ;;  %8629 = vmatprep.mubr.bf16.mxu1 %v5252_v24  ;;  %v5072_v5 = vadd.bf16 %v14647_v35, %v17452_v26  ;;  %v17458_v33 = vpack.c.bf16 %v17456_v59, %v17457_v15  ;;  %v12493_v26 = vld [vmem:[#allocation8 + $0x2a0] ss:$12 sps:$4 sm:$0xff]  }
 0x40d   : > { %7609 = vmatpush1.bf16.msra.mxu0 %v12477_v55  ;;  %v17454_v55 = vld [vmem:[#allocation68_spill] sm:$0xff] }
 0x40e   : > { %7610 = vmatprep.subr.bf16.mxu0 %v12482_v13  ;;  %v5264_v11 = vmax.bf16 %v17232_v41, %v5072_v5  ;;  %v17455_v24 = vpack.c.bf16 %v17453_v3, %v17454_v55  ;;  %v12488_v13 = vld [vmem:[#allocation8 + $0x288] ss:$12 sps:$4 sm:$0xff]   ;;  %v17462_v55 = vld [vmem:[#allocation90_spill] sm:$0xff] }
 0x40f   : > { %v12503_v59 = vld [vmem:[#allocation8 + $0x2d4] ss:$12 sps:$4 sm:$0xff]  }
 0x410   : > { %v5071_v63 = vadd.bf16 %v14663_v9, %v17455_v24  ;;  %v17463_v24 = vld [vmem:[#allocation86_spill] sm:$0xff] }
 0x411   : > { %7611 = vmatpush1.bf16.msra.mxu0 %v12480_v53  ;;  %v5084_v53 = vadd.bf16 %v14647_v35, %v17458_v33  ;;  %v12501_v33 = vld [vmem:[#allocation8 + $0x2d0] ss:$12 sps:$4 sm:$0xff]  }
 0x412   : > { %7612 = vmatprep.subr.bf16.mxu0 %v12487_v58  ;;  %v5263_v54 = vmax.bf16 %v17232_v41, %v5071_v63  ;;  %v12498_v58 = vld [vmem:[#allocation8 + $0x2bc] ss:$12 sps:$4 sm:$0xff]   ;;  %v17464_v63 = vpack.c.bf16 %v17462_v55, %v17463_v24  ;;  %v12511_v55 = vld [vmem:[#allocation8 + $0x304] ss:$12 sps:$4 sm:$0xff]  }
 0x413   : > { %7482 = vmatmul.mubr.bf16.gmra.mrb[212].mxu0 %v5251_v39  ;;  %8630 = vmatmul.mubr.bf16.gmra.mrb[212].mxu1 %v5251_v39  ;;  %v5276_v5 = vmax.bf16 %v17232_v41, %v5084_v53  ;;  %v17459_v39 = vld [vmem:[#allocation80_spill] sm:$0xff] }
 0x414   : > { %7491 = vmatprep.mubr.bf16.mxu0 %v5264_v11  ;;  %8637 = vmatprep.mubr.bf16.mxu1 %v5264_v11 }
 0x415   : > { %7613 = vmatpush1.bf16.msra.mxu0 %v12485_v56  ;;  %v17460_v56 = vld [vmem:[#allocation76_spill] sm:$0xff] }
 0x416   : > { %7614 = vmatprep.subr.bf16.mxu0 %v12490_v10  ;;  %v17461_v11 = vpack.c.bf16 %v17459_v39, %v17460_v56  ;;  %v12496_v10 = vld [vmem:[#allocation8 + $0x2b8] ss:$12 sps:$4 sm:$0xff]   ;;  %v17468_v56 = vld [vmem:[#allocation98_spill] sm:$0xff] }
 0x418   : > { %v5083_v3 = vadd.bf16 %v14663_v9, %v17461_v11  ;;  %v17469_v11 = vld [vmem:[#allocation94_spill] sm:$0xff] }
 0x419   : > { %7615 = vmatpush1.bf16.msra.mxu0 %v12488_v13  ;;  %v5096_v13 = vadd.bf16 %v14647_v35, %v17464_v63 }
 0x41a   : > { %7616 = vmatprep.subr.bf16.mxu0 %v12495_v42  ;;  %v5275_v15 = vmax.bf16 %v17232_v41, %v5083_v3  ;;  %v12506_v42 = vld [vmem:[#allocation8 + $0x2ec] ss:$12 sps:$4 sm:$0xff]   ;;  %v17470_v3 = vpack.c.bf16 %v17468_v56, %v17469_v11  ;;  %v17478_v56 = vld [vmem:[#allocation100_spill] sm:$0xff] }
 0x41b   : > { %7492 = vmatmul.mubr.bf16.gmra.mrb[216].mxu0 %v5263_v54  ;;  %8638 = vmatmul.mubr.bf16.gmra.mrb[216].mxu1 %v5263_v54  ;;  %v5288_v53 = vmax.bf16 %v17232_v41, %v5096_v13  ;;  %v17465_v54 = vld [vmem:[#allocation88_spill] sm:$0xff] }
 0x41c   : > { %7501 = vmatprep.mubr.bf16.mxu0 %v5276_v5  ;;  %8645 = vmatprep.mubr.bf16.mxu1 %v5276_v5  ;;  %v17471_v13 = vld [vmem:[#allocation96_spill] sm:$0xff] }
 0x41d   : > { %7617 = vmatpush1.bf16.msra.mxu0 %v12493_v26  ;;  %v17466_v26 = vld [vmem:[#allocation84_spill] sm:$0xff] }
 0x41e   : > { %7618 = vmatprep.subr.bf16.mxu0 %v12498_v58  ;;  %v17467_v5 = vpack.c.bf16 %v17465_v54, %v17466_v26  ;;  %v12504_v58 = vld [vmem:[#allocation8 + $0x2e8] ss:$12 sps:$4 sm:$0xff]   ;;  %v17475_v54 = vld [vmem:[#allocation102_spill] sm:$0xff] }
 0x420   : > { %v5095_v39 = vadd.bf16 %v14663_v9, %v17467_v5 }
 0x421   : > { %7619 = vmatpush1.bf16.msra.mxu0 %v12496_v10  ;;  %v5108_v10 = vadd.bf16 %v14647_v35, %v17470_v3 }
 0x422   : > { %7620 = vmatprep.subr.bf16.mxu0 %v12503_v59  ;;  %v5287_v24 = vmax.bf16 %v17232_v41, %v5095_v39  ;;  %v17472_v59 = vld [vmem:[#allocation92_spill] sm:$0xff] }
 0x423   : > { %7502 = vmatmul.mubr.bf16.gmra.mrb[220].mxu0 %v5275_v15  ;;  %8646 = vmatmul.mubr.bf16.gmra.mrb[220].mxu1 %v5275_v15  ;;  %v5300_v63 = vmax.bf16 %v17232_v41, %v5108_v10  ;;  %v17473_v15 = vpack.c.bf16 %v17471_v13, %v17472_v59  ;;  %v17480_v10 = vld [vmem:[#allocation114_spill] sm:$0xff] }
 0x424   : > { %7511 = vmatprep.mubr.bf16.mxu0 %v5288_v53  ;;  %8653 = vmatprep.mubr.bf16.mxu1 %v5288_v53  ;;  %v17474_v53 = vld [vmem:[#allocation106_spill] sm:$0xff] }
 0x425   : > { %7621 = vmatpush1.bf16.msra.mxu0 %v12501_v33  ;;  %v5107_v33 = vadd.bf16 %v14663_v9, %v17473_v15  ;;  %v17476_v26 = vpack.c.bf16 %v17474_v53, %v17475_v54  ;;  %v17483_v15 = vld [vmem:[#allocation112_spill] sm:$0xff] }
 0x426   : > { %7622 = vmatprep.subr.bf16.mxu0 %v12506_v42 }
 0x427   : > { %v5120_v42 = vadd.bf16 %v14647_v35, %v17476_v26  ;;  %v5299_v5 = vmax.bf16 %v17232_v41, %v5107_v33  ;;  %v17484_v33 = vld [vmem:[#allocation108_spill] sm:$0xff]  ;;  %v17486_v26 = vpack.c.bf16 %v14013_v7, %v14001_v62 }
 0x428   : > { %v17485_v53 = vpack.c.bf16 %v17483_v15, %v17484_v33  ;;  %v17491_v15 = vld [vmem:[#allocation119_spill] sm:$0xff]  ;;  %v17492_v33 = vld [vmem:[#allocation116_spill] sm:$0xff] }
 0x429   : > { %7623 = vmatpush1.bf16.msra.mxu0 %v12504_v58  ;;  %v5312_v39 = vmax.bf16 %v17232_v41, %v5120_v42  ;;  %v17477_v58 = vld [vmem:[#allocation104_spill] sm:$0xff]  ;;  %v5144_v42 = vadd.bf16 %v14647_v35, %v17486_v26 }
 0x42a   : > { %7785 = vmatprep.subr.bf16.mxu0 %v12511_v55  ;;  %v17479_v11 = vpack.c.bf16 %v17477_v58, %v17478_v56  ;;  %v17481_v55 = vld [vmem:[#allocation110_spill] sm:$0xff]  ;;  %v5131_v54 = vadd.bf16 %v14663_v9, %v17485_v53  ;;  %v17493_v53 = vpack.c.bf16 %v17491_v15, %v17492_v33 }
 0x42b   : > { %7512 = vmatmul.mubr.bf16.gmra.mrb[224].mxu0 %v5287_v24  ;;  %8654 = vmatmul.mubr.bf16.gmra.mrb[224].mxu1 %v5287_v24  ;;  %v17482_v24 = vpack.c.bf16 %v17480_v10, %v17481_v55 }
 0x42c   : > { %7521 = vmatprep.mubr.bf16.mxu0 %v5300_v63  ;;  %8661 = vmatprep.mubr.bf16.mxu1 %v5300_v63  ;;  %v5119_v3 = vadd.bf16 %v14663_v9, %v17479_v11  ;;  %v5143_v26 = vadd.bf16 %v14663_v9, %v17493_v53 }
 0x42d   : > { %v5132_v63 = vadd.bf16 %v14647_v35, %v17482_v24  ;;  %v5323_v24 = vmax.bf16 %v17232_v41, %v5131_v54  ;;  %v17494_v54 = vpack.c.bf16 %v14041_v27, %v14029_v18  ;;  %v17503_v18 = vpack.c.bf16 %v14033_v20, %v14025_v21  ;;  %v17515_v21 = vld [vmem:[#allocation130_spill] sm:$0xff] }
 0x42e   : > { %v5311_v13 = vmax.bf16 %v17232_v41, %v5119_v3  ;;  %v5335_v53 = vmax.bf16 %v17232_v41, %v5143_v26 }
 0x42f   : > { %v5324_v59 = vmax.bf16 %v17232_v41, %v5132_v63  ;;  %v5156_v62 = vadd.bf16 %v14647_v35, %v17494_v54  ;;  %v5155_v15 = vadd.bf16 %v14663_v9, %v17503_v18 }
 0x431   : > { %v5347_v18 = vmax.bf16 %v17232_v41, %v5155_v15 }
 0x433   : > { %7522 = vmatmul.mubr.bf16.gmra.mrb[228].mxu0 %v5299_v5  ;;  %8662 = vmatmul.mubr.bf16.gmra.mrb[228].mxu1 %v5299_v5 }
 0x434   : > { %7531 = vmatprep.mubr.bf16.mxu0 %v5312_v39  ;;  %8669 = vmatprep.mubr.bf16.mxu1 %v5312_v39 }
 0x43b   : > { %7532 = vmatmul.mubr.bf16.gmra.mrb[232].mxu0 %v5311_v13  ;;  %8670 = vmatmul.mubr.bf16.gmra.mrb[232].mxu1 %v5311_v13 }
 0x43c   : > { %7541 = vmatprep.mubr.bf16.mxu0 %v5324_v59  ;;  %8677 = vmatprep.mubr.bf16.mxu1 %v5324_v59  ;;  %v5336_v59 = vmax.bf16 %v17232_v41, %v5144_v42 }
 0x43e   : > { %v14786_v5 = vpop.f32.mrb[128].mxu0  ;;  %v14788_v39 = vpop.f32.mrb[128].mxu1 }
 0x43f   : > { %17487 = vst [vmem:[#allocation26_spill] sm:$0xff] %v14788_v39  ;;  %v14790_v58 = vpop.f32.mrb[129].mxu0  ;;  %v14792_v56 = vpop.f32.mrb[129].mxu1 }
 0x440   : > { %17488 = vst [vmem:[#allocation22_spill] sm:$0xff] %v14792_v56  ;;  %v14794_v11 = vpop.f32.mrb[130].mxu0  ;;  %v14796_v3 = vpop.f32.mrb[130].mxu1 }
 0x441   : > { %17489 = vst [vmem:[#allocation24_spill] sm:$0xff] %v14796_v3  ;;  %v14802_v7 = vpop.f32.mrb[131].mxu0  ;;  %v14804_v55 = vpop.f32.mrb[131].mxu1  ;;  %v5348_v3 = vmax.bf16 %v17232_v41, %v5156_v62 }
 0x442   : > { %17490 = vst [vmem:[#allocation20_spill] sm:$0xff] %v14804_v55 }
 0x443   : > { %7542 = vmatmul.mubr.bf16.gmra.mrb[236].mxu0 %v5323_v24  ;;  %8678 = vmatmul.mubr.bf16.gmra.mrb[236].mxu1 %v5323_v24 }
 0x444   : > { %7551 = vmatprep.mubr.bf16.mxu0 %v5336_v59  ;;  %8685 = vmatprep.mubr.bf16.mxu1 %v5336_v59 }
 0x446   : > { %v14820_v10 = vpop.f32.mrb[132].mxu0  ;;  %v14822_v63 = vpop.f32.mrb[132].mxu1 }
 0x447   : > { %17495 = vst [vmem:[#allocation34_spill] sm:$0xff] %v14820_v10  ;;  %17496 = vst [vmem:[#allocation30_spill] sm:$0xff] %v14822_v63  ;;  %v14824_v13 = vpop.f32.mrb[133].mxu0  ;;  %v14826_v42 = vpop.f32.mrb[133].mxu1  ;;  %v17504_v63 = vld [vmem:[#allocation132_spill] sm:$0xff]  ;;  %v17572_v10 = vld [vmem:[#allocation51_spill] sm:$0xff] }
 0x448   : > { %17497 = vst [vmem:[#allocation32_spill] sm:$0xff] %v14824_v13  ;;  %17498 = vst [vmem:[#allocation28_spill] sm:$0xff] %v14826_v42  ;;  %v14828_v24 = vpop.f32.mrb[134].mxu0  ;;  %v14830_v59 = vpop.f32.mrb[134].mxu1 }
 0x449   : > { %17499 = vst [vmem:[#allocation42_spill] sm:$0xff] %v14828_v24  ;;  %17500 = vst [vmem:[#allocation38_spill] sm:$0xff] %v14830_v59  ;;  %v14836_v27 = vpop.f32.mrb[135].mxu0  ;;  %v14838_v33 = vpop.f32.mrb[135].mxu1  ;;  %v17505_v59 = vld [vmem:[#allocation128_spill] sm:$0xff] }
 0x44a   : > { %17501 = vst [vmem:[#allocation40_spill] sm:$0xff] %v14836_v27  ;;  %17502 = vst [vmem:[#allocation36_spill] sm:$0xff] %v14838_v33  ;;  %v17506_v26 = vpack.c.bf16 %v17504_v63, %v17505_v59 }
 0x44b   : > { %7552 = vmatmul.mubr.bf16.gmra.mrb[240].mxu0 %v5335_v53  ;;  %8686 = vmatmul.mubr.bf16.gmra.mrb[240].mxu1 %v5335_v53 }
 0x44c   : > { %7561 = vmatprep.mubr.bf16.mxu0 %v5348_v3  ;;  %8693 = vmatprep.mubr.bf16.mxu1 %v5348_v3  ;;  %v5168_v56 = vadd.bf16 %v14647_v35, %v17506_v26  ;;  %v4889_v26 = vcombine.high %v14637_v0, %v14637_v0  ;;  %v17518_v0 = vpack.c.bf16 %v14097_v57, %v14085_v28 }
 0x44e   : > { %v14854_v54 = vpop.f32.mrb[136].mxu0  ;;  %v14856_v55 = vpop.f32.mrb[136].mxu1  ;;  %v5360_v20 = vmax.bf16 %v17232_v41, %v5168_v56  ;;  %v5180_v42 = vadd.bf16 %v14647_v35, %v17518_v0 }
 0x44f   : > { %17507 = vst [vmem:[#allocation50_spill] sm:$0xff] %v14854_v54  ;;  %17508 = vst [vmem:[#allocation46_spill] sm:$0xff] %v14856_v55  ;;  %v14858_v39 = vpop.f32.mrb[137].mxu0  ;;  %v14860_v62 = vpop.f32.mrb[137].mxu1  ;;  %v17516_v55 = vld [vmem:[#allocation126_spill] sm:$0xff]  ;;  %v4937_v54 = vpack.i.b16 %v4889_v26, %v4889_v26 }
 0x450   : > { %17509 = vst [vmem:[#allocation48_spill] sm:$0xff] %v14858_v39  ;;  %17510 = vst [vmem:[#allocation44_spill] sm:$0xff] %v14860_v62  ;;  %v14862_v53 = vpop.f32.mrb[138].mxu0  ;;  %v14864_v3 = vpop.f32.mrb[138].mxu1  ;;  %v5372_v57 = vmax.bf16 %v17232_v41, %v5180_v42  ;;  %v12515_v39 = vld [vmem:[#allocation8 + $0x3e0] ss:$12 sps:$4 sm:$0xff]  }
 0x451   : > { %17511 = vst [vmem:[#allocation58_spill] sm:$0xff] %v14862_v53  ;;  %17512 = vst [vmem:[#allocation54_spill] sm:$0xff] %v14864_v3  ;;  %v14870_v63 = vpop.f32.mrb[139].mxu0  ;;  %v14872_v59 = vpop.f32.mrb[139].mxu1  ;;  %v17517_v3 = vpack.c.bf16 %v17515_v21, %v17516_v55  ;;  %v4887_v55 = vcombine.high %v14650_v43, %v14650_v43  ;;  %v14914_v26 = vrot.slane %v4937_v54, %v14642_v25  ;;  %v17530_v54 = vld [vmem:[#allocation27_spill] sm:$0xff] }
 0x452   : > { %17513 = vst [vmem:[#allocation56_spill] sm:$0xff] %v14870_v63  ;;  %17514 = vst [vmem:[#allocation52_spill] sm:$0xff] %v14872_v59  ;;  %v12520_v63 = vld [vmem:[#allocation8 + $0x348] ss:$12 sps:$4 sm:$0xff]  }
 0x453   : > { %7562 = vmatmul.mubr.bf16.gmra.mrb[244].mxu0 %v5347_v18  ;;  %8694 = vmatmul.mubr.bf16.gmra.mrb[244].mxu1 %v5347_v18  ;;  %v5167_v15 = vadd.bf16 %v14663_v9, %v17517_v3  ;;  %v4930_v28 = vpack.i.b16 %v4887_v55, %v4887_v55 }
 0x454   : > { %7571 = vmatprep.mubr.bf16.mxu0 %v5360_v20  ;;  %8701 = vmatprep.mubr.bf16.mxu1 %v5360_v20 }
 0x455   : > { %v5359_v21 = vmax.bf16 %v17232_v41, %v5167_v15 }
 0x456   : > { %v14890_v53 = vpop.f32.mrb[140].mxu0  ;;  %v14892_v33 = vpop.f32.mrb[140].mxu1 }
 0x457   : > { %17519 = vst [vmem:[#allocation66_spill] sm:$0xff] %v14890_v53  ;;  %17520 = vst [vmem:[#allocation62_spill] sm:$0xff] %v14892_v33  ;;  %v14894_v56 = vpop.f32.mrb[141].mxu0  ;;  %v14896_v18 = vpop.f32.mrb[141].mxu1  ;;  %v17527_v33 = vld [vmem:[#allocation137_spill] sm:$0xff]  ;;  %v17531_v53 = vld [vmem:[#allocation23_spill] sm:$0xff] }
 0x458   : > { %17521 = vst [vmem:[#allocation64_spill] sm:$0xff] %v14894_v56  ;;  %17522 = vst [vmem:[#allocation60_spill] sm:$0xff] %v14896_v18  ;;  %v14898_v20 = vpop.f32.mrb[142].mxu0  ;;  %v14900_v62 = vpop.f32.mrb[142].mxu1 }
 0x459   : > { %17523 = vst [vmem:[#allocation74_spill] sm:$0xff] %v14898_v20  ;;  %17524 = vst [vmem:[#allocation70_spill] sm:$0xff] %v14900_v62  ;;  %v14908_v35 = vpop.f32.mrb[143].mxu0  ;;  %v14910_v3 = vpop.f32.mrb[143].mxu1  ;;  %v17528_v62 = vld [vmem:[#allocation134_spill] sm:$0xff]  ;;  %v17532_v20 = vpack.c.bf16 %v17530_v54, %v17531_v53 }
 0x45a   : > { %17525 = vst [vmem:[#allocation72_spill] sm:$0xff] %v14908_v35  ;;  %17526 = vst [vmem:[#allocation68_spill] sm:$0xff] %v14910_v3  ;;  %v17529_v59 = vpack.c.bf16 %v17527_v33, %v17528_v62  ;;  %v14942_v33 = vrot.slane %v4930_v28, %v14642_v25  ;;  %v17542_v62 = vld [vmem:[#allocation21_spill] sm:$0xff]  ;;  %v17544_v3 = vld [vmem:[#allocation35_spill] sm:$0xff] }
 0x45b   : > { %7572 = vmatmul.mubr.bf16.gmra.mrb[248].mxu0 %v5359_v21  ;;  %8702 = vmatmul.mubr.bf16.gmra.mrb[248].mxu1 %v5359_v21  ;;  %v5002_v0 = vadd.bf16 %v14914_v26, %v17532_v20  ;;  %v12514_v35 = vld [vmem:[#allocation8 + $0x31c] ss:$12 sps:$4 sm:$0xff]  }
 0x45c   : > { %7581 = vmatprep.mubr.bf16.mxu0 %v5372_v57  ;;  %8709 = vmatprep.mubr.bf16.mxu1 %v5372_v57  ;;  %v5179_v15 = vadd.bf16 %v14663_v9, %v17529_v59  ;;  %v17541_v9 = vld [vmem:[#allocation25_spill] sm:$0xff] }
 0x45d   : > { %v5194_v28 = vmax.bf16 %v17232_v41, %v5002_v0 }
 0x45e   : > { %v14929_v56 = vpop.f32.mrb[144].mxu0  ;;  %v14931_v43 = vpop.f32.mrb[144].mxu1  ;;  %v5371_v20 = vmax.bf16 %v17232_v41, %v5179_v15 }
 0x45f   : > { %17533 = vst [vmem:[#allocation82_spill] sm:$0xff] %v14929_v56  ;;  %17534 = vst [vmem:[#allocation78_spill] sm:$0xff] %v14931_v43  ;;  %v14933_v42 = vpop.f32.mrb[145].mxu0  ;;  %v14935_v21 = vpop.f32.mrb[145].mxu1  ;;  %v17543_v43 = vpack.c.bf16 %v17541_v9, %v17542_v62  ;;  %v17545_v56 = vld [vmem:[#allocation31_spill] sm:$0xff] }
 0x460   : > { %17535 = vst [vmem:[#allocation80_spill] sm:$0xff] %v14933_v42  ;;  %17536 = vst [vmem:[#allocation76_spill] sm:$0xff] %v14935_v21  ;;  %v14937_v57 = vpop.f32.mrb[146].mxu0  ;;  %v14939_v55 = vpop.f32.mrb[146].mxu1  ;;  %v17546_v15 = vpack.c.bf16 %v17544_v3, %v17545_v56  ;;  %v12509_v21 = vld [vmem:[#allocation8 + $0x300] ss:$12 sps:$4 sm:$0xff]  }
 0x461   : > { %17537 = vst [vmem:[#allocation90_spill] sm:$0xff] %v14937_v57  ;;  %17538 = vst [vmem:[#allocation86_spill] sm:$0xff] %v14939_v55  ;;  %v14948_v53 = vpop.f32.mrb[147].mxu0  ;;  %v14950_v59 = vpop.f32.mrb[147].mxu1  ;;  %v5001_v55 = vadd.bf16 %v14942_v33, %v17543_v43  ;;  %v17555_v56 = vld [vmem:[#allocation33_spill] sm:$0xff] }
 0x462   : > { %17539 = vst [vmem:[#allocation88_spill] sm:$0xff] %v14948_v53  ;;  %17540 = vst [vmem:[#allocation84_spill] sm:$0xff] %v14950_v59  ;;  %v5014_v57 = vadd.bf16 %v14914_v26, %v17546_v15  ;;  %v12508_v15 = vld [vmem:[#allocation8 + $0x308] ss:$12 sps:$4 sm:$0xff]   ;;  %v12516_v59 = vld [vmem:[#allocation8 + $0x320] ss:$12 sps:$4 sm:$0xff]  }
 0x463   : > { %7582 = vmatmul.mubr.bf16.gmra.mrb[252].mxu0 %v5371_v20  ;;  %8710 = vmatmul.mubr.bf16.gmra.mrb[252].mxu1 %v5371_v20  ;;  %v5193_v9 = vmax.bf16 %v17232_v41, %v5001_v55  ;;  %v17556_v43 = vld [vmem:[#allocation29_spill] sm:$0xff] }
 0x464   : > { %7624 = vmatprep.mubr.bf16.mxu0 %v5194_v28  ;;  %8750 = vmatprep.mubr.bf16.mxu1 %v5194_v28  ;;  %v5206_v55 = vmax.bf16 %v17232_v41, %v5014_v57 }
 0x466   : > { %v14966_v54 = vpop.f32.mrb[148].mxu0  ;;  %v14968_v42 = vpop.f32.mrb[148].mxu1 }
 0x467   : > { %17547 = vst [vmem:[#allocation98_spill] sm:$0xff] %v14966_v54  ;;  %17548 = vst [vmem:[#allocation94_spill] sm:$0xff] %v14968_v42  ;;  %v14970_v18 = vpop.f32.mrb[149].mxu0  ;;  %v14972_v0 = vpop.f32.mrb[149].mxu1  ;;  %v17557_v42 = vpack.c.bf16 %v17555_v56, %v17556_v43  ;;  %v12512_v54 = vld [vmem:[#allocation8 + $0x318] ss:$12 sps:$4 sm:$0xff]  }
 0x468   : > { %17549 = vst [vmem:[#allocation96_spill] sm:$0xff] %v14970_v18  ;;  %17550 = vst [vmem:[#allocation92_spill] sm:$0xff] %v14972_v0  ;;  %v14974_v20 = vpop.f32.mrb[150].mxu0  ;;  %v14976_v28 = vpop.f32.mrb[150].mxu1  ;;  %v17559_v18 = vld [vmem:[#allocation39_spill] sm:$0xff] }
 0x469   : > { %17551 = vst [vmem:[#allocation106_spill] sm:$0xff] %v14974_v20  ;;  %17552 = vst [vmem:[#allocation102_spill] sm:$0xff] %v14976_v28  ;;  %v14983_v3 = vpop.f32.mrb[151].mxu0  ;;  %v14985_v62 = vpop.f32.mrb[151].mxu1  ;;  %v5013_v28 = vadd.bf16 %v14942_v33, %v17557_v42  ;;  %v17558_v20 = vld [vmem:[#allocation43_spill] sm:$0xff] }
 0x46a   : > { %17553 = vst [vmem:[#allocation104_spill] sm:$0xff] %v14983_v3  ;;  %17554 = vst [vmem:[#allocation100_spill] sm:$0xff] %v14985_v62  ;;  %v17560_v53 = vpack.c.bf16 %v17558_v20, %v17559_v18  ;;  %v12524_v3 = vld [vmem:[#allocation8 + $0x338] ss:$12 sps:$4 sm:$0xff]  }
 0x46b   : > { %7625 = vmatmul.mubr.bf16.vlgmr.msra.gmra.mrb[192].mxu0 %v5193_v9  ;;  %8751 = vmatmul.mubr.bf16.vlgmr.msra.gmra.mrb[0].mxu1 %v5193_v9  ;;  %v12519_v9 = vld [vmem:[#allocation8 + $0x334] ss:$12 sps:$4 sm:$0xff]  }
 0x46c   : > { %7634 = vmatprep.mubr.bf16.mxu0 %v5206_v55  ;;  %8758 = vmatprep.mubr.bf16.mxu1 %v5206_v55  ;;  %v5026_v57 = vadd.bf16 %v14914_v26, %v17560_v53  ;;  %v12523_v55 = vld [vmem:[#allocation8 + $0x3f8] ss:$12 sps:$4 sm:$0xff]  }
 0x46d   : > { %10678 = vmatpush3.bf16.msra.mxu1 %v12508_v15  ;;  %7786 = vmatpush1.bf16.msra.mxu0 %v12509_v21  ;;  %v12517_v15 = vld [vmem:[#allocation8 + $0x330] ss:$12 sps:$4 sm:$0xff]   ;;  %v12522_v53 = vld [vmem:[#allocation8 + $0x34c] ss:$12 sps:$4 sm:$0xff]  }
 0x46e   : > { %v15000_v0 = vpop.f32.mrb[152].mxu0  ;;  %v15002_v62 = vpop.f32.mrb[152].mxu1  ;;  %7787 = vmatprep.subr.bf16.mxu0 %v12514_v35  ;;  %10679 = vmatprep.subr.bf16.mxu1 %v12515_v39  ;;  %v5205_v39 = vmax.bf16 %v17232_v41, %v5013_v28  ;;  %v5218_v18 = vmax.bf16 %v17232_v41, %v5026_v57 }
 0x46f   : > { %17561 = vst [vmem:[#allocation114_spill] sm:$0xff] %v15000_v0  ;;  %17562 = vst [vmem:[#allocation110_spill] sm:$0xff] %v15002_v62  ;;  %v15004_v43 = vpop.f32.mrb[153].mxu0  ;;  %v15006_v42 = vpop.f32.mrb[153].mxu1  ;;  %v12531_v62 = vld [vmem:[#allocation8 + $0x410] ss:$12 sps:$4 sm:$0xff]  }
 0x470   : > { %17563 = vst [vmem:[#allocation112_spill] sm:$0xff] %v15004_v43  ;;  %17564 = vst [vmem:[#allocation108_spill] sm:$0xff] %v15006_v42  ;;  %v15008_v21 = vpop.f32.mrb[154].mxu0  ;;  %v15010_v56 = vpop.f32.mrb[154].mxu1  ;;  %v12532_v0 = vld [vmem:[#allocation8 + $0x350] ss:$12 sps:$4 sm:$0xff]  }
 0x471   : > { %17565 = vst [vmem:[#allocation119_spill] sm:$0xff] %v15008_v21  ;;  %17566 = vst [vmem:[#allocation116_spill] sm:$0xff] %v15010_v56  ;;  %v15016_v20 = vpop.f32.mrb[155].mxu0  ;;  %v15018_v35 = vpop.f32.mrb[155].mxu1  ;;  %7788 = vmatpush1.bf16.msra.mxu0 %v12512_v54  ;;  %10680 = vmatpush3.bf16.msra.mxu1 %v12516_v59  ;;  %v17569_v54 = vld [vmem:[#allocation41_spill] sm:$0xff]  ;;  %v17573_v42 = vld [vmem:[#allocation47_spill] sm:$0xff] }
 0x472   : > { %17567 = vst [vmem:[#allocation132_spill] sm:$0xff] %v15016_v20  ;;  %17568 = vst [vmem:[#allocation128_spill] sm:$0xff] %v15018_v35  ;;  %7789 = vmatprep.subr.bf16.mxu0 %v12519_v9  ;;  %10681 = vmatprep.subr.bf16.mxu1 %v12523_v55  ;;  %v17570_v59 = vld [vmem:[#allocation37_spill] sm:$0xff]  ;;  %v17574_v57 = vpack.c.bf16 %v17572_v10, %v17573_v42  ;;  %v17586_v20 = vld [vmem:[#allocation59_spill] sm:$0xff] }
 0x473   : > { %7635 = vmatmul.mubr.bf16.gmra.mrb[196].mxu0 %v5205_v39  ;;  %8759 = vmatmul.mubr.bf16.gmra.mrb[4].mxu1 %v5205_v39  ;;  %v17571_v28 = vpack.c.bf16 %v17569_v54, %v17570_v59  ;;  %v12539_v39 = vld [vmem:[#allocation8 + $0x428] ss:$12 sps:$4 sm:$0xff]   ;;  %v12528_v43 = vld [vmem:[#allocation8 + $0x378] ss:$12 sps:$4 sm:$0xff]  }
 0x474   : > { %7644 = vmatprep.mubr.bf16.mxu0 %v5218_v18  ;;  %8766 = vmatprep.mubr.bf16.mxu1 %v5218_v18  ;;  %v5038_v9 = vadd.bf16 %v14914_v26, %v17574_v57  ;;  %v12527_v18 = vld [vmem:[#allocation8 + $0x364] ss:$12 sps:$4 sm:$0xff]   ;;  %v12525_v57 = vld [vmem:[#allocation8 + $0x360] ss:$12 sps:$4 sm:$0xff]   ;;  %v12540_v21 = vld [vmem:[#allocation8 + $0x368] ss:$12 sps:$4 sm:$0xff]  }
 0x475   : > { %v5025_v56 = vadd.bf16 %v14942_v33, %v17571_v28  ;;  %7790 = vmatpush1.bf16.msra.mxu0 %v12517_v15  ;;  %10682 = vmatpush3.bf16.msra.mxu1 %v12524_v3  ;;  %v12530_v42 = vld [vmem:[#allocation8 + $0x37c] ss:$12 sps:$4 sm:$0xff]  }
 0x476   : > { %v15034_v55 = vpop.f32.mrb[156].mxu0  ;;  %v15036_v35 = vpop.f32.mrb[156].mxu1  ;;  %7791 = vmatprep.subr.bf16.mxu0 %v12522_v53  ;;  %10683 = vmatprep.subr.bf16.mxu1 %v12531_v62  ;;  %v5230_v10 = vmax.bf16 %v17232_v41, %v5038_v9 }
 0x477   : > { %17575 = vst [vmem:[#allocation130_spill] sm:$0xff] %v15034_v55  ;;  %17576 = vst [vmem:[#allocation126_spill] sm:$0xff] %v15036_v35  ;;  %v15038_v54 = vpop.f32.mrb[157].mxu0  ;;  %v15040_v59 = vpop.f32.mrb[157].mxu1  ;;  %v5217_v62 = vmax.bf16 %v17232_v41, %v5025_v56  ;;  %v12547_v35 = vld [vmem:[#allocation8 + $0x440] ss:$12 sps:$4 sm:$0xff]  }
 0x478   : > { %17577 = vst [vmem:[#allocation137_spill] sm:$0xff] %v15038_v54  ;;  %17578 = vst [vmem:[#allocation134_spill] sm:$0xff] %v15040_v59  ;;  %v15042_v15 = vpop.f32.mrb[158].mxu0  ;;  %v15044_v3 = vpop.f32.mrb[158].mxu1  ;;  %v17584_v56 = vld [vmem:[#allocation45_spill] sm:$0xff]  ;;  %v17587_v59 = vld [vmem:[#allocation55_spill] sm:$0xff] }
 0x479   : > { %17579 = vst [vmem:[#allocation27_spill] sm:$0xff] %v15042_v15  ;;  %17580 = vst [vmem:[#allocation23_spill] sm:$0xff] %v15044_v3  ;;  %v15050_v28 = vpop.f32.mrb[159].mxu0  ;;  %v15052_v53 = vpop.f32.mrb[159].mxu1  ;;  %7792 = vmatpush1.bf16.msra.mxu0 %v12520_v63  ;;  %10684 = vmatpush3.bf16.msra.mxu1 %v12532_v0  ;;  %v17583_v63 = vld [vmem:[#allocation49_spill] sm:$0xff]  ;;  %v17588_v9 = vpack.c.bf16 %v17586_v20, %v17587_v59 }
 0x47a   : > { %17581 = vst [vmem:[#allocation25_spill] sm:$0xff] %v15050_v28  ;;  %17582 = vst [vmem:[#allocation21_spill] sm:$0xff] %v15052_v53  ;;  %7793 = vmatprep.subr.bf16.mxu0 %v12527_v18  ;;  %10685 = vmatprep.subr.bf16.mxu1 %v12539_v39  ;;  %v17585_v0 = vpack.c.bf16 %v17583_v63, %v17584_v56  ;;  %v12548_v55 = vld [vmem:[#allocation8 + $0x380] ss:$12 sps:$4 sm:$0xff]   ;;  %v12556_v15 = vld [vmem:[#allocation8 + $0x398] ss:$12 sps:$4 sm:$0xff]  }
 0x47b   : > { %7645 = vmatmul.mubr.bf16.gmra.mrb[200].mxu0 %v5217_v62  ;;  %8767 = vmatmul.mubr.bf16.gmra.mrb[8].mxu1 %v5217_v62  ;;  %v5050_v18 = vadd.bf16 %v14914_v26, %v17588_v9  ;;  %v12555_v62 = vld [vmem:[#allocation8 + $0x458] ss:$12 sps:$4 sm:$0xff]   ;;  %v12533_v9 = vld [vmem:[#allocation8 + $0x390] ss:$12 sps:$4 sm:$0xff]   ;;  %v12536_v54 = vld [vmem:[#allocation8 + $0x3a8] ss:$12 sps:$4 sm:$0xff]  }
 0x47c   : > { %7654 = vmatprep.mubr.bf16.mxu0 %v5230_v10  ;;  %8774 = vmatprep.mubr.bf16.mxu1 %v5230_v10  ;;  %v5037_v3 = vadd.bf16 %v14942_v33, %v17585_v0  ;;  %v12535_v10 = vld [vmem:[#allocation8 + $0x394] ss:$12 sps:$4 sm:$0xff]   ;;  %v12538_v59 = vld [vmem:[#allocation8 + $0x3ac] ss:$12 sps:$4 sm:$0xff]  }
 0x47d   : > { %7794 = vmatpush1.bf16.msra.mxu0 %v12525_v57  ;;  %10686 = vmatpush3.bf16.msra.mxu1 %v12540_v21  ;;  %v5242_v20 = vmax.bf16 %v17232_v41, %v5050_v18  ;;  %v17600_v28 = vld [vmem:[#allocation67_spill] sm:$0xff] }
 0x47e   : > { %v15068_v39 = vpop.f32.mrb[160].mxu0  ;;  %v15070_v53 = vpop.f32.mrb[160].mxu1  ;;  %7795 = vmatprep.subr.bf16.mxu0 %v12530_v42  ;;  %10687 = vmatprep.subr.bf16.mxu1 %v12547_v35  ;;  %v5229_v35 = vmax.bf16 %v17232_v41, %v5037_v3  ;;  %v17598_v3 = vld [vmem:[#allocation53_spill] sm:$0xff] }
 0x47f   : > { %17589 = vst [vmem:[#allocation35_spill] sm:$0xff] %v15068_v39  ;;  %17590 = vst [vmem:[#allocation31_spill] sm:$0xff] %v15070_v53  ;;  %v15072_v63 = vpop.f32.mrb[161].mxu0  ;;  %v15074_v56 = vpop.f32.mrb[161].mxu1  ;;  %v12563_v53 = vld [vmem:[#allocation8 + $0x470] ss:$12 sps:$4 sm:$0xff]  }
 0x480   : > { %17591 = vst [vmem:[#allocation33_spill] sm:$0xff] %v15072_v63  ;;  %17592 = vst [vmem:[#allocation29_spill] sm:$0xff] %v15074_v56  ;;  %v15076_v57 = vpop.f32.mrb[162].mxu0  ;;  %v15078_v21 = vpop.f32.mrb[162].mxu1  ;;  %v12564_v39 = vld [vmem:[#allocation8 + $0x3b0] ss:$12 sps:$4 sm:$0xff]  }
 0x481   : > { %17593 = vst [vmem:[#allocation43_spill] sm:$0xff] %v15076_v57  ;;  %17594 = vst [vmem:[#allocation39_spill] sm:$0xff] %v15078_v21  ;;  %v15084_v0 = vpop.f32.mrb[163].mxu0  ;;  %v15086_v42 = vpop.f32.mrb[163].mxu1  ;;  %7796 = vmatpush1.bf16.msra.mxu0 %v12528_v43  ;;  %10688 = vmatpush3.bf16.msra.mxu1 %v12548_v55  ;;  %v17597_v43 = vld [vmem:[#allocation57_spill] sm:$0xff]  ;;  %v17601_v56 = vld [vmem:[#allocation63_spill] sm:$0xff] }
 0x482   : > { %17595 = vst [vmem:[#allocation41_spill] sm:$0xff] %v15084_v0  ;;  %17596 = vst [vmem:[#allocation37_spill] sm:$0xff] %v15086_v42  ;;  %7797 = vmatprep.subr.bf16.mxu0 %v12535_v10  ;;  %10689 = vmatprep.subr.bf16.mxu1 %v12555_v62  ;;  %v17599_v55 = vpack.c.bf16 %v17597_v43, %v17598_v3  ;;  %v17602_v18 = vpack.c.bf16 %v17600_v28, %v17601_v56  ;;  %v17611_v56 = vld [vmem:[#allocation65_spill] sm:$0xff]  ;;  %v17614_v57 = vld [vmem:[#allocation75_spill] sm:$0xff] }
 0x483   : > { %7655 = vmatmul.mubr.bf16.gmra.mrb[204].mxu0 %v5229_v35  ;;  %8775 = vmatmul.mubr.bf16.gmra.mrb[12].mxu1 %v5229_v35  ;;  %v12571_v35 = vld [vmem:[#allocation8 + $0x548] ss:$12 sps:$4 sm:$0xff]  }
 0x484   : > { %7664 = vmatprep.mubr.bf16.mxu0 %v5242_v20  ;;  %8782 = vmatprep.mubr.bf16.mxu1 %v5242_v20  ;;  %v5049_v21 = vadd.bf16 %v14942_v33, %v17599_v55  ;;  %v5062_v10 = vadd.bf16 %v14914_v26, %v17602_v18  ;;  %v12543_v20 = vld [vmem:[#allocation8 + $0x3c4] ss:$12 sps:$4 sm:$0xff]   ;;  %v12541_v18 = vld [vmem:[#allocation8 + $0x3c0] ss:$12 sps:$4 sm:$0xff]  }
 0x485   : > { %7798 = vmatpush1.bf16.msra.mxu0 %v12533_v9  ;;  %10690 = vmatpush3.bf16.msra.mxu1 %v12556_v15 }
 0x486   : > { %v15102_v62 = vpop.f32.mrb[164].mxu0  ;;  %v15104_v42 = vpop.f32.mrb[164].mxu1  ;;  %7799 = vmatprep.subr.bf16.mxu0 %v12538_v59  ;;  %10691 = vmatprep.subr.bf16.mxu1 %v12563_v53  ;;  %v5241_v53 = vmax.bf16 %v17232_v41, %v5049_v21  ;;  %v5254_v28 = vmax.bf16 %v17232_v41, %v5062_v10  ;;  %v17612_v21 = vld [vmem:[#allocation61_spill] sm:$0xff] }
 0x487   : > { %17603 = vst [vmem:[#allocation51_spill] sm:$0xff] %v15102_v62  ;;  %17604 = vst [vmem:[#allocation47_spill] sm:$0xff] %v15104_v42  ;;  %v15106_v43 = vpop.f32.mrb[165].mxu0  ;;  %v15108_v3 = vpop.f32.mrb[165].mxu1  ;;  %v12546_v62 = vld [vmem:[#allocation8 + $0x3dc] ss:$12 sps:$4 sm:$0xff]  }
 0x488   : > { %17605 = vst [vmem:[#allocation49_spill] sm:$0xff] %v15106_v43  ;;  %17606 = vst [vmem:[#allocation45_spill] sm:$0xff] %v15108_v3  ;;  %v15110_v9 = vpop.f32.mrb[166].mxu0  ;;  %v15112_v15 = vpop.f32.mrb[166].mxu1  ;;  %v12544_v42 = vld [vmem:[#allocation8 + $0x3d8] ss:$12 sps:$4 sm:$0xff]  }
 0x489   : > { %17607 = vst [vmem:[#allocation59_spill] sm:$0xff] %v15110_v9  ;;  %17608 = vst [vmem:[#allocation55_spill] sm:$0xff] %v15112_v15  ;;  %v15118_v55 = vpop.f32.mrb[167].mxu0  ;;  %v15120_v59 = vpop.f32.mrb[167].mxu1  ;;  %7800 = vmatpush1.bf16.msra.mxu0 %v12536_v54  ;;  %10692 = vmatpush3.bf16.msra.mxu1 %v12564_v39  ;;  %v17613_v54 = vpack.c.bf16 %v17611_v56, %v17612_v21  ;;  %v17615_v15 = vld [vmem:[#allocation71_spill] sm:$0xff] }
 0x48a   : > { %17609 = vst [vmem:[#allocation57_spill] sm:$0xff] %v15118_v55  ;;  %17610 = vst [vmem:[#allocation53_spill] sm:$0xff] %v15120_v59  ;;  %7801 = vmatprep.subr.bf16.mxu0 %v12543_v20  ;;  %10789 = vmatprep.subr.bf16.mxu1 %v12571_v35  ;;  %v17616_v9 = vpack.c.bf16 %v17614_v57, %v17615_v15  ;;  %v12551_v35 = vld [vmem:[#allocation8 + $0x3f4] ss:$12 sps:$4 sm:$0xff]   ;;  %v17625_v57 = vld [vmem:[#allocation73_spill] sm:$0xff] }
 0x48b   : > { %7665 = vmatmul.mubr.bf16.gmra.mrb[208].mxu0 %v5241_v53  ;;  %8783 = vmatmul.mubr.bf16.gmra.mrb[16].mxu1 %v5241_v53  ;;  %v5061_v39 = vadd.bf16 %v14942_v33, %v17613_v54  ;;  %v12549_v54 = vld [vmem:[#allocation8 + $0x3f0] ss:$12 sps:$4 sm:$0xff]   ;;  %v17629_v3 = vld [vmem:[#allocation79_spill] sm:$0xff] }
 0x48c   : > { %7674 = vmatprep.mubr.bf16.mxu0 %v5254_v28  ;;  %8790 = vmatprep.mubr.bf16.mxu1 %v5254_v28  ;;  %v5074_v63 = vadd.bf16 %v14914_v26, %v17616_v9 }
 0x48d   : > { %7802 = vmatpush1.bf16.msra.mxu0 %v12541_v18  ;;  %v12554_v18 = vld [vmem:[#allocation8 + $0x40c] ss:$12 sps:$4 sm:$0xff]  }
 0x48e   : > { %v15136_v10 = vpop.f32.mrb[168].mxu0  ;;  %v15138_v20 = vpop.f32.mrb[168].mxu1  ;;  %7803 = vmatprep.subr.bf16.mxu0 %v12546_v62  ;;  %v5253_v62 = vmax.bf16 %v17232_v41, %v5061_v39  ;;  %v5266_v43 = vmax.bf16 %v17232_v41, %v5074_v63  ;;  %v12552_v39 = vld [vmem:[#allocation8 + $0x408] ss:$12 sps:$4 sm:$0xff]  }
 0x48f   : > { %17617 = vst [vmem:[#allocation67_spill] sm:$0xff] %v15136_v10  ;;  %17618 = vst [vmem:[#allocation63_spill] sm:$0xff] %v15138_v20  ;;  %v15140_v53 = vpop.f32.mrb[169].mxu0  ;;  %v15142_v28 = vpop.f32.mrb[169].mxu1  ;;  %v17626_v20 = vld [vmem:[#allocation69_spill] sm:$0xff]  ;;  %v17628_v10 = vld [vmem:[#allocation83_spill] sm:$0xff] }
 0x490   : > { %17619 = vst [vmem:[#allocation65_spill] sm:$0xff] %v15140_v53  ;;  %17620 = vst [vmem:[#allocation61_spill] sm:$0xff] %v15142_v28  ;;  %v15144_v56 = vpop.f32.mrb[170].mxu0  ;;  %v15146_v21 = vpop.f32.mrb[170].mxu1 }
 0x491   : > { %17621 = vst [vmem:[#allocation75_spill] sm:$0xff] %v15144_v56  ;;  %17622 = vst [vmem:[#allocation71_spill] sm:$0xff] %v15146_v21  ;;  %v15152_v9 = vpop.f32.mrb[171].mxu0  ;;  %v15154_v15 = vpop.f32.mrb[171].mxu1  ;;  %7804 = vmatpush1.bf16.msra.mxu0 %v12544_v42  ;;  %v17627_v21 = vpack.c.bf16 %v17625_v57, %v17626_v20  ;;  %v17630_v56 = vpack.c.bf16 %v17628_v10, %v17629_v3  ;;  %v12562_v57 = vld [vmem:[#allocation8 + $0x43c] ss:$12 sps:$4 sm:$0xff]  }
 0x492   : > { %17623 = vst [vmem:[#allocation235_spill] sm:$0xff] %v15152_v9  ;;  %17624 = vst [vmem:[#allocation236_spill] sm:$0xff] %v15154_v15  ;;  %7805 = vmatprep.subr.bf16.mxu0 %v12551_v35  ;;  %v12559_v35 = vld [vmem:[#allocation8 + $0x424] ss:$12 sps:$4 sm:$0xff]   ;;  %v17643_v15 = vld [vmem:[#allocation87_spill] sm:$0xff] }
 0x493   : > { %7675 = vmatmul.mubr.bf16.gmra.mrb[212].mxu0 %v5253_v62  ;;  %8791 = vmatmul.mubr.bf16.gmra.mrb[20].mxu1 %v5253_v62  ;;  %v5073_v42 = vadd.bf16 %v14942_v33, %v17627_v21  ;;  %v5086_v59 = vadd.bf16 %v14914_v26, %v17630_v56  ;;  %v17639_v3 = vld [vmem:[#allocation81_spill] sm:$0xff] }
 0x494   : > { %7684 = vmatprep.mubr.bf16.mxu0 %v5266_v43  ;;  %8798 = vmatprep.mubr.bf16.mxu1 %v5266_v43 }
 0x495   : > { %7806 = vmatpush1.bf16.msra.mxu0 %v12549_v54  ;;  %v12557_v54 = vld [vmem:[#allocation8 + $0x420] ss:$12 sps:$4 sm:$0xff]   ;;  %v5278_v9 = vmax.bf16 %v17232_v41, %v5086_v59 }
 0x496   : > { %v15170_v28 = vpop.f32.mrb[172].mxu0  ;;  %v15172_v63 = vpop.f32.mrb[172].mxu1  ;;  %7807 = vmatprep.subr.bf16.mxu0 %v12554_v18  ;;  %v5265_v18 = vmax.bf16 %v17232_v41, %v5073_v42 }
 0x497   : > { %17631 = vst [vmem:[#allocation73_spill] sm:$0xff] %v15170_v28  ;;  %17632 = vst [vmem:[#allocation69_spill] sm:$0xff] %v15172_v63  ;;  %v15174_v62 = vpop.f32.mrb[173].mxu0  ;;  %v15176_v43 = vpop.f32.mrb[173].mxu1  ;;  %v17640_v63 = vld [vmem:[#allocation77_spill] sm:$0xff]  ;;  %v17642_v28 = vld [vmem:[#allocation91_spill] sm:$0xff] }
 0x498   : > { %17633 = vst [vmem:[#allocation83_spill] sm:$0xff] %v15174_v62  ;;  %17634 = vst [vmem:[#allocation79_spill] sm:$0xff] %v15176_v43  ;;  %v15178_v20 = vpop.f32.mrb[174].mxu0  ;;  %v15180_v21 = vpop.f32.mrb[174].mxu1 }
 0x499   : > { %17635 = vst [vmem:[#allocation237_spill] sm:$0xff] %v15178_v20  ;;  %17636 = vst [vmem:[#allocation238_spill] sm:$0xff] %v15180_v21  ;;  %v15186_v10 = vpop.f32.mrb[175].mxu0  ;;  %v15188_v56 = vpop.f32.mrb[175].mxu1  ;;  %7808 = vmatpush1.bf16.msra.mxu0 %v12552_v39  ;;  %v17641_v21 = vpack.c.bf16 %v17639_v3, %v17640_v63  ;;  %v12560_v39 = vld [vmem:[#allocation8 + $0x438] ss:$12 sps:$4 sm:$0xff]   ;;  %v17644_v20 = vpack.c.bf16 %v17642_v28, %v17643_v15 }
 0x49a   : > { %17637 = vst [vmem:[#allocation239_spill] sm:$0xff] %v15186_v10  ;;  %17638 = vst [vmem:[#allocation240_spill] sm:$0xff] %v15188_v56  ;;  %7809 = vmatprep.subr.bf16.mxu0 %v12559_v35  ;;  %v12567_v35 = vld [vmem:[#allocation8 + $0x454] ss:$12 sps:$4 sm:$0xff]   ;;  %v12570_v3 = vld [vmem:[#allocation8 + $0x46c] ss:$12 sps:$4 sm:$0xff]  }
 0x49b   : > { %7685 = vmatmul.mubr.bf16.gmra.mrb[216].mxu0 %v5265_v18  ;;  %8799 = vmatmul.mubr.bf16.gmra.mrb[24].mxu1 %v5265_v18  ;;  %v5085_v42 = vadd.bf16 %v14942_v33, %v17641_v21  ;;  %v5098_v53 = vadd.bf16 %v14914_v26, %v17644_v20  ;;  %v17653_v28 = vld [vmem:[#allocation89_spill] sm:$0xff]  ;;  %v17657_v56 = vld [vmem:[#allocation95_spill] sm:$0xff] }
 0x49c   : > { %7694 = vmatprep.mubr.bf16.mxu0 %v5278_v9  ;;  %8806 = vmatprep.mubr.bf16.mxu1 %v5278_v9 }
 0x49d   : > { %7810 = vmatpush1.bf16.msra.mxu0 %v12557_v54  ;;  %v12565_v54 = vld [vmem:[#allocation8 + $0x450] ss:$12 sps:$4 sm:$0xff]   ;;  %v5290_v10 = vmax.bf16 %v17232_v41, %v5098_v53 }
 0x49e   : > { %v15204_v43 = vpop.f32.mrb[176].mxu0  ;;  %v15206_v59 = vpop.f32.mrb[176].mxu1  ;;  %7811 = vmatprep.subr.bf16.mxu0 %v12562_v57  ;;  %v5277_v57 = vmax.bf16 %v17232_v41, %v5085_v42 }
 0x49f   : > { %17645 = vst [vmem:[#allocation81_spill] sm:$0xff] %v15204_v43  ;;  %17646 = vst [vmem:[#allocation77_spill] sm:$0xff] %v15206_v59  ;;  %v15208_v18 = vpop.f32.mrb[177].mxu0  ;;  %v15210_v9 = vpop.f32.mrb[177].mxu1  ;;  %v17654_v59 = vld [vmem:[#allocation85_spill] sm:$0xff]  ;;  %v17656_v43 = vld [vmem:[#allocation99_spill] sm:$0xff] }
 0x4a0   : > { %17647 = vst [vmem:[#allocation91_spill] sm:$0xff] %v15208_v18  ;;  %17648 = vst [vmem:[#allocation87_spill] sm:$0xff] %v15210_v9  ;;  %v15212_v63 = vpop.f32.mrb[178].mxu0  ;;  %v15214_v21 = vpop.f32.mrb[178].mxu1 }
 0x4a1   : > { %17649 = vst [vmem:[#allocation241_spill] sm:$0xff] %v15212_v63  ;;  %17650 = vst [vmem:[#allocation242_spill] sm:$0xff] %v15214_v21  ;;  %v15220_v15 = vpop.f32.mrb[179].mxu0  ;;  %v15222_v20 = vpop.f32.mrb[179].mxu1  ;;  %7812 = vmatpush1.bf16.msra.mxu0 %v12560_v39  ;;  %v17655_v21 = vpack.c.bf16 %v17653_v28, %v17654_v59  ;;  %v12568_v39 = vld [vmem:[#allocation8 + $0x468] ss:$12 sps:$4 sm:$0xff]   ;;  %v17658_v63 = vpack.c.bf16 %v17656_v43, %v17657_v56 }
 0x4a2   : > { %17651 = vst [vmem:[#allocation243_spill] sm:$0xff] %v15220_v15  ;;  %17652 = vst [vmem:[#allocation244_spill] sm:$0xff] %v15222_v20  ;;  %7813 = vmatprep.subr.bf16.mxu0 %v12567_v35  ;;  %v12575_v35 = vld [vmem:[#allocation8 + $0x484] ss:$12 sps:$4 sm:$0xff]  }
 0x4a3   : > { %7695 = vmatmul.mubr.bf16.gmra.mrb[220].mxu0 %v5277_v57  ;;  %8807 = vmatmul.mubr.bf16.gmra.mrb[28].mxu1 %v5277_v57  ;;  %v5097_v42 = vadd.bf16 %v14942_v33, %v17655_v21  ;;  %v5110_v62 = vadd.bf16 %v14914_v26, %v17658_v63  ;;  %v17667_v43 = vld [vmem:[#allocation97_spill] sm:$0xff] }
 0x4a4   : > { %7704 = vmatprep.mubr.bf16.mxu0 %v5290_v10  ;;  %8814 = vmatprep.mubr.bf16.mxu1 %v5290_v10  ;;  %v17668_v28 = vld [vmem:[#allocation93_spill] sm:$0xff] }
 0x4a5   : > { %7814 = vmatpush1.bf16.msra.mxu0 %v12565_v54  ;;  %v5302_v18 = vmax.bf16 %v17232_v41, %v5110_v62 }
 0x4a6   : > { %v15238_v9 = vpop.f32.mrb[180].mxu0  ;;  %v15240_v53 = vpop.f32.mrb[180].mxu1  ;;  %7815 = vmatprep.subr.bf16.mxu0 %v12570_v3  ;;  %v5289_v3 = vmax.bf16 %v17232_v41, %v5097_v42  ;;  %v17670_v42 = vld [vmem:[#allocation107_spill] sm:$0xff] }
 0x4a7   : > { %17659 = vst [vmem:[#allocation89_spill] sm:$0xff] %v15238_v9  ;;  %17660 = vst [vmem:[#allocation85_spill] sm:$0xff] %v15240_v53  ;;  %v15242_v57 = vpop.f32.mrb[181].mxu0  ;;  %v15244_v10 = vpop.f32.mrb[181].mxu1  ;;  %v17669_v53 = vpack.c.bf16 %v17667_v43, %v17668_v28  ;;  %v17682_v28 = vld [vmem:[#allocation101_spill] sm:$0xff] }
 0x4a8   : > { %17661 = vst [vmem:[#allocation99_spill] sm:$0xff] %v15242_v57  ;;  %17662 = vst [vmem:[#allocation95_spill] sm:$0xff] %v15244_v10  ;;  %v15246_v59 = vpop.f32.mrb[182].mxu0  ;;  %v15248_v21 = vpop.f32.mrb[182].mxu1 }
 0x4a9   : > { %17663 = vst [vmem:[#allocation245_spill] sm:$0xff] %v15246_v59  ;;  %17664 = vst [vmem:[#allocation246_spill] sm:$0xff] %v15248_v21  ;;  %v15254_v56 = vpop.f32.mrb[183].mxu0  ;;  %v15256_v63 = vpop.f32.mrb[183].mxu1  ;;  %7816 = vmatpush1.bf16.msra.mxu0 %v12568_v39  ;;  %v5109_v21 = vadd.bf16 %v14942_v33, %v17669_v53  ;;  %v17671_v39 = vld [vmem:[#allocation103_spill] sm:$0xff]  ;;  %v17681_v53 = vld [vmem:[#allocation105_spill] sm:$0xff] }
 0x4aa   : > { %17665 = vst [vmem:[#allocation247_spill] sm:$0xff] %v15254_v56  ;;  %17666 = vst [vmem:[#allocation248_spill] sm:$0xff] %v15256_v63  ;;  %7978 = vmatprep.subr.bf16.mxu0 %v12575_v35  ;;  %v17672_v9 = vpack.c.bf16 %v17670_v42, %v17671_v39 }
 0x4ab   : > { %7705 = vmatmul.mubr.bf16.gmra.mrb[224].mxu0 %v5289_v3  ;;  %8815 = vmatmul.mubr.bf16.gmra.mrb[32].mxu1 %v5289_v3  ;;  %v5301_v42 = vmax.bf16 %v17232_v41, %v5109_v21 }
 0x4ac   : > { %7714 = vmatprep.mubr.bf16.mxu0 %v5302_v18  ;;  %8822 = vmatprep.mubr.bf16.mxu1 %v5302_v18  ;;  %v5122_v54 = vadd.bf16 %v14914_v26, %v17672_v9 }
 0x4ae   : > { %v15272_v59 = vpop.f32.mrb[184].mxu0  ;;  %v15274_v20 = vpop.f32.mrb[184].mxu1  ;;  %v5314_v63 = vmax.bf16 %v17232_v41, %v5122_v54 }
 0x4af   : > { %17673 = vst [vmem:[#allocation97_spill] sm:$0xff] %v15272_v59  ;;  %17674 = vst [vmem:[#allocation93_spill] sm:$0xff] %v15274_v20  ;;  %v15276_v62 = vpop.f32.mrb[185].mxu0  ;;  %v15278_v35 = vpop.f32.mrb[185].mxu1  ;;  %v17683_v20 = vpack.c.bf16 %v17681_v53, %v17682_v28  ;;  %v17684_v59 = vld [vmem:[#allocation115_spill] sm:$0xff] }
 0x4b0   : > { %17675 = vst [vmem:[#allocation107_spill] sm:$0xff] %v15276_v62  ;;  %17676 = vst [vmem:[#allocation103_spill] sm:$0xff] %v15278_v35  ;;  %v15280_v3 = vpop.f32.mrb[186].mxu0  ;;  %v15282_v18 = vpop.f32.mrb[186].mxu1 }
 0x4b1   : > { %17677 = vst [vmem:[#allocation249_spill] sm:$0xff] %v15280_v3  ;;  %17678 = vst [vmem:[#allocation250_spill] sm:$0xff] %v15282_v18  ;;  %v15288_v43 = vpop.f32.mrb[187].mxu0  ;;  %v15290_v9 = vpop.f32.mrb[187].mxu1  ;;  %v5121_v18 = vadd.bf16 %v14942_v33, %v17683_v20  ;;  %v17685_v3 = vld [vmem:[#allocation111_spill] sm:$0xff]  ;;  %v17695_v20 = vld [vmem:[#allocation113_spill] sm:$0xff] }
 0x4b2   : > { %17679 = vst [vmem:[#allocation251_spill] sm:$0xff] %v15288_v43  ;;  %17680 = vst [vmem:[#allocation252_spill] sm:$0xff] %v15290_v9  ;;  %v17686_v21 = vpack.c.bf16 %v17684_v59, %v17685_v3  ;;  %v17696_v59 = vld [vmem:[#allocation109_spill] sm:$0xff] }
 0x4b3   : > { %7715 = vmatmul.mubr.bf16.gmra.mrb[228].mxu0 %v5301_v42  ;;  %8823 = vmatmul.mubr.bf16.gmra.mrb[36].mxu1 %v5301_v42  ;;  %v5313_v28 = vmax.bf16 %v17232_v41, %v5121_v18 }
 0x4b4   : > { %7724 = vmatprep.mubr.bf16.mxu0 %v5314_v63  ;;  %8830 = vmatprep.mubr.bf16.mxu1 %v5314_v63  ;;  %v5134_v57 = vadd.bf16 %v14914_v26, %v17686_v21 }
 0x4b6   : > { %v15306_v39 = vpop.f32.mrb[188].mxu0  ;;  %v15308_v62 = vpop.f32.mrb[188].mxu1  ;;  %v5326_v9 = vmax.bf16 %v17232_v41, %v5134_v57 }
 0x4b7   : > { %17687 = vst [vmem:[#allocation105_spill] sm:$0xff] %v15306_v39  ;;  %17688 = vst [vmem:[#allocation101_spill] sm:$0xff] %v15308_v62  ;;  %v15310_v10 = vpop.f32.mrb[189].mxu0  ;;  %v15312_v54 = vpop.f32.mrb[189].mxu1  ;;  %v17697_v62 = vpack.c.bf16 %v17695_v20, %v17696_v59  ;;  %v17698_v39 = vld [vmem:[#allocation121_spill] sm:$0xff] }
 0x4b8   : > { %17689 = vst [vmem:[#allocation115_spill] sm:$0xff] %v15310_v10  ;;  %17690 = vst [vmem:[#allocation111_spill] sm:$0xff] %v15312_v54  ;;  %v15314_v42 = vpop.f32.mrb[190].mxu0  ;;  %v15316_v63 = vpop.f32.mrb[190].mxu1  ;;  %v17704_v59 = vld [vmem:[#allocation125_spill] sm:$0xff] }
 0x4b9   : > { %17691 = vst [vmem:[#allocation253_spill] sm:$0xff] %v15314_v42  ;;  %17692 = vst [vmem:[#allocation254_spill] sm:$0xff] %v15316_v63  ;;  %v15322_v3 = vpop.f32.mrb[191].mxu0  ;;  %v15324_v53 = vpop.f32.mrb[191].mxu1  ;;  %v5133_v63 = vadd.bf16 %v14942_v33, %v17697_v62  ;;  %v17699_v42 = vld [vmem:[#allocation118_spill] sm:$0xff]  ;;  %v17701_v62 = vld [vmem:[#allocation120_spill] sm:$0xff] }
 0x4ba   : > { %17693 = vst [vmem:[#allocation255_spill] sm:$0xff] %v15322_v3  ;;  %17694 = vst [vmem:[#allocation256_spill] sm:$0xff] %v15324_v53  ;;  %v17700_v18 = vpack.c.bf16 %v17698_v39, %v17699_v42  ;;  %v17702_v39 = vld [vmem:[#allocation117_spill] sm:$0xff] }
 0x4bb   : > { %7725 = vmatmul.mubr.bf16.gmra.mrb[232].mxu0 %v5313_v28  ;;  %8831 = vmatmul.mubr.bf16.gmra.mrb[40].mxu1 %v5313_v28  ;;  %v5325_v28 = vmax.bf16 %v17232_v41, %v5133_v63  ;;  %v17703_v42 = vpack.c.bf16 %v17701_v62, %v17702_v39 }
 0x4bc   : > { %7734 = vmatprep.mubr.bf16.mxu0 %v5326_v9  ;;  %8838 = vmatprep.mubr.bf16.mxu1 %v5326_v9  ;;  %v5146_v43 = vadd.bf16 %v14914_v26, %v17700_v18 }
 0x4bd   : > { %v5145_v20 = vadd.bf16 %v14942_v33, %v17703_v42  ;;  %v17707_v42 = vld [vmem:[#allocation124_spill] sm:$0xff] }
 0x4be   : > { %v10469_v21 = vpop.f32.mrb[192].mxu1  ;;  %v5338_v9 = vmax.bf16 %v17232_v41, %v5146_v43 }
 0x4bf   : > { %v10470_v10 = vpop.f32.mrb[193].mxu1 }
 0x4c0   : > { %v15340_v3 = vadd.f32 %v10470_v10, %v10469_v21  ;;  %v10472_v35 = vpop.f32.mrb[194].mxu1  ;;  %v17705_v10 = vld [vmem:[#allocation123_spill] sm:$0xff] }
 0x4c1   : > { %v10473_v57 = vpop.f32.mrb[195].mxu1  ;;  %v17706_v21 = vpack.c.bf16 %v17704_v59, %v17705_v10  ;;  %v17708_v59 = vld [vmem:[#allocation122_spill] sm:$0xff] }
 0x4c2   : > { %v15343_v54 = vadd.f32 %v10473_v57, %v10472_v35  ;;  %v12763_v35 = vld [vmem:[#allocation7] sm:$0xff]  ;;  %v17709_v10 = vpack.c.bf16 %v17707_v42, %v17708_v59 }
 0x4c3   : > { %7735 = vmatmul.mubr.bf16.gmra.mrb[236].mxu0 %v5325_v28  ;;  %8839 = vmatmul.mubr.bf16.gmra.mrb[44].mxu1 %v5325_v28  ;;  %v5158_v18 = vadd.bf16 %v14914_v26, %v17706_v21  ;;  %v4842_v57 = vcombine.high %v12763_v35, %v12763_v35  ;;  %v17710_v21 = vld [vmem:[#allocation133_spill] sm:$0xff] }
 0x4c4   : > { %7744 = vmatprep.mubr.bf16.mxu0 %v5338_v9  ;;  %8846 = vmatprep.mubr.bf16.mxu1 %v5338_v9  ;;  %v5337_v9 = vmax.bf16 %v17232_v41, %v5145_v20 }
 0x4c5   : > { %v5350_v62 = vmax.bf16 %v17232_v41, %v5158_v18  ;;  %v4856_v39 = vrot.slane %v4842_v57, %v14628_v49 }
 0x4c6   : > { %v10475_v53 = vpop.f32.mrb[196].mxu1 }
 0x4c7   : > { %v10476_v63 = vpop.f32.mrb[197].mxu1  ;;  %v4858_v55 = vcombine.high %v4856_v39, %v4856_v39 }
 0x4c8   : > { %v15354_v56 = vadd.f32 %v10476_v63, %v10475_v53  ;;  %v10478_v43 = vpop.f32.mrb[198].mxu1  ;;  %v5157_v53 = vadd.bf16 %v14942_v33, %v17709_v10  ;;  %v17711_v63 = vld [vmem:[#allocation129_spill] sm:$0xff]  ;;  %v17713_v10 = vld [vmem:[#allocation131_spill] sm:$0xff] }
 0x4c9   : > { %v10479_v28 = vpop.f32.mrb[199].mxu1  ;;  %v17712_v35 = vpack.c.bf16 %v17710_v21, %v17711_v63  ;;  %v15376_v59 = vrot.slane %v4858_v55, %v14628_v49  ;;  %v17714_v21 = vld [vmem:[#allocation127_spill] sm:$0xff] }
 0x4ca   : > { %v15357_v15 = vadd.f32 %v10479_v28, %v10478_v43  ;;  %v5349_v57 = vmax.bf16 %v17232_v41, %v5157_v53  ;;  %v17715_v63 = vpack.c.bf16 %v17713_v10, %v17714_v21 }
 0x4cb   : > { %7745 = vmatmul.mubr.bf16.gmra.mrb[240].mxu0 %v5337_v9  ;;  %8847 = vmatmul.mubr.bf16.gmra.mrb[48].mxu1 %v5337_v9  ;;  %v5170_v20 = vadd.bf16 %v14914_v26, %v17712_v35  ;;  %v4951_v53 = vpack.i.b16 %v15376_v59, %v15376_v59 }
 0x4cc   : > { %7754 = vmatprep.mubr.bf16.mxu0 %v5350_v62  ;;  %8854 = vmatprep.mubr.bf16.mxu1 %v5350_v62  ;;  %v5169_v35 = vadd.bf16 %v14942_v33, %v17715_v63 }
 0x4cd   : > { %v5362_v42 = vmax.bf16 %v17232_v41, %v5170_v20  ;;  %v15392_v10 = vrot.slane %v4951_v53, %v14642_v25 }
 0x4ce   : > { %v10481_v43 = vpop.f32.mrb[200].mxu1 }
 0x4cf   : > { %v10482_v28 = vpop.f32.mrb[201].mxu1 }
 0x4d0   : > { %v15369_v18 = vadd.f32 %v10482_v28, %v10481_v43  ;;  %v10484_v9 = vpop.f32.mrb[202].mxu1  ;;  %v17716_v43 = vld [vmem:[#allocation139_spill] sm:$0xff]  ;;  %v17717_v28 = vld [vmem:[#allocation136_spill] sm:$0xff] }
 0x4d1   : > { %v10485_v0 = vpop.f32.mrb[203].mxu1  ;;  %v17718_v24 = vpack.c.bf16 %v17716_v43, %v17717_v28  ;;  %v17720_v43 = vld [vmem:[#allocation135_spill] sm:$0xff] }
 0x4d2   : > { %v15372_v62 = vadd.f32 %v10485_v0, %v10484_v9 }
 0x4d3   : > { %7755 = vmatmul.mubr.bf16.gmra.mrb[244].mxu0 %v5349_v57  ;;  %8855 = vmatmul.mubr.bf16.gmra.mrb[52].mxu1 %v5349_v57  ;;  %v5182_v0 = vadd.bf16 %v14914_v26, %v17718_v24  ;;  %v15398_v24 = vrot.slane %v4856_v39, %v14628_v49  ;;  %v17719_v26 = vld [vmem:[#allocation138_spill] sm:$0xff] }
 0x4d4   : > { %7764 = vmatprep.mubr.bf16.mxu0 %v5362_v42  ;;  %8862 = vmatprep.mubr.bf16.mxu1 %v5362_v42  ;;  %v5361_v42 = vmax.bf16 %v17232_v41, %v5169_v35  ;;  %v17721_v28 = vpack.c.bf16 %v17719_v26, %v17720_v43 }
 0x4d5   : > { %v5374_v63 = vmax.bf16 %v17232_v41, %v5182_v0  ;;  %v4944_v35 = vpack.i.b16 %v15398_v24, %v15398_v24 }
 0x4d6   : > { %v10487_v20 = vpop.f32.mrb[204].mxu1 }
 0x4d7   : > { %v10488_v9 = vpop.f32.mrb[205].mxu1 }
 0x4d8   : > { %v15388_v57 = vadd.f32 %v10488_v9, %v10487_v20  ;;  %v10490_v55 = vpop.f32.mrb[206].mxu1  ;;  %v5181_v20 = vadd.bf16 %v14942_v33, %v17721_v28  ;;  %v17724_v28 = vpack.c.bf16 %v14217_v14, %v14205_v44  ;;  %v17725_v44 = vpack.c.bf16 %v14209_v48, %v14201_v36 }
 0x4d9   : > { %v10491_v13 = vpop.f32.mrb[207].mxu1 }
 0x4da   : > { %v15394_v21 = vadd.f32 %v10491_v13, %v10490_v55  ;;  %v17722_v13 = vpack.c.bf16 %v14189_v22, %v14177_v2  ;;  %v5373_v26 = vmax.bf16 %v17232_v41, %v5181_v20  ;;  %v17723_v2 = vpack.c.bf16 %v14181_v8, %v14173_v52  ;;  %v12578_v8 = vld [vmem:[#allocation8 + $0x49c] ss:$12 sps:$4 sm:$0xff]  }
 0x4db   : > { %7765 = vmatmul.mubr.bf16.gmra.mrb[248].mxu0 %v5361_v42  ;;  %8863 = vmatmul.mubr.bf16.gmra.mrb[56].mxu1 %v5361_v42  ;;  %v15413_v42 = vrot.slane %v4944_v35, %v14642_v25  ;;  %v5016_v35 = vadd.bf16 %v15392_v10, %v17724_v28  ;;  %v12580_v28 = vld [vmem:[#allocation8 + $0x4a0] ss:$12 sps:$4 sm:$0xff]  }
 0x4dc   : > { %7774 = vmatprep.mubr.bf16.mxu0 %v5374_v63  ;;  %8870 = vmatprep.mubr.bf16.mxu1 %v5374_v63  ;;  %v5004_v0 = vadd.bf16 %v15392_v10, %v17722_v13 }
 0x4dd   : > { %v5003_v22 = vadd.bf16 %v15413_v42, %v17723_v2  ;;  %v5208_v52 = vmax.bf16 %v17232_v41, %v5016_v35  ;;  %v12579_v2 = vld [vmem:[#allocation8 + $0x560] ss:$12 sps:$4 sm:$0xff]   ;;  %v5015_v14 = vadd.bf16 %v15413_v42, %v17725_v44  ;;  %v12588_v44 = vld [vmem:[#allocation8 + $0x4b8] ss:$12 sps:$4 sm:$0xff]  }
 0x4de   : > { %v10493_v53 = vpop.f32.mrb[208].mxu1  ;;  %v5196_v43 = vmax.bf16 %v17232_v41, %v5004_v0 }
 0x4df   : > { %v10494_v39 = vpop.f32.mrb[209].mxu1  ;;  %v5195_v0 = vmax.bf16 %v17232_v41, %v5003_v22  ;;  %v12576_v22 = vld [vmem:[#allocation8 + $0x498] ss:$12 sps:$4 sm:$0xff]  }
 0x4e0   : > { %v15410_v9 = vadd.f32 %v10494_v39, %v10493_v53  ;;  %v10496_v55 = vpop.f32.mrb[210].mxu1 }
 0x4e1   : > { %v10497_v63 = vpop.f32.mrb[211].mxu1 }
 0x4e2   : > { %v15416_v33 = vadd.f32 %v10497_v63, %v10496_v55  ;;  %v12572_v63 = vld [vmem:[#allocation8 + $0x488] ss:$12 sps:$4 sm:$0xff]  }
 0x4e3   : > { %7775 = vmatmul.mubr.bf16.gmra.mrb[252].mxu0 %v5373_v26  ;;  %8871 = vmatmul.mubr.bf16.gmra.mrb[60].mxu1 %v5373_v26  ;;  %v12573_v26 = vld [vmem:[#allocation8 + $0x480] ss:$12 sps:$4 sm:$0xff]  }
 0x4e4   : > { %7817 = vmatprep.mubr.bf16.mxu0 %v5196_v43  ;;  %8911 = vmatprep.mubr.bf16.mxu1 %v5196_v43 }
 0x4e6   : > { %v10499_v13 = vpop.f32.mrb[212].mxu1 }
 0x4e7   : > { %v10500_v20 = vpop.f32.mrb[213].mxu1 }
 0x4e8   : > { %v15427_v53 = vadd.f32 %v10500_v20, %v10499_v13  ;;  %v10502_v39 = vpop.f32.mrb[214].mxu1  ;;  %v17726_v13 = vpack.c.bf16 %v14245_v38, %v14233_v29  ;;  %v12586_v38 = vld [vmem:[#allocation8 + $0x4cc] ss:$12 sps:$4 sm:$0xff]  }
 0x4e9   : > { %v10503_v55 = vpop.f32.mrb[215].mxu1 }
 0x4ea   : > { %v15430_v43 = vadd.f32 %v10503_v55, %v10502_v39  ;;  %v5028_v35 = vadd.bf16 %v15392_v10, %v17726_v13  ;;  %v12583_v39 = vld [vmem:[#allocation8 + $0x4b4] ss:$12 sps:$4 sm:$0xff]   ;;  %v17728_v13 = vpack.c.bf16 %v14273_v37, %v14261_v50  ;;  %v12594_v37 = vld [vmem:[#allocation8 + $0x4fc] ss:$12 sps:$4 sm:$0xff]  }
 0x4eb   : > { %7818 = vmatmul.mubr.bf16.vlgmr.msra.gmra.mrb[192].mxu0 %v5195_v0  ;;  %8912 = vmatmul.mubr.bf16.vlgmr.msra.gmra.mrb[64].mxu1 %v5195_v0  ;;  %v12587_v0 = vld [vmem:[#allocation8 + $0x578] ss:$12 sps:$4 sm:$0xff]  }
 0x4ec   : > { %7827 = vmatprep.mubr.bf16.mxu0 %v5208_v52  ;;  %8919 = vmatprep.mubr.bf16.mxu1 %v5208_v52  ;;  %v5220_v29 = vmax.bf16 %v17232_v41, %v5028_v35  ;;  %v5040_v35 = vadd.bf16 %v15392_v10, %v17728_v13 }
 0x4ed   : > { %10790 = vmatpush3.bf16.msra.mxu1 %v12572_v63  ;;  %7979 = vmatpush1.bf16.msra.mxu0 %v12573_v26  ;;  %v5207_v63 = vmax.bf16 %v17232_v41, %v5015_v14  ;;  %v12581_v26 = vld [vmem:[#allocation8 + $0x4b0] ss:$12 sps:$4 sm:$0xff]  }
 0x4ee   : > { %v10505_v20 = vpop.f32.mrb[216].mxu1  ;;  %7980 = vmatprep.subr.bf16.mxu0 %v12578_v8  ;;  %10791 = vmatprep.subr.bf16.mxu1 %v12579_v2  ;;  %v12595_v8 = vld [vmem:[#allocation8 + $0x590] ss:$12 sps:$4 sm:$0xff]   ;;  %v17727_v2 = vpack.c.bf16 %v14237_v51, %v14229_v40  ;;  %v5232_v50 = vmax.bf16 %v17232_v41, %v5040_v35  ;;  %v12599_v35 = vld [vmem:[#allocation8 + $0x514] ss:$12 sps:$4 sm:$0xff]  }
 0x4ef   : > { %v10506_v55 = vpop.f32.mrb[217].mxu1 }
 0x4f0   : > { %v15441_v52 = vadd.f32 %v10506_v55, %v10505_v20  ;;  %v10508_v36 = vpop.f32.mrb[218].mxu1  ;;  %v5027_v14 = vadd.bf16 %v15413_v42, %v17727_v2  ;;  %v12592_v2 = vld [vmem:[#allocation8 + $0x4f8] ss:$12 sps:$4 sm:$0xff]  }
 0x4f1   : > { %v10509_v48 = vpop.f32.mrb[219].mxu1  ;;  %7981 = vmatpush1.bf16.msra.mxu0 %v12576_v22  ;;  %10792 = vmatpush3.bf16.msra.mxu1 %v12580_v28  ;;  %v12584_v22 = vld [vmem:[#allocation8 + $0x4c8] ss:$12 sps:$4 sm:$0xff]   ;;  %v12596_v28 = vld [vmem:[#allocation8 + $0x4d0] ss:$12 sps:$4 sm:$0xff]  }
 0x4f2   : > { %v15444_v27 = vadd.f32 %v10509_v48, %v10508_v36  ;;  %7982 = vmatprep.subr.bf16.mxu0 %v12583_v39  ;;  %10793 = vmatprep.subr.bf16.mxu1 %v12587_v0  ;;  %v12591_v39 = vld [vmem:[#allocation8 + $0x4e4] ss:$12 sps:$4 sm:$0xff]   ;;  %v12603_v0 = vld [vmem:[#allocation8 + $0x5a8] ss:$12 sps:$4 sm:$0xff]   ;;  %v5219_v48 = vmax.bf16 %v17232_v41, %v5027_v14  ;;  %v12612_v14 = vld [vmem:[#allocation8 + $0x500] ss:$12 sps:$4 sm:$0xff]  }
 0x4f3   : > { %7828 = vmatmul.mubr.bf16.gmra.mrb[196].mxu0 %v5207_v63  ;;  %8920 = vmatmul.mubr.bf16.gmra.mrb[68].mxu1 %v5207_v63  ;;  %v12589_v63 = vld [vmem:[#allocation8 + $0x4e0] ss:$12 sps:$4 sm:$0xff]  }
 0x4f4   : > { %7837 = vmatprep.mubr.bf16.mxu0 %v5220_v29  ;;  %8927 = vmatprep.mubr.bf16.mxu1 %v5220_v29  ;;  %v12611_v29 = vld [vmem:[#allocation8 + $0x5c0] ss:$12 sps:$4 sm:$0xff]  }
 0x4f5   : > { %7983 = vmatpush1.bf16.msra.mxu0 %v12581_v26  ;;  %10794 = vmatpush3.bf16.msra.mxu1 %v12588_v44  ;;  %v12604_v26 = vld [vmem:[#allocation8 + $0x4e8] ss:$12 sps:$4 sm:$0xff]  }
 0x4f6   : > { %v10511_v20 = vpop.f32.mrb[220].mxu1  ;;  %7984 = vmatprep.subr.bf16.mxu0 %v12586_v38  ;;  %10795 = vmatprep.subr.bf16.mxu1 %v12595_v8  ;;  %v17729_v38 = vpack.c.bf16 %v14265_v17, %v14257_v61 }
 0x4f7   : > { %v10512_v55 = vpop.f32.mrb[221].mxu1 }
 0x4f8   : > { %v15455_v36 = vadd.f32 %v10512_v55, %v10511_v20  ;;  %v10514_v40 = vpop.f32.mrb[222].mxu1  ;;  %v5039_v8 = vadd.bf16 %v15413_v42, %v17729_v38  ;;  %v12619_v20 = vld [vmem:[#allocation8 + $0x5d8] ss:$12 sps:$4 sm:$0xff]   ;;  %v17732_v38 = vpack.c.bf16 %v14329_v34, %v14317_v1  ;;  %v12610_v1 = vld [vmem:[#allocation8 + $0x55c] ss:$12 sps:$4 sm:$0xff]  }
 0x4f9   : > { %v10515_v51 = vpop.f32.mrb[223].mxu1  ;;  %7985 = vmatpush1.bf16.msra.mxu0 %v12584_v22  ;;  %10796 = vmatpush3.bf16.msra.mxu1 %v12596_v28  ;;  %v17730_v22 = vpack.c.bf16 %v14301_v31, %v14289_v16  ;;  %v12602_v31 = vld [vmem:[#allocation8 + $0x52c] ss:$12 sps:$4 sm:$0xff]  }
 0x4fa   : > { %v15458_v44 = vadd.f32 %v10515_v51, %v10514_v40  ;;  %7986 = vmatprep.subr.bf16.mxu0 %v12591_v39  ;;  %10797 = vmatprep.subr.bf16.mxu1 %v12603_v0  ;;  %v5231_v55 = vmax.bf16 %v17232_v41, %v5039_v8  ;;  %v12597_v40 = vld [vmem:[#allocation8 + $0x510] ss:$12 sps:$4 sm:$0xff]   ;;  %v12620_v51 = vld [vmem:[#allocation8 + $0x518] ss:$12 sps:$4 sm:$0xff]   ;;  %v5064_v8 = vadd.bf16 %v15392_v10, %v17732_v38 }
 0x4fb   : > { %7838 = vmatmul.mubr.bf16.gmra.mrb[200].mxu0 %v5219_v48  ;;  %8928 = vmatmul.mubr.bf16.gmra.mrb[72].mxu1 %v5219_v48  ;;  %v5052_v28 = vadd.bf16 %v15392_v10, %v17730_v22  ;;  %v12635_v22 = vld [vmem:[#allocation8 + $0x6c8] ss:$12 sps:$4 sm:$0xff]  }
 0x4fc   : > { %7847 = vmatprep.mubr.bf16.mxu0 %v5232_v50  ;;  %8935 = vmatprep.mubr.bf16.mxu1 %v5232_v50  ;;  %v5256_v34 = vmax.bf16 %v17232_v41, %v5064_v8 }
 0x4fd   : > { %7987 = vmatpush1.bf16.msra.mxu0 %v12589_v63  ;;  %10798 = vmatpush3.bf16.msra.mxu1 %v12604_v26  ;;  %v5244_v16 = vmax.bf16 %v17232_v41, %v5052_v28  ;;  %v12627_v63 = vld [vmem:[#allocation8 + $0x5f0] ss:$12 sps:$4 sm:$0xff]   ;;  %v17731_v26 = vpack.c.bf16 %v14293_v12, %v14285_v6 }
 0x4fe   : > { %v10517_v13 = vpop.f32.mrb[224].mxu1  ;;  %7988 = vmatprep.subr.bf16.mxu0 %v12594_v37  ;;  %10799 = vmatprep.subr.bf16.mxu1 %v12611_v29  ;;  %v12600_v37 = vld [vmem:[#allocation8 + $0x528] ss:$12 sps:$4 sm:$0xff]   ;;  %v12628_v29 = vld [vmem:[#allocation8 + $0x530] ss:$12 sps:$4 sm:$0xff]  }
 0x4ff   : > { %v10518_v39 = vpop.f32.mrb[225].mxu1  ;;  %v5051_v50 = vadd.bf16 %v15413_v42, %v17731_v26 }
 0x500   : > { %v15469_v0 = vadd.f32 %v10518_v39, %v10517_v13  ;;  %v10520_v17 = vpop.f32.mrb[226].mxu1 }
 0x501   : > { %v10521_v61 = vpop.f32.mrb[227].mxu1  ;;  %7989 = vmatpush1.bf16.msra.mxu0 %v12592_v2  ;;  %10800 = vmatpush3.bf16.msra.mxu1 %v12612_v14  ;;  %v12607_v14 = vld [vmem:[#allocation8 + $0x544] ss:$12 sps:$4 sm:$0xff]  }
 0x502   : > { %v15472_v48 = vadd.f32 %v10521_v61, %v10520_v17  ;;  %7990 = vmatprep.subr.bf16.mxu0 %v12599_v35  ;;  %10801 = vmatprep.subr.bf16.mxu1 %v12619_v20  ;;  %v5243_v35 = vmax.bf16 %v17232_v41, %v5051_v50  ;;  %v12605_v20 = vld [vmem:[#allocation8 + $0x540] ss:$12 sps:$4 sm:$0xff]   ;;  %v17733_v17 = vld [vmem:[#allocation161_spill] sm:$0xff] }
 0x503   : > { %7848 = vmatmul.mubr.bf16.gmra.mrb[204].mxu0 %v5231_v55  ;;  %8936 = vmatmul.mubr.bf16.gmra.mrb[76].mxu1 %v5231_v55  ;;  %v17734_v61 = vld [vmem:[#allocation18_spill] sm:$0xff] }
 0x504   : > { %7857 = vmatprep.mubr.bf16.mxu0 %v5244_v16  ;;  %8943 = vmatprep.mubr.bf16.mxu1 %v5244_v16  ;;  %v17735_v55 = vpack.c.bf16 %v17733_v17, %v17734_v61  ;;  %v17736_v16 = vld [vmem:[#allocation169_spill] sm:$0xff] }
 0x505   : > { %7991 = vmatpush1.bf16.msra.mxu0 %v12597_v40  ;;  %10802 = vmatpush3.bf16.msra.mxu1 %v12620_v51  ;;  %v12608_v51 = vld [vmem:[#allocation8 + $0x558] ss:$12 sps:$4 sm:$0xff]   ;;  %v12616_v17 = vld [vmem:[#allocation8 + $0x588] ss:$12 sps:$4 sm:$0xff]  }
 0x506   : > { %v10523_v2 = vpop.f32.mrb[228].mxu1  ;;  %7992 = vmatprep.subr.bf16.mxu0 %v12602_v31  ;;  %10803 = vmatprep.subr.bf16.mxu1 %v12627_v63  ;;  %v5063_v40 = vadd.bf16 %v15413_v42, %v17735_v55  ;;  %v17737_v31 = vld [vmem:[#allocation165_spill] sm:$0xff] }
 0x507   : > { %v10524_v28 = vpop.f32.mrb[229].mxu1  ;;  %v17738_v63 = vpack.c.bf16 %v17736_v16, %v17737_v31  ;;  %v17742_v61 = vld [vmem:[#allocation173_spill] sm:$0xff] }
 0x508   : > { %v15483_v13 = vadd.f32 %v10524_v28, %v10523_v2  ;;  %v10526_v12 = vpop.f32.mrb[230].mxu1  ;;  %v17743_v55 = vpack.c.bf16 %v14385_v45, %v17742_v61  ;;  %v12623_v16 = vld [vmem:[#allocation8 + $0x5a4] ss:$12 sps:$4 sm:$0xff]   ;;  %v12626_v45 = vld [vmem:[#allocation8 + $0x5bc] ss:$12 sps:$4 sm:$0xff]  }
 0x509   : > { %v10527_v6 = vpop.f32.mrb[231].mxu1  ;;  %7993 = vmatpush1.bf16.msra.mxu0 %v12600_v37  ;;  %10804 = vmatpush3.bf16.msra.mxu1 %v12628_v29  ;;  %v5076_v26 = vadd.bf16 %v15392_v10, %v17738_v63  ;;  %v12615_v37 = vld [vmem:[#allocation8 + $0x574] ss:$12 sps:$4 sm:$0xff]  }
 0x50a   : > { %v15486_v39 = vadd.f32 %v10527_v6, %v10526_v12  ;;  %7994 = vmatprep.subr.bf16.mxu0 %v12607_v14  ;;  %10901 = vmatprep.subr.bf16.mxu1 %v12635_v22  ;;  %v5255_v14 = vmax.bf16 %v17232_v41, %v5063_v40  ;;  %v12613_v22 = vld [vmem:[#allocation8 + $0x570] ss:$12 sps:$4 sm:$0xff]   ;;  %v12618_v6 = vld [vmem:[#allocation8 + $0x58c] ss:$12 sps:$4 sm:$0xff]   ;;  %v5088_v40 = vadd.bf16 %v15392_v10, %v17743_v55 }
 0x50b   : > { %7858 = vmatmul.mubr.bf16.gmra.mrb[208].mxu0 %v5243_v35  ;;  %8944 = vmatmul.mubr.bf16.gmra.mrb[80].mxu1 %v5243_v35  ;;  %v5268_v12 = vmax.bf16 %v17232_v41, %v5076_v26  ;;  %v17739_v35 = vld [vmem:[#allocation167_spill] sm:$0xff] }
 0x50c   : > { %7867 = vmatprep.mubr.bf16.mxu0 %v5256_v34  ;;  %8951 = vmatprep.mubr.bf16.mxu1 %v5256_v34 }
 0x50d   : > { %7995 = vmatpush1.bf16.msra.mxu0 %v12605_v20  ;;  %v17740_v20 = vld [vmem:[#allocation19_spill] sm:$0xff] }
 0x50e   : > { %v10529_v50 = vpop.f32.mrb[232].mxu1  ;;  %7996 = vmatprep.subr.bf16.mxu0 %v12610_v1  ;;  %v17741_v34 = vpack.c.bf16 %v17739_v35, %v17740_v20  ;;  %v12624_v35 = vld [vmem:[#allocation8 + $0x5b8] ss:$12 sps:$4 sm:$0xff]   ;;  %v17747_v20 = vpack.c.bf16 %v14413_v30, %v14401_v19 }
 0x50f   : > { %v10530_v29 = vpop.f32.mrb[233].mxu1  ;;  %v12634_v19 = vld [vmem:[#allocation8 + $0x5ec] ss:$12 sps:$4 sm:$0xff]   ;;  %v17748_v30 = vld [vmem:[#allocation181_spill] sm:$0xff] }
 0x510   : > { %v15497_v38 = vadd.f32 %v10530_v29, %v10529_v50  ;;  %v10532_v8 = vpop.f32.mrb[234].mxu1  ;;  %v5075_v1 = vadd.bf16 %v15413_v42, %v17741_v34  ;;  %v12621_v29 = vld [vmem:[#allocation8 + $0x5a0] ss:$12 sps:$4 sm:$0xff]   ;;  %v5100_v34 = vadd.bf16 %v15392_v10, %v17747_v20 }
 0x511   : > { %v10533_v2 = vpop.f32.mrb[235].mxu1  ;;  %7997 = vmatpush1.bf16.msra.mxu0 %v12608_v51 }
 0x512   : > { %v15500_v28 = vadd.f32 %v10533_v2, %v10532_v8  ;;  %7998 = vmatprep.subr.bf16.mxu0 %v12615_v37  ;;  %v5267_v37 = vmax.bf16 %v17232_v41, %v5075_v1  ;;  %v5280_v2 = vmax.bf16 %v17232_v41, %v5088_v40 }
 0x513   : > { %7868 = vmatmul.mubr.bf16.gmra.mrb[212].mxu0 %v5255_v14  ;;  %8952 = vmatmul.mubr.bf16.gmra.mrb[84].mxu1 %v5255_v14  ;;  %v17744_v14 = vld [vmem:[#allocation175_spill] sm:$0xff] }
 0x514   : > { %7877 = vmatprep.mubr.bf16.mxu0 %v5268_v12  ;;  %8959 = vmatprep.mubr.bf16.mxu1 %v5268_v12 }
 0x515   : > { %7999 = vmatpush1.bf16.msra.mxu0 %v12613_v22  ;;  %v17745_v22 = vld [vmem:[#allocation171_spill] sm:$0xff] }
 0x516   : > { %v10535_v51 = vpop.f32.mrb[236].mxu1  ;;  %8000 = vmatprep.subr.bf16.mxu0 %v12618_v6  ;;  %v17746_v12 = vpack.c.bf16 %v17744_v14, %v17745_v22  ;;  %v17751_v14 = vpack.c.bf16 %v14441_v4, %v14429_v46  ;;  %v17752_v4 = vld [vmem:[#allocation184_spill] sm:$0xff] }
 0x517   : > { %v10536_v31 = vpop.f32.mrb[237].mxu1  ;;  %v17753_v46 = vpack.c.bf16 %v14433_v32, %v17752_v4  ;;  %v17756_v32 = vld [vmem:[#allocation193_spill] sm:$0xff] }
 0x518   : > { %v15511_v63 = vadd.f32 %v10536_v31, %v10535_v51  ;;  %v10538_v26 = vpop.f32.mrb[238].mxu1  ;;  %v5087_v6 = vadd.bf16 %v15413_v42, %v17746_v12  ;;  %v12629_v31 = vld [vmem:[#allocation8 + $0x5d0] ss:$12 sps:$4 sm:$0xff]   ;;  %v5112_v22 = vadd.bf16 %v15392_v10, %v17751_v14 }
 0x519   : > { %v10539_v50 = vpop.f32.mrb[239].mxu1  ;;  %8001 = vmatpush1.bf16.msra.mxu0 %v12616_v17  ;;  %v12631_v17 = vld [vmem:[#allocation8 + $0x5d4] ss:$12 sps:$4 sm:$0xff]  }
 0x51a   : > { %v15514_v8 = vadd.f32 %v10539_v50, %v10538_v26  ;;  %8002 = vmatprep.subr.bf16.mxu0 %v12623_v16  ;;  %v5279_v16 = vmax.bf16 %v17232_v41, %v5087_v6  ;;  %v5292_v50 = vmax.bf16 %v17232_v41, %v5100_v34  ;;  %v12639_v6 = vld [vmem:[#allocation8 + $0x604] ss:$12 sps:$4 sm:$0xff]  }
 0x51b   : > { %7878 = vmatmul.mubr.bf16.gmra.mrb[216].mxu0 %v5267_v37  ;;  %8960 = vmatmul.mubr.bf16.gmra.mrb[88].mxu1 %v5267_v37  ;;  %v17749_v37 = vld [vmem:[#allocation178_spill] sm:$0xff] }
 0x51c   : > { %7887 = vmatprep.mubr.bf16.mxu0 %v5280_v2  ;;  %8967 = vmatprep.mubr.bf16.mxu1 %v5280_v2 }
 0x51d   : > { %8003 = vmatpush1.bf16.msra.mxu0 %v12621_v29  ;;  %v17750_v29 = vpack.c.bf16 %v17748_v30, %v17749_v37 }
 0x51e   : > { %v10541_v1 = vpop.f32.mrb[240].mxu1  ;;  %8004 = vmatprep.subr.bf16.mxu0 %v12626_v45  ;;  %v12632_v45 = vld [vmem:[#allocation8 + $0x5e8] ss:$12 sps:$4 sm:$0xff]  }
 0x51f   : > { %v10542_v61 = vpop.f32.mrb[241].mxu1  ;;  %v5099_v2 = vadd.bf16 %v15413_v42, %v17750_v29 }
 0x520   : > { %v15525_v55 = vadd.f32 %v10542_v61, %v10541_v1  ;;  %v10544_v40 = vpop.f32.mrb[242].mxu1 }
 0x521   : > { %v10545_v51 = vpop.f32.mrb[243].mxu1  ;;  %8005 = vmatpush1.bf16.msra.mxu0 %v12624_v35 }
 0x522   : > { %v15528_v26 = vadd.f32 %v10545_v51, %v10544_v40  ;;  %8006 = vmatprep.subr.bf16.mxu0 %v12631_v17  ;;  %v5291_v17 = vmax.bf16 %v17232_v41, %v5099_v2  ;;  %v5304_v40 = vmax.bf16 %v17232_v41, %v5112_v22  ;;  %v5111_v51 = vadd.bf16 %v15413_v42, %v17753_v46 }
 0x523   : > { %7888 = vmatmul.mubr.bf16.gmra.mrb[220].mxu0 %v5279_v16  ;;  %8968 = vmatmul.mubr.bf16.gmra.mrb[92].mxu1 %v5279_v16  ;;  %v17754_v16 = vld [vmem:[#allocation191_spill] sm:$0xff] }
 0x524   : > { %7897 = vmatprep.mubr.bf16.mxu0 %v5292_v50  ;;  %8975 = vmatprep.mubr.bf16.mxu1 %v5292_v50 }
 0x525   : > { %8007 = vmatpush1.bf16.msra.mxu0 %v12629_v31  ;;  %v17755_v31 = vpack.c.bf16 %v14469_v60, %v17754_v16  ;;  %v17757_v60 = vld [vmem:[#allocation189_spill] sm:$0xff] }
 0x526   : > { %v10547_v12 = vpop.f32.mrb[244].mxu1  ;;  %8008 = vmatprep.subr.bf16.mxu0 %v12634_v19 }
 0x527   : > { %v10548_v35 = vpop.f32.mrb[245].mxu1  ;;  %v5124_v50 = vadd.bf16 %v15392_v10, %v17755_v31 }
 0x528   : > { %v15539_v20 = vadd.f32 %v10548_v35, %v10547_v12  ;;  %v10550_v34 = vpop.f32.mrb[246].mxu1  ;;  %v17758_v12 = vpack.c.bf16 %v17756_v32, %v17757_v60  ;;  %v17759_v35 = vld [vmem:[#allocation198_spill] sm:$0xff] }
 0x529   : > { %v10551_v1 = vpop.f32.mrb[247].mxu1  ;;  %8009 = vmatpush1.bf16.msra.mxu0 %v12632_v45  ;;  %v5303_v45 = vmax.bf16 %v17232_v41, %v5111_v51  ;;  %v5316_v22 = vmax.bf16 %v17232_v41, %v5124_v50 }
 0x52a   : > { %v15542_v61 = vadd.f32 %v10551_v1, %v10550_v34  ;;  %8171 = vmatprep.subr.bf16.mxu0 %v12639_v6  ;;  %v5123_v6 = vadd.bf16 %v15413_v42, %v17758_v12  ;;  %v17760_v34 = vpack.c.bf16 %v14497_v23, %v17759_v35  ;;  %v17762_v23 = vld [vmem:[#allocation196_spill] sm:$0xff] }
 0x52b   : > { %7898 = vmatmul.mubr.bf16.gmra.mrb[224].mxu0 %v5291_v17  ;;  %8976 = vmatmul.mubr.bf16.gmra.mrb[96].mxu1 %v5291_v17 }
 0x52c   : > { %7907 = vmatprep.mubr.bf16.mxu0 %v5304_v40  ;;  %8983 = vmatprep.mubr.bf16.mxu1 %v5304_v40  ;;  %v5136_v1 = vadd.bf16 %v15392_v10, %v17760_v34  ;;  %v5315_v16 = vmax.bf16 %v17232_v41, %v5123_v6 }
 0x52e   : > { %v10553_v19 = vpop.f32.mrb[248].mxu1  ;;  %v5328_v50 = vmax.bf16 %v17232_v41, %v5136_v1 }
 0x52f   : > { %v10554_v30 = vpop.f32.mrb[249].mxu1 }
 0x530   : > { %v15553_v37 = vadd.f32 %v10554_v30, %v10553_v19  ;;  %v10556_v29 = vpop.f32.mrb[250].mxu1  ;;  %v17761_v19 = vld [vmem:[#allocation200_spill] sm:$0xff] }
 0x531   : > { %v10557_v2 = vpop.f32.mrb[251].mxu1  ;;  %v17763_v30 = vpack.c.bf16 %v17761_v19, %v17762_v23  ;;  %v17769_v19 = vld [vmem:[#allocation216_spill] sm:$0xff] }
 0x532   : > { %v15556_v14 = vadd.f32 %v10557_v2, %v10556_v29  ;;  %v17764_v2 = vld [vmem:[#allocation205_spill] sm:$0xff]  ;;  %v17770_v23 = vld [vmem:[#allocation212_spill] sm:$0xff] }
 0x533   : > { %7908 = vmatmul.mubr.bf16.gmra.mrb[228].mxu0 %v5303_v45  ;;  %8984 = vmatmul.mubr.bf16.gmra.mrb[100].mxu1 %v5303_v45  ;;  %v5135_v29 = vadd.bf16 %v15413_v42, %v17763_v30  ;;  %v17765_v45 = vpack.c.bf16 %v14525_v47, %v17764_v2  ;;  %v17771_v30 = vpack.c.bf16 %v17769_v19, %v17770_v23 }
 0x534   : > { %7917 = vmatprep.mubr.bf16.mxu0 %v5316_v22  ;;  %8991 = vmatprep.mubr.bf16.mxu1 %v5316_v22 }
 0x535   : > { %v5148_v22 = vadd.bf16 %v15392_v10, %v17765_v45  ;;  %v5327_v34 = vmax.bf16 %v17232_v41, %v5135_v29  ;;  %v5160_v29 = vadd.bf16 %v15392_v10, %v17771_v30 }
 0x536   : > { %v10559_v17 = vpop.f32.mrb[252].mxu1 }
 0x537   : > { %v10560_v40 = vpop.f32.mrb[253].mxu1 }
 0x538   : > { %v15567_v4 = vadd.f32 %v10560_v40, %v10559_v17  ;;  %v10562_v46 = vpop.f32.mrb[254].mxu1  ;;  %v5340_v17 = vmax.bf16 %v17232_v41, %v5148_v22 }
 0x539   : > { %v10563_v51 = vpop.f32.mrb[255].mxu1 }
 0x53a   : > { %v15570_v31 = vadd.f32 %v10563_v51, %v10562_v46  ;;  %v17766_v46 = vld [vmem:[#allocation207_spill] sm:$0xff] }
 0x53b   : > { %7918 = vmatmul.mubr.bf16.gmra.mrb[232].mxu0 %v5315_v16  ;;  %8992 = vmatmul.mubr.bf16.gmra.mrb[104].mxu1 %v5315_v16  ;;  %v17767_v51 = vld [vmem:[#allocation203_spill] sm:$0xff] }
 0x53c   : > { %7927 = vmatprep.mubr.bf16.mxu0 %v5328_v50  ;;  %8999 = vmatprep.mubr.bf16.mxu1 %v5328_v50  ;;  %v17768_v16 = vpack.c.bf16 %v17766_v46, %v17767_v51  ;;  %v17775_v51 = vld [vmem:[#allocation224_spill] sm:$0xff] }
 0x53e   : > { %v10581_v32 = vpop.f32.mrb[0].mxu1  ;;  %v5147_v50 = vadd.bf16 %v15413_v42, %v17768_v16  ;;  %v17776_v16 = vld [vmem:[#allocation220_spill] sm:$0xff] }
 0x53f   : > { %v10582_v60 = vpop.f32.mrb[1].mxu1 }
 0x540   : > { %v10583_v12 = vadd.f32 %v10582_v60, %v10581_v32  ;;  %v10584_v6 = vpop.f32.mrb[2].mxu1  ;;  %v5339_v60 = vmax.bf16 %v17232_v41, %v5147_v50  ;;  %v17777_v50 = vpack.c.bf16 %v17775_v51, %v17776_v16 }
 0x541   : > { %v10585_v35 = vpop.f32.mrb[3].mxu1 }
 0x542   : > { %v10586_v1 = vadd.f32 %v10585_v35, %v10584_v6  ;;  %v15584_v40 = vadd.f32 %v10583_v12, %v15340_v3  ;;  %v5172_v19 = vadd.bf16 %v15392_v10, %v17777_v50 }
 0x543   : > { %7928 = vmatmul.mubr.bf16.gmra.mrb[236].mxu0 %v5327_v34  ;;  %9000 = vmatmul.mubr.bf16.gmra.mrb[108].mxu1 %v5327_v34  ;;  %v17772_v34 = vld [vmem:[#allocation214_spill] sm:$0xff] }
 0x544   : > { %7937 = vmatprep.mubr.bf16.mxu0 %v5340_v17  ;;  %9007 = vmatprep.mubr.bf16.mxu1 %v5340_v17  ;;  %v15587_v47 = vadd.f32 %v10586_v1, %v15343_v54  ;;  %v5352_v54 = vmax.bf16 %v17232_v41, %v5160_v29  ;;  %v17773_v1 = vld [vmem:[#allocation210_spill] sm:$0xff] }
 0x545   : > { %v17774_v17 = vpack.c.bf16 %v17772_v34, %v17773_v1 }
 0x546   : > { %v10587_v2 = vpop.f32.mrb[4].mxu1 }
 0x547   : > { %v10588_v3 = vpop.f32.mrb[5].mxu1  ;;  %v5159_v46 = vadd.bf16 %v15413_v42, %v17774_v17 }
 0x548   : > { %v10589_v45 = vadd.f32 %v10588_v3, %v10587_v2  ;;  %v10590_v22 = vpop.f32.mrb[6].mxu1 }
 0x549   : > { %v10591_v32 = vpop.f32.mrb[7].mxu1  ;;  %v5351_v3 = vmax.bf16 %v17232_v41, %v5159_v46  ;;  %v17782_v46 = vld [vmem:[#allocation228_spill] sm:$0xff] }
 0x54a   : > { %v10592_v12 = vadd.f32 %v10591_v32, %v10590_v22  ;;  %v15600_v6 = vadd.f32 %v10589_v45, %v15354_v56  ;;  %v5364_v22 = vmax.bf16 %v17232_v41, %v5172_v19 }
 0x54b   : > { %7938 = vmatmul.mubr.bf16.gmra.mrb[240].mxu0 %v5339_v60  ;;  %9008 = vmatmul.mubr.bf16.gmra.mrb[112].mxu1 %v5339_v60 }
 0x54c   : > { %7947 = vmatprep.mubr.bf16.mxu0 %v5352_v54  ;;  %9015 = vmatprep.mubr.bf16.mxu1 %v5352_v54  ;;  %v15603_v35 = vadd.f32 %v10592_v12, %v15357_v15  ;;  %v4890_v15 = vcombine.high %v15376_v59, %v15376_v59  ;;  %v17778_v12 = vld [vmem:[#allocation222_spill] sm:$0xff]  ;;  %v17781_v59 = vld [vmem:[#allocation232_spill] sm:$0xff] }
 0x54d   : > { %v17779_v54 = vld [vmem:[#allocation218_spill] sm:$0xff]  ;;  %v17783_v51 = vpack.c.bf16 %v17781_v59, %v17782_v46 }
 0x54e   : > { %v10593_v23 = vpop.f32.mrb[8].mxu1  ;;  %v17780_v34 = vpack.c.bf16 %v17778_v12, %v17779_v54  ;;  %v4965_v17 = vpack.i.b16 %v4890_v15, %v4890_v15 }
 0x54f   : > { %v10594_v56 = vpop.f32.mrb[9].mxu1  ;;  %v5184_v16 = vadd.bf16 %v15392_v10, %v17783_v51 }
 0x550   : > { %v10595_v30 = vadd.f32 %v10594_v56, %v10593_v23  ;;  %v10596_v29 = vpop.f32.mrb[10].mxu1  ;;  %v5171_v1 = vadd.bf16 %v15413_v42, %v17780_v34  ;;  %v4888_v56 = vcombine.high %v15398_v24, %v15398_v24  ;;  %v17787_v34 = vld [vmem:[#allocation143_spill] sm:$0xff] }
 0x551   : > { %v10597_v2 = vpop.f32.mrb[11].mxu1 }
 0x552   : > { %v10598_v45 = vadd.f32 %v10597_v2, %v10596_v29  ;;  %v15618_v32 = vadd.f32 %v10595_v30, %v15369_v18  ;;  %v5363_v30 = vmax.bf16 %v17232_v41, %v5171_v1  ;;  %v15635_v29 = vrot.slane %v4965_v17, %v14642_v25  ;;  %v17788_v1 = vld [vmem:[#allocation141_spill] sm:$0xff] }
 0x553   : > { %7948 = vmatmul.mubr.bf16.gmra.mrb[244].mxu0 %v5351_v3  ;;  %9016 = vmatmul.mubr.bf16.gmra.mrb[116].mxu1 %v5351_v3  ;;  %v5376_v3 = vmax.bf16 %v17232_v41, %v5184_v16  ;;  %v4958_v24 = vpack.i.b16 %v4888_v56, %v4888_v56  ;;  %v17789_v17 = vpack.c.bf16 %v17787_v34, %v17788_v1 }
 0x554   : > { %7957 = vmatprep.mubr.bf16.mxu0 %v5364_v22  ;;  %9023 = vmatprep.mubr.bf16.mxu1 %v5364_v22  ;;  %v15621_v60 = vadd.f32 %v10598_v45, %v15372_v62  ;;  %v17784_v45 = vld [vmem:[#allocation230_spill] sm:$0xff] }
 0x555   : > { %v17785_v22 = vld [vmem:[#allocation226_spill] sm:$0xff]  ;;  %v5006_v59 = vadd.bf16 %v15635_v29, %v17789_v17 }
 0x556   : > { %v10599_v18 = vpop.f32.mrb[12].mxu1  ;;  %v17786_v12 = vpack.c.bf16 %v17784_v45, %v17785_v22  ;;  %v17794_v45 = vld [vmem:[#allocation145_spill] sm:$0xff] }
 0x557   : > { %v10600_v50 = vpop.f32.mrb[13].mxu1 }
 0x558   : > { %v10601_v19 = vadd.f32 %v10600_v50, %v10599_v18  ;;  %v10602_v23 = vpop.f32.mrb[14].mxu1  ;;  %v5183_v54 = vadd.bf16 %v15413_v42, %v17786_v12  ;;  %v15653_v18 = vrot.slane %v4958_v24, %v14642_v25  ;;  %v17793_v24 = vld [vmem:[#allocation147_spill] sm:$0xff] }
 0x559   : > { %v10603_v62 = vpop.f32.mrb[15].mxu1  ;;  %v17795_v22 = vpack.c.bf16 %v17793_v24, %v17794_v45  ;;  %v12644_v24 = vld [vmem:[#allocation8 + $0x620] ss:$12 sps:$4 sm:$0xff]   ;;  %v17799_v45 = vld [vmem:[#allocation151_spill] sm:$0xff] }
 0x55a   : > { %v10604_v2 = vadd.f32 %v10603_v62, %v10602_v23  ;;  %v15639_v15 = vadd.f32 %v10601_v19, %v15388_v57  ;;  %v5375_v50 = vmax.bf16 %v17232_v41, %v5183_v54  ;;  %v5198_v23 = vmax.bf16 %v17232_v41, %v5006_v59  ;;  %v17790_v62 = vld [vmem:[#allocation142_spill] sm:$0xff] }
 0x55b   : > { %7958 = vmatmul.mubr.bf16.gmra.mrb[248].mxu0 %v5363_v30  ;;  %9024 = vmatmul.mubr.bf16.gmra.mrb[120].mxu1 %v5363_v30  ;;  %v17791_v30 = vld [vmem:[#allocation140_spill] sm:$0xff]  ;;  %v5018_v12 = vadd.bf16 %v15635_v29, %v17795_v22  ;;  %v17800_v22 = vld [vmem:[#allocation149_spill] sm:$0xff] }
 0x55c   : > { %7967 = vmatprep.mubr.bf16.mxu0 %v5376_v3  ;;  %9031 = vmatprep.mubr.bf16.mxu1 %v5376_v3  ;;  %v15642_v10 = vadd.f32 %v10604_v2, %v15394_v21  ;;  %v17792_v2 = vpack.c.bf16 %v17790_v62, %v17791_v30  ;;  %v17797_v62 = vld [vmem:[#allocation144_spill] sm:$0xff] }
 0x55e   : > { %v10605_v57 = vpop.f32.mrb[16].mxu1  ;;  %v5005_v3 = vadd.bf16 %v15653_v18, %v17792_v2 }
 0x55f   : > { %v10606_v46 = vpop.f32.mrb[17].mxu1 }
 0x560   : > { %v10607_v51 = vadd.f32 %v10606_v46, %v10605_v57  ;;  %v10608_v16 = vpop.f32.mrb[18].mxu1  ;;  %v5197_v17 = vmax.bf16 %v17232_v41, %v5005_v3  ;;  %v12636_v57 = vld [vmem:[#allocation8 + $0x608] ss:$12 sps:$4 sm:$0xff]   ;;  %v12640_v3 = vld [vmem:[#allocation8 + $0x618] ss:$12 sps:$4 sm:$0xff]  }
 0x561   : > { %v10609_v21 = vpop.f32.mrb[19].mxu1 }
 0x562   : > { %v10610_v19 = vadd.f32 %v10609_v21, %v10608_v16  ;;  %v15658_v42 = vadd.f32 %v10607_v51, %v15410_v9  ;;  %v5210_v51 = vmax.bf16 %v17232_v41, %v5018_v12  ;;  %v12642_v16 = vld [vmem:[#allocation8 + $0x61c] ss:$12 sps:$4 sm:$0xff]   ;;  %v12643_v21 = vld [vmem:[#allocation8 + $0x6e0] ss:$12 sps:$4 sm:$0xff]  }
 0x563   : > { %7968 = vmatmul.mubr.bf16.gmra.mrb[252].mxu0 %v5375_v50  ;;  %9032 = vmatmul.mubr.bf16.gmra.mrb[124].mxu1 %v5375_v50 }
 0x564   : > { %8010 = vmatprep.mubr.bf16.mxu0 %v5198_v23  ;;  %9072 = vmatprep.mubr.bf16.mxu1 %v5198_v23  ;;  %v15661_v56 = vadd.f32 %v10610_v19, %v15416_v33  ;;  %v12637_v33 = vld [vmem:[#allocation8 + $0x600] ss:$12 sps:$4 sm:$0xff]  }
 0x565   : > { %v17796_v23 = vld [vmem:[#allocation146_spill] sm:$0xff] }
 0x566   : > { %v10611_v54 = vpop.f32.mrb[20].mxu1  ;;  %v17798_v30 = vpack.c.bf16 %v17796_v23, %v17797_v62  ;;  %v12650_v62 = vld [vmem:[#allocation8 + $0x64c] ss:$12 sps:$4 sm:$0xff]  }
 0x567   : > { %v10612_v9 = vpop.f32.mrb[21].mxu1 }
 0x568   : > { %v10613_v34 = vadd.f32 %v10612_v9, %v10611_v54  ;;  %v10614_v1 = vpop.f32.mrb[22].mxu1  ;;  %v5017_v2 = vadd.bf16 %v15653_v18, %v17798_v30  ;;  %v12647_v9 = vld [vmem:[#allocation8 + $0x634] ss:$12 sps:$4 sm:$0xff]  }
 0x569   : > { %v10615_v59 = vpop.f32.mrb[23].mxu1 }
 0x56a   : > { %v10616_v46 = vadd.f32 %v10615_v59, %v10614_v1  ;;  %v15674_v50 = vadd.f32 %v10613_v34, %v15427_v53  ;;  %v17801_v53 = vpack.c.bf16 %v17799_v45, %v17800_v22  ;;  %v12648_v22 = vld [vmem:[#allocation8 + $0x648] ss:$12 sps:$4 sm:$0xff]  }
 0x56b   : > { %8011 = vmatmul.mubr.bf16.vlgmr.msra.gmra.mrb[192].mxu0 %v5197_v17  ;;  %9073 = vmatmul.mubr.bf16.vlgmr.msra.gmra.mrb[128].mxu1 %v5197_v17 }
 0x56c   : > { %8020 = vmatprep.mubr.bf16.mxu0 %v5210_v51  ;;  %9080 = vmatprep.mubr.bf16.mxu1 %v5210_v51  ;;  %v15677_v19 = vadd.f32 %v10616_v46, %v15430_v43  ;;  %v5030_v12 = vadd.bf16 %v15635_v29, %v17801_v53  ;;  %v12651_v43 = vld [vmem:[#allocation8 + $0x6f8] ss:$12 sps:$4 sm:$0xff]   ;;  %v5209_v46 = vmax.bf16 %v17232_v41, %v5017_v2  ;;  %v17802_v2 = vld [vmem:[#allocation150_spill] sm:$0xff] }
 0x56d   : > { %10902 = vmatpush3.bf16.msra.mxu1 %v12636_v57  ;;  %8172 = vmatpush1.bf16.msra.mxu0 %v12637_v33  ;;  %v12645_v57 = vld [vmem:[#allocation8 + $0x630] ss:$12 sps:$4 sm:$0xff]   ;;  %v12652_v33 = vld [vmem:[#allocation8 + $0x638] ss:$12 sps:$4 sm:$0xff]  }
 0x56e   : > { %v10617_v54 = vpop.f32.mrb[24].mxu1  ;;  %8173 = vmatprep.subr.bf16.mxu0 %v12642_v16  ;;  %10903 = vmatprep.subr.bf16.mxu1 %v12643_v21  ;;  %v5222_v23 = vmax.bf16 %v17232_v41, %v5030_v12  ;;  %v12659_v16 = vld [vmem:[#allocation8 + $0x710] ss:$12 sps:$4 sm:$0xff]   ;;  %v17805_v12 = vld [vmem:[#allocation155_spill] sm:$0xff] }
 0x56f   : > { %v10618_v34 = vpop.f32.mrb[25].mxu1  ;;  %v12660_v53 = vld [vmem:[#allocation8 + $0x650] ss:$12 sps:$4 sm:$0xff]  }
 0x570   : > { %v10619_v1 = vadd.f32 %v10618_v34, %v10617_v54  ;;  %v10620_v17 = vpop.f32.mrb[26].mxu1  ;;  %v17806_v54 = vld [vmem:[#allocation153_spill] sm:$0xff] }
 0x571   : > { %v10621_v59 = vpop.f32.mrb[27].mxu1  ;;  %8174 = vmatpush1.bf16.msra.mxu0 %v12640_v3  ;;  %10904 = vmatpush3.bf16.msra.mxu1 %v12644_v24  ;;  %v17803_v3 = vld [vmem:[#allocation148_spill] sm:$0xff]  ;;  %v12655_v34 = vld [vmem:[#allocation8 + $0x664] ss:$12 sps:$4 sm:$0xff]  }
 0x572   : > { %v10622_v51 = vadd.f32 %v10621_v59, %v10620_v17  ;;  %8175 = vmatprep.subr.bf16.mxu0 %v12647_v9  ;;  %10905 = vmatprep.subr.bf16.mxu1 %v12651_v43  ;;  %v15690_v21 = vadd.f32 %v10619_v1, %v15441_v52  ;;  %v17804_v24 = vpack.c.bf16 %v17802_v2, %v17803_v3  ;;  %v12658_v3 = vld [vmem:[#allocation8 + $0x67c] ss:$12 sps:$4 sm:$0xff]  }
 0x573   : > { %8021 = vmatmul.mubr.bf16.gmra.mrb[196].mxu0 %v5209_v46  ;;  %9081 = vmatmul.mubr.bf16.gmra.mrb[132].mxu1 %v5209_v46  ;;  %v17807_v52 = vpack.c.bf16 %v17805_v12, %v17806_v54  ;;  %v12656_v54 = vld [vmem:[#allocation8 + $0x678] ss:$12 sps:$4 sm:$0xff]  }
 0x574   : > { %8030 = vmatprep.mubr.bf16.mxu0 %v5222_v23  ;;  %9088 = vmatprep.mubr.bf16.mxu1 %v5222_v23  ;;  %v15693_v30 = vadd.f32 %v10622_v51, %v15444_v27  ;;  %v5029_v45 = vadd.bf16 %v15653_v18, %v17804_v24  ;;  %v12667_v27 = vld [vmem:[#allocation8 + $0x728] ss:$12 sps:$4 sm:$0xff]  }
 0x575   : > { %8176 = vmatpush1.bf16.msra.mxu0 %v12645_v57  ;;  %10906 = vmatpush3.bf16.msra.mxu1 %v12652_v33  ;;  %v5042_v9 = vadd.bf16 %v15635_v29, %v17807_v52  ;;  %v12653_v57 = vld [vmem:[#allocation8 + $0x660] ss:$12 sps:$4 sm:$0xff]   ;;  %v12668_v33 = vld [vmem:[#allocation8 + $0x668] ss:$12 sps:$4 sm:$0xff]  }
 0x576   : > { %v10623_v43 = vpop.f32.mrb[28].mxu1  ;;  %8177 = vmatprep.subr.bf16.mxu0 %v12650_v62  ;;  %10907 = vmatprep.subr.bf16.mxu1 %v12659_v16  ;;  %v5221_v51 = vmax.bf16 %v17232_v41, %v5029_v45  ;;  %v12675_v62 = vld [vmem:[#allocation8 + $0x740] ss:$12 sps:$4 sm:$0xff]  }
 0x577   : > { %v10624_v1 = vpop.f32.mrb[29].mxu1  ;;  %v5234_v2 = vmax.bf16 %v17232_v41, %v5042_v9  ;;  %v17808_v45 = vld [vmem:[#allocation154_spill] sm:$0xff] }
 0x578   : > { %v10625_v17 = vadd.f32 %v10624_v1, %v10623_v43  ;;  %v10626_v59 = vpop.f32.mrb[30].mxu1  ;;  %v12676_v52 = vld [vmem:[#allocation8 + $0x680] ss:$12 sps:$4 sm:$0xff]  }
 0x579   : > { %v10627_v46 = vpop.f32.mrb[31].mxu1  ;;  %8178 = vmatpush1.bf16.msra.mxu0 %v12648_v22  ;;  %10908 = vmatpush3.bf16.msra.mxu1 %v12660_v53  ;;  %v17809_v22 = vld [vmem:[#allocation152_spill] sm:$0xff]  ;;  %v17811_v9 = vld [vmem:[#allocation158_spill] sm:$0xff] }
 0x57a   : > { %v10628_v23 = vadd.f32 %v10627_v46, %v10626_v59  ;;  %8179 = vmatprep.subr.bf16.mxu0 %v12655_v34  ;;  %10909 = vmatprep.subr.bf16.mxu1 %v12667_v27  ;;  %v15706_v16 = vadd.f32 %v10625_v17, %v15455_v36  ;;  %v17810_v53 = vpack.c.bf16 %v17808_v45, %v17809_v22  ;;  %v17812_v43 = vld [vmem:[#allocation156_spill] sm:$0xff]  ;;  %v12666_v22 = vld [vmem:[#allocation8 + $0x6ac] ss:$12 sps:$4 sm:$0xff]  }
 0x57b   : > { %8031 = vmatmul.mubr.bf16.gmra.mrb[200].mxu0 %v5221_v51  ;;  %9089 = vmatmul.mubr.bf16.gmra.mrb[136].mxu1 %v5221_v51  ;;  %v17813_v36 = vpack.c.bf16 %v17811_v9, %v17812_v43  ;;  %v12663_v1 = vld [vmem:[#allocation8 + $0x694] ss:$12 sps:$4 sm:$0xff]  }
 0x57c   : > { %8040 = vmatprep.mubr.bf16.mxu0 %v5234_v2  ;;  %9096 = vmatprep.mubr.bf16.mxu1 %v5234_v2  ;;  %v15709_v24 = vadd.f32 %v10628_v23, %v15458_v44  ;;  %v5041_v12 = vadd.bf16 %v15653_v18, %v17810_v53  ;;  %v12683_v44 = vld [vmem:[#allocation8 + $0x758] ss:$12 sps:$4 sm:$0xff]   ;;  %v12664_v43 = vld [vmem:[#allocation8 + $0x6a8] ss:$12 sps:$4 sm:$0xff]  }
 0x57d   : > { %8180 = vmatpush1.bf16.msra.mxu0 %v12653_v57  ;;  %10910 = vmatpush3.bf16.msra.mxu1 %v12668_v33  ;;  %v5054_v34 = vadd.bf16 %v15635_v29, %v17813_v36  ;;  %v12661_v57 = vld [vmem:[#allocation8 + $0x690] ss:$12 sps:$4 sm:$0xff]   ;;  %v12684_v33 = vld [vmem:[#allocation8 + $0x698] ss:$12 sps:$4 sm:$0xff]  }
 0x57e   : > { %v10629_v27 = vpop.f32.mrb[32].mxu1  ;;  %8181 = vmatprep.subr.bf16.mxu0 %v12658_v3  ;;  %10911 = vmatprep.subr.bf16.mxu1 %v12675_v62  ;;  %v5233_v23 = vmax.bf16 %v17232_v41, %v5041_v12  ;;  %v12691_v3 = vld [vmem:[#allocation8 + $0x770] ss:$12 sps:$4 sm:$0xff]   ;;  %v17814_v12 = vld [vmem:[#allocation157_spill] sm:$0xff] }
 0x57f   : > { %v10630_v17 = vpop.f32.mrb[33].mxu1  ;;  %v5246_v45 = vmax.bf16 %v17232_v41, %v5054_v34  ;;  %v12692_v36 = vld [vmem:[#allocation8 + $0x6b0] ss:$12 sps:$4 sm:$0xff]   ;;  %v17817_v34 = vld [vmem:[#allocation163_spill] sm:$0xff] }
 0x580   : > { %v10631_v59 = vadd.f32 %v10630_v17, %v10629_v27  ;;  %v10632_v46 = vpop.f32.mrb[34].mxu1  ;;  %v17818_v27 = vld [vmem:[#allocation160_spill] sm:$0xff]  ;;  %v12671_v17 = vld [vmem:[#allocation8 + $0x6c4] ss:$12 sps:$4 sm:$0xff]  }
 0x581   : > { %v10633_v51 = vpop.f32.mrb[35].mxu1  ;;  %8182 = vmatpush1.bf16.msra.mxu0 %v12656_v54  ;;  %10912 = vmatpush3.bf16.msra.mxu1 %v12676_v52  ;;  %v17815_v54 = vld [vmem:[#allocation17_spill] sm:$0xff] }
 0x582   : > { %v10634_v2 = vadd.f32 %v10633_v51, %v10632_v46  ;;  %8183 = vmatprep.subr.bf16.mxu0 %v12663_v1  ;;  %10913 = vmatprep.subr.bf16.mxu1 %v12683_v44  ;;  %v15722_v62 = vadd.f32 %v10631_v59, %v15469_v0  ;;  %v17816_v52 = vpack.c.bf16 %v17814_v12, %v17815_v54  ;;  %v12674_v12 = vld [vmem:[#allocation8 + $0x6dc] ss:$12 sps:$4 sm:$0xff]   ;;  %v17820_v54 = vld [vmem:[#allocation162_spill] sm:$0xff] }
 0x583   : > { %8041 = vmatmul.mubr.bf16.gmra.mrb[204].mxu0 %v5233_v23  ;;  %9097 = vmatmul.mubr.bf16.gmra.mrb[140].mxu1 %v5233_v23  ;;  %v17819_v0 = vpack.c.bf16 %v17817_v34, %v17818_v27  ;;  %v17823_v34 = vld [vmem:[#allocation170_spill] sm:$0xff] }
 0x584   : > { %8050 = vmatprep.mubr.bf16.mxu0 %v5246_v45  ;;  %9104 = vmatprep.mubr.bf16.mxu1 %v5246_v45  ;;  %v15725_v53 = vadd.f32 %v10634_v2, %v15472_v48  ;;  %v5053_v9 = vadd.bf16 %v15653_v18, %v17816_v52  ;;  %v12699_v48 = vld [vmem:[#allocation8 + $0x848] ss:$12 sps:$4 sm:$0xff]   ;;  %v17824_v27 = vld [vmem:[#allocation166_spill] sm:$0xff] }
 0x585   : > { %8184 = vmatpush1.bf16.msra.mxu0 %v12661_v57  ;;  %10914 = vmatpush3.bf16.msra.mxu1 %v12684_v33  ;;  %v5066_v1 = vadd.bf16 %v15635_v29, %v17819_v0  ;;  %v12669_v57 = vld [vmem:[#allocation8 + $0x6c0] ss:$12 sps:$4 sm:$0xff]   ;;  %v17821_v52 = vld [vmem:[#allocation159_spill] sm:$0xff]  ;;  %v17825_v0 = vpack.c.bf16 %v17823_v34, %v17824_v27 }
 0x586   : > { %v10635_v44 = vpop.f32.mrb[36].mxu1  ;;  %8185 = vmatprep.subr.bf16.mxu0 %v12666_v22  ;;  %10915 = vmatprep.subr.bf16.mxu1 %v12691_v3  ;;  %v5245_v2 = vmax.bf16 %v17232_v41, %v5053_v9  ;;  %v17822_v9 = vpack.c.bf16 %v17820_v54, %v17821_v52  ;;  %v17827_v54 = vld [vmem:[#allocation164_spill] sm:$0xff]  ;;  %v17830_v34 = vld [vmem:[#allocation174_spill] sm:$0xff] }
 0x587   : > { %v10636_v59 = vpop.f32.mrb[37].mxu1  ;;  %v5258_v45 = vmax.bf16 %v17232_v41, %v5066_v1 }
 0x588   : > { %v10637_v46 = vadd.f32 %v10636_v59, %v10635_v44  ;;  %v10638_v51 = vpop.f32.mrb[38].mxu1  ;;  %v12679_v44 = vld [vmem:[#allocation8 + $0x6f4] ss:$12 sps:$4 sm:$0xff]  }
 0x589   : > { %v10639_v23 = vpop.f32.mrb[39].mxu1  ;;  %8186 = vmatpush1.bf16.msra.mxu0 %v12664_v43  ;;  %10916 = vmatpush3.bf16.msra.mxu1 %v12692_v36  ;;  %v5065_v43 = vadd.bf16 %v15653_v18, %v17822_v9  ;;  %v12672_v36 = vld [vmem:[#allocation8 + $0x6d8] ss:$12 sps:$4 sm:$0xff]  }
 0x58a   : > { %v10640_v33 = vadd.f32 %v10639_v23, %v10638_v51  ;;  %8187 = vmatprep.subr.bf16.mxu0 %v12671_v17  ;;  %11013 = vmatprep.subr.bf16.mxu1 %v12699_v48  ;;  %v15738_v22 = vadd.f32 %v10637_v46, %v15483_v13  ;;  %v5078_v13 = vadd.bf16 %v15635_v29, %v17825_v0  ;;  %v12677_v51 = vld [vmem:[#allocation8 + $0x6f0] ss:$12 sps:$4 sm:$0xff]  }
 0x58b   : > { %8051 = vmatmul.mubr.bf16.gmra.mrb[208].mxu0 %v5245_v2  ;;  %9105 = vmatmul.mubr.bf16.gmra.mrb[144].mxu1 %v5245_v2  ;;  %v5257_v46 = vmax.bf16 %v17232_v41, %v5065_v43  ;;  %v12680_v43 = vld [vmem:[#allocation8 + $0x708] ss:$12 sps:$4 sm:$0xff]  }
 0x58c   : > { %8060 = vmatprep.mubr.bf16.mxu0 %v5258_v45  ;;  %9112 = vmatprep.mubr.bf16.mxu1 %v5258_v45  ;;  %v15741_v3 = vadd.f32 %v10640_v33, %v15486_v39  ;;  %v5270_v2 = vmax.bf16 %v17232_v41, %v5078_v13  ;;  %v12687_v13 = vld [vmem:[#allocation8 + $0x724] ss:$12 sps:$4 sm:$0xff]  }
 0x58d   : > { %8188 = vmatpush1.bf16.msra.mxu0 %v12669_v57  ;;  %v12682_v57 = vld [vmem:[#allocation8 + $0x70c] ss:$12 sps:$4 sm:$0xff]  }
 0x58e   : > { %v10641_v1 = vpop.f32.mrb[40].mxu1  ;;  %8189 = vmatprep.subr.bf16.mxu0 %v12674_v12  ;;  %v17826_v12 = vld [vmem:[#allocation168_spill] sm:$0xff] }
 0x58f   : > { %v10642_v17 = vpop.f32.mrb[41].mxu1  ;;  %v17828_v52 = vpack.c.bf16 %v17826_v12, %v17827_v54  ;;  %v17833_v12 = vld [vmem:[#allocation172_spill] sm:$0xff] }
 0x590   : > { %v10643_v48 = vadd.f32 %v10642_v17, %v10641_v1  ;;  %v10644_v59 = vpop.f32.mrb[42].mxu1 }
 0x591   : > { %v10645_v39 = vpop.f32.mrb[43].mxu1  ;;  %8190 = vmatpush1.bf16.msra.mxu0 %v12672_v36  ;;  %v5077_v9 = vadd.bf16 %v15653_v18, %v17828_v52  ;;  %v17829_v36 = vld [vmem:[#allocation177_spill] sm:$0xff] }
 0x592   : > { %v10646_v23 = vadd.f32 %v10645_v39, %v10644_v59  ;;  %8191 = vmatprep.subr.bf16.mxu0 %v12679_v44  ;;  %v15754_v33 = vadd.f32 %v10643_v48, %v15497_v38  ;;  %v17831_v27 = vpack.c.bf16 %v17829_v36, %v17830_v34  ;;  %v12685_v59 = vld [vmem:[#allocation8 + $0x720] ss:$12 sps:$4 sm:$0xff]  }
 0x593   : > { %8061 = vmatmul.mubr.bf16.gmra.mrb[212].mxu0 %v5257_v46  ;;  %9113 = vmatmul.mubr.bf16.gmra.mrb[148].mxu1 %v5257_v46  ;;  %v5269_v48 = vmax.bf16 %v17232_v41, %v5077_v9  ;;  %v12688_v9 = vld [vmem:[#allocation8 + $0x738] ss:$12 sps:$4 sm:$0xff]   ;;  %v17836_v36 = vld [vmem:[#allocation180_spill] sm:$0xff] }
 0x594   : > { %8070 = vmatprep.mubr.bf16.mxu0 %v5270_v2  ;;  %9120 = vmatprep.mubr.bf16.mxu1 %v5270_v2  ;;  %v15757_v45 = vadd.f32 %v10646_v23, %v15500_v28  ;;  %v5090_v38 = vadd.bf16 %v15635_v29, %v17831_v27 }
 0x595   : > { %8192 = vmatpush1.bf16.msra.mxu0 %v12677_v51  ;;  %v12690_v51 = vld [vmem:[#allocation8 + $0x73c] ss:$12 sps:$4 sm:$0xff]  }
 0x596   : > { %v10647_v0 = vpop.f32.mrb[44].mxu1  ;;  %8193 = vmatprep.subr.bf16.mxu0 %v12682_v57  ;;  %v5282_v46 = vmax.bf16 %v17232_v41, %v5090_v38  ;;  %v17832_v57 = vld [vmem:[#allocation176_spill] sm:$0xff] }
 0x597   : > { %v10648_v1 = vpop.f32.mrb[45].mxu1  ;;  %v17834_v54 = vpack.c.bf16 %v17832_v57, %v17833_v12  ;;  %v12695_v38 = vld [vmem:[#allocation8 + $0x754] ss:$12 sps:$4 sm:$0xff]  }
 0x598   : > { %v10649_v44 = vadd.f32 %v10648_v1, %v10647_v0  ;;  %v10650_v17 = vpop.f32.mrb[46].mxu1  ;;  %v17839_v57 = vld [vmem:[#allocation179_spill] sm:$0xff] }
 0x599   : > { %v10651_v28 = vpop.f32.mrb[47].mxu1  ;;  %8194 = vmatpush1.bf16.msra.mxu0 %v12680_v43  ;;  %v5089_v52 = vadd.bf16 %v15653_v18, %v17834_v54  ;;  %v17835_v43 = vld [vmem:[#allocation183_spill] sm:$0xff] }
 0x59a   : > { %v10652_v39 = vadd.f32 %v10651_v28, %v10650_v17  ;;  %8195 = vmatprep.subr.bf16.mxu0 %v12687_v13  ;;  %v15770_v23 = vadd.f32 %v10649_v44, %v15511_v63  ;;  %v17837_v34 = vpack.c.bf16 %v17835_v43, %v17836_v36  ;;  %v12693_v17 = vld [vmem:[#allocation8 + $0x750] ss:$12 sps:$4 sm:$0xff]  }
 0x59b   : > { %8071 = vmatmul.mubr.bf16.gmra.mrb[216].mxu0 %v5269_v48  ;;  %9121 = vmatmul.mubr.bf16.gmra.mrb[152].mxu1 %v5269_v48  ;;  %v5281_v44 = vmax.bf16 %v17232_v41, %v5089_v52  ;;  %v12696_v52 = vld [vmem:[#allocation8 + $0x768] ss:$12 sps:$4 sm:$0xff]   ;;  %v17842_v43 = vld [vmem:[#allocation186_spill] sm:$0xff] }
 0x59c   : > { %8080 = vmatprep.mubr.bf16.mxu0 %v5282_v46  ;;  %9128 = vmatprep.mubr.bf16.mxu1 %v5282_v46  ;;  %v15773_v2 = vadd.f32 %v10652_v39, %v15514_v8  ;;  %v5102_v63 = vadd.bf16 %v15635_v29, %v17837_v34 }
 0x59d   : > { %8196 = vmatpush1.bf16.msra.mxu0 %v12685_v59  ;;  %v12698_v59 = vld [vmem:[#allocation8 + $0x76c] ss:$12 sps:$4 sm:$0xff]  }
 0x59e   : > { %v10653_v27 = vpop.f32.mrb[48].mxu1  ;;  %8197 = vmatprep.subr.bf16.mxu0 %v12690_v51  ;;  %v5294_v48 = vmax.bf16 %v17232_v41, %v5102_v63  ;;  %v17838_v51 = vld [vmem:[#allocation182_spill] sm:$0xff] }
 0x59f   : > { %v10654_v0 = vpop.f32.mrb[49].mxu1  ;;  %v17840_v12 = vpack.c.bf16 %v17838_v51, %v17839_v57  ;;  %v12703_v63 = vld [vmem:[#allocation8 + $0x784] ss:$12 sps:$4 sm:$0xff]   ;;  %v17847_v57 = vld [vmem:[#allocation195_spill] sm:$0xff] }
 0x5a0   : > { %v10655_v13 = vadd.f32 %v10654_v0, %v10653_v27  ;;  %v10656_v1 = vpop.f32.mrb[50].mxu1 }
 0x5a1   : > { %v10657_v8 = vpop.f32.mrb[51].mxu1  ;;  %8198 = vmatpush1.bf16.msra.mxu0 %v12688_v9  ;;  %v5101_v54 = vadd.bf16 %v15653_v18, %v17840_v12  ;;  %v17841_v9 = vld [vmem:[#allocation188_spill] sm:$0xff] }
 0x5a2   : > { %v10658_v28 = vadd.f32 %v10657_v8, %v10656_v1  ;;  %8199 = vmatprep.subr.bf16.mxu0 %v12695_v38  ;;  %v15786_v39 = vadd.f32 %v10655_v13, %v15525_v55  ;;  %v17843_v36 = vpack.c.bf16 %v17841_v9, %v17842_v43  ;;  %v17848_v12 = vld [vmem:[#allocation192_spill] sm:$0xff] }
 0x5a3   : > { %8081 = vmatmul.mubr.bf16.gmra.mrb[220].mxu0 %v5281_v44  ;;  %9129 = vmatmul.mubr.bf16.gmra.mrb[156].mxu1 %v5281_v44  ;;  %v5293_v13 = vmax.bf16 %v17232_v41, %v5101_v54  ;;  %v17849_v54 = vpack.c.bf16 %v17847_v57, %v17848_v12 }
 0x5a4   : > { %8090 = vmatprep.mubr.bf16.mxu0 %v5294_v48  ;;  %9136 = vmatprep.mubr.bf16.mxu1 %v5294_v48  ;;  %v15789_v46 = vadd.f32 %v10658_v28, %v15528_v26  ;;  %v5114_v55 = vadd.bf16 %v15635_v29, %v17843_v36  ;;  %v17844_v28 = vld [vmem:[#allocation187_spill] sm:$0xff]  ;;  %v17845_v48 = vld [vmem:[#allocation185_spill] sm:$0xff] }
 0x5a5   : > { %8200 = vmatpush1.bf16.msra.mxu0 %v12693_v17 }
 0x5a6   : > { %v10659_v34 = vpop.f32.mrb[52].mxu1  ;;  %8201 = vmatprep.subr.bf16.mxu0 %v12698_v59  ;;  %v5306_v8 = vmax.bf16 %v17232_v41, %v5114_v55  ;;  %v17846_v59 = vpack.c.bf16 %v17844_v28, %v17845_v48  ;;  %v17854_v28 = vld [vmem:[#allocation199_spill] sm:$0xff] }
 0x5a7   : > { %v10660_v27 = vpop.f32.mrb[53].mxu1 }
 0x5a8   : > { %v10661_v38 = vadd.f32 %v10660_v27, %v10659_v34  ;;  %v10662_v0 = vpop.f32.mrb[54].mxu1  ;;  %v5113_v51 = vadd.bf16 %v15653_v18, %v17846_v59 }
 0x5a9   : > { %v10663_v26 = vpop.f32.mrb[55].mxu1  ;;  %8202 = vmatpush1.bf16.msra.mxu0 %v12696_v52  ;;  %v5126_v52 = vadd.bf16 %v15635_v29, %v17849_v54 }
 0x5aa   : > { %v10664_v1 = vadd.f32 %v10663_v26, %v10662_v0  ;;  %8364 = vmatprep.subr.bf16.mxu0 %v12703_v63  ;;  %v15802_v44 = vadd.f32 %v10661_v38, %v15539_v20  ;;  %v5305_v34 = vmax.bf16 %v17232_v41, %v5113_v51  ;;  %v17850_v0 = vld [vmem:[#allocation194_spill] sm:$0xff] }
 0x5ab   : > { %8091 = vmatmul.mubr.bf16.gmra.mrb[224].mxu0 %v5293_v13  ;;  %9137 = vmatmul.mubr.bf16.gmra.mrb[160].mxu1 %v5293_v13  ;;  %v17851_v26 = vld [vmem:[#allocation190_spill] sm:$0xff] }
 0x5ac   : > { %8100 = vmatprep.mubr.bf16.mxu0 %v5306_v8  ;;  %9144 = vmatprep.mubr.bf16.mxu1 %v5306_v8  ;;  %v15805_v17 = vadd.f32 %v10664_v1, %v15542_v61  ;;  %v5318_v61 = vmax.bf16 %v17232_v41, %v5126_v52  ;;  %v17852_v13 = vpack.c.bf16 %v17850_v0, %v17851_v26  ;;  %v17853_v8 = vld [vmem:[#allocation202_spill] sm:$0xff] }
 0x5ad   : > { %v17855_v48 = vpack.c.bf16 %v17853_v8, %v17854_v28  ;;  %v17860_v0 = vld [vmem:[#allocation206_spill] sm:$0xff] }
 0x5ae   : > { %v10665_v9 = vpop.f32.mrb[56].mxu1  ;;  %v5125_v1 = vadd.bf16 %v15653_v18, %v17852_v13 }
 0x5af   : > { %v10666_v20 = vpop.f32.mrb[57].mxu1  ;;  %v5138_v59 = vadd.bf16 %v15635_v29, %v17855_v48 }
 0x5b0   : > { %v10667_v43 = vadd.f32 %v10666_v20, %v10665_v9  ;;  %v10668_v36 = vpop.f32.mrb[58].mxu1  ;;  %v5317_v52 = vmax.bf16 %v17232_v41, %v5125_v1 }
 0x5b1   : > { %v10669_v55 = vpop.f32.mrb[59].mxu1 }
 0x5b2   : > { %v10670_v63 = vadd.f32 %v10669_v55, %v10668_v36  ;;  %v15818_v27 = vadd.f32 %v10667_v43, %v15553_v37  ;;  %v17856_v36 = vld [vmem:[#allocation201_spill] sm:$0xff] }
 0x5b3   : > { %8101 = vmatmul.mubr.bf16.gmra.mrb[228].mxu0 %v5305_v34  ;;  %9145 = vmatmul.mubr.bf16.gmra.mrb[164].mxu1 %v5305_v34  ;;  %v17857_v55 = vld [vmem:[#allocation197_spill] sm:$0xff] }
 0x5b4   : > { %8110 = vmatprep.mubr.bf16.mxu0 %v5318_v61  ;;  %9152 = vmatprep.mubr.bf16.mxu1 %v5318_v61  ;;  %v15821_v38 = vadd.f32 %v10670_v63, %v15556_v14  ;;  %v5330_v14 = vmax.bf16 %v17232_v41, %v5138_v59  ;;  %v17858_v34 = vpack.c.bf16 %v17856_v36, %v17857_v55  ;;  %v17859_v61 = vld [vmem:[#allocation209_spill] sm:$0xff] }
 0x5b5   : > { %v17861_v26 = vpack.c.bf16 %v17859_v61, %v17860_v0  ;;  %v17866_v36 = vld [vmem:[#allocation213_spill] sm:$0xff] }
 0x5b6   : > { %v10671_v51 = vpop.f32.mrb[60].mxu1  ;;  %v5137_v63 = vadd.bf16 %v15653_v18, %v17858_v34 }
 0x5b7   : > { %v10672_v37 = vpop.f32.mrb[61].mxu1  ;;  %v5150_v13 = vadd.bf16 %v15635_v29, %v17861_v26 }
 0x5b8   : > { %v10673_v57 = vadd.f32 %v10672_v37, %v10671_v51  ;;  %v10674_v12 = vpop.f32.mrb[62].mxu1  ;;  %v5329_v59 = vmax.bf16 %v17232_v41, %v5137_v63 }
 0x5b9   : > { %v10675_v54 = vpop.f32.mrb[63].mxu1  ;;  %v5342_v37 = vmax.bf16 %v17232_v41, %v5150_v13 }
 0x5ba   : > { %v10676_v9 = vadd.f32 %v10675_v54, %v10674_v12  ;;  %v15834_v20 = vadd.f32 %v10673_v57, %v15567_v4  ;;  %v17862_v12 = vld [vmem:[#allocation208_spill] sm:$0xff] }
 0x5bb   : > { %8111 = vmatmul.mubr.bf16.gmra.mrb[232].mxu0 %v5317_v52  ;;  %9153 = vmatmul.mubr.bf16.gmra.mrb[168].mxu1 %v5317_v52  ;;  %v17863_v54 = vld [vmem:[#allocation204_spill] sm:$0xff] }
 0x5bc   : > { %8120 = vmatprep.mubr.bf16.mxu0 %v5330_v14  ;;  %9160 = vmatprep.mubr.bf16.mxu1 %v5330_v14  ;;  %v15837_v43 = vadd.f32 %v10676_v9, %v15570_v31  ;;  %v17864_v52 = vpack.c.bf16 %v17862_v12, %v17863_v54  ;;  %v17865_v14 = vld [vmem:[#allocation217_spill] sm:$0xff] }
 0x5bd   : > { %v17867_v55 = vpack.c.bf16 %v17865_v14, %v17866_v36  ;;  %v17871_v12 = vld [vmem:[#allocation225_spill] sm:$0xff] }
 0x5be   : > { %v10693_v1 = vpop.f32.mrb[64].mxu1  ;;  %v5149_v9 = vadd.bf16 %v15653_v18, %v17864_v52  ;;  %v17872_v54 = vld [vmem:[#allocation221_spill] sm:$0xff] }
 0x5bf   : > { %v10694_v4 = vpop.f32.mrb[65].mxu1 }
 0x5c0   : > { %v10695_v8 = vadd.f32 %v10694_v4, %v10693_v1  ;;  %v10696_v28 = vpop.f32.mrb[66].mxu1 }
 0x5c1   : > { %v10697_v48 = vpop.f32.mrb[67].mxu1 }
 0x5c2   : > { %v15849_v31 = vadd.f32 %v10695_v8, %v15584_v40  ;;  %v10698_v51 = vadd.f32 %v10697_v48, %v10696_v28  ;;  %v5162_v40 = vadd.bf16 %v15635_v29, %v17867_v55  ;;  %v17868_v28 = vld [vmem:[#allocation215_spill] sm:$0xff] }
 0x5c3   : > { %8121 = vmatmul.mubr.bf16.gmra.mrb[236].mxu0 %v5329_v59  ;;  %9161 = vmatmul.mubr.bf16.gmra.mrb[172].mxu1 %v5329_v59  ;;  %v17869_v48 = vld [vmem:[#allocation211_spill] sm:$0xff] }
 0x5c4   : > { %v15853_v57 = vadd.f32 %v10698_v51, %v15587_v47  ;;  %8130 = vmatprep.mubr.bf16.mxu0 %v5342_v37  ;;  %9168 = vmatprep.mubr.bf16.mxu1 %v5342_v37  ;;  %v5341_v47 = vmax.bf16 %v17232_v41, %v5149_v9  ;;  %v5354_v4 = vmax.bf16 %v17232_v41, %v5162_v40  ;;  %v10159_v37 = vld.sshfl [vmem:[#allocation7 + $0x8] sm:$0x33 pattern:$0x75316420] }
 0x5c5   : > { %v17870_v59 = vpack.c.bf16 %v17868_v28, %v17869_v48  ;;  %v4898_v36 = vcombine.high %v10159_v37, %v10159_v37 }
 0x5c6   : > { %v10699_v34 = vpop.f32.mrb[68].mxu1 }
 0x5c7   : > { %v10700_v63 = vpop.f32.mrb[69].mxu1  ;;  %v5161_v51 = vadd.bf16 %v15653_v18, %v17870_v59  ;;  %v17878_v59 = vld [vmem:[#allocation229_spill] sm:$0xff] }
 0x5c8   : > { %v10701_v61 = vadd.f32 %v10700_v63, %v10699_v34  ;;  %v10702_v0 = vpop.f32.mrb[70].mxu1 }
 0x5c9   : > { %v10703_v26 = vpop.f32.mrb[71].mxu1  ;;  %v5353_v34 = vmax.bf16 %v17232_v41, %v5161_v51 }
 0x5ca   : > { %v15865_v13 = vadd.f32 %v10701_v61, %v15600_v6  ;;  %v10704_v1 = vadd.f32 %v10703_v26, %v10702_v0  ;;  %v17873_v6 = vpack.c.bf16 %v17871_v12, %v17872_v54  ;;  %v15885_v26 = vrot.slane %v4898_v36, %v14628_v49 }
 0x5cb   : > { %8131 = vmatmul.mubr.bf16.gmra.mrb[240].mxu0 %v5341_v47  ;;  %9169 = vmatmul.mubr.bf16.gmra.mrb[176].mxu1 %v5341_v47 }
 0x5cc   : > { %v15869_v8 = vadd.f32 %v10704_v1, %v15603_v35  ;;  %8140 = vmatprep.mubr.bf16.mxu0 %v5354_v4  ;;  %9176 = vmatprep.mubr.bf16.mxu1 %v5354_v4  ;;  %v5174_v52 = vadd.bf16 %v15635_v29, %v17873_v6  ;;  %v17874_v1 = vld [vmem:[#allocation223_spill] sm:$0xff]  ;;  %v4979_v54 = vpack.i.b16 %v15885_v26, %v15885_v26 }
 0x5cd   : > { %v17875_v4 = vld [vmem:[#allocation219_spill] sm:$0xff] }
 0x5ce   : > { %v10705_v9 = vpop.f32.mrb[72].mxu1  ;;  %v5366_v0 = vmax.bf16 %v17232_v41, %v5174_v52  ;;  %v17876_v28 = vpack.c.bf16 %v17874_v1, %v17875_v4  ;;  %v17881_v1 = vld [vmem:[#allocation227_spill] sm:$0xff] }
 0x5cf   : > { %v10706_v14 = vpop.f32.mrb[73].mxu1 }
 0x5d0   : > { %v10707_v55 = vadd.f32 %v10706_v14, %v10705_v9  ;;  %v10708_v40 = vpop.f32.mrb[74].mxu1  ;;  %v5173_v48 = vadd.bf16 %v15653_v18, %v17876_v28 }
 0x5d1   : > { %v10709_v35 = vpop.f32.mrb[75].mxu1 }
 0x5d2   : > { %v15881_v63 = vadd.f32 %v10707_v55, %v15618_v32  ;;  %v10710_v61 = vadd.f32 %v10709_v35, %v10708_v40  ;;  %v17877_v32 = vld [vmem:[#allocation233_spill] sm:$0xff]  ;;  %v5365_v36 = vmax.bf16 %v17232_v41, %v5173_v48  ;;  %v15902_v55 = vrot.slane %v4979_v54, %v14642_v25 }
 0x5d3   : > { %8141 = vmatmul.mubr.bf16.gmra.mrb[244].mxu0 %v5353_v34  ;;  %9177 = vmatmul.mubr.bf16.gmra.mrb[180].mxu1 %v5353_v34  ;;  %v17879_v51 = vpack.c.bf16 %v17877_v32, %v17878_v59  ;;  %v17883_v48 = vpack.c.bf16 %v14802_v7, %v14790_v58  ;;  %v17884_v7 = vpack.c.bf16 %v14794_v11, %v14786_v5 }
 0x5d4   : > { %v15888_v47 = vadd.f32 %v10710_v61, %v15621_v60  ;;  %8150 = vmatprep.mubr.bf16.mxu0 %v5366_v0  ;;  %9184 = vmatprep.mubr.bf16.mxu1 %v5366_v0  ;;  %v17880_v0 = vld [vmem:[#allocation231_spill] sm:$0xff] }
 0x5d5   : > { %v5186_v12 = vadd.bf16 %v15635_v29, %v17879_v51  ;;  %v15909_v29 = vrot.slane %v10159_v37, %v14628_v49  ;;  %v17882_v4 = vpack.c.bf16 %v17880_v0, %v17881_v1  ;;  %v5008_v49 = vadd.bf16 %v15902_v55, %v17883_v48 }
 0x5d6   : > { %v10711_v6 = vpop.f32.mrb[76].mxu1 }
 0x5d7   : > { %v10712_v52 = vpop.f32.mrb[77].mxu1  ;;  %v5378_v34 = vmax.bf16 %v17232_v41, %v5186_v12  ;;  %v5185_v28 = vadd.bf16 %v15653_v18, %v17882_v4 }
 0x5d8   : > { %v10713_v9 = vadd.f32 %v10712_v52, %v10711_v6  ;;  %v10714_v60 = vpop.f32.mrb[78].mxu1  ;;  %v5200_v52 = vmax.bf16 %v17232_v41, %v5008_v49  ;;  %v12706_v49 = vld [vmem:[#allocation8 + $0x79c] ss:$12 sps:$4 sm:$0xff]  }
 0x5d9   : > { %v10715_v14 = vpop.f32.mrb[79].mxu1  ;;  %v5377_v54 = vmax.bf16 %v17232_v41, %v5185_v28  ;;  %v12700_v28 = vld [vmem:[#allocation8 + $0x788] ss:$12 sps:$4 sm:$0xff]  }
 0x5da   : > { %v15905_v40 = vadd.f32 %v10713_v9, %v15639_v15  ;;  %v10716_v35 = vadd.f32 %v10715_v14, %v10714_v60  ;;  %v4972_v15 = vpack.i.b16 %v15909_v29, %v15909_v29  ;;  %v17885_v60 = vld [vmem:[#allocation40_spill] sm:$0xff] }
 0x5db   : > { %8151 = vmatmul.mubr.bf16.gmra.mrb[248].mxu0 %v5365_v36  ;;  %9185 = vmatmul.mubr.bf16.gmra.mrb[184].mxu1 %v5365_v36  ;;  %v17886_v14 = vld [vmem:[#allocation32_spill] sm:$0xff] }
 0x5dc   : > { %v15912_v61 = vadd.f32 %v10716_v35, %v15642_v10  ;;  %8160 = vmatprep.mubr.bf16.mxu0 %v5378_v34  ;;  %9192 = vmatprep.mubr.bf16.mxu1 %v5378_v34  ;;  %v15925_v51 = vrot.slane %v4972_v15, %v14642_v25  ;;  %v17887_v36 = vpack.c.bf16 %v17885_v60, %v17886_v14  ;;  %v12701_v15 = vld [vmem:[#allocation8 + $0x780] ss:$12 sps:$4 sm:$0xff]  }
 0x5de   : > { %v10717_v37 = vpop.f32.mrb[80].mxu1  ;;  %v5007_v9 = vadd.bf16 %v15925_v51, %v17884_v7  ;;  %v17892_v7 = vld [vmem:[#allocation48_spill] sm:$0xff] }
 0x5df   : > { %v10718_v32 = vpop.f32.mrb[81].mxu1 }
 0x5e0   : > { %v10719_v59 = vadd.f32 %v10718_v32, %v10717_v37  ;;  %v10720_v10 = vpop.f32.mrb[82].mxu1  ;;  %v5199_v4 = vmax.bf16 %v17232_v41, %v5007_v9  ;;  %v12707_v37 = vld [vmem:[#allocation8 + $0x860] ss:$12 sps:$4 sm:$0xff]  }
 0x5e1   : > { %v10721_v12 = vpop.f32.mrb[83].mxu1 }
 0x5e2   : > { %v15929_v18 = vadd.f32 %v10719_v59, %v15658_v42  ;;  %v10722_v6 = vadd.f32 %v10721_v12, %v10720_v10  ;;  %v5020_v42 = vadd.bf16 %v15902_v55, %v17887_v36  ;;  %v17888_v59 = vld [vmem:[#allocation42_spill] sm:$0xff]  ;;  %v12715_v36 = vld [vmem:[#allocation8 + $0x878] ss:$12 sps:$4 sm:$0xff]  }
 0x5e3   : > { %8161 = vmatmul.mubr.bf16.gmra.mrb[252].mxu0 %v5377_v54  ;;  %9193 = vmatmul.mubr.bf16.gmra.mrb[188].mxu1 %v5377_v54  ;;  %v17889_v10 = vld [vmem:[#allocation34_spill] sm:$0xff] }
 0x5e4   : > { %v15933_v58 = vadd.f32 %v10722_v6, %v15661_v56  ;;  %8203 = vmatprep.mubr.bf16.mxu0 %v5200_v52  ;;  %9233 = vmatprep.mubr.bf16.mxu1 %v5200_v52  ;;  %v5212_v11 = vmax.bf16 %v17232_v41, %v5020_v42  ;;  %v17890_v12 = vpack.c.bf16 %v17888_v59, %v17889_v10  ;;  %v12708_v6 = vld [vmem:[#allocation8 + $0x7a0] ss:$12 sps:$4 sm:$0xff]  }
 0x5e5   : > { %v17891_v52 = vld [vmem:[#allocation56_spill] sm:$0xff]  ;;  %v17894_v59 = vld [vmem:[#allocation58_spill] sm:$0xff] }
 0x5e6   : > { %v10723_v35 = vpop.f32.mrb[84].mxu1  ;;  %v5019_v54 = vadd.bf16 %v15925_v51, %v17890_v12  ;;  %v17893_v9 = vpack.c.bf16 %v17891_v52, %v17892_v7  ;;  %v17895_v10 = vld [vmem:[#allocation50_spill] sm:$0xff]  ;;  %v17898_v52 = vld [vmem:[#allocation64_spill] sm:$0xff] }
 0x5e7   : > { %v10724_v34 = vpop.f32.mrb[85].mxu1  ;;  %v17896_v12 = vpack.c.bf16 %v17894_v59, %v17895_v10  ;;  %v17900_v59 = vld [vmem:[#allocation74_spill] sm:$0xff] }
 0x5e8   : > { %v10725_v0 = vadd.f32 %v10724_v34, %v10723_v35  ;;  %v10726_v1 = vpop.f32.mrb[86].mxu1  ;;  %v5032_v60 = vadd.bf16 %v15902_v55, %v17893_v9  ;;  %v17901_v10 = vld [vmem:[#allocation66_spill] sm:$0xff] }
 0x5e9   : > { %v10727_v56 = vpop.f32.mrb[87].mxu1 }
 0x5ea   : > { %v15945_v48 = vadd.f32 %v10725_v0, %v15674_v50  ;;  %v10728_v5 = vadd.f32 %v10727_v56, %v10726_v1  ;;  %v12704_v50 = vld [vmem:[#allocation8 + $0x798] ss:$12 sps:$4 sm:$0xff]   ;;  %v5211_v1 = vmax.bf16 %v17232_v41, %v5019_v54  ;;  %v12712_v54 = vld [vmem:[#allocation8 + $0x7c8] ss:$12 sps:$4 sm:$0xff]  }
 0x5eb   : > { %8204 = vmatmul.mubr.bf16.vlgmr.msra.gmra.mrb[192].mxu0 %v5199_v4  ;;  %9234 = vmatmul.mubr.bf16.vlgmr.msra.gmra.mrb[192].mxu1 %v5199_v4  ;;  %v12709_v4 = vld [vmem:[#allocation8 + $0x7b0] ss:$12 sps:$4 sm:$0xff]   ;;  %v12716_v56 = vld [vmem:[#allocation8 + $0x7b8] ss:$12 sps:$4 sm:$0xff]  }
 0x5ec   : > { %v15949_v32 = vadd.f32 %v10728_v5, %v15677_v19  ;;  %8213 = vmatprep.mubr.bf16.mxu0 %v5212_v11  ;;  %9241 = vmatprep.mubr.bf16.mxu1 %v5212_v11  ;;  %v12711_v19 = vld [vmem:[#allocation8 + $0x7b4] ss:$12 sps:$4 sm:$0xff]   ;;  %v5224_v5 = vmax.bf16 %v17232_v41, %v5032_v60  ;;  %v12714_v11 = vld [vmem:[#allocation8 + $0x7cc] ss:$12 sps:$4 sm:$0xff]  }
 0x5ed   : > { %11014 = vmatpush3.bf16.msra.mxu1 %v12700_v28  ;;  %8365 = vmatpush1.bf16.msra.mxu0 %v12701_v15 }
 0x5ee   : > { %v10729_v14 = vpop.f32.mrb[88].mxu1  ;;  %8366 = vmatprep.subr.bf16.mxu0 %v12706_v49  ;;  %11015 = vmatprep.subr.bf16.mxu1 %v12707_v37  ;;  %v12723_v49 = vld [vmem:[#allocation8 + $0x890] ss:$12 sps:$4 sm:$0xff]  }
 0x5ef   : > { %v10730_v42 = vpop.f32.mrb[89].mxu1 }
 0x5f0   : > { %v10731_v35 = vadd.f32 %v10730_v42, %v10729_v14  ;;  %v10732_v34 = vpop.f32.mrb[90].mxu1  ;;  %v12731_v14 = vld [vmem:[#allocation8 + $0x8a8] ss:$12 sps:$4 sm:$0xff]  }
 0x5f1   : > { %v10733_v0 = vpop.f32.mrb[91].mxu1  ;;  %8367 = vmatpush1.bf16.msra.mxu0 %v12704_v50  ;;  %11016 = vmatpush3.bf16.msra.mxu1 %v12708_v6  ;;  %v12724_v50 = vld [vmem:[#allocation8 + $0x7d0] ss:$12 sps:$4 sm:$0xff]  }
 0x5f2   : > { %v15961_v28 = vadd.f32 %v10731_v35, %v15690_v21  ;;  %v10734_v15 = vadd.f32 %v10733_v0, %v10732_v34  ;;  %8368 = vmatprep.subr.bf16.mxu0 %v12711_v19  ;;  %11017 = vmatprep.subr.bf16.mxu1 %v12715_v36  ;;  %v5031_v21 = vadd.bf16 %v15925_v51, %v17896_v12  ;;  %v17897_v6 = vld [vmem:[#allocation72_spill] sm:$0xff] }
 0x5f3   : > { %8214 = vmatmul.mubr.bf16.gmra.mrb[196].mxu0 %v5211_v1  ;;  %9242 = vmatmul.mubr.bf16.gmra.mrb[196].mxu1 %v5211_v1  ;;  %v17899_v7 = vpack.c.bf16 %v17897_v6, %v17898_v52  ;;  %v12717_v0 = vld [vmem:[#allocation8 + $0x7e0] ss:$12 sps:$4 sm:$0xff]   ;;  %v12732_v1 = vld [vmem:[#allocation8 + $0x7e8] ss:$12 sps:$4 sm:$0xff]   ;;  %v17902_v12 = vpack.c.bf16 %v17900_v59, %v17901_v10 }
 0x5f4   : > { %v15965_v37 = vadd.f32 %v10734_v15, %v15693_v30  ;;  %8223 = vmatprep.mubr.bf16.mxu0 %v5224_v5  ;;  %9249 = vmatprep.mubr.bf16.mxu1 %v5224_v5  ;;  %v12719_v30 = vld [vmem:[#allocation8 + $0x7e4] ss:$12 sps:$4 sm:$0xff]   ;;  %v5223_v34 = vmax.bf16 %v17232_v41, %v5031_v21  ;;  %v12722_v5 = vld [vmem:[#allocation8 + $0x7fc] ss:$12 sps:$4 sm:$0xff]  }
 0x5f5   : > { %8369 = vmatpush1.bf16.msra.mxu0 %v12709_v4  ;;  %11018 = vmatpush3.bf16.msra.mxu1 %v12716_v56  ;;  %v5044_v9 = vadd.bf16 %v15902_v55, %v17899_v7  ;;  %v12720_v21 = vld [vmem:[#allocation8 + $0x7f8] ss:$12 sps:$4 sm:$0xff]   ;;  %v17904_v6 = vld [vmem:[#allocation80_spill] sm:$0xff]  ;;  %v17906_v59 = vld [vmem:[#allocation90_spill] sm:$0xff] }
 0x5f6   : > { %v10735_v60 = vpop.f32.mrb[92].mxu1  ;;  %8370 = vmatprep.subr.bf16.mxu0 %v12714_v11  ;;  %11019 = vmatprep.subr.bf16.mxu1 %v12723_v49  ;;  %v12739_v11 = vld [vmem:[#allocation8 + $0x8c0] ss:$12 sps:$4 sm:$0xff]  }
 0x5f7   : > { %v10736_v19 = vpop.f32.mrb[93].mxu1  ;;  %v5236_v15 = vmax.bf16 %v17232_v41, %v5044_v9  ;;  %v17907_v10 = vld [vmem:[#allocation82_spill] sm:$0xff] }
 0x5f8   : > { %v10737_v36 = vadd.f32 %v10736_v19, %v10735_v60  ;;  %v10738_v42 = vpop.f32.mrb[94].mxu1  ;;  %v12747_v60 = vld [vmem:[#allocation8 + $0x8d8] ss:$12 sps:$4 sm:$0xff]  }
 0x5f9   : > { %v10739_v35 = vpop.f32.mrb[95].mxu1  ;;  %8371 = vmatpush1.bf16.msra.mxu0 %v12712_v54  ;;  %11020 = vmatpush3.bf16.msra.mxu1 %v12724_v50  ;;  %v12740_v54 = vld [vmem:[#allocation8 + $0x800] ss:$12 sps:$4 sm:$0xff]  }
 0x5fa   : > { %v15977_v4 = vadd.f32 %v10737_v36, %v15706_v16  ;;  %v10740_v56 = vadd.f32 %v10739_v35, %v10738_v42  ;;  %8372 = vmatprep.subr.bf16.mxu0 %v12719_v30  ;;  %11021 = vmatprep.subr.bf16.mxu1 %v12731_v14  ;;  %v5043_v16 = vadd.bf16 %v15925_v51, %v17902_v12  ;;  %v17903_v50 = vld [vmem:[#allocation88_spill] sm:$0xff] }
 0x5fb   : > { %8224 = vmatmul.mubr.bf16.gmra.mrb[200].mxu0 %v5223_v34  ;;  %9250 = vmatmul.mubr.bf16.gmra.mrb[200].mxu1 %v5223_v34  ;;  %v17905_v52 = vpack.c.bf16 %v17903_v50, %v17904_v6  ;;  %v12725_v35 = vld [vmem:[#allocation8 + $0x810] ss:$12 sps:$4 sm:$0xff]   ;;  %v12748_v34 = vld [vmem:[#allocation8 + $0x818] ss:$12 sps:$4 sm:$0xff]   ;;  %v17908_v12 = vpack.c.bf16 %v17906_v59, %v17907_v10 }
 0x5fc   : > { %v15981_v49 = vadd.f32 %v10740_v56, %v15709_v24  ;;  %8233 = vmatprep.mubr.bf16.mxu0 %v5236_v15  ;;  %9257 = vmatprep.mubr.bf16.mxu1 %v5236_v15  ;;  %v12727_v24 = vld [vmem:[#allocation8 + $0x814] ss:$12 sps:$4 sm:$0xff]   ;;  %v5235_v42 = vmax.bf16 %v17232_v41, %v5043_v16  ;;  %v12730_v15 = vld [vmem:[#allocation8 + $0x82c] ss:$12 sps:$4 sm:$0xff]  }
 0x5fd   : > { %8373 = vmatpush1.bf16.msra.mxu0 %v12717_v0  ;;  %11022 = vmatpush3.bf16.msra.mxu1 %v12732_v1  ;;  %v5056_v7 = vadd.bf16 %v15902_v55, %v17905_v52  ;;  %v12728_v16 = vld [vmem:[#allocation8 + $0x828] ss:$12 sps:$4 sm:$0xff]   ;;  %v17910_v50 = vld [vmem:[#allocation96_spill] sm:$0xff] }
 0x5fe   : > { %v10741_v9 = vpop.f32.mrb[96].mxu1  ;;  %8374 = vmatprep.subr.bf16.mxu0 %v12722_v5  ;;  %11023 = vmatprep.subr.bf16.mxu1 %v12739_v11  ;;  %v12755_v5 = vld [vmem:[#allocation8 + $0x8f0] ss:$12 sps:$4 sm:$0xff]  }
 0x5ff   : > { %v10742_v30 = vpop.f32.mrb[97].mxu1  ;;  %v5248_v56 = vmax.bf16 %v17232_v41, %v5056_v7  ;;  %v17915_v10 = vld [vmem:[#allocation132_spill] sm:$0xff] }
 0x600   : > { %v10743_v14 = vadd.f32 %v10742_v30, %v10741_v9  ;;  %v10744_v19 = vpop.f32.mrb[98].mxu1 }
 0x601   : > { %v10745_v36 = vpop.f32.mrb[99].mxu1  ;;  %8375 = vmatpush1.bf16.msra.mxu0 %v12720_v21  ;;  %11024 = vmatpush3.bf16.msra.mxu1 %v12740_v54  ;;  %v12756_v21 = vld [vmem:[#allocation8 + $0x830] ss:$12 sps:$4 sm:$0xff]  }
 0x602   : > { %v15993_v0 = vadd.f32 %v10743_v14, %v15722_v62  ;;  %v10746_v1 = vadd.f32 %v10745_v36, %v10744_v19  ;;  %8376 = vmatprep.subr.bf16.mxu0 %v12727_v24  ;;  %11025 = vmatprep.subr.bf16.mxu1 %v12747_v60  ;;  %v5055_v62 = vadd.bf16 %v15925_v51, %v17908_v12  ;;  %v17909_v54 = vld [vmem:[#allocation104_spill] sm:$0xff] }
 0x603   : > { %8234 = vmatmul.mubr.bf16.gmra.mrb[204].mxu0 %v5235_v42  ;;  %9258 = vmatmul.mubr.bf16.gmra.mrb[204].mxu1 %v5235_v42  ;;  %v17911_v6 = vpack.c.bf16 %v17909_v54, %v17910_v50  ;;  %v12733_v19 = vld [vmem:[#allocation8 + $0x840] ss:$12 sps:$4 sm:$0xff]  }
 0x604   : > { %v15997_v11 = vadd.f32 %v10746_v1, %v15725_v53  ;;  %8243 = vmatprep.mubr.bf16.mxu0 %v5248_v56  ;;  %9265 = vmatprep.mubr.bf16.mxu1 %v5248_v56  ;;  %v12735_v53 = vld [vmem:[#allocation8 + $0x844] ss:$12 sps:$4 sm:$0xff]   ;;  %v5247_v14 = vmax.bf16 %v17232_v41, %v5055_v62  ;;  %v17916_v12 = vld [vmem:[#allocation112_spill] sm:$0xff] }
 0x605   : > { %8377 = vmatpush1.bf16.msra.mxu0 %v12725_v35  ;;  %11026 = vmatpush3.bf16.msra.mxu1 %v12748_v34  ;;  %v5068_v52 = vadd.bf16 %v15902_v55, %v17911_v6  ;;  %v12738_v34 = vld [vmem:[#allocation8 + $0x85c] ss:$12 sps:$4 sm:$0xff]   ;;  %v17912_v56 = vld [vmem:[#allocation106_spill] sm:$0xff]  ;;  %v17917_v62 = vpack.c.bf16 %v17915_v10, %v17916_v12  ;;  %v12743_v54 = vld [vmem:[#allocation8 + $0x874] ss:$12 sps:$4 sm:$0xff]  }
 0x606   : > { %v10747_v7 = vpop.f32.mrb[100].mxu1  ;;  %8378 = vmatprep.subr.bf16.mxu0 %v12730_v15  ;;  %11027 = vmatprep.subr.bf16.mxu1 %v12755_v5  ;;  %v17913_v15 = vld [vmem:[#allocation98_spill] sm:$0xff] }
 0x607   : > { %v10748_v9 = vpop.f32.mrb[101].mxu1  ;;  %v5260_v35 = vmax.bf16 %v17232_v41, %v5068_v52  ;;  %v17914_v5 = vpack.c.bf16 %v17912_v56, %v17913_v15  ;;  %v17921_v56 = vld [vmem:[#allocation25_spill] sm:$0xff] }
 0x608   : > { %v10749_v24 = vadd.f32 %v10748_v9, %v10747_v7  ;;  %v10750_v60 = vpop.f32.mrb[102].mxu1  ;;  %v17922_v15 = vld [vmem:[#allocation137_spill] sm:$0xff] }
 0x609   : > { %v10751_v30 = vpop.f32.mrb[103].mxu1  ;;  %8379 = vmatpush1.bf16.msra.mxu0 %v12728_v16  ;;  %11028 = vmatpush3.bf16.msra.mxu1 %v12756_v21  ;;  %v5067_v59 = vadd.bf16 %v15925_v51, %v17914_v5  ;;  %v5080_v16 = vadd.bf16 %v15902_v55, %v17917_v62  ;;  %v17923_v5 = vpack.c.bf16 %v17921_v56, %v17922_v15  ;;  %v12751_v10 = vld [vmem:[#allocation8 + $0x8a4] ss:$12 sps:$4 sm:$0xff]   ;;  %v12759_v56 = vld [vmem:[#allocation8 + $0x8d4] ss:$12 sps:$4 sm:$0xff]  }
 0x60a   : > { %v16009_v36 = vadd.f32 %v10749_v24, %v15738_v22  ;;  %v10752_v42 = vadd.f32 %v10751_v30, %v10750_v60  ;;  %8380 = vmatprep.subr.bf16.mxu0 %v12735_v53  ;;  %v12736_v22 = vld [vmem:[#allocation8 + $0x858] ss:$12 sps:$4 sm:$0xff]   ;;  %v12741_v53 = vld [vmem:[#allocation8 + $0x870] ss:$12 sps:$4 sm:$0xff]  }
 0x60b   : > { %8244 = vmatmul.mubr.bf16.gmra.mrb[208].mxu0 %v5247_v14  ;;  %9266 = vmatmul.mubr.bf16.gmra.mrb[208].mxu1 %v5247_v14  ;;  %v5259_v7 = vmax.bf16 %v17232_v41, %v5067_v59  ;;  %v5272_v60 = vmax.bf16 %v17232_v41, %v5080_v16  ;;  %v12746_v30 = vld [vmem:[#allocation8 + $0x88c] ss:$12 sps:$4 sm:$0xff]   ;;  %v5092_v59 = vadd.bf16 %v15902_v55, %v17923_v5 }
 0x60c   : > { %v16013_v1 = vadd.f32 %v10752_v42, %v15741_v3  ;;  %8253 = vmatprep.mubr.bf16.mxu0 %v5260_v35  ;;  %9273 = vmatprep.mubr.bf16.mxu1 %v5260_v35  ;;  %v17919_v42 = vld [vmem:[#allocation114_spill] sm:$0xff] }
 0x60d   : > { %8381 = vmatpush1.bf16.msra.mxu0 %v12733_v19  ;;  %v17918_v19 = vld [vmem:[#allocation119_spill] sm:$0xff] }
 0x60e   : > { %v10753_v21 = vpop.f32.mrb[104].mxu1  ;;  %8382 = vmatprep.subr.bf16.mxu0 %v12738_v34  ;;  %v17920_v35 = vpack.c.bf16 %v17918_v19, %v17919_v42  ;;  %v17927_v19 = vld [vmem:[#allocation41_spill] sm:$0xff] }
 0x60f   : > { %v10754_v50 = vpop.f32.mrb[105].mxu1  ;;  %v17928_v42 = vld [vmem:[#allocation33_spill] sm:$0xff] }
 0x610   : > { %v10755_v3 = vadd.f32 %v10754_v50, %v10753_v21  ;;  %v10756_v6 = vpop.f32.mrb[106].mxu1  ;;  %v5079_v34 = vadd.bf16 %v15925_v51, %v17920_v35  ;;  %v17929_v35 = vpack.c.bf16 %v17927_v19, %v17928_v42 }
 0x611   : > { %v10757_v52 = vpop.f32.mrb[107].mxu1  ;;  %8383 = vmatpush1.bf16.msra.mxu0 %v12736_v22 }
 0x612   : > { %v16025_v9 = vadd.f32 %v10755_v3, %v15754_v33  ;;  %v10758_v24 = vadd.f32 %v10757_v52, %v10756_v6  ;;  %8384 = vmatprep.subr.bf16.mxu0 %v12743_v54  ;;  %v12744_v33 = vld [vmem:[#allocation8 + $0x888] ss:$12 sps:$4 sm:$0xff]   ;;  %v5271_v21 = vmax.bf16 %v17232_v41, %v5079_v34  ;;  %v12749_v54 = vld [vmem:[#allocation8 + $0x8a0] ss:$12 sps:$4 sm:$0xff]   ;;  %v5284_v6 = vmax.bf16 %v17232_v41, %v5092_v59 }
 0x613   : > { %8254 = vmatmul.mubr.bf16.gmra.mrb[212].mxu0 %v5259_v7  ;;  %9274 = vmatmul.mubr.bf16.gmra.mrb[212].mxu1 %v5259_v7  ;;  %v12754_v52 = vld [vmem:[#allocation8 + $0x8bc] ss:$12 sps:$4 sm:$0xff]   ;;  %v5104_v34 = vadd.bf16 %v15902_v55, %v17929_v35 }
 0x614   : > { %v16029_v14 = vadd.f32 %v10758_v24, %v15757_v45  ;;  %8263 = vmatprep.mubr.bf16.mxu0 %v5272_v60  ;;  %9281 = vmatprep.mubr.bf16.mxu1 %v5272_v60  ;;  %v17925_v24 = vld [vmem:[#allocation130_spill] sm:$0xff] }
 0x615   : > { %8385 = vmatpush1.bf16.msra.mxu0 %v12741_v53  ;;  %v17924_v53 = vld [vmem:[#allocation27_spill] sm:$0xff] }
 0x616   : > { %v10759_v22 = vpop.f32.mrb[108].mxu1  ;;  %8386 = vmatprep.subr.bf16.mxu0 %v12746_v30  ;;  %v17926_v60 = vpack.c.bf16 %v17924_v53, %v17925_v24  ;;  %v17933_v53 = vld [vmem:[#allocation57_spill] sm:$0xff] }
 0x617   : > { %v10760_v12 = vpop.f32.mrb[109].mxu1  ;;  %v17934_v24 = vld [vmem:[#allocation49_spill] sm:$0xff] }
 0x618   : > { %v10761_v45 = vadd.f32 %v10760_v12, %v10759_v22  ;;  %v10762_v62 = vpop.f32.mrb[110].mxu1  ;;  %v5091_v30 = vadd.bf16 %v15925_v51, %v17926_v60  ;;  %v17935_v60 = vpack.c.bf16 %v17933_v53, %v17934_v24 }
 0x619   : > { %v10763_v16 = vpop.f32.mrb[111].mxu1  ;;  %8387 = vmatpush1.bf16.msra.mxu0 %v12744_v33 }
 0x61a   : > { %v16041_v50 = vadd.f32 %v10761_v45, %v15770_v23  ;;  %v10764_v3 = vadd.f32 %v10763_v16, %v10762_v62  ;;  %8388 = vmatprep.subr.bf16.mxu0 %v12751_v10  ;;  %v12752_v23 = vld [vmem:[#allocation8 + $0x8b8] ss:$12 sps:$4 sm:$0xff]   ;;  %v5283_v22 = vmax.bf16 %v17232_v41, %v5091_v30  ;;  %v12757_v10 = vld [vmem:[#allocation8 + $0x8d0] ss:$12 sps:$4 sm:$0xff]   ;;  %v5296_v62 = vmax.bf16 %v17232_v41, %v5104_v34 }
 0x61b   : > { %8264 = vmatmul.mubr.bf16.gmra.mrb[216].mxu0 %v5271_v21  ;;  %9282 = vmatmul.mubr.bf16.gmra.mrb[216].mxu1 %v5271_v21  ;;  %v12762_v16 = vld [vmem:[#allocation8 + $0x8ec] ss:$12 sps:$4 sm:$0xff]   ;;  %v5116_v30 = vadd.bf16 %v15902_v55, %v17935_v60 }
 0x61c   : > { %v16045_v7 = vadd.f32 %v10764_v3, %v15773_v2  ;;  %8273 = vmatprep.mubr.bf16.mxu0 %v5284_v6  ;;  %9289 = vmatprep.mubr.bf16.mxu1 %v5284_v6  ;;  %v17931_v3 = vld [vmem:[#allocation35_spill] sm:$0xff] }
 0x61d   : > { %8389 = vmatpush1.bf16.msra.mxu0 %v12749_v54  ;;  %v17930_v54 = vld [vmem:[#allocation43_spill] sm:$0xff] }
 0x61e   : > { %v10765_v33 = vpop.f32.mrb[112].mxu1  ;;  %8390 = vmatprep.subr.bf16.mxu0 %v12754_v52  ;;  %v17932_v6 = vpack.c.bf16 %v17930_v54, %v17931_v3 }
 0x61f   : > { %v10766_v15 = vpop.f32.mrb[113].mxu1 }
 0x620   : > { %v10767_v2 = vadd.f32 %v10766_v15, %v10765_v33  ;;  %v10768_v5 = vpop.f32.mrb[114].mxu1  ;;  %v5103_v52 = vadd.bf16 %v15925_v51, %v17932_v6  ;;  %v5308_v15 = vmax.bf16 %v17232_v41, %v5116_v30 }
 0x621   : > { %v10769_v59 = vpop.f32.mrb[115].mxu1  ;;  %8391 = vmatpush1.bf16.msra.mxu0 %v12752_v23 }
 0x622   : > { %v16057_v12 = vadd.f32 %v10767_v2, %v15786_v39  ;;  %v10770_v45 = vadd.f32 %v10769_v59, %v10768_v5  ;;  %8392 = vmatprep.subr.bf16.mxu0 %v12759_v56  ;;  %v12760_v39 = vld [vmem:[#allocation8 + $0x8e8] ss:$12 sps:$4 sm:$0xff]   ;;  %v5295_v34 = vmax.bf16 %v17232_v41, %v5103_v52 }
 0x623   : > { %8274 = vmatmul.mubr.bf16.gmra.mrb[220].mxu0 %v5283_v22  ;;  %9290 = vmatmul.mubr.bf16.gmra.mrb[220].mxu1 %v5283_v22  ;;  %v17936_v5 = vld [vmem:[#allocation59_spill] sm:$0xff] }
 0x624   : > { %v16061_v21 = vadd.f32 %v10770_v45, %v15789_v46  ;;  %8283 = vmatprep.mubr.bf16.mxu0 %v5296_v62  ;;  %9297 = vmatprep.mubr.bf16.mxu1 %v5296_v62  ;;  %v17937_v59 = vld [vmem:[#allocation51_spill] sm:$0xff]  ;;  %v17940_v62 = vld [vmem:[#allocation65_spill] sm:$0xff] }
 0x625   : > { %8393 = vmatpush1.bf16.msra.mxu0 %v12757_v10  ;;  %v17938_v22 = vpack.c.bf16 %v17936_v5, %v17937_v59  ;;  %v17939_v45 = vld [vmem:[#allocation235_spill] sm:$0xff] }
 0x626   : > { %v10771_v23 = vpop.f32.mrb[116].mxu1  ;;  %8394 = vmatprep.subr.bf16.mxu0 %v12762_v16  ;;  %v17941_v16 = vpack.c.bf16 %v17939_v45, %v17940_v62 }
 0x627   : > { %v10772_v19 = vpop.f32.mrb[117].mxu1  ;;  %v5115_v10 = vadd.bf16 %v15925_v51, %v17938_v22 }
 0x628   : > { %v10773_v42 = vadd.f32 %v10772_v19, %v10771_v23  ;;  %v10774_v46 = vpop.f32.mrb[118].mxu1  ;;  %v17942_v23 = vld [vmem:[#allocation75_spill] sm:$0xff] }
 0x629   : > { %v10775_v35 = vpop.f32.mrb[119].mxu1  ;;  %8395 = vmatpush1.bf16.msra.mxu0 %v12760_v39  ;;  %v17943_v19 = vld [vmem:[#allocation67_spill] sm:$0xff] }
 0x62a   : > { %v16073_v33 = vadd.f32 %v10773_v42, %v15802_v44  ;;  %v10776_v56 = vadd.f32 %v10775_v35, %v10774_v46  ;;  %v5128_v44 = vadd.bf16 %v15902_v55, %v17941_v16  ;;  %v17944_v42 = vpack.c.bf16 %v17942_v23, %v17943_v19  ;;  %v17945_v35 = vld [vmem:[#allocation239_spill] sm:$0xff] }
 0x62b   : > { %8284 = vmatmul.mubr.bf16.gmra.mrb[224].mxu0 %v5295_v34  ;;  %9298 = vmatmul.mubr.bf16.gmra.mrb[224].mxu1 %v5295_v34  ;;  %v17946_v34 = vld [vmem:[#allocation83_spill] sm:$0xff] }
 0x62c   : > { %v16077_v2 = vadd.f32 %v10776_v56, %v15805_v17  ;;  %8293 = vmatprep.mubr.bf16.mxu0 %v5308_v15  ;;  %9305 = vmatprep.mubr.bf16.mxu1 %v5308_v15  ;;  %v5307_v17 = vmax.bf16 %v17232_v41, %v5115_v10  ;;  %v5320_v60 = vmax.bf16 %v17232_v41, %v5128_v44 }
 0x62d   : > { %v5127_v46 = vadd.bf16 %v15925_v51, %v17944_v42  ;;  %v17947_v56 = vpack.c.bf16 %v17945_v35, %v17946_v34 }
 0x62e   : > { %v10777_v54 = vpop.f32.mrb[120].mxu1 }
 0x62f   : > { %v10778_v3 = vpop.f32.mrb[121].mxu1 }
 0x630   : > { %v10779_v6 = vadd.f32 %v10778_v3, %v10777_v54  ;;  %v10780_v52 = vpop.f32.mrb[122].mxu1  ;;  %v17948_v54 = vld [vmem:[#allocation237_spill] sm:$0xff] }
 0x631   : > { %v10781_v39 = vpop.f32.mrb[123].mxu1  ;;  %v17949_v3 = vld [vmem:[#allocation73_spill] sm:$0xff] }
 0x632   : > { %v16089_v53 = vadd.f32 %v10779_v6, %v15818_v27  ;;  %v10782_v24 = vadd.f32 %v10781_v39, %v10780_v52  ;;  %v5140_v27 = vadd.bf16 %v15902_v55, %v17947_v56  ;;  %v17950_v6 = vpack.c.bf16 %v17948_v54, %v17949_v3  ;;  %v17951_v39 = vld [vmem:[#allocation243_spill] sm:$0xff] }
 0x633   : > { %8294 = vmatmul.mubr.bf16.gmra.mrb[228].mxu0 %v5307_v17  ;;  %9306 = vmatmul.mubr.bf16.gmra.mrb[228].mxu1 %v5307_v17  ;;  %v17952_v17 = vld [vmem:[#allocation91_spill] sm:$0xff] }
 0x634   : > { %v16093_v30 = vadd.f32 %v10782_v24, %v15821_v38  ;;  %8303 = vmatprep.mubr.bf16.mxu0 %v5320_v60  ;;  %9313 = vmatprep.mubr.bf16.mxu1 %v5320_v60  ;;  %v5319_v38 = vmax.bf16 %v17232_v41, %v5127_v46  ;;  %v5332_v16 = vmax.bf16 %v17232_v41, %v5140_v27 }
 0x635   : > { %v5139_v52 = vadd.bf16 %v15925_v51, %v17950_v6  ;;  %v17953_v24 = vpack.c.bf16 %v17951_v39, %v17952_v17 }
 0x636   : > { %v10783_v15 = vpop.f32.mrb[124].mxu1 }
 0x637   : > { %v10784_v5 = vpop.f32.mrb[125].mxu1 }
 0x638   : > { %v10785_v59 = vadd.f32 %v10784_v5, %v10783_v15  ;;  %v10786_v22 = vpop.f32.mrb[126].mxu1  ;;  %v17954_v15 = vld [vmem:[#allocation241_spill] sm:$0xff] }
 0x639   : > { %v10787_v10 = vpop.f32.mrb[127].mxu1  ;;  %v17955_v5 = vld [vmem:[#allocation81_spill] sm:$0xff] }
 0x63a   : > { %v16105_v45 = vadd.f32 %v10785_v59, %v15834_v20  ;;  %v10788_v62 = vadd.f32 %v10787_v10, %v10786_v22  ;;  %v5152_v20 = vadd.bf16 %v15902_v55, %v17953_v24  ;;  %v17956_v59 = vpack.c.bf16 %v17954_v15, %v17955_v5  ;;  %v17957_v10 = vld [vmem:[#allocation247_spill] sm:$0xff] }
 0x63b   : > { %8304 = vmatmul.mubr.bf16.gmra.mrb[232].mxu0 %v5319_v38  ;;  %9314 = vmatmul.mubr.bf16.gmra.mrb[232].mxu1 %v5319_v38  ;;  %v17958_v38 = vld [vmem:[#allocation99_spill] sm:$0xff] }
 0x63c   : > { %v16109_v44 = vadd.f32 %v10788_v62, %v15837_v43  ;;  %8313 = vmatprep.mubr.bf16.mxu0 %v5332_v16  ;;  %9321 = vmatprep.mubr.bf16.mxu1 %v5332_v16  ;;  %v5331_v43 = vmax.bf16 %v17232_v41, %v5139_v52  ;;  %v5344_v56 = vmax.bf16 %v17232_v41, %v5152_v20 }
 0x63d   : > { %v5151_v22 = vadd.bf16 %v15925_v51, %v17956_v59  ;;  %v17959_v62 = vpack.c.bf16 %v17957_v10, %v17958_v38  ;;  %v4914_v10 = vcombine.high %v15885_v26, %v15885_v26  ;;  %v17969_v26 = vld [vmem:[#allocation255_spill] sm:$0xff] }
 0x63e   : > { %v10805_v60 = vpop.f32.mrb[128].mxu1 }
 0x63f   : > { %v10806_v23 = vpop.f32.mrb[129].mxu1 }
 0x640   : > { %v10807_v19 = vadd.f32 %v10806_v23, %v10805_v60  ;;  %v10808_v42 = vpop.f32.mrb[130].mxu1  ;;  %v17960_v60 = vld [vmem:[#allocation245_spill] sm:$0xff] }
 0x641   : > { %v10809_v46 = vpop.f32.mrb[131].mxu1  ;;  %v17961_v23 = vld [vmem:[#allocation89_spill] sm:$0xff] }
 0x642   : > { %v16121_v35 = vadd.f32 %v10807_v19, %v15849_v31  ;;  %v10810_v34 = vadd.f32 %v10809_v46, %v10808_v42  ;;  %v5164_v31 = vadd.bf16 %v15902_v55, %v17959_v62  ;;  %v17962_v19 = vpack.c.bf16 %v17960_v60, %v17961_v23  ;;  %v17963_v46 = vld [vmem:[#allocation251_spill] sm:$0xff] }
 0x643   : > { %8314 = vmatmul.mubr.bf16.gmra.mrb[236].mxu0 %v5331_v43  ;;  %9322 = vmatmul.mubr.bf16.gmra.mrb[236].mxu1 %v5331_v43  ;;  %v17964_v43 = vld [vmem:[#allocation107_spill] sm:$0xff] }
 0x644   : > { %v16125_v27 = vadd.f32 %v10810_v34, %v15853_v57  ;;  %8323 = vmatprep.mubr.bf16.mxu0 %v5344_v56  ;;  %9329 = vmatprep.mubr.bf16.mxu1 %v5344_v56  ;;  %v5343_v57 = vmax.bf16 %v17232_v41, %v5151_v22  ;;  %v5356_v24 = vmax.bf16 %v17232_v41, %v5164_v31 }
 0x645   : > { %v5163_v42 = vadd.bf16 %v15925_v51, %v17962_v19  ;;  %v17965_v34 = vpack.c.bf16 %v17963_v46, %v17964_v43 }
 0x646   : > { %v10811_v16 = vpop.f32.mrb[132].mxu1 }
 0x647   : > { %v10812_v54 = vpop.f32.mrb[133].mxu1 }
 0x648   : > { %v10813_v3 = vadd.f32 %v10812_v54, %v10811_v16  ;;  %v10814_v6 = vpop.f32.mrb[134].mxu1  ;;  %v17966_v54 = vld [vmem:[#allocation249_spill] sm:$0xff] }
 0x649   : > { %v10815_v52 = vpop.f32.mrb[135].mxu1 }
 0x64a   : > { %v16137_v39 = vadd.f32 %v10813_v3, %v15865_v13  ;;  %v10816_v17 = vadd.f32 %v10815_v52, %v10814_v6  ;;  %v5176_v13 = vadd.bf16 %v15902_v55, %v17965_v34  ;;  %v17967_v3 = vld [vmem:[#allocation97_spill] sm:$0xff] }
 0x64b   : > { %8324 = vmatmul.mubr.bf16.gmra.mrb[240].mxu0 %v5343_v57  ;;  %9330 = vmatmul.mubr.bf16.gmra.mrb[240].mxu1 %v5343_v57  ;;  %v17968_v6 = vpack.c.bf16 %v17966_v54, %v17967_v3  ;;  %v4993_v57 = vpack.i.b16 %v4914_v10, %v4914_v10  ;;  %v17975_v10 = vld [vmem:[#allocation20_spill] sm:$0xff] }
 0x64c   : > { %v16141_v20 = vadd.f32 %v10816_v17, %v15869_v8  ;;  %8333 = vmatprep.mubr.bf16.mxu0 %v5356_v24  ;;  %9337 = vmatprep.mubr.bf16.mxu1 %v5356_v24  ;;  %v5355_v8 = vmax.bf16 %v17232_v41, %v5163_v42  ;;  %v5368_v31 = vmax.bf16 %v17232_v41, %v5176_v13  ;;  %v17970_v17 = vld [vmem:[#allocation115_spill] sm:$0xff] }
 0x64d   : > { %v5175_v52 = vadd.bf16 %v15925_v51, %v17968_v6  ;;  %v16173_v34 = vrot.slane %v4993_v57, %v14642_v25 }
 0x64e   : > { %v10817_v56 = vpop.f32.mrb[136].mxu1 }
 0x64f   : > { %v10818_v15 = vpop.f32.mrb[137].mxu1  ;;  %v5367_v43 = vmax.bf16 %v17232_v41, %v5175_v52 }
 0x650   : > { %v10819_v5 = vadd.f32 %v10818_v15, %v10817_v56  ;;  %v10820_v59 = vpop.f32.mrb[138].mxu1 }
 0x651   : > { %v10821_v22 = vpop.f32.mrb[139].mxu1 }
 0x652   : > { %v16155_v38 = vadd.f32 %v10819_v5, %v15881_v63  ;;  %v10822_v62 = vadd.f32 %v10821_v22, %v10820_v59  ;;  %v17971_v63 = vpack.c.bf16 %v17969_v26, %v17970_v17  ;;  %v17972_v5 = vld [vmem:[#allocation253_spill] sm:$0xff] }
 0x653   : > { %8334 = vmatmul.mubr.bf16.gmra.mrb[244].mxu0 %v5355_v8  ;;  %9338 = vmatmul.mubr.bf16.gmra.mrb[244].mxu1 %v5355_v8  ;;  %v17973_v59 = vld [vmem:[#allocation105_spill] sm:$0xff] }
 0x654   : > { %v16159_v16 = vadd.f32 %v10822_v62, %v15888_v47  ;;  %8343 = vmatprep.mubr.bf16.mxu0 %v5368_v31  ;;  %9345 = vmatprep.mubr.bf16.mxu1 %v5368_v31  ;;  %v5188_v24 = vadd.bf16 %v15902_v55, %v17971_v63  ;;  %v4913_v47 = vcombine.high %v15909_v29, %v15909_v29  ;;  %v17976_v62 = vld [vmem:[#allocation22_spill] sm:$0xff] }
 0x655   : > { %v17974_v22 = vpack.c.bf16 %v17972_v5, %v17973_v59 }
 0x656   : > { %v10823_v60 = vpop.f32.mrb[140].mxu1  ;;  %v5380_v15 = vmax.bf16 %v17232_v41, %v5188_v24  ;;  %v4986_v29 = vpack.i.b16 %v4913_v47, %v4913_v47  ;;  %v17981_v47 = vld [vmem:[#allocation36_spill] sm:$0xff] }
 0x657   : > { %v10824_v23 = vpop.f32.mrb[141].mxu1  ;;  %v5187_v8 = vadd.bf16 %v15925_v51, %v17974_v22 }
 0x658   : > { %v10825_v19 = vadd.f32 %v10824_v23, %v10823_v60  ;;  %v10826_v42 = vpop.f32.mrb[142].mxu1  ;;  %v17978_v60 = vld [vmem:[#allocation24_spill] sm:$0xff]  ;;  %v17979_v23 = vld [vmem:[#allocation26_spill] sm:$0xff] }
 0x659   : > { %v10827_v46 = vpop.f32.mrb[143].mxu1  ;;  %v5379_v26 = vmax.bf16 %v17232_v41, %v5187_v8 }
 0x65a   : > { %v16176_v13 = vadd.f32 %v10825_v19, %v15905_v40  ;;  %v10828_v56 = vadd.f32 %v10827_v46, %v10826_v42  ;;  %v17977_v40 = vpack.c.bf16 %v17975_v10, %v17976_v62  ;;  %v17980_v19 = vpack.c.bf16 %v17978_v60, %v17979_v23  ;;  %v17982_v46 = vld [vmem:[#allocation28_spill] sm:$0xff] }
 0x65b   : > { %8344 = vmatmul.mubr.bf16.gmra.mrb[248].mxu0 %v5367_v43  ;;  %9346 = vmatmul.mubr.bf16.gmra.mrb[248].mxu1 %v5367_v43  ;;  %v17983_v43 = vpack.c.bf16 %v17981_v47, %v17982_v46 }
 0x65c   : > { %v16180_v55 = vadd.f32 %v10828_v56, %v15912_v61  ;;  %8353 = vmatprep.mubr.bf16.mxu0 %v5380_v15  ;;  %9353 = vmatprep.mubr.bf16.mxu1 %v5380_v15  ;;  %v5010_v31 = vadd.bf16 %v16173_v34, %v17977_v40  ;;  %v16191_v61 = vrot.slane %v4986_v29, %v14642_v25  ;;  %v17984_v40 = vld [vmem:[#allocation38_spill] sm:$0xff] }
 0x65e   : > { %v10829_v54 = vpop.f32.mrb[144].mxu1  ;;  %v5202_v51 = vmax.bf16 %v17232_v41, %v5010_v31  ;;  %v5009_v42 = vadd.bf16 %v16191_v61, %v17980_v19  ;;  %v17985_v31 = vld [vmem:[#allocation30_spill] sm:$0xff] }
 0x65f   : > { %v10830_v3 = vpop.f32.mrb[145].mxu1 }
 0x660   : > { %v10831_v6 = vadd.f32 %v10830_v3, %v10829_v54  ;;  %v10832_v52 = vpop.f32.mrb[146].mxu1  ;;  %v5201_v59 = vmax.bf16 %v17232_v41, %v5009_v42  ;;  %v17986_v54 = vpack.c.bf16 %v17984_v40, %v17985_v31 }
 0x661   : > { %v10833_v57 = vpop.f32.mrb[147].mxu1 }
 0x662   : > { %v16195_v17 = vadd.f32 %v10831_v6, %v15929_v18  ;;  %v10834_v63 = vadd.f32 %v10833_v57, %v10832_v52  ;;  %v5022_v18 = vadd.bf16 %v16173_v34, %v17983_v43  ;;  %v5021_v3 = vadd.bf16 %v16191_v61, %v17986_v54  ;;  %v17987_v6 = vld [vmem:[#allocation52_spill] sm:$0xff]  ;;  %v17990_v43 = vld [vmem:[#allocation54_spill] sm:$0xff] }
 0x663   : > { %8354 = vmatmul.mubr.bf16.gmra.mrb[252].mxu0 %v5379_v26  ;;  %9354 = vmatmul.mubr.bf16.gmra.mrb[252].mxu1 %v5379_v26  ;;  %v17988_v52 = vld [vmem:[#allocation44_spill] sm:$0xff] }
 0x664   : > { %v16199_v24 = vadd.f32 %v10834_v63, %v15933_v58  ;;  %8396 = vmatprep.mubr.bf16.mxu0 %v5202_v51  ;;  %9394 = vmatprep.mubr.bf16.mxu1 %v5202_v51  ;;  %v5214_v10 = vmax.bf16 %v17232_v41, %v5022_v18  ;;  %v17989_v57 = vpack.c.bf16 %v17987_v6, %v17988_v52  ;;  %v17991_v18 = vld [vmem:[#allocation46_spill] sm:$0xff] }
 0x666   : > { %v10835_v56 = vpop.f32.mrb[148].mxu1 }
 0x667   : > { %v10836_v15 = vpop.f32.mrb[149].mxu1 }
 0x668   : > { %v10837_v29 = vadd.f32 %v10836_v15, %v10835_v56  ;;  %v10838_v5 = vpop.f32.mrb[150].mxu1  ;;  %v17992_v56 = vpack.c.bf16 %v17990_v43, %v17991_v18 }
 0x669   : > { %v10839_v58 = vpop.f32.mrb[151].mxu1 }
 0x66a   : > { %v16211_v22 = vadd.f32 %v10837_v29, %v15945_v48  ;;  %v10840_v8 = vadd.f32 %v10839_v58, %v10838_v5  ;;  %v5034_v48 = vadd.bf16 %v16173_v34, %v17989_v57  ;;  %v5033_v15 = vadd.bf16 %v16191_v61, %v17992_v56  ;;  %v17993_v29 = vld [vmem:[#allocation68_spill] sm:$0xff]  ;;  %v17996_v57 = vld [vmem:[#allocation70_spill] sm:$0xff] }
 0x66b   : > { %8397 = vmatmul.mubr.bf16.vlgmr.msra.gmra.mrb[192].mxu0 %v5201_v59  ;;  %9395 = vmatmul.mubr.bf16.vlgmr.msra.gmra.mrb[0].mxu1 %v5201_v59  ;;  %v17994_v5 = vld [vmem:[#allocation60_spill] sm:$0xff] }
 0x66c   : > { %v16215_v62 = vadd.f32 %v10840_v8, %v15949_v32  ;;  %8406 = vmatprep.mubr.bf16.mxu0 %v5214_v10  ;;  %9402 = vmatprep.mubr.bf16.mxu1 %v5214_v10  ;;  %v5213_v32 = vmax.bf16 %v17232_v41, %v5021_v3  ;;  %v5226_v47 = vmax.bf16 %v17232_v41, %v5034_v48  ;;  %v17997_v48 = vld [vmem:[#allocation62_spill] sm:$0xff] }
 0x66d   : > { %v17995_v59 = vpack.c.bf16 %v17993_v29, %v17994_v5 }
 0x66e   : > { %v10841_v26 = vpop.f32.mrb[152].mxu1 }
 0x66f   : > { %v10842_v63 = vpop.f32.mrb[153].mxu1 }
 0x670   : > { %v10843_v51 = vadd.f32 %v10842_v63, %v10841_v26  ;;  %v10844_v60 = vpop.f32.mrb[154].mxu1  ;;  %v17998_v26 = vpack.c.bf16 %v17996_v57, %v17997_v48 }
 0x671   : > { %v10845_v23 = vpop.f32.mrb[155].mxu1 }
 0x672   : > { %v16227_v19 = vadd.f32 %v10843_v51, %v15961_v28  ;;  %v10846_v42 = vadd.f32 %v10845_v23, %v10844_v60  ;;  %v5046_v28 = vadd.bf16 %v16173_v34, %v17995_v59  ;;  %v5045_v63 = vadd.bf16 %v16191_v61, %v17998_v26  ;;  %v17999_v51 = vld [vmem:[#allocation84_spill] sm:$0xff]  ;;  %v18002_v59 = vld [vmem:[#allocation86_spill] sm:$0xff] }
 0x673   : > { %8407 = vmatmul.mubr.bf16.gmra.mrb[196].mxu0 %v5213_v32  ;;  %9403 = vmatmul.mubr.bf16.gmra.mrb[4].mxu1 %v5213_v32  ;;  %v18000_v60 = vld [vmem:[#allocation76_spill] sm:$0xff] }
 0x674   : > { %v16231_v46 = vadd.f32 %v10846_v42, %v15965_v37  ;;  %8416 = vmatprep.mubr.bf16.mxu0 %v5226_v47  ;;  %9410 = vmatprep.mubr.bf16.mxu1 %v5226_v47  ;;  %v5225_v37 = vmax.bf16 %v17232_v41, %v5033_v15  ;;  %v5238_v6 = vmax.bf16 %v17232_v41, %v5046_v28  ;;  %v18003_v28 = vld [vmem:[#allocation78_spill] sm:$0xff] }
 0x675   : > { %v18001_v23 = vpack.c.bf16 %v17999_v51, %v18000_v60 }
 0x676   : > { %v10847_v58 = vpop.f32.mrb[156].mxu1 }
 0x677   : > { %v10848_v8 = vpop.f32.mrb[157].mxu1 }
 0x678   : > { %v10849_v10 = vadd.f32 %v10848_v8, %v10847_v58  ;;  %v10850_v40 = vpop.f32.mrb[158].mxu1  ;;  %v18004_v58 = vpack.c.bf16 %v18002_v59, %v18003_v28 }
 0x679   : > { %v10851_v31 = vpop.f32.mrb[159].mxu1 }
 0x67a   : > { %v16243_v54 = vadd.f32 %v10849_v10, %v15977_v4  ;;  %v10852_v3 = vadd.f32 %v10851_v31, %v10850_v40  ;;  %v5058_v4 = vadd.bf16 %v16173_v34, %v18001_v23  ;;  %v5057_v8 = vadd.bf16 %v16191_v61, %v18004_v58  ;;  %v18005_v10 = vld [vmem:[#allocation100_spill] sm:$0xff]  ;;  %v18008_v23 = vld [vmem:[#allocation102_spill] sm:$0xff] }
 0x67b   : > { %8417 = vmatmul.mubr.bf16.gmra.mrb[200].mxu0 %v5225_v37  ;;  %9411 = vmatmul.mubr.bf16.gmra.mrb[8].mxu1 %v5225_v37  ;;  %v18006_v40 = vld [vmem:[#allocation92_spill] sm:$0xff] }
 0x67c   : > { %v16247_v52 = vadd.f32 %v10852_v3, %v15981_v49  ;;  %8426 = vmatprep.mubr.bf16.mxu0 %v5238_v6  ;;  %9418 = vmatprep.mubr.bf16.mxu1 %v5238_v6  ;;  %v5237_v49 = vmax.bf16 %v17232_v41, %v5045_v63  ;;  %v5250_v29 = vmax.bf16 %v17232_v41, %v5058_v4  ;;  %v18009_v4 = vld [vmem:[#allocation94_spill] sm:$0xff] }
 0x67d   : > { %v18007_v31 = vpack.c.bf16 %v18005_v10, %v18006_v40 }
 0x67e   : > { %v10853_v32 = vpop.f32.mrb[160].mxu1 }
 0x67f   : > { %v10854_v42 = vpop.f32.mrb[161].mxu1 }
 0x680   : > { %v10855_v47 = vadd.f32 %v10854_v42, %v10853_v32  ;;  %v10856_v43 = vpop.f32.mrb[162].mxu1  ;;  %v18010_v32 = vpack.c.bf16 %v18008_v23, %v18009_v4 }
 0x681   : > { %v10857_v18 = vpop.f32.mrb[163].mxu1 }
 0x682   : > { %v16259_v56 = vadd.f32 %v10855_v47, %v15993_v0  ;;  %v10858_v15 = vadd.f32 %v10857_v18, %v10856_v43  ;;  %v5070_v0 = vadd.bf16 %v16173_v34, %v18007_v31  ;;  %v5069_v42 = vadd.bf16 %v16191_v61, %v18010_v32  ;;  %v18011_v47 = vld [vmem:[#allocation128_spill] sm:$0xff] }
 0x683   : > { %8427 = vmatmul.mubr.bf16.gmra.mrb[204].mxu0 %v5237_v49  ;;  %9419 = vmatmul.mubr.bf16.gmra.mrb[12].mxu1 %v5237_v49  ;;  %v18012_v43 = vld [vmem:[#allocation108_spill] sm:$0xff] }
 0x684   : > { %v16263_v5 = vadd.f32 %v10858_v15, %v15997_v11  ;;  %8436 = vmatprep.mubr.bf16.mxu0 %v5250_v29  ;;  %9426 = vmatprep.mubr.bf16.mxu1 %v5250_v29  ;;  %v5249_v11 = vmax.bf16 %v17232_v41, %v5057_v8  ;;  %v5262_v51 = vmax.bf16 %v17232_v41, %v5070_v0  ;;  %v18014_v31 = vld [vmem:[#allocation116_spill] sm:$0xff]  ;;  %v18015_v0 = vld [vmem:[#allocation110_spill] sm:$0xff] }
 0x685   : > { %v18013_v18 = vpack.c.bf16 %v18011_v47, %v18012_v43 }
 0x686   : > { %v10859_v37 = vpop.f32.mrb[164].mxu1 }
 0x687   : > { %v10860_v3 = vpop.f32.mrb[165].mxu1 }
 0x688   : > { %v10861_v6 = vadd.f32 %v10860_v3, %v10859_v37  ;;  %v10862_v57 = vpop.f32.mrb[166].mxu1  ;;  %v18016_v37 = vpack.c.bf16 %v18014_v31, %v18015_v0 }
 0x689   : > { %v10863_v48 = vpop.f32.mrb[167].mxu1 }
 0x68a   : > { %v16275_v26 = vadd.f32 %v10861_v6, %v16009_v36  ;;  %v10864_v63 = vadd.f32 %v10863_v48, %v10862_v57  ;;  %v5082_v36 = vadd.bf16 %v16173_v34, %v18013_v18  ;;  %v5081_v3 = vadd.bf16 %v16191_v61, %v18016_v37  ;;  %v18017_v6 = vld [vmem:[#allocation21_spill] sm:$0xff]  ;;  %v18018_v57 = vld [vmem:[#allocation134_spill] sm:$0xff]  ;;  %v18020_v18 = vld [vmem:[#allocation23_spill] sm:$0xff] }
 0x68b   : > { %8437 = vmatmul.mubr.bf16.gmra.mrb[208].mxu0 %v5249_v11  ;;  %9427 = vmatmul.mubr.bf16.gmra.mrb[16].mxu1 %v5249_v11  ;;  %v18019_v48 = vpack.c.bf16 %v18017_v6, %v18018_v57 }
 0x68c   : > { %v16279_v60 = vadd.f32 %v10864_v63, %v16013_v1  ;;  %8446 = vmatprep.mubr.bf16.mxu0 %v5262_v51  ;;  %9434 = vmatprep.mubr.bf16.mxu1 %v5262_v51  ;;  %v5261_v1 = vmax.bf16 %v17232_v41, %v5069_v42  ;;  %v5274_v10 = vmax.bf16 %v17232_v41, %v5082_v36  ;;  %v18021_v36 = vld [vmem:[#allocation126_spill] sm:$0xff] }
 0x68e   : > { %v10865_v49 = vpop.f32.mrb[168].mxu1 }
 0x68f   : > { %v10866_v15 = vpop.f32.mrb[169].mxu1 }
 0x690   : > { %v10867_v29 = vadd.f32 %v10866_v15, %v10865_v49  ;;  %v10868_v59 = vpop.f32.mrb[170].mxu1  ;;  %v18022_v49 = vpack.c.bf16 %v18020_v18, %v18021_v36 }
 0x691   : > { %v10869_v28 = vpop.f32.mrb[171].mxu1 }
 0x692   : > { %v16291_v58 = vadd.f32 %v10867_v29, %v16025_v9  ;;  %v10870_v8 = vadd.f32 %v10869_v28, %v10868_v59  ;;  %v5094_v9 = vadd.bf16 %v16173_v34, %v18019_v48  ;;  %v5093_v15 = vadd.bf16 %v16191_v61, %v18022_v49  ;;  %v18023_v29 = vld [vmem:[#allocation37_spill] sm:$0xff]  ;;  %v18026_v48 = vld [vmem:[#allocation39_spill] sm:$0xff] }
 0x693   : > { %8447 = vmatmul.mubr.bf16.gmra.mrb[212].mxu0 %v5261_v1  ;;  %9435 = vmatmul.mubr.bf16.gmra.mrb[20].mxu1 %v5261_v1  ;;  %v18024_v59 = vld [vmem:[#allocation29_spill] sm:$0xff] }
 0x694   : > { %v16295_v40 = vadd.f32 %v10870_v8, %v16029_v14  ;;  %8456 = vmatprep.mubr.bf16.mxu0 %v5274_v10  ;;  %9442 = vmatprep.mubr.bf16.mxu1 %v5274_v10  ;;  %v5273_v14 = vmax.bf16 %v17232_v41, %v5081_v3  ;;  %v5286_v47 = vmax.bf16 %v17232_v41, %v5094_v9  ;;  %v18027_v9 = vld [vmem:[#allocation31_spill] sm:$0xff] }
 0x695   : > { %v18025_v28 = vpack.c.bf16 %v18023_v29, %v18024_v59 }
 0x696   : > { %v10871_v11 = vpop.f32.mrb[172].mxu1 }
 0x697   : > { %v10872_v63 = vpop.f32.mrb[173].mxu1 }
 0x698   : > { %v10873_v51 = vadd.f32 %v10872_v63, %v10871_v11  ;;  %v10874_v23 = vpop.f32.mrb[174].mxu1  ;;  %v18028_v11 = vpack.c.bf16 %v18026_v48, %v18027_v9 }
 0x699   : > { %v10875_v4 = vpop.f32.mrb[175].mxu1 }
 0x69a   : > { %v16307_v32 = vadd.f32 %v10873_v51, %v16041_v50  ;;  %v10876_v42 = vadd.f32 %v10875_v4, %v10874_v23  ;;  %v5106_v50 = vadd.bf16 %v16173_v34, %v18025_v28  ;;  %v5105_v63 = vadd.bf16 %v16191_v61, %v18028_v11  ;;  %v18029_v51 = vld [vmem:[#allocation53_spill] sm:$0xff]  ;;  %v18032_v28 = vld [vmem:[#allocation55_spill] sm:$0xff] }
 0x69b   : > { %8457 = vmatmul.mubr.bf16.gmra.mrb[216].mxu0 %v5273_v14  ;;  %9443 = vmatmul.mubr.bf16.gmra.mrb[24].mxu1 %v5273_v14  ;;  %v18030_v23 = vld [vmem:[#allocation45_spill] sm:$0xff] }
 0x69c   : > { %v16311_v43 = vadd.f32 %v10876_v42, %v16045_v7  ;;  %8466 = vmatprep.mubr.bf16.mxu0 %v5286_v47  ;;  %9450 = vmatprep.mubr.bf16.mxu1 %v5286_v47  ;;  %v5285_v7 = vmax.bf16 %v17232_v41, %v5093_v15  ;;  %v5298_v6 = vmax.bf16 %v17232_v41, %v5106_v50  ;;  %v18033_v50 = vld [vmem:[#allocation47_spill] sm:$0xff] }
 0x69d   : > { %v18031_v4 = vpack.c.bf16 %v18029_v51, %v18030_v23 }
 0x69e   : > { %v10877_v1 = vpop.f32.mrb[176].mxu1 }
 0x69f   : > { %v10878_v8 = vpop.f32.mrb[177].mxu1 }
 0x6a0   : > { %v10879_v10 = vadd.f32 %v10878_v8, %v10877_v1  ;;  %v10880_v31 = vpop.f32.mrb[178].mxu1  ;;  %v18034_v1 = vpack.c.bf16 %v18032_v28, %v18033_v50 }
 0x6a1   : > { %v10881_v0 = vpop.f32.mrb[179].mxu1 }
 0x6a2   : > { %v16323_v37 = vadd.f32 %v10879_v10, %v16057_v12  ;;  %v10882_v3 = vadd.f32 %v10881_v0, %v10880_v31  ;;  %v5118_v12 = vadd.bf16 %v16173_v34, %v18031_v4  ;;  %v5117_v8 = vadd.bf16 %v16191_v61, %v18034_v1  ;;  %v18035_v10 = vld [vmem:[#allocation236_spill] sm:$0xff]  ;;  %v18036_v31 = vld [vmem:[#allocation61_spill] sm:$0xff]  ;;  %v18038_v4 = vld [vmem:[#allocation71_spill] sm:$0xff] }
 0x6a3   : > { %8467 = vmatmul.mubr.bf16.gmra.mrb[220].mxu0 %v5285_v7  ;;  %9451 = vmatmul.mubr.bf16.gmra.mrb[28].mxu1 %v5285_v7  ;;  %v18037_v0 = vpack.c.bf16 %v18035_v10, %v18036_v31 }
 0x6a4   : > { %v16327_v57 = vadd.f32 %v10882_v3, %v16061_v21  ;;  %8476 = vmatprep.mubr.bf16.mxu0 %v5298_v6  ;;  %9458 = vmatprep.mubr.bf16.mxu1 %v5298_v6  ;;  %v5297_v21 = vmax.bf16 %v17232_v41, %v5105_v63  ;;  %v5310_v29 = vmax.bf16 %v17232_v41, %v5118_v12  ;;  %v18039_v12 = vld [vmem:[#allocation63_spill] sm:$0xff] }
 0x6a6   : > { %v10883_v14 = vpop.f32.mrb[180].mxu1 }
 0x6a7   : > { %v10884_v42 = vpop.f32.mrb[181].mxu1 }
 0x6a8   : > { %v10885_v47 = vadd.f32 %v10884_v42, %v10883_v14  ;;  %v10886_v18 = vpop.f32.mrb[182].mxu1  ;;  %v18040_v14 = vpack.c.bf16 %v18038_v4, %v18039_v12 }
 0x6a9   : > { %v10887_v36 = vpop.f32.mrb[183].mxu1 }
 0x6aa   : > { %v16339_v49 = vadd.f32 %v10885_v47, %v16073_v33  ;;  %v10888_v15 = vadd.f32 %v10887_v36, %v10886_v18  ;;  %v5130_v33 = vadd.bf16 %v16173_v34, %v18037_v0  ;;  %v5129_v42 = vadd.bf16 %v16191_v61, %v18040_v14  ;;  %v18041_v47 = vld [vmem:[#allocation240_spill] sm:$0xff]  ;;  %v18042_v18 = vld [vmem:[#allocation79_spill] sm:$0xff]  ;;  %v18044_v0 = vld [vmem:[#allocation238_spill] sm:$0xff] }
 0x6ab   : > { %8477 = vmatmul.mubr.bf16.gmra.mrb[224].mxu0 %v5297_v21  ;;  %9459 = vmatmul.mubr.bf16.gmra.mrb[32].mxu1 %v5297_v21  ;;  %v18043_v36 = vpack.c.bf16 %v18041_v47, %v18042_v18 }
 0x6ac   : > { %v16343_v59 = vadd.f32 %v10888_v15, %v16077_v2  ;;  %8486 = vmatprep.mubr.bf16.mxu0 %v5310_v29  ;;  %9466 = vmatprep.mubr.bf16.mxu1 %v5310_v29  ;;  %v5309_v2 = vmax.bf16 %v17232_v41, %v5117_v8  ;;  %v5322_v51 = vmax.bf16 %v17232_v41, %v5130_v33  ;;  %v18045_v33 = vld [vmem:[#allocation69_spill] sm:$0xff] }
 0x6ae   : > { %v10889_v7 = vpop.f32.mrb[184].mxu1 }
 0x6af   : > { %v10890_v3 = vpop.f32.mrb[185].mxu1 }
 0x6b0   : > { %v10891_v6 = vadd.f32 %v10890_v3, %v10889_v7  ;;  %v10892_v48 = vpop.f32.mrb[186].mxu1  ;;  %v18046_v7 = vpack.c.bf16 %v18044_v0, %v18045_v33 }
 0x6b1   : > { %v10893_v9 = vpop.f32.mrb[187].mxu1 }
 0x6b2   : > { %v16355_v11 = vadd.f32 %v10891_v6, %v16089_v53  ;;  %v10894_v63 = vadd.f32 %v10893_v9, %v10892_v48  ;;  %v5142_v53 = vadd.bf16 %v16173_v34, %v18043_v36  ;;  %v5141_v3 = vadd.bf16 %v16191_v61, %v18046_v7  ;;  %v18047_v6 = vld [vmem:[#allocation244_spill] sm:$0xff]  ;;  %v18048_v48 = vld [vmem:[#allocation87_spill] sm:$0xff]  ;;  %v18050_v36 = vld [vmem:[#allocation242_spill] sm:$0xff] }
 0x6b3   : > { %8487 = vmatmul.mubr.bf16.gmra.mrb[228].mxu0 %v5309_v2  ;;  %9467 = vmatmul.mubr.bf16.gmra.mrb[36].mxu1 %v5309_v2  ;;  %v18049_v9 = vpack.c.bf16 %v18047_v6, %v18048_v48 }
 0x6b4   : > { %v16359_v23 = vadd.f32 %v10894_v63, %v16093_v30  ;;  %8496 = vmatprep.mubr.bf16.mxu0 %v5322_v51  ;;  %9474 = vmatprep.mubr.bf16.mxu1 %v5322_v51  ;;  %v5321_v30 = vmax.bf16 %v17232_v41, %v5129_v42  ;;  %v5334_v10 = vmax.bf16 %v17232_v41, %v5142_v53  ;;  %v18051_v53 = vld [vmem:[#allocation77_spill] sm:$0xff] }
 0x6b6   : > { %v10895_v21 = vpop.f32.mrb[188].mxu1 }
 0x6b7   : > { %v10896_v15 = vpop.f32.mrb[189].mxu1 }
 0x6b8   : > { %v10897_v29 = vadd.f32 %v10896_v15, %v10895_v21  ;;  %v10898_v28 = vpop.f32.mrb[190].mxu1  ;;  %v18052_v21 = vpack.c.bf16 %v18050_v36, %v18051_v53 }
 0x6b9   : > { %v10899_v50 = vpop.f32.mrb[191].mxu1 }
 0x6ba   : > { %v16371_v1 = vadd.f32 %v10897_v29, %v16105_v45  ;;  %v10900_v8 = vadd.f32 %v10899_v50, %v10898_v28  ;;  %v5154_v45 = vadd.bf16 %v16173_v34, %v18049_v9  ;;  %v5153_v15 = vadd.bf16 %v16191_v61, %v18052_v21  ;;  %v18053_v29 = vld [vmem:[#allocation248_spill] sm:$0xff]  ;;  %v18054_v28 = vld [vmem:[#allocation95_spill] sm:$0xff]  ;;  %v18056_v9 = vld [vmem:[#allocation246_spill] sm:$0xff] }
 0x6bb   : > { %8497 = vmatmul.mubr.bf16.gmra.mrb[232].mxu0 %v5321_v30  ;;  %9475 = vmatmul.mubr.bf16.gmra.mrb[40].mxu1 %v5321_v30  ;;  %v18055_v50 = vpack.c.bf16 %v18053_v29, %v18054_v28 }
 0x6bc   : > { %v16375_v31 = vadd.f32 %v10900_v8, %v16109_v44  ;;  %8506 = vmatprep.mubr.bf16.mxu0 %v5334_v10  ;;  %9482 = vmatprep.mubr.bf16.mxu1 %v5334_v10  ;;  %v5333_v44 = vmax.bf16 %v17232_v41, %v5141_v3  ;;  %v5346_v47 = vmax.bf16 %v17232_v41, %v5154_v45  ;;  %v18057_v45 = vld [vmem:[#allocation85_spill] sm:$0xff] }
 0x6be   : > { %v10917_v2 = vpop.f32.mrb[192].mxu1 }
 0x6bf   : > { %v10918_v63 = vpop.f32.mrb[193].mxu1 }
 0x6c0   : > { %v10919_v51 = vadd.f32 %v10918_v63, %v10917_v2  ;;  %v10920_v4 = vpop.f32.mrb[194].mxu1  ;;  %v18058_v2 = vpack.c.bf16 %v18056_v9, %v18057_v45 }
 0x6c1   : > { %v10921_v12 = vpop.f32.mrb[195].mxu1 }
 0x6c2   : > { %v16387_v14 = vadd.f32 %v10919_v51, %v16121_v35  ;;  %v10922_v42 = vadd.f32 %v10921_v12, %v10920_v4  ;;  %v5166_v35 = vadd.bf16 %v16173_v34, %v18055_v50  ;;  %v5165_v63 = vadd.bf16 %v16191_v61, %v18058_v2  ;;  %v18059_v51 = vld [vmem:[#allocation252_spill] sm:$0xff]  ;;  %v18060_v4 = vld [vmem:[#allocation103_spill] sm:$0xff]  ;;  %v18062_v50 = vld [vmem:[#allocation250_spill] sm:$0xff] }
 0x6c3   : > { %8507 = vmatmul.mubr.bf16.gmra.mrb[236].mxu0 %v5333_v44  ;;  %9483 = vmatmul.mubr.bf16.gmra.mrb[44].mxu1 %v5333_v44  ;;  %v18061_v12 = vpack.c.bf16 %v18059_v51, %v18060_v4 }
 0x6c4   : > { %v16391_v18 = vadd.f32 %v10922_v42, %v16125_v27  ;;  %8516 = vmatprep.mubr.bf16.mxu0 %v5346_v47  ;;  %9490 = vmatprep.mubr.bf16.mxu1 %v5346_v47  ;;  %v5345_v27 = vmax.bf16 %v17232_v41, %v5153_v15  ;;  %v5358_v6 = vmax.bf16 %v17232_v41, %v5166_v35  ;;  %v18063_v35 = vld [vmem:[#allocation93_spill] sm:$0xff] }
 0x6c6   : > { %v10923_v30 = vpop.f32.mrb[196].mxu1 }
 0x6c7   : > { %v10924_v8 = vpop.f32.mrb[197].mxu1 }
 0x6c8   : > { %v10925_v10 = vadd.f32 %v10924_v8, %v10923_v30  ;;  %v10926_v0 = vpop.f32.mrb[198].mxu1  ;;  %v18064_v30 = vpack.c.bf16 %v18062_v50, %v18063_v35 }
 0x6c9   : > { %v10927_v33 = vpop.f32.mrb[199].mxu1 }
 0x6ca   : > { %v16403_v7 = vadd.f32 %v10925_v10, %v16137_v39  ;;  %v10928_v3 = vadd.f32 %v10927_v33, %v10926_v0  ;;  %v5178_v39 = vadd.bf16 %v16173_v34, %v18061_v12  ;;  %v5177_v8 = vadd.bf16 %v16191_v61, %v18064_v30  ;;  %v18065_v10 = vld [vmem:[#allocation256_spill] sm:$0xff]  ;;  %v18066_v0 = vld [vmem:[#allocation111_spill] sm:$0xff]  ;;  %v18069_v12 = vld [vmem:[#allocation101_spill] sm:$0xff] }
 0x6cb   : > { %8517 = vmatmul.mubr.bf16.gmra.mrb[240].mxu0 %v5345_v27  ;;  %9491 = vmatmul.mubr.bf16.gmra.mrb[48].mxu1 %v5345_v27  ;;  %v18067_v33 = vpack.c.bf16 %v18065_v10, %v18066_v0 }
 0x6cc   : > { %v16407_v48 = vadd.f32 %v10928_v3, %v16141_v20  ;;  %8526 = vmatprep.mubr.bf16.mxu0 %v5358_v6  ;;  %9498 = vmatprep.mubr.bf16.mxu1 %v5358_v6  ;;  %v5357_v20 = vmax.bf16 %v17232_v41, %v5165_v63  ;;  %v5370_v29 = vmax.bf16 %v17232_v41, %v5178_v39 }
 0x6ce   : > { %v10929_v44 = vpop.f32.mrb[200].mxu1 }
 0x6cf   : > { %v10930_v42 = vpop.f32.mrb[201].mxu1 }
 0x6d0   : > { %v10931_v47 = vadd.f32 %v10930_v42, %v10929_v44  ;;  %v10932_v36 = vpop.f32.mrb[202].mxu1 }
 0x6d1   : > { %v10933_v53 = vpop.f32.mrb[203].mxu1 }
 0x6d2   : > { %v16419_v21 = vadd.f32 %v10931_v47, %v16155_v38  ;;  %v10934_v15 = vadd.f32 %v10933_v53, %v10932_v36  ;;  %v5190_v38 = vadd.bf16 %v16173_v34, %v18067_v33  ;;  %v18068_v34 = vld [vmem:[#allocation254_spill] sm:$0xff] }
 0x6d3   : > { %8527 = vmatmul.mubr.bf16.gmra.mrb[244].mxu0 %v5357_v20  ;;  %9499 = vmatmul.mubr.bf16.gmra.mrb[52].mxu1 %v5357_v20  ;;  %v18070_v39 = vpack.c.bf16 %v18068_v34, %v18069_v12 }
 0x6d4   : > { %v16423_v28 = vadd.f32 %v10934_v15, %v16159_v16  ;;  %8536 = vmatprep.mubr.bf16.mxu0 %v5370_v29  ;;  %9506 = vmatprep.mubr.bf16.mxu1 %v5370_v29  ;;  %v5369_v16 = vmax.bf16 %v17232_v41, %v5177_v8  ;;  %v5382_v51 = vmax.bf16 %v17232_v41, %v5190_v38 }
 0x6d5   : > { %v5189_v44 = vadd.bf16 %v16191_v61, %v18070_v39 }
 0x6d6   : > { %v10935_v27 = vpop.f32.mrb[204].mxu1 }
 0x6d7   : > { %v10936_v3 = vpop.f32.mrb[205].mxu1  ;;  %v5381_v20 = vmax.bf16 %v17232_v41, %v5189_v44 }
 0x6d8   : > { %v10937_v6 = vadd.f32 %v10936_v3, %v10935_v27  ;;  %v10938_v9 = vpop.f32.mrb[206].mxu1 }
 0x6d9   : > { %v10939_v45 = vpop.f32.mrb[207].mxu1 }
 0x6da   : > { %v16435_v2 = vadd.f32 %v10937_v6, %v16176_v13  ;;  %v10940_v63 = vadd.f32 %v10939_v45, %v10938_v9 }
 0x6db   : > { %8537 = vmatmul.mubr.bf16.gmra.mrb[248].mxu0 %v5369_v16  ;;  %9507 = vmatmul.mubr.bf16.gmra.mrb[56].mxu1 %v5369_v16 }
 0x6dc   : > { %v16439_v4 = vadd.f32 %v10940_v63, %v16180_v55  ;;  %8546 = vmatprep.mubr.bf16.mxu0 %v5382_v51  ;;  %9514 = vmatprep.mubr.bf16.mxu1 %v5382_v51 }
 0x6de   : > { %v10941_v42 = vpop.f32.mrb[208].mxu1 }
 0x6df   : > { %v10942_v47 = vpop.f32.mrb[209].mxu1 }
 0x6e0   : > { %v10943_v36 = vadd.f32 %v10942_v47, %v10941_v42  ;;  %v10944_v13 = vpop.f32.mrb[210].mxu1 }
 0x6e1   : > { %v10945_v53 = vpop.f32.mrb[211].mxu1 }
 0x6e2   : > { %v16447_v15 = vadd.f32 %v10943_v36, %v16195_v17  ;;  %v10946_v29 = vadd.f32 %v10945_v53, %v10944_v13 }
 0x6e3   : > { %8547 = vmatmul.mubr.bf16.gmra.mrb[252].mxu0 %v5381_v20  ;;  %9515 = vmatmul.mubr.bf16.gmra.mrb[60].mxu1 %v5381_v20 }
 0x6e4   : > { %v16450_v55 = vadd.f32 %v10946_v29, %v16199_v24 }
 0x6e6   : > { %v10947_v50 = vpop.f32.mrb[212].mxu1 }
 0x6e7   : > { %v10948_v35 = vpop.f32.mrb[213].mxu1 }
 0x6e8   : > { %v10949_v30 = vadd.f32 %v10948_v35, %v10947_v50  ;;  %v10950_v61 = vpop.f32.mrb[214].mxu1 }
 0x6e9   : > { %v10951_v8 = vpop.f32.mrb[215].mxu1 }
 0x6ea   : > { %v16453_v10 = vadd.f32 %v10949_v30, %v16211_v22  ;;  %v10952_v0 = vadd.f32 %v10951_v8, %v10950_v61 }
 0x6ec   : > { %v16456_v41 = vadd.f32 %v10952_v0, %v16215_v62 }
 0x6ee   : > { %v10953_v17 = vpop.f32.mrb[216].mxu1 }
 0x6ef   : > { %v10954_v33 = vpop.f32.mrb[217].mxu1 }
 0x6f0   : > { %v10955_v38 = vadd.f32 %v10954_v33, %v10953_v17  ;;  %v10956_v27 = vpop.f32.mrb[218].mxu1 }
 0x6f1   : > { %v10957_v3 = vpop.f32.mrb[219].mxu1 }
 0x6f2   : > { %v16459_v24 = vadd.f32 %v10955_v38, %v16227_v19  ;;  %v10958_v6 = vadd.f32 %v10957_v3, %v10956_v27 }
 0x6f4   : > { %v16462_v9 = vadd.f32 %v10958_v6, %v16231_v46 }
 0x6f6   : > { %v10959_v45 = vpop.f32.mrb[220].mxu1 }
 0x6f7   : > { %v10960_v16 = vpop.f32.mrb[221].mxu1 }
 0x6f8   : > { %v10961_v22 = vadd.f32 %v10960_v16, %v10959_v45  ;;  %v10962_v63 = vpop.f32.mrb[222].mxu1 }
 0x6f9   : > { %v10963_v51 = vpop.f32.mrb[223].mxu1 }
 0x6fa   : > { %v16465_v62 = vadd.f32 %v10961_v22, %v16243_v54  ;;  %v10964_v34 = vadd.f32 %v10963_v51, %v10962_v63 }
 0x6fc   : > { %v16468_v12 = vadd.f32 %v10964_v34, %v16247_v52 }
 0x6fe   : > { %v10965_v39 = vpop.f32.mrb[224].mxu1 }
 0x6ff   : > { %v10966_v44 = vpop.f32.mrb[225].mxu1 }
 0x700   : > { %v10967_v19 = vadd.f32 %v10966_v44, %v10965_v39  ;;  %v10968_v42 = vpop.f32.mrb[226].mxu1 }
 0x701   : > { %v10969_v47 = vpop.f32.mrb[227].mxu1 }
 0x702   : > { %v16471_v46 = vadd.f32 %v10967_v19, %v16259_v56  ;;  %v10970_v36 = vadd.f32 %v10969_v47, %v10968_v42 }
 0x704   : > { %v16474_v13 = vadd.f32 %v10970_v36, %v16263_v5 }
 0x706   : > { %v10971_v53 = vpop.f32.mrb[228].mxu1 }
 0x707   : > { %v10972_v20 = vpop.f32.mrb[229].mxu1 }
 0x708   : > { %v10973_v54 = vadd.f32 %v10972_v20, %v10971_v53  ;;  %v10974_v29 = vpop.f32.mrb[230].mxu1 }
 0x709   : > { %v10975_v50 = vpop.f32.mrb[231].mxu1 }
 0x70a   : > { %v16477_v52 = vadd.f32 %v10973_v54, %v16275_v26  ;;  %v10976_v35 = vadd.f32 %v10975_v50, %v10974_v29 }
 0x70c   : > { %v16480_v30 = vadd.f32 %v10976_v35, %v16279_v60 }
 0x70e   : > { %v10977_v61 = vpop.f32.mrb[232].mxu1 }
 0x70f   : > { %v10978_v8 = vpop.f32.mrb[233].mxu1 }
 0x710   : > { %v10979_v56 = vadd.f32 %v10978_v8, %v10977_v61  ;;  %v10980_v0 = vpop.f32.mrb[234].mxu1 }
 0x711   : > { %v10981_v17 = vpop.f32.mrb[235].mxu1 }
 0x712   : > { %v16483_v5 = vadd.f32 %v10979_v56, %v16291_v58  ;;  %v10982_v33 = vadd.f32 %v10981_v17, %v10980_v0 }
 0x714   : > { %v16486_v38 = vadd.f32 %v10982_v33, %v16295_v40  ;;  %v18071_v33 = vld [vmem:[#allocation234_spill] sm:$0xff] }
 0x716   : > { %v10983_v27 = vpop.f32.mrb[236].mxu1 }
 0x717   : > { %v10984_v3 = vpop.f32.mrb[237].mxu1 }
 0x718   : > { %v10985_v26 = vadd.f32 %v10984_v3, %v10983_v27  ;;  %v10986_v6 = vpop.f32.mrb[238].mxu1  ;;  %v353_v27 = vsub.s32 1, %v18071_v33 }
 0x719   : > { %v10987_v45 = vpop.f32.mrb[239].mxu1 }
 0x71a   : > { %v16489_v60 = vadd.f32 %v10985_v26, %v16307_v32  ;;  %v10988_v16 = vadd.f32 %v10987_v45, %v10986_v6 }
 0x71c   : > { %v16492_v22 = vadd.f32 %v10988_v16, %v16311_v43 }
 0x71e   : > { %v10989_v63 = vpop.f32.mrb[240].mxu1 }
 0x71f   : > { %v10990_v51 = vpop.f32.mrb[241].mxu1 }
 0x720   : > { %v10991_v58 = vadd.f32 %v10990_v51, %v10989_v63  ;;  %v10992_v34 = vpop.f32.mrb[242].mxu1 }
 0x721   : > { %v10993_v39 = vpop.f32.mrb[243].mxu1 }
 0x722   : > { %v16495_v40 = vadd.f32 %v10991_v58, %v16323_v37  ;;  %v10994_v44 = vadd.f32 %v10993_v39, %v10992_v34 }
 0x724   : > { %v16498_v19 = vadd.f32 %v10994_v44, %v16327_v57 }
 0x726   : > { %v10995_v42 = vpop.f32.mrb[244].mxu1 }
 0x727   : > { %v10996_v47 = vpop.f32.mrb[245].mxu1 }
 0x728   : > { %v10997_v32 = vadd.f32 %v10996_v47, %v10995_v42  ;;  %v10998_v36 = vpop.f32.mrb[246].mxu1 }
 0x729   : > { %v10999_v53 = vpop.f32.mrb[247].mxu1 }
 0x72a   : > { %v16501_v43 = vadd.f32 %v10997_v32, %v16339_v49  ;;  %v11000_v20 = vadd.f32 %v10999_v53, %v10998_v36  ;;  %v345_v49 = vld [vmem:[#allocation10] sm:$0x7] }
 0x72b   : > { %v16519_v16 = vrot.slane %v345_v49, %v353_v27 }
 0x72c   : > { %v16504_v54 = vadd.f32 %v11000_v20, %v16343_v59 }
 0x72e   : > { %v11001_v29 = vpop.f32.mrb[248].mxu1 }
 0x72f   : > { %v11002_v50 = vpop.f32.mrb[249].mxu1 }
 0x730   : > { %v11003_v37 = vadd.f32 %v11002_v50, %v11001_v29  ;;  %v11004_v35 = vpop.f32.mrb[250].mxu1 }
 0x731   : > { %v11005_v61 = vpop.f32.mrb[251].mxu1 }
 0x732   : > { %v16507_v57 = vadd.f32 %v11003_v37, %v16355_v11  ;;  %v11006_v8 = vadd.f32 %v11005_v61, %v11004_v35  ;;  %v16517_v11 = vrot.slane %v345_v49, %v14642_v25 }
 0x734   : > { %v16510_v56 = vadd.f32 %v11006_v8, %v16359_v23  ;;  %v357_v23 = vsub.s32 2, %v18071_v33 }
 0x736   : > { %v11007_v0 = vpop.f32.mrb[252].mxu1 }
 0x737   : > { %v11008_v17 = vpop.f32.mrb[253].mxu1 }
 0x738   : > { %v11009_v3 = vadd.f32 %v11008_v17, %v11007_v0  ;;  %v11010_v59 = vpop.f32.mrb[254].mxu1 }
 0x739   : > { %v11011_v26 = vpop.f32.mrb[255].mxu1 }
 0x73a   : > { %v16514_v6 = vadd.f32 %v11009_v3, %v16371_v1  ;;  %v11012_v45 = vadd.f32 %v11011_v26, %v11010_v59  ;;  %v16526_v1 = vrot.slane %v345_v49, %v357_v23 }
 0x73c   : > { %v16523_v63 = vadd.f32 %v11012_v45, %v16375_v31 }
 0x73e   : > { %v8398_v51 = vpop.f32.mrb[192].mxu0  ;;  %v11029_v58 = vpop.f32.mrb[0].mxu1 }
 0x73f   : > { %v9523_v34 = vadd.f32 %v8398_v51, %v16517_v11  ;;  %v8400_v39 = vpop.f32.mrb[193].mxu0  ;;  %v11030_v44 = vpop.f32.mrb[1].mxu1 }
 0x740   : > { %v9524_v42 = vadd.f32 %v8400_v39, %v16519_v16  ;;  %v11031_v47 = vadd.f32 %v11030_v44, %v11029_v58  ;;  %v8402_v25 = vpop.f32.mrb[194].mxu0  ;;  %v11032_v32 = vpop.f32.mrb[2].mxu1 }
 0x741   : > { %9619 = vst [vmem:[%s16531_s26] sm:$0xff] %v9523_v34  ;;  %v9526_v31 = vadd.f32 %v8402_v25, %v16517_v11  ;;  %v8404_v36 = vpop.f32.mrb[195].mxu0  ;;  %v11033_v53 = vpop.f32.mrb[3].mxu1 }
 0x742   : > { %9620 = vst [vmem:[%s16531_s26 + $0x8] sm:$0xff] %v9524_v42  ;;  %v9397_v20 = vadd.f32 %v11031_v47, %v16387_v14  ;;  %v9527_v29 = vadd.f32 %v8404_v36, %v16519_v16  ;;  %v11034_v50 = vadd.f32 %v11033_v53, %v11032_v32 }
 0x743   : > { %9622 = vst [vmem:[%s16531_s26 + $0x18] sm:$0xff] %v9526_v31 }
 0x744   : > { %v9525_v37 = vadd.f32 %v9397_v20, %v16526_v1  ;;  %9623 = vst [vmem:[%s16531_s26 + $0x20] sm:$0xff] %v9527_v29  ;;  %v9400_v35 = vadd.f32 %v11034_v50, %v16391_v18 }
 0x746   : > { %9621 = vst [vmem:[%s16531_s26 + $0x10] sm:$0xff] %v9525_v37  ;;  %v9528_v61 = vadd.f32 %v9400_v35, %v16526_v1  ;;  %v8408_v8 = vpop.f32.mrb[196].mxu0  ;;  %v11035_v0 = vpop.f32.mrb[4].mxu1 }
 0x747   : > { %v9529_v17 = vadd.f32 %v8408_v8, %v16517_v11  ;;  %v8410_v14 = vpop.f32.mrb[197].mxu0  ;;  %v11036_v49 = vpop.f32.mrb[5].mxu1 }
 0x748   : > { %9624 = vst [vmem:[%s16531_s26 + $0x28] sm:$0xff] %v9528_v61  ;;  %v9530_v33 = vadd.f32 %v8410_v14, %v16519_v16  ;;  %v11037_v27 = vadd.f32 %v11036_v49, %v11035_v0  ;;  %v8412_v3 = vpop.f32.mrb[198].mxu0  ;;  %v11038_v59 = vpop.f32.mrb[6].mxu1 }
 0x749   : > { %9625 = vst [vmem:[%s16531_s26 + $0x30] sm:$0xff] %v9529_v17  ;;  %v9532_v18 = vadd.f32 %v8412_v3, %v16517_v11  ;;  %v8414_v26 = vpop.f32.mrb[199].mxu0  ;;  %v11039_v45 = vpop.f32.mrb[7].mxu1 }
 0x74a   : > { %9626 = vst [vmem:[%s16531_s26 + $0x38] sm:$0xff] %v9530_v33  ;;  %v9405_v23 = vadd.f32 %v11037_v27, %v16403_v7  ;;  %v9533_v51 = vadd.f32 %v8414_v26, %v16519_v16  ;;  %v11040_v58 = vadd.f32 %v11039_v45, %v11038_v59 }
 0x74b   : > { %9628 = vst [vmem:[%s16531_s26 + $0x48] sm:$0xff] %v9532_v18 }
 0x74c   : > { %v9531_v34 = vadd.f32 %v9405_v23, %v16526_v1  ;;  %9629 = vst [vmem:[%s16531_s26 + $0x50] sm:$0xff] %v9533_v51  ;;  %v9408_v39 = vadd.f32 %v11040_v58, %v16407_v48 }
 0x74e   : > { %9627 = vst [vmem:[%s16531_s26 + $0x40] sm:$0xff] %v9531_v34  ;;  %v9534_v44 = vadd.f32 %v9408_v39, %v16526_v1  ;;  %v8418_v42 = vpop.f32.mrb[200].mxu0  ;;  %v11041_v47 = vpop.f32.mrb[8].mxu1 }
 0x74f   : > { %v9535_v25 = vadd.f32 %v8418_v42, %v16517_v11  ;;  %v8420_v7 = vpop.f32.mrb[201].mxu0  ;;  %v11042_v32 = vpop.f32.mrb[9].mxu1 }
 0x750   : > { %9630 = vst [vmem:[%s16531_s26 + $0x58] sm:$0xff] %v9534_v44  ;;  %v9536_v31 = vadd.f32 %v8420_v7, %v16519_v16  ;;  %v11043_v36 = vadd.f32 %v11042_v32, %v11041_v47  ;;  %v8422_v53 = vpop.f32.mrb[202].mxu0  ;;  %v11044_v20 = vpop.f32.mrb[10].mxu1 }
 0x751   : > { %9631 = vst [vmem:[%s16531_s26 + $0x60] sm:$0xff] %v9535_v25  ;;  %v9538_v48 = vadd.f32 %v8422_v53, %v16517_v11  ;;  %v8424_v29 = vpop.f32.mrb[203].mxu0  ;;  %v11045_v50 = vpop.f32.mrb[11].mxu1 }
 0x752   : > { %9632 = vst [vmem:[%s16531_s26 + $0x68] sm:$0xff] %v9536_v31  ;;  %v9413_v37 = vadd.f32 %v11043_v36, %v16419_v21  ;;  %v9539_v35 = vadd.f32 %v8424_v29, %v16519_v16  ;;  %v11046_v61 = vadd.f32 %v11045_v50, %v11044_v20 }
 0x753   : > { %9634 = vst [vmem:[%s16531_s26 + $0x78] sm:$0xff] %v9538_v48 }
 0x754   : > { %v9537_v8 = vadd.f32 %v9413_v37, %v16526_v1  ;;  %9635 = vst [vmem:[%s16531_s26 + $0x80] sm:$0xff] %v9539_v35  ;;  %v9416_v0 = vadd.f32 %v11046_v61, %v16423_v28 }
 0x756   : > { %9633 = vst [vmem:[%s16531_s26 + $0x70] sm:$0xff] %v9537_v8  ;;  %v9540_v17 = vadd.f32 %v9416_v0, %v16526_v1  ;;  %v8428_v14 = vpop.f32.mrb[204].mxu0  ;;  %v11047_v49 = vpop.f32.mrb[12].mxu1 }
 0x757   : > { %v9541_v33 = vadd.f32 %v8428_v14, %v16517_v11  ;;  %v8430_v21 = vpop.f32.mrb[205].mxu0  ;;  %v11048_v27 = vpop.f32.mrb[13].mxu1 }
 0x758   : > { %9636 = vst [vmem:[%s16531_s26 + $0x88] sm:$0xff] %v9540_v17  ;;  %v9542_v3 = vadd.f32 %v8430_v21, %v16519_v16  ;;  %v11049_v59 = vadd.f32 %v11048_v27, %v11047_v49  ;;  %v8432_v18 = vpop.f32.mrb[206].mxu0  ;;  %v11050_v26 = vpop.f32.mrb[14].mxu1 }
 0x759   : > { %9637 = vst [vmem:[%s16531_s26 + $0x90] sm:$0xff] %v9541_v33  ;;  %v9544_v28 = vadd.f32 %v8432_v18, %v16517_v11  ;;  %v8434_v45 = vpop.f32.mrb[207].mxu0  ;;  %v11051_v23 = vpop.f32.mrb[15].mxu1 }
 0x75a   : > { %9638 = vst [vmem:[%s16531_s26 + $0x98] sm:$0xff] %v9542_v3  ;;  %v9421_v51 = vadd.f32 %v11049_v59, %v16435_v2  ;;  %v9545_v58 = vadd.f32 %v8434_v45, %v16519_v16  ;;  %v11052_v34 = vadd.f32 %v11051_v23, %v11050_v26 }
 0x75b   : > { %9640 = vst [vmem:[%s16531_s26 + $0xa8] sm:$0xff] %v9544_v28 }
 0x75c   : > { %v9543_v39 = vadd.f32 %v9421_v51, %v16526_v1  ;;  %9641 = vst [vmem:[%s16531_s26 + $0xb0] sm:$0xff] %v9545_v58  ;;  %v9424_v44 = vadd.f32 %v11052_v34, %v16439_v4 }
 0x75e   : > { %9639 = vst [vmem:[%s16531_s26 + $0xa0] sm:$0xff] %v9543_v39  ;;  %v9546_v42 = vadd.f32 %v9424_v44, %v16526_v1  ;;  %v8438_v47 = vpop.f32.mrb[208].mxu0  ;;  %v11053_v25 = vpop.f32.mrb[16].mxu1 }
 0x75f   : > { %v9547_v7 = vadd.f32 %v8438_v47, %v16517_v11  ;;  %v8440_v2 = vpop.f32.mrb[209].mxu0  ;;  %v11054_v32 = vpop.f32.mrb[17].mxu1 }
 0x760   : > { %9642 = vst [vmem:[%s16531_s26 + $0xb8] sm:$0xff] %v9546_v42  ;;  %v9548_v31 = vadd.f32 %v8440_v2, %v16519_v16  ;;  %v11055_v36 = vadd.f32 %v11054_v32, %v11053_v25  ;;  %v8442_v53 = vpop.f32.mrb[210].mxu0  ;;  %v11056_v20 = vpop.f32.mrb[18].mxu1 }
 0x761   : > { %9643 = vst [vmem:[%s16531_s26 + $0xc0] sm:$0xff] %v9547_v7  ;;  %v9550_v4 = vadd.f32 %v8442_v53, %v16517_v11  ;;  %v8444_v48 = vpop.f32.mrb[211].mxu0  ;;  %v11057_v29 = vpop.f32.mrb[19].mxu1 }
 0x762   : > { %9644 = vst [vmem:[%s16531_s26 + $0xc8] sm:$0xff] %v9548_v31  ;;  %v9429_v50 = vadd.f32 %v11055_v36, %v16447_v15  ;;  %v9551_v37 = vadd.f32 %v8444_v48, %v16519_v16  ;;  %v11058_v35 = vadd.f32 %v11057_v29, %v11056_v20 }
 0x763   : > { %9646 = vst [vmem:[%s16531_s26 + $0xd8] sm:$0xff] %v9550_v4 }
 0x764   : > { %v9549_v61 = vadd.f32 %v9429_v50, %v16526_v1  ;;  %9647 = vst [vmem:[%s16531_s26 + $0xe0] sm:$0xff] %v9551_v37  ;;  %v9432_v8 = vadd.f32 %v11058_v35, %v16450_v55 }
 0x766   : > { %9645 = vst [vmem:[%s16531_s26 + $0xd0] sm:$0xff] %v9549_v61  ;;  %v9552_v0 = vadd.f32 %v9432_v8, %v16526_v1  ;;  %v8448_v17 = vpop.f32.mrb[212].mxu0  ;;  %v11059_v14 = vpop.f32.mrb[20].mxu1 }
 0x767   : > { %v9553_v49 = vadd.f32 %v8448_v17, %v16517_v11  ;;  %v8450_v15 = vpop.f32.mrb[213].mxu0  ;;  %v11060_v33 = vpop.f32.mrb[21].mxu1 }
 0x768   : > { %9648 = vst [vmem:[%s16531_s26 + $0xe8] sm:$0xff] %v9552_v0  ;;  %v9554_v21 = vadd.f32 %v8450_v15, %v16519_v16  ;;  %v11061_v27 = vadd.f32 %v11060_v33, %v11059_v14  ;;  %v8452_v3 = vpop.f32.mrb[214].mxu0  ;;  %v11062_v59 = vpop.f32.mrb[22].mxu1 }
 0x769   : > { %9649 = vst [vmem:[%s16531_s26 + $0xf0] sm:$0xff] %v9553_v49  ;;  %v9556_v55 = vadd.f32 %v8452_v3, %v16517_v11  ;;  %v8454_v18 = vpop.f32.mrb[215].mxu0  ;;  %v11063_v26 = vpop.f32.mrb[23].mxu1 }
 0x76a   : > { %9650 = vst [vmem:[%s16531_s26 + $0xf8] sm:$0xff] %v9554_v21  ;;  %v9437_v28 = vadd.f32 %v11061_v27, %v16453_v10  ;;  %v9557_v45 = vadd.f32 %v8454_v18, %v16519_v16  ;;  %v11064_v23 = vadd.f32 %v11063_v26, %v11062_v59 }
 0x76b   : > { %9652 = vst [vmem:[%s16531_s26 + $0x108] sm:$0xff] %v9556_v55 }
 0x76c   : > { %v9555_v51 = vadd.f32 %v9437_v28, %v16526_v1  ;;  %9653 = vst [vmem:[%s16531_s26 + $0x110] sm:$0xff] %v9557_v45  ;;  %v9440_v58 = vadd.f32 %v11064_v23, %v16456_v41 }
 0x76e   : > { %9651 = vst [vmem:[%s16531_s26 + $0x100] sm:$0xff] %v9555_v51  ;;  %v9558_v34 = vadd.f32 %v9440_v58, %v16526_v1  ;;  %v8458_v39 = vpop.f32.mrb[216].mxu0  ;;  %v11065_v44 = vpop.f32.mrb[24].mxu1 }
 0x76f   : > { %v9559_v42 = vadd.f32 %v8458_v39, %v16517_v11  ;;  %v8460_v10 = vpop.f32.mrb[217].mxu0  ;;  %v11066_v47 = vpop.f32.mrb[25].mxu1 }
 0x770   : > { %9654 = vst [vmem:[%s16531_s26 + $0x118] sm:$0xff] %v9558_v34  ;;  %v9560_v25 = vadd.f32 %v8460_v10, %v16519_v16  ;;  %v11067_v7 = vadd.f32 %v11066_v47, %v11065_v44  ;;  %v8462_v2 = vpop.f32.mrb[218].mxu0  ;;  %v11068_v32 = vpop.f32.mrb[26].mxu1 }
 0x771   : > { %9655 = vst [vmem:[%s16531_s26 + $0x120] sm:$0xff] %v9559_v42  ;;  %v9562_v41 = vadd.f32 %v8462_v2, %v16517_v11  ;;  %v8464_v31 = vpop.f32.mrb[219].mxu0  ;;  %v11069_v36 = vpop.f32.mrb[27].mxu1 }
 0x772   : > { %9656 = vst [vmem:[%s16531_s26 + $0x128] sm:$0xff] %v9560_v25  ;;  %v9445_v53 = vadd.f32 %v11067_v7, %v16459_v24  ;;  %v9563_v20 = vadd.f32 %v8464_v31, %v16519_v16  ;;  %v11070_v4 = vadd.f32 %v11069_v36, %v11068_v32 }
 0x773   : > { %9658 = vst [vmem:[%s16531_s26 + $0x138] sm:$0xff] %v9562_v41 }
 0x774   : > { %v9561_v48 = vadd.f32 %v9445_v53, %v16526_v1  ;;  %9659 = vst [vmem:[%s16531_s26 + $0x140] sm:$0xff] %v9563_v20  ;;  %v9448_v29 = vadd.f32 %v11070_v4, %v16462_v9 }
 0x776   : > { %9657 = vst [vmem:[%s16531_s26 + $0x130] sm:$0xff] %v9561_v48  ;;  %v9564_v50 = vadd.f32 %v9448_v29, %v16526_v1  ;;  %v8468_v37 = vpop.f32.mrb[220].mxu0  ;;  %v11071_v35 = vpop.f32.mrb[28].mxu1 }
 0x777   : > { %v9565_v61 = vadd.f32 %v8468_v37, %v16517_v11  ;;  %v8470_v24 = vpop.f32.mrb[221].mxu0  ;;  %v11072_v8 = vpop.f32.mrb[29].mxu1 }
 0x778   : > { %9660 = vst [vmem:[%s16531_s26 + $0x148] sm:$0xff] %v9564_v50  ;;  %v9566_v0 = vadd.f32 %v8470_v24, %v16519_v16  ;;  %v11073_v17 = vadd.f32 %v11072_v8, %v11071_v35  ;;  %v8472_v14 = vpop.f32.mrb[222].mxu0  ;;  %v11074_v49 = vpop.f32.mrb[30].mxu1 }
 0x779   : > { %9661 = vst [vmem:[%s16531_s26 + $0x150] sm:$0xff] %v9565_v61  ;;  %v9568_v9 = vadd.f32 %v8472_v14, %v16517_v11  ;;  %v8474_v15 = vpop.f32.mrb[223].mxu0  ;;  %v11075_v33 = vpop.f32.mrb[31].mxu1 }
 0x77a   : > { %9662 = vst [vmem:[%s16531_s26 + $0x158] sm:$0xff] %v9566_v0  ;;  %v9453_v21 = vadd.f32 %v11073_v17, %v16465_v62  ;;  %v9569_v27 = vadd.f32 %v8474_v15, %v16519_v16  ;;  %v11076_v3 = vadd.f32 %v11075_v33, %v11074_v49 }
 0x77b   : > { %9664 = vst [vmem:[%s16531_s26 + $0x168] sm:$0xff] %v9568_v9 }
 0x77c   : > { %v9567_v59 = vadd.f32 %v9453_v21, %v16526_v1  ;;  %9665 = vst [vmem:[%s16531_s26 + $0x170] sm:$0xff] %v9569_v27  ;;  %v9456_v55 = vadd.f32 %v11076_v3, %v16468_v12 }
 0x77e   : > { %9663 = vst [vmem:[%s16531_s26 + $0x160] sm:$0xff] %v9567_v59  ;;  %v9570_v18 = vadd.f32 %v9456_v55, %v16526_v1  ;;  %v8478_v26 = vpop.f32.mrb[224].mxu0  ;;  %v11077_v28 = vpop.f32.mrb[32].mxu1 }
 0x77f   : > { %v9571_v45 = vadd.f32 %v8478_v26, %v16517_v11  ;;  %v8480_v62 = vpop.f32.mrb[225].mxu0  ;;  %v11078_v23 = vpop.f32.mrb[33].mxu1 }
 0x780   : > { %9666 = vst [vmem:[%s16531_s26 + $0x178] sm:$0xff] %v9570_v18  ;;  %v9572_v51 = vadd.f32 %v8480_v62, %v16519_v16  ;;  %v11079_v58 = vadd.f32 %v11078_v23, %v11077_v28  ;;  %v8482_v34 = vpop.f32.mrb[226].mxu0  ;;  %v11080_v39 = vpop.f32.mrb[34].mxu1 }
 0x781   : > { %9667 = vst [vmem:[%s16531_s26 + $0x180] sm:$0xff] %v9571_v45  ;;  %v9574_v12 = vadd.f32 %v8482_v34, %v16517_v11  ;;  %v8484_v44 = vpop.f32.mrb[227].mxu0  ;;  %v11081_v42 = vpop.f32.mrb[35].mxu1 }
 0x782   : > { %9668 = vst [vmem:[%s16531_s26 + $0x188] sm:$0xff] %v9572_v51  ;;  %v9461_v10 = vadd.f32 %v11079_v58, %v16471_v46  ;;  %v9575_v47 = vadd.f32 %v8484_v44, %v16519_v16  ;;  %v11082_v25 = vadd.f32 %v11081_v42, %v11080_v39 }
 0x783   : > { %9670 = vst [vmem:[%s16531_s26 + $0x198] sm:$0xff] %v9574_v12 }
 0x784   : > { %v9573_v7 = vadd.f32 %v9461_v10, %v16526_v1  ;;  %9671 = vst [vmem:[%s16531_s26 + $0x1a0] sm:$0xff] %v9575_v47  ;;  %v9464_v2 = vadd.f32 %v11082_v25, %v16474_v13 }
 0x786   : > { %9669 = vst [vmem:[%s16531_s26 + $0x190] sm:$0xff] %v9573_v7  ;;  %v9576_v32 = vadd.f32 %v9464_v2, %v16526_v1  ;;  %v8488_v41 = vpop.f32.mrb[228].mxu0  ;;  %v11083_v31 = vpop.f32.mrb[36].mxu1 }
 0x787   : > { %v9577_v36 = vadd.f32 %v8488_v41, %v16517_v11  ;;  %v8490_v46 = vpop.f32.mrb[229].mxu0  ;;  %v11084_v53 = vpop.f32.mrb[37].mxu1 }
 0x788   : > { %9672 = vst [vmem:[%s16531_s26 + $0x1a8] sm:$0xff] %v9576_v32  ;;  %v9578_v20 = vadd.f32 %v8490_v46, %v16519_v16  ;;  %v11085_v4 = vadd.f32 %v11084_v53, %v11083_v31  ;;  %v8492_v48 = vpop.f32.mrb[230].mxu0  ;;  %v11086_v29 = vpop.f32.mrb[38].mxu1 }
 0x789   : > { %9673 = vst [vmem:[%s16531_s26 + $0x1b0] sm:$0xff] %v9577_v36  ;;  %v9580_v13 = vadd.f32 %v8492_v48, %v16517_v11  ;;  %v8494_v50 = vpop.f32.mrb[231].mxu0  ;;  %v11087_v37 = vpop.f32.mrb[39].mxu1 }
 0x78a   : > { %9674 = vst [vmem:[%s16531_s26 + $0x1b8] sm:$0xff] %v9578_v20  ;;  %v9469_v35 = vadd.f32 %v11085_v4, %v16477_v52  ;;  %v9581_v61 = vadd.f32 %v8494_v50, %v16519_v16  ;;  %v11088_v24 = vadd.f32 %v11087_v37, %v11086_v29 }
 0x78b   : > { %9676 = vst [vmem:[%s16531_s26 + $0x1c8] sm:$0xff] %v9580_v13 }
 0x78c   : > { %v9579_v8 = vadd.f32 %v9469_v35, %v16526_v1  ;;  %9677 = vst [vmem:[%s16531_s26 + $0x1d0] sm:$0xff] %v9581_v61  ;;  %v9472_v0 = vadd.f32 %v11088_v24, %v16480_v30 }
 0x78e   : > { %9675 = vst [vmem:[%s16531_s26 + $0x1c0] sm:$0xff] %v9579_v8  ;;  %v9582_v17 = vadd.f32 %v9472_v0, %v16526_v1  ;;  %v8498_v14 = vpop.f32.mrb[232].mxu0  ;;  %v11089_v49 = vpop.f32.mrb[40].mxu1 }
 0x78f   : > { %v9583_v9 = vadd.f32 %v8498_v14, %v16517_v11  ;;  %v8500_v52 = vpop.f32.mrb[233].mxu0  ;;  %v11090_v15 = vpop.f32.mrb[41].mxu1 }
 0x790   : > { %9678 = vst [vmem:[%s16531_s26 + $0x1d8] sm:$0xff] %v9582_v17  ;;  %v9584_v33 = vadd.f32 %v8500_v52, %v16519_v16  ;;  %v11091_v21 = vadd.f32 %v11090_v15, %v11089_v49  ;;  %v8502_v27 = vpop.f32.mrb[234].mxu0  ;;  %v11092_v3 = vpop.f32.mrb[42].mxu1 }
 0x791   : > { %9679 = vst [vmem:[%s16531_s26 + $0x1e0] sm:$0xff] %v9583_v9  ;;  %v9586_v30 = vadd.f32 %v8502_v27, %v16517_v11  ;;  %v8504_v59 = vpop.f32.mrb[235].mxu0  ;;  %v11093_v55 = vpop.f32.mrb[43].mxu1 }
 0x792   : > { %9680 = vst [vmem:[%s16531_s26 + $0x1e8] sm:$0xff] %v9584_v33  ;;  %v9477_v18 = vadd.f32 %v11091_v21, %v16483_v5  ;;  %v9587_v26 = vadd.f32 %v8504_v59, %v16519_v16  ;;  %v11094_v28 = vadd.f32 %v11093_v55, %v11092_v3 }
 0x793   : > { %9682 = vst [vmem:[%s16531_s26 + $0x1f8] sm:$0xff] %v9586_v30 }
 0x794   : > { %v9585_v45 = vadd.f32 %v9477_v18, %v16526_v1  ;;  %9683 = vst [vmem:[%s16531_s26 + $0x200] sm:$0xff] %v9587_v26  ;;  %v9480_v62 = vadd.f32 %v11094_v28, %v16486_v38 }
 0x796   : > { %9681 = vst [vmem:[%s16531_s26 + $0x1f0] sm:$0xff] %v9585_v45  ;;  %v9588_v23 = vadd.f32 %v9480_v62, %v16526_v1  ;;  %v8508_v51 = vpop.f32.mrb[236].mxu0  ;;  %v11095_v58 = vpop.f32.mrb[44].mxu1 }
 0x797   : > { %v9589_v34 = vadd.f32 %v8508_v51, %v16517_v11  ;;  %v8510_v5 = vpop.f32.mrb[237].mxu0  ;;  %v11096_v39 = vpop.f32.mrb[45].mxu1 }
 0x798   : > { %9684 = vst [vmem:[%s16531_s26 + $0x208] sm:$0xff] %v9588_v23  ;;  %v9590_v12 = vadd.f32 %v8510_v5, %v16519_v16  ;;  %v11097_v44 = vadd.f32 %v11096_v39, %v11095_v58  ;;  %v8512_v42 = vpop.f32.mrb[238].mxu0  ;;  %v11098_v10 = vpop.f32.mrb[46].mxu1 }
 0x799   : > { %9685 = vst [vmem:[%s16531_s26 + $0x210] sm:$0xff] %v9589_v34  ;;  %v9592_v38 = vadd.f32 %v8512_v42, %v16517_v11  ;;  %v8514_v47 = vpop.f32.mrb[239].mxu0  ;;  %v11099_v25 = vpop.f32.mrb[47].mxu1 }
 0x79a   : > { %9686 = vst [vmem:[%s16531_s26 + $0x218] sm:$0xff] %v9590_v12  ;;  %v9485_v7 = vadd.f32 %v11097_v44, %v16489_v60  ;;  %v9593_v2 = vadd.f32 %v8514_v47, %v16519_v16  ;;  %v11100_v32 = vadd.f32 %v11099_v25, %v11098_v10 }
 0x79b   : > { %9688 = vst [vmem:[%s16531_s26 + $0x228] sm:$0xff] %v9592_v38 }
 0x79c   : > { %v9591_v41 = vadd.f32 %v9485_v7, %v16526_v1  ;;  %9689 = vst [vmem:[%s16531_s26 + $0x230] sm:$0xff] %v9593_v2  ;;  %v9488_v31 = vadd.f32 %v11100_v32, %v16492_v22 }
 0x79e   : > { %9687 = vst [vmem:[%s16531_s26 + $0x220] sm:$0xff] %v9591_v41  ;;  %v9594_v36 = vadd.f32 %v9488_v31, %v16526_v1  ;;  %v8518_v46 = vpop.f32.mrb[240].mxu0  ;;  %v11101_v53 = vpop.f32.mrb[48].mxu1 }
 0x79f   : > { %v9595_v20 = vadd.f32 %v8518_v46, %v16517_v11  ;;  %v8520_v60 = vpop.f32.mrb[241].mxu0  ;;  %v11102_v4 = vpop.f32.mrb[49].mxu1 }
 0x7a0   : > { %9690 = vst [vmem:[%s16531_s26 + $0x238] sm:$0xff] %v9594_v36  ;;  %v9596_v48 = vadd.f32 %v8520_v60, %v16519_v16  ;;  %v11103_v29 = vadd.f32 %v11102_v4, %v11101_v53  ;;  %v8522_v13 = vpop.f32.mrb[242].mxu0  ;;  %v11104_v50 = vpop.f32.mrb[50].mxu1 }
 0x7a1   : > { %9691 = vst [vmem:[%s16531_s26 + $0x240] sm:$0xff] %v9595_v20  ;;  %v9598_v22 = vadd.f32 %v8522_v13, %v16517_v11  ;;  %v8524_v37 = vpop.f32.mrb[243].mxu0  ;;  %v11105_v35 = vpop.f32.mrb[51].mxu1 }
 0x7a2   : > { %9692 = vst [vmem:[%s16531_s26 + $0x248] sm:$0xff] %v9596_v48  ;;  %v9493_v61 = vadd.f32 %v11103_v29, %v16495_v40  ;;  %v9599_v24 = vadd.f32 %v8524_v37, %v16519_v16  ;;  %v11106_v8 = vadd.f32 %v11105_v35, %v11104_v50 }
 0x7a3   : > { %9694 = vst [vmem:[%s16531_s26 + $0x258] sm:$0xff] %v9598_v22 }
 0x7a4   : > { %v9597_v0 = vadd.f32 %v9493_v61, %v16526_v1  ;;  %9695 = vst [vmem:[%s16531_s26 + $0x260] sm:$0xff] %v9599_v24  ;;  %v9496_v17 = vadd.f32 %v11106_v8, %v16498_v19 }
 0x7a6   : > { %9693 = vst [vmem:[%s16531_s26 + $0x250] sm:$0xff] %v9597_v0  ;;  %v9600_v14 = vadd.f32 %v9496_v17, %v16526_v1  ;;  %v8528_v49 = vpop.f32.mrb[244].mxu0  ;;  %v11107_v9 = vpop.f32.mrb[52].mxu1 }
 0x7a7   : > { %v9601_v52 = vadd.f32 %v8528_v49, %v16517_v11  ;;  %v8530_v40 = vpop.f32.mrb[245].mxu0  ;;  %v11108_v15 = vpop.f32.mrb[53].mxu1 }
 0x7a8   : > { %9696 = vst [vmem:[%s16531_s26 + $0x268] sm:$0xff] %v9600_v14  ;;  %v9602_v33 = vadd.f32 %v8530_v40, %v16519_v16  ;;  %v11109_v21 = vadd.f32 %v11108_v15, %v11107_v9  ;;  %v8532_v27 = vpop.f32.mrb[246].mxu0  ;;  %v11110_v3 = vpop.f32.mrb[54].mxu1 }
 0x7a9   : > { %9697 = vst [vmem:[%s16531_s26 + $0x270] sm:$0xff] %v9601_v52  ;;  %v9604_v19 = vadd.f32 %v8532_v27, %v16517_v11  ;;  %v8534_v30 = vpop.f32.mrb[247].mxu0  ;;  %v11111_v59 = vpop.f32.mrb[55].mxu1 }
 0x7aa   : > { %9698 = vst [vmem:[%s16531_s26 + $0x278] sm:$0xff] %v9602_v33  ;;  %v9501_v55 = vadd.f32 %v11109_v21, %v16501_v43  ;;  %v9605_v18 = vadd.f32 %v8534_v30, %v16519_v16  ;;  %v11112_v26 = vadd.f32 %v11111_v59, %v11110_v3 }
 0x7ab   : > { %9700 = vst [vmem:[%s16531_s26 + $0x288] sm:$0xff] %v9604_v19 }
 0x7ac   : > { %v9603_v28 = vadd.f32 %v9501_v55, %v16526_v1  ;;  %9701 = vst [vmem:[%s16531_s26 + $0x290] sm:$0xff] %v9605_v18  ;;  %v9504_v45 = vadd.f32 %v11112_v26, %v16504_v54 }
 0x7ae   : > { %9699 = vst [vmem:[%s16531_s26 + $0x280] sm:$0xff] %v9603_v28  ;;  %v9606_v62 = vadd.f32 %v9504_v45, %v16526_v1  ;;  %v8538_v23 = vpop.f32.mrb[248].mxu0  ;;  %v11113_v51 = vpop.f32.mrb[56].mxu1 }
 0x7af   : > { %v9607_v58 = vadd.f32 %v8538_v23, %v16517_v11  ;;  %v8540_v43 = vpop.f32.mrb[249].mxu0  ;;  %v11114_v34 = vpop.f32.mrb[57].mxu1 }
 0x7b0   : > { %9702 = vst [vmem:[%s16531_s26 + $0x298] sm:$0xff] %v9606_v62  ;;  %v9608_v5 = vadd.f32 %v8540_v43, %v16519_v16  ;;  %v11115_v39 = vadd.f32 %v11114_v34, %v11113_v51  ;;  %v8542_v12 = vpop.f32.mrb[250].mxu0  ;;  %v11116_v44 = vpop.f32.mrb[58].mxu1 }
 0x7b1   : > { %9703 = vst [vmem:[%s16531_s26 + $0x2a0] sm:$0xff] %v9607_v58  ;;  %v9610_v54 = vadd.f32 %v8542_v12, %v16517_v11  ;;  %v8544_v42 = vpop.f32.mrb[251].mxu0  ;;  %v11117_v10 = vpop.f32.mrb[59].mxu1 }
 0x7b2   : > { %9704 = vst [vmem:[%s16531_s26 + $0x2a8] sm:$0xff] %v9608_v5  ;;  %v9509_v38 = vadd.f32 %v11115_v39, %v16507_v57  ;;  %v9611_v47 = vadd.f32 %v8544_v42, %v16519_v16  ;;  %v11118_v25 = vadd.f32 %v11117_v10, %v11116_v44 }
 0x7b3   : > { %9706 = vst [vmem:[%s16531_s26 + $0x2b8] sm:$0xff] %v9610_v54 }
 0x7b4   : > { %v9609_v7 = vadd.f32 %v9509_v38, %v16526_v1  ;;  %9707 = vst [vmem:[%s16531_s26 + $0x2c0] sm:$0xff] %v9611_v47  ;;  %v9512_v2 = vadd.f32 %v11118_v25, %v16510_v56 }
 0x7b6   : > { %9705 = vst [vmem:[%s16531_s26 + $0x2b0] sm:$0xff] %v9609_v7  ;;  %v9612_v32 = vadd.f32 %v9512_v2, %v16526_v1  ;;  %v8548_v41 = vpop.f32.mrb[252].mxu0  ;;  %v11119_v31 = vpop.f32.mrb[60].mxu1 }
 0x7b7   : > { %v9613_v36 = vadd.f32 %v8548_v41, %v16517_v11  ;;  %v8550_v57 = vpop.f32.mrb[253].mxu0  ;;  %v11120_v46 = vpop.f32.mrb[61].mxu1 }
 0x7b8   : > { %9708 = vst [vmem:[%s16531_s26 + $0x2c8] sm:$0xff] %v9612_v32  ;;  %v9614_v53 = vadd.f32 %v8550_v57, %v16519_v16  ;;  %v11121_v20 = vadd.f32 %v11120_v46, %v11119_v31  ;;  %v8552_v60 = vpop.f32.mrb[254].mxu0  ;;  %v11122_v56 = vpop.f32.mrb[62].mxu1 }
 0x7b9   : > { %9709 = vst [vmem:[%s16531_s26 + $0x2d0] sm:$0xff] %v9613_v36  ;;  %v9616_v4 = vadd.f32 %v8552_v60, %v16517_v11  ;;  %v8554_v48 = vpop.f32.mrb[255].mxu0  ;;  %v11123_v29 = vpop.f32.mrb[63].mxu1 }
 0x7ba   : > { %9710 = vst [vmem:[%s16531_s26 + $0x2d8] sm:$0xff] %v9614_v53  ;;  %v9517_v13 = vadd.f32 %v11121_v20, %v16514_v6  ;;  %v9617_v50 = vadd.f32 %v8554_v48, %v16519_v16  ;;  %v11124_v22 = vadd.f32 %v11123_v29, %v11122_v56 }
 0x7bb   : > { %9712 = vst [vmem:[%s16531_s26 + $0x2e8] sm:$0xff] %v9616_v4 }
 0x7bc   : > { %v9615_v37 = vadd.f32 %v9517_v13, %v16526_v1  ;;  %9713 = vst [vmem:[%s16531_s26 + $0x2f0] sm:$0xff] %v9617_v50  ;;  %v9520_v35 = vadd.f32 %v11124_v22, %v16523_v63 }
 0x7be   : > { %9711 = vst [vmem:[%s16531_s26 + $0x2e0] sm:$0xff] %v9615_v37  ;;  %v9618_v6 = vadd.f32 %v9520_v35, %v16526_v1 }
 0x7c0   : > { %9714 = vst [vmem:[%s16531_s26 + $0x2f8] sm:$0xff] %v9618_v6 }
 0x7c1   : > { %12920 = shalt.err (!%p12917_p0)
}
 0x7c2   : > { %s12921_s7 = scalar_lea.hbm %s16757_s13, 12288  ;;  %s12925_s29 = scalar_lea.hbm %s16816_s5, 24576 }
 0x7c3   : > { %p12922_p4 = scmp.ne.s32.totalorder %s16757_s13, %s12921_s7  ;;  %p12926_p12 = scmp.lt.u32.totalorder %s16757_s13, %s16816_s5 }
 0x7c4   : > { %p12927_p1 = scmp.lt.u32.totalorder %s12925_s29, %s12921_s7  ;;  %p12929_p10 = scmp.lt.u32.totalorder %s12921_s7, %s16757_s13 }
 0x7c5   : > { %p12923_p13 = pnand %p12922_p4, %p13222_p5 }
 0x7c6   : > { %p12928_p11 = por %p12927_p1, %p12926_p12 }
 0x7c7   : > { %p12924_p6 = pneg %p12923_p13 }
 0x7c8   : > { %p12930_p3 = por %p12929_p10, %p12928_p11 }
 0x7ca   : > { %p12931_p2 = pnand %p12930_p3, %p12924_p6 }
 0x7cc   : > { %12934 = shalt.err (!%p12931_p2)
}
 0x7cd   : > { %s13013_s26 = smov 384   ;;  %s13014_s28 = smov 24  }
 0x7ce   : > { %11851 = dma.vmem_to_hbm [thread:$0]  (%p13222_p5), %s16759_s30, 12288, %s16757_s13, %s9716_s21, %s13013_s26, %s13013_s26, %s13014_s28  }
 0x7cf PF: > { %s18072_s12 = sld [smem:[#allocation16_spill]]  ;;  %s9745_s25 = sand.u32 1, %s12977_s18  }
 0x7d0   : > { %p18074_p7 = scmp.ge.s32.totalorder %s12997_s23, 2  ;;  %s9746_s9 = scalar_lea.sflag [#allocation4], %s9745_s25 }
 0x7d5   : > { %p18073_p8 = scmp.ne.s32.totalorder %s18072_s12, 0 }
 0x7d7   : > { %p11871_p9 = pnand %p18074_p7, %p18073_p8 }
 0x7d9   : > { %12972 = dma.done.wait (!%p11871_p9), %s9746_s9, 12288  }
 0x7da   : > { %12974 = vsyncadd (!%p11871_p9), %s9746_s9, 4294955008  ;;  %s23_s23 = sadd.s32 1, %s12997_s23   ;;  %s18075_s18 = smov %s12981_s19 }
 0x7db   : > { %p20_p0 = scmp.ge.s32.totalorder %s23_s23, 4   ;;  %s18076_s19 = smov %s12985_s20 }
 0x7dc   : > { %s18077_s20 = smov %s13234_s14  ;;  %s18078_s21 = smov %s12993_s22 }
 0x7dd   : > { %s18079_s22 = smov %s18081_s16  ;;  %22 = sbr.rel (!%p20_p0) target bundleno = 10 (0xa), region = 108 }
 0x7e4   :  { %9751 = vsyncpa [#allocation3], 1 }
 0x7e5   :  { %9753 = vsyncpa [#allocation3 + $0x1], 1 }
 0x7e6   :  { %9754 = vsyncpa [#allocation6], 1 }
 0x7e7   :  { %9755 = vsyncpa [#allocation9], 1 }
 0x7e8   :  { %9756 = vsyncpa [#allocation4], 1 }
 0x7e9   :  { %9758 = vsyncpa [#allocation4 + $0x1], 1 }

</bundles_post_ra>
